<compile_context>
chip_gen: v6e
topology: v6e:2x2x1
jax: 0.10.0
libtpu: 0.0.40
codegen_flags: <defaults>
</compile_context>

<pallas_src>
import math

import jax
import jax.numpy as jnp
from jax.experimental import pallas as pl
from jax.experimental.pallas import tpu as pltpu

# --- synthetic "pretrained model" config (small, lane-dense stand-in) ---------
VOCAB = 100          # stands in for 21128
TYPE_VOCAB = 2
MAX_LEN = 128        # stands in for max_len=150 (pad to 256 at real scale) -> lane-dense scores
HIDDEN = 128         # stands in for 1024; multiple of 128 -> lane-dense tiles
NUM_LAYERS = 2       # stands in for 24
FFN = 256            # stands in for 4096; multiple of 128
CLASS_SIZE = 6
CLASS_PAD = 128      # lane-dense logits width; sliced back to CLASS_SIZE outside
LN_EPS = 1e-12
ATTN_SCALE = 1.0 / math.sqrt(HIDDEN)   # single synthetic head of width HIDDEN
BATCH_TILES = 1      # >1 (with rows-per-tile a multiple of 8) to shard over v7x's 2 TCs


# ----------------------------- kernel helpers ---------------------------------
def _layernorm(x, g, b):
    # f32 elementwise path on every generation (v5e has no bf16 VPU).
    mu = jnp.mean(x, axis=-1, keepdims=True)
    var = jnp.mean((x - mu) ** 2, axis=-1, keepdims=True)
    return (x - mu) * jax.lax.rsqrt(var + LN_EPS) * g + b


def _vmem_limit_bytes():
    # ~3/4 of physical VMEM (128 MiB v5e/v6e, 64 MiB v7x); the 32 MiB scoped
    # default would shrink the double-buffered bf16 weight blocks at real scale.
    try:
        cap = pltpu.get_tpu_info().vmem_capacity_bytes
    except Exception:
        cap = 64 * 1024 * 1024
    return int(cap * 3 // 4)


# ------------------------------ fused kernel ----------------------------------
def fused_bert_kernel(x0_hbm, bias_ref, emb_g_ref, emb_b_ref,
                      wqkv_ref, bqkv_ref, wo_ref, bo_ref, g1_ref, be1_ref,
                      w1_ref, b1_ref, w2_ref, b2_ref, g2_ref, be2_ref,
                      clsw_ref, clsb_ref, out_ref, x_sc, dma_sem):
    bt = pl.program_id(0)                       # batch-tile axis ("parallel")
    layer = pl.program_id(1)                    # layer axis ("arbitrary", carried)
    BT, _, S = bias_ref.shape                   # (BT, 1, S)
    BTS, H = x_sc.shape                         # (BT*S, H) f32 residual stream

    # --- step 0: DMA this batch tile's embeddings HBM -> scratch, then LN -----
    @pl.when(layer == 0)
    def _():
        row0 = pl.multiple_of(bt * BTS, BTS)
        cp = pltpu.make_async_copy(x0_hbm.at[pl.ds(row0, BTS), :], x_sc, dma_sem)
        cp.start()
        cp.wait()
        x_sc[...] = _layernorm(x_sc[...], emb_g_ref[...], emb_b_ref[...])

    # --- encoder layer `layer` (its bf16 weights are the current streamed block)
    x = x_sc[...]                                                    # (BT*S, H) f32
    xb = x.astype(jnp.bfloat16)

    qkv = jnp.dot(xb, wqkv_ref[0],
                  preferred_element_type=jnp.float32) + bqkv_ref[0]  # (BT*S, 3H) f32
    q = qkv[:, :H].reshape(BT, S, H)
    k = qkv[:, H:2 * H].reshape(BT, S, H)
    v = qkv[:, 2 * H:].reshape(BT, S, H)

    # per-batch (S, S) scores; contract H directly (no materialized transpose)
    s = jnp.einsum('bqd,bkd->bqk',
                   q.astype(jnp.bfloat16), k.astype(jnp.bfloat16),
                   preferred_element_type=jnp.float32) * ATTN_SCALE  # (BT, S, S)
    s = s + bias_ref[...]                      # precomputed additive pad-mask bias (BT,1,S)
    m = jnp.max(s, axis=-1, keepdims=True)
    p = jnp.exp(s - m)
    p = p * pl.reciprocal(jnp.sum(p, axis=-1, keepdims=True), approx=True)
    ctx = jnp.einsum('bqk,bkd->bqd',
                     p.astype(jnp.bfloat16), v.astype(jnp.bfloat16),
                     preferred_element_type=jnp.float32).reshape(BTS, H)

    attn = jnp.dot(ctx.astype(jnp.bfloat16), wo_ref[0],
                   preferred_element_type=jnp.float32) + bo_ref[0]
    h = _layernorm(x + attn, g1_ref[0], be1_ref[0])                  # post-LN residual (f32)

    ff = jnp.dot(h.astype(jnp.bfloat16), w1_ref[0],
                 preferred_element_type=jnp.float32) + b1_ref[0]
    ff = jax.nn.gelu(ff, approximate=True)     # tanh approx (PyTorch default is erf)
    ff = jnp.dot(ff.astype(jnp.bfloat16), w2_ref[0],
                 preferred_element_type=jnp.float32) + b2_ref[0]
    x_new = _layernorm(h + ff, g2_ref[0], be2_ref[0])
    x_sc[...] = x_new                                                # carry to next layer

    # --- last step: mean-pool (incl. padding, matching the PyTorch ref),
    #     dropout(identity), Linear(H -> class), log_softmax over true classes ---
    @pl.when(layer == pl.num_programs(1) - 1)
    def _():
        pooled = jnp.mean(x_new.reshape(BT, S, H), axis=1)           # (BT, H) f32
        logits = jnp.dot(pooled, clsw_ref[...],
                         preferred_element_type=jnp.float32) + clsb_ref[...]
        col = jax.lax.broadcasted_iota(jnp.int32, logits.shape, 1)
        logits = jnp.where(col < CLASS_SIZE, logits, -1e30)          # mask lane padding (f32)
        mx = jnp.max(logits, axis=-1, keepdims=True)
        z = logits - mx
        lse = jnp.log(jnp.sum(jnp.exp(z), axis=-1, keepdims=True))
        out_ref[...] = z - lse                                       # log_softmax


# --------------------------- pallas_call wrapper -------------------------------
_LAYER_PARAM_ORDER = ('wqkv', 'bqkv', 'wo', 'bo', 'g1', 'be1',
                      'w1', 'b1', 'w2', 'b2', 'g2', 'be2')


def fused_bert_call(x0, mask_bias, params, batch_tiles=BATCH_TILES):
    B, _, S = mask_bias.shape
    H = x0.shape[1]
    L = NUM_LAYERS
    BS = B * S
    assert B % batch_tiles == 0
    BT = B // batch_tiles
    BTS = BT * S
    layer_arrays = [params['layers'][k] for k in _LAYER_PARAM_ORDER]

    in_specs = [
        pl.BlockSpec(memory_space=pl.ANY),                     # embeddings stay in HBM
        pl.BlockSpec((BT, 1, S), lambda b, l: (b, 0, 0)),      # additive mask bias
        pl.BlockSpec((1, H), lambda b, l: (0, 0)),             # emb LN gamma (resident)
        pl.BlockSpec((1, H), lambda b, l: (0, 0)),             # emb LN beta  (resident)
    ]
    # per-layer weights: leading layer axis, streamed block-by-block over the grid
    in_specs += [pl.BlockSpec((1,) + a.shape[1:], lambda b, l: (l, 0, 0))
                 for a in layer_arrays]
    in_specs += [
        pl.BlockSpec((H, CLASS_PAD), lambda b, l: (0, 0)),     # classifier weight (resident)
        pl.BlockSpec((1, CLASS_PAD), lambda b, l: (0, 0)),     # classifier bias   (resident)
    ]

    flops_layer = (2 * BS * H * 3 * H            # fused QKV projection
                   + 2 * B * S * S * H * 2       # scores + context
                   + 2 * BS * H * H              # attention output projection
                   + 2 * BS * H * FFN * 2)       # FFN up + down
    flops = L * flops_layer + 2 * B * H * CLASS_PAD
    transcendentals = L * (B * S * S + BS * FFN) + B * CLASS_PAD
    w_bytes = sum(a.size * a.dtype.itemsize for a in layer_arrays)   # bf16 where it matters
    bytes_accessed = (4 * x0.size + 4 * mask_bias.size
                      + batch_tiles * w_bytes                        # weights re-streamed per tile
                      + 4 * (params['emb_g'].size + params['emb_b'].size
                             + params['cls_w'].size + params['cls_b'].size)
                      + 4 * B * CLASS_PAD)

    return pl.pallas_call(
        fused_bert_kernel,
        out_shape=jax.ShapeDtypeStruct((B, CLASS_PAD), jnp.float32),
        grid=(batch_tiles, L),
        in_specs=in_specs,
        out_specs=pl.BlockSpec((BT, CLASS_PAD), lambda b, l: (b, 0)),
        scratch_shapes=[pltpu.VMEM((BTS, H), jnp.float32),     # VMEM-resident activations
                        pltpu.SemaphoreType.DMA(())],          # layer-0 embedding DMA
        compiler_params=pltpu.CompilerParams(
            dimension_semantics=("parallel", "arbitrary"),     # batch tiles || , layers serial
            vmem_limit_bytes=_vmem_limit_bytes()),
        cost_estimate=pl.CostEstimate(flops=flops,
                                      transcendentals=transcendentals,
                                      bytes_accessed=bytes_accessed),
    )(x0, mask_bias, params['emb_g'], params['emb_b'],
      *layer_arrays, params['cls_w'], params['cls_b'])


# ------------------------------- parameters -----------------------------------
def init_params(key):
    keys = iter(jax.random.split(key, 16))

    def nrm(shape, scale=0.02, dtype=jnp.float32):
        return (jax.random.normal(next(keys), shape, jnp.float32) * scale).astype(dtype)

    L, H, F = NUM_LAYERS, HIDDEN, FFN
    params = {
        'tok_emb': nrm((VOCAB, H)),
        'seg_emb': nrm((TYPE_VOCAB, H)),
        'pos_emb': nrm((MAX_LEN, H)),
        'emb_g': jnp.ones((1, H), jnp.float32),
        'emb_b': jnp.zeros((1, H), jnp.float32),
        'layers': {
            # large matmul weights streamed in bf16; biases/LN params stay f32
            'wqkv': nrm((L, H, 3 * H), dtype=jnp.bfloat16),    # fused Q|K|V
            'bqkv': jnp.zeros((L, 1, 3 * H), jnp.float32),
            'wo': nrm((L, H, H), dtype=jnp.bfloat16),
            'bo': jnp.zeros((L, 1, H), jnp.float32),
            'g1': jnp.ones((L, 1, H), jnp.float32),
            'be1': jnp.zeros((L, 1, H), jnp.float32),
            'w1': nrm((L, H, F), dtype=jnp.bfloat16),
            'b1': jnp.zeros((L, 1, F), jnp.float32),
            'w2': nrm((L, F, H), dtype=jnp.bfloat16),
            'b2': jnp.zeros((L, 1, H), jnp.float32),
            'g2': jnp.ones((L, 1, H), jnp.float32),
            'be2': jnp.zeros((L, 1, H), jnp.float32),
        },
    }
    # hidden2class, mimicking init_weights(initrange=0.2); zero-padded to 128 lanes, f32
    cls_w = jax.random.uniform(next(keys), (H, CLASS_SIZE), jnp.float32, -0.2, 0.2)
    cls_b = jax.random.uniform(next(keys), (1, CLASS_SIZE), jnp.float32, -0.2, 0.2)
    params['cls_w'] = jnp.zeros((H, CLASS_PAD), jnp.float32).at[:, :CLASS_SIZE].set(cls_w)
    params['cls_b'] = jnp.zeros((1, CLASS_PAD), jnp.float32).at[:, :CLASS_SIZE].set(cls_b)
    # NOTE: self.pooling = nn.Linear(max_len, 1) is defined but never used in
    # forward(), so it is intentionally not instantiated here.
    return params


# -------------------------------- forward -------------------------------------
def bert_emotion_forward(params, tokens, segments, mask):
    B, S = tokens.shape
    # Embedding lookups are gather glue in plain JAX.
    pos = jnp.arange(S)
    emb = (params['tok_emb'][tokens]
           + params['seg_emb'][segments]
           + params['pos_emb'][pos][None, :, :])              # (B, S, H)
    x0 = emb.reshape(B * S, HIDDEN).astype(jnp.float32)       # rows folded; DMA'd at layer 0
    # Additive attention-mask bias, computed once and pre-shaped (B,1,S) so the
    # kernel just adds it (no per-layer broadcast_in_dim). Kept in f32: a bf16
    # cast could round/saturate and leak attention to pads.
    mask_bias = ((1.0 - mask.astype(jnp.float32)) * (-1e9))[:, None, :]   # (B, 1, S)
    scores_pad = fused_bert_call(x0, mask_bias, params)       # (B, CLASS_PAD)
    return scores_pad[:, :CLASS_SIZE]                         # (B, class_size)


if __name__ == "__main__":
    key = jax.random.PRNGKey(0)
    pkey, k_tok, _ = jax.random.split(key, 3)
    params = init_params(pkey)

    B, S = 2, MAX_LEN
    tokens = jax.random.randint(k_tok, (B, S), 0, VOCAB, dtype=jnp.int32)
    segments = jnp.zeros((B, S), dtype=jnp.int32)
    mask = jnp.ones((B, S), dtype=jnp.int32).at[1, 100:].set(0)   # pad tail of sample 1

    scores = jax.jit(bert_emotion_forward)(params, tokens, segments, mask)
    scores = jax.block_until_ready(scores)

    assert scores.shape == (B, CLASS_SIZE)
    assert bool(jnp.all(jnp.isfinite(scores)))
    # log_softmax rows should exponentiate to a probability distribution
    assert bool(jnp.allclose(jnp.sum(jnp.exp(scores), axis=1), 1.0, atol=1e-4))
    print("KERNEL_OK")
</pallas_src>

<mosaic_0001>
module attributes {stable_mosaic.version = 11 : i64} {
  func.func @fused_bert_kernel(%arg0: i32, %arg1: i32, %arg2: memref<256x128xf32, #tpu.memory_space<any>>, %arg3: memref<2x1x128xf32, #tpu.memory_space<vmem>>, %arg4: memref<1x128xf32, #tpu.memory_space<vmem>>, %arg5: memref<1x128xf32, #tpu.memory_space<vmem>>, %arg6: memref<1x128x384xbf16, #tpu.memory_space<vmem>>, %arg7: memref<1x1x384xf32, #tpu.memory_space<vmem>>, %arg8: memref<1x128x128xbf16, #tpu.memory_space<vmem>>, %arg9: memref<1x1x128xf32, #tpu.memory_space<vmem>>, %arg10: memref<1x1x128xf32, #tpu.memory_space<vmem>>, %arg11: memref<1x1x128xf32, #tpu.memory_space<vmem>>, %arg12: memref<1x128x256xbf16, #tpu.memory_space<vmem>>, %arg13: memref<1x1x256xf32, #tpu.memory_space<vmem>>, %arg14: memref<1x256x128xbf16, #tpu.memory_space<vmem>>, %arg15: memref<1x1x128xf32, #tpu.memory_space<vmem>>, %arg16: memref<1x1x128xf32, #tpu.memory_space<vmem>>, %arg17: memref<1x1x128xf32, #tpu.memory_space<vmem>>, %arg18: memref<128x128xf32, #tpu.memory_space<vmem>>, %arg19: memref<1x128xf32, #tpu.memory_space<vmem>>, %arg20: memref<2x128xf32, #tpu.memory_space<vmem>>, %arg21: memref<256x128xf32, #tpu.memory_space<vmem>>, %arg22: memref<!tpu.dma_semaphore, #tpu.memory_space<semaphore_mem>>) attributes {dimension_semantics = [#tpu.dimension_semantics<parallel>, #tpu.dimension_semantics<arbitrary>], iteration_bounds = array<i64: 1, 2>, scalar_prefetch = 0 : i64, scratch_operands = 2 : i64, tpu.core_type = #tpu.core_type<tc>, window_params = [{}, {transform_indices = @transform_1, window_bounds = array<i64: 2, 1, 128>}, {pipeline_mode = #tpu.pipeline_mode<synchronous>, transform_indices = @transform_2, window_bounds = array<i64: 1, 128>}, {pipeline_mode = #tpu.pipeline_mode<synchronous>, transform_indices = @transform_3, window_bounds = array<i64: 1, 128>}, {transform_indices = @transform_4, window_bounds = array<i64: 1, 128, 384>}, {transform_indices = @transform_5, window_bounds = array<i64: 1, 1, 384>}, {transform_indices = @transform_6, window_bounds = array<i64: 1, 128, 128>}, {transform_indices = @transform_7, window_bounds = array<i64: 1, 1, 128>}, {transform_indices = @transform_8, window_bounds = array<i64: 1, 1, 128>}, {transform_indices = @transform_9, window_bounds = array<i64: 1, 1, 128>}, {transform_indices = @transform_10, window_bounds = array<i64: 1, 128, 256>}, {transform_indices = @transform_11, window_bounds = array<i64: 1, 1, 256>}, {transform_indices = @transform_12, window_bounds = array<i64: 1, 256, 128>}, {transform_indices = @transform_13, window_bounds = array<i64: 1, 1, 128>}, {transform_indices = @transform_14, window_bounds = array<i64: 1, 1, 128>}, {transform_indices = @transform_15, window_bounds = array<i64: 1, 1, 128>}, {pipeline_mode = #tpu.pipeline_mode<synchronous>, transform_indices = @transform_16, window_bounds = array<i64: 128, 128>}, {pipeline_mode = #tpu.pipeline_mode<synchronous>, transform_indices = @transform_17, window_bounds = array<i64: 1, 128>}, {transform_indices = @transform_18, window_bounds = array<i64: 2, 128>}]} {
    %c0_i32 = arith.constant 0 : i32
    %0 = arith.cmpi eq, %arg1, %c0_i32 : i32
    %1 = arith.extui %0 : i1 to i32
    %c0_i32_0 = arith.constant 0 : i32
    %2 = arith.cmpi ne, %1, %c0_i32_0 : i32
    scf.if %2 {
      %c256_i32 = arith.constant 256 : i32
      %135 = arith.muli %arg0, %c256_i32 : i32
      %136 = tpu.assume_multiple %135, 256 : i32
      %c0_i32_66 = arith.constant 0 : i32
      %137 = tpu.memref_slice %arg2[%136, %c0_i32_66] : memref<256x128xf32, #tpu.memory_space<any>> -> memref<256x128xf32, #tpu.memory_space<any>>
      tpu.enqueue_dma source(%137 : memref<256x128xf32, #tpu.memory_space<any>>) target(%arg21 : memref<256x128xf32, #tpu.memory_space<vmem>>) target_semaphore(%arg22 : memref<!tpu.dma_semaphore, #tpu.memory_space<semaphore_mem>>)
      %c0_i32_67 = arith.constant 0 : i32
      %138 = tpu.memref_slice %arg2[%136, %c0_i32_67] : memref<256x128xf32, #tpu.memory_space<any>> -> memref<256x128xf32, #tpu.memory_space<any>>
      tpu.wait_dma2 semaphore(%arg22 : memref<!tpu.dma_semaphore, #tpu.memory_space<semaphore_mem>>) src(%138 : memref<256x128xf32, #tpu.memory_space<any>>) dst(%arg21 : memref<256x128xf32, #tpu.memory_space<vmem>>)
      %c0_68 = arith.constant 0 : index
      %c0_69 = arith.constant 0 : index
      %139 = vector.load %arg21[%c0_68, %c0_69] : memref<256x128xf32, #tpu.memory_space<vmem>>, vector<256x128xf32>
      %c0_70 = arith.constant 0 : index
      %c0_71 = arith.constant 0 : index
      %140 = vector.load %arg4[%c0_70, %c0_71] : memref<1x128xf32, #tpu.memory_space<vmem>>, vector<1x128xf32>
      %c0_72 = arith.constant 0 : index
      %c0_73 = arith.constant 0 : index
      %141 = vector.load %arg5[%c0_72, %c0_73] : memref<1x128xf32, #tpu.memory_space<vmem>>, vector<1x128xf32>
      %cst_74 = arith.constant dense<0.000000e+00> : vector<256xf32>
      %142 = vector.multi_reduction <add>, %139, %cst_74 [1] : vector<256x128xf32> to vector<256xf32>
      %143 = vector.shape_cast %142 : vector<256xf32> to vector<256x1xf32>
      %cst_75 = arith.constant 1.280000e+02 : f32
      %144 = vector.broadcast %cst_75 : f32 to vector<256x1xf32>
      %145 = arith.divf %143, %144 : vector<256x1xf32>
      %146 = vector.broadcast %145 : vector<256x1xf32> to vector<256x128xf32>
      %147 = arith.subf %139, %146 : vector<256x128xf32>
      %148 = arith.mulf %147, %147 : vector<256x128xf32>
      %cst_76 = arith.constant dense<0.000000e+00> : vector<256xf32>
      %149 = vector.multi_reduction <add>, %148, %cst_76 [1] : vector<256x128xf32> to vector<256xf32>
      %150 = vector.shape_cast %149 : vector<256xf32> to vector<256x1xf32>
      %cst_77 = arith.constant 1.280000e+02 : f32
      %151 = vector.broadcast %cst_77 : f32 to vector<256x1xf32>
      %152 = arith.divf %150, %151 : vector<256x1xf32>
      %153 = vector.broadcast %145 : vector<256x1xf32> to vector<256x128xf32>
      %154 = arith.subf %139, %153 : vector<256x128xf32>
      %cst_78 = arith.constant 9.99999996E-13 : f32
      %155 = vector.broadcast %cst_78 : f32 to vector<256x1xf32>
      %156 = arith.addf %152, %155 : vector<256x1xf32>
      %157 = math.rsqrt %156 : vector<256x1xf32>
      %158 = vector.broadcast %157 : vector<256x1xf32> to vector<256x128xf32>
      %159 = arith.mulf %154, %158 : vector<256x128xf32>
      %160 = vector.broadcast %140 : vector<1x128xf32> to vector<256x128xf32>
      %161 = arith.mulf %159, %160 : vector<256x128xf32>
      %162 = vector.broadcast %141 : vector<1x128xf32> to vector<256x128xf32>
      %163 = arith.addf %161, %162 : vector<256x128xf32>
      %c0_79 = arith.constant 0 : index
      %c0_80 = arith.constant 0 : index
      %164 = vector.load %arg21[%c0_79, %c0_80] : memref<256x128xf32, #tpu.memory_space<vmem>>, vector<256x128xf32>
      tpu.vector_store %arg21[%c0_79, %c0_80], %163 {strides = array<i32>} : memref<256x128xf32, #tpu.memory_space<vmem>>, vector<256x128xf32>,
    } else {
    }
    %c0 = arith.constant 0 : index
    %c0_1 = arith.constant 0 : index
    %3 = vector.load %arg21[%c0, %c0_1] : memref<256x128xf32, #tpu.memory_space<vmem>>, vector<256x128xf32>
    %4 = arith.truncf %3 : vector<256x128xf32> to vector<256x128xbf16>
    %c0_2 = arith.constant 0 : index
    %c0_3 = arith.constant 0 : index
    %c0_4 = arith.constant 0 : index
    %5 = vector.load %arg6[%c0_2, %c0_3, %c0_4] : memref<1x128x384xbf16, #tpu.memory_space<vmem>>, vector<1x128x384xbf16>
    %6 = vector.shape_cast %5 : vector<1x128x384xbf16> to vector<128x384xbf16>
    %cst = arith.constant dense<0.000000e+00> : vector<256x384xf32>
    %7 = tpu.matmul %4, %6, %cst {dimension_numbers = #tpu.dot_dimension_numbers<[1], [0], [0], [1], [0, 0, 1, 1], [], []>} : vector<256x128xbf16>, vector<128x384xbf16>, vector<256x384xf32> -> vector<256x384xf32>
    %c0_5 = arith.constant 0 : index
    %c0_6 = arith.constant 0 : index
    %c0_7 = arith.constant 0 : index
    %8 = vector.load %arg7[%c0_5, %c0_6, %c0_7] : memref<1x1x384xf32, #tpu.memory_space<vmem>>, vector<1x1x384xf32>
    %9 = vector.shape_cast %8 : vector<1x1x384xf32> to vector<1x384xf32>
    %10 = vector.broadcast %9 : vector<1x384xf32> to vector<256x384xf32>
    %11 = arith.addf %7, %10 : vector<256x384xf32>
    %12 = vector.extract_strided_slice %11 {offsets = [0, 0], sizes = [256, 128], strides = [1, 1]} : vector<256x384xf32> to vector<256x128xf32>
    %13 = vector.shape_cast %12 : vector<256x128xf32> to vector<2x128x128xf32>
    %14 = vector.extract_strided_slice %11 {offsets = [0, 128], sizes = [256, 128], strides = [1, 1]} : vector<256x384xf32> to vector<256x128xf32>
    %15 = vector.shape_cast %14 : vector<256x128xf32> to vector<2x128x128xf32>
    %16 = vector.extract_strided_slice %11 {offsets = [0, 256], sizes = [256, 128], strides = [1, 1]} : vector<256x384xf32> to vector<256x128xf32>
    %17 = vector.shape_cast %16 : vector<256x128xf32> to vector<2x128x128xf32>
    %18 = arith.truncf %13 : vector<2x128x128xf32> to vector<2x128x128xbf16>
    %19 = arith.truncf %15 : vector<2x128x128xf32> to vector<2x128x128xbf16>
    "tpu.trace_start"() <{level = 10 : i32, message = "bqd,bkd->bqk"}> : () -> ()
    %cst_8 = arith.constant dense<0.000000e+00> : vector<2x128x128xf32>
    %20 = tpu.matmul %18, %19, %cst_8 {dimension_numbers = #tpu.dot_dimension_numbers<[2], [2], [1], [1], [0, 0, 0, 1, 1, 1], [0], [0]>} : vector<2x128x128xbf16>, vector<2x128x128xbf16>, vector<2x128x128xf32> -> vector<2x128x128xf32>
    "tpu.trace_stop"() : () -> ()
    %cst_9 = arith.constant 0.0883883461 : f32
    %21 = vector.broadcast %cst_9 : f32 to vector<2x128x128xf32>
    %22 = arith.mulf %20, %21 : vector<2x128x128xf32>
    %c0_10 = arith.constant 0 : index
    %c0_11 = arith.constant 0 : index
    %c0_12 = arith.constant 0 : index
    %23 = vector.load %arg3[%c0_10, %c0_11, %c0_12] : memref<2x1x128xf32, #tpu.memory_space<vmem>>, vector<2x1x128xf32>
    %24 = vector.broadcast %23 : vector<2x1x128xf32> to vector<2x128x128xf32>
    %25 = arith.addf %22, %24 : vector<2x128x128xf32>
    %cst_13 = arith.constant dense<0xFF800000> : vector<2x128xf32>
    %26 = vector.multi_reduction <maximumf>, %25, %cst_13 [2] : vector<2x128x128xf32> to vector<2x128xf32>
    %27 = vector.shape_cast %26 : vector<2x128xf32> to vector<2x128x1xf32>
    %28 = vector.broadcast %27 : vector<2x128x1xf32> to vector<2x128x128xf32>
    %29 = arith.subf %25, %28 : vector<2x128x128xf32>
    %30 = math.exp %29 : vector<2x128x128xf32>
    %cst_14 = arith.constant dense<0.000000e+00> : vector<2x128xf32>
    %31 = vector.multi_reduction <add>, %30, %cst_14 [2] : vector<2x128x128xf32> to vector<2x128xf32>
    %32 = vector.shape_cast %31 : vector<2x128xf32> to vector<2x128x1xf32>
    %33 = tpu.reciprocal %32 {approx = true} : vector<2x128x1xf32> -> vector<2x128x1xf32>
    %34 = vector.broadcast %33 : vector<2x128x1xf32> to vector<2x128x128xf32>
    %35 = arith.mulf %30, %34 : vector<2x128x128xf32>
    %36 = arith.truncf %35 : vector<2x128x128xf32> to vector<2x128x128xbf16>
    %37 = arith.truncf %17 : vector<2x128x128xf32> to vector<2x128x128xbf16>
    "tpu.trace_start"() <{level = 10 : i32, message = "bqk,bkd->bqd"}> : () -> ()
    %cst_15 = arith.constant dense<0.000000e+00> : vector<2x128x128xf32>
    %38 = tpu.matmul %36, %37, %cst_15 {dimension_numbers = #tpu.dot_dimension_numbers<[2], [1], [1], [2], [0, 0, 0, 1, 1, 2], [0], [0]>} : vector<2x128x128xbf16>, vector<2x128x128xbf16>, vector<2x128x128xf32> -> vector<2x128x128xf32>
    "tpu.trace_stop"() : () -> ()
    %39 = vector.shape_cast %38 : vector<2x128x128xf32> to vector<256x128xf32>
    %40 = arith.truncf %39 : vector<256x128xf32> to vector<256x128xbf16>
    %c0_16 = arith.constant 0 : index
    %c0_17 = arith.constant 0 : index
    %c0_18 = arith.constant 0 : index
    %41 = vector.load %arg8[%c0_16, %c0_17, %c0_18] : memref<1x128x128xbf16, #tpu.memory_space<vmem>>, vector<1x128x128xbf16>
    %42 = vector.shape_cast %41 : vector<1x128x128xbf16> to vector<128x128xbf16>
    %cst_19 = arith.constant dense<0.000000e+00> : vector<256x128xf32>
    %43 = tpu.matmul %40, %42, %cst_19 {dimension_numbers = #tpu.dot_dimension_numbers<[1], [0], [0], [1], [0, 0, 1, 1], [], []>} : vector<256x128xbf16>, vector<128x128xbf16>, vector<256x128xf32> -> vector<256x128xf32>
    %c0_20 = arith.constant 0 : index
    %c0_21 = arith.constant 0 : index
    %c0_22 = arith.constant 0 : index
    %44 = vector.load %arg9[%c0_20, %c0_21, %c0_22] : memref<1x1x128xf32, #tpu.memory_space<vmem>>, vector<1x1x128xf32>
    %45 = vector.shape_cast %44 : vector<1x1x128xf32> to vector<1x128xf32>
    %46 = vector.broadcast %45 : vector<1x128xf32> to vector<256x128xf32>
    %47 = arith.addf %43, %46 : vector<256x128xf32>
    %48 = arith.addf %3, %47 : vector<256x128xf32>
    %c0_23 = arith.constant 0 : index
    %c0_24 = arith.constant 0 : index
    %c0_25 = arith.constant 0 : index
    %49 = vector.load %arg10[%c0_23, %c0_24, %c0_25] : memref<1x1x128xf32, #tpu.memory_space<vmem>>, vector<1x1x128xf32>
    %50 = vector.shape_cast %49 : vector<1x1x128xf32> to vector<1x128xf32>
    %c0_26 = arith.constant 0 : index
    %c0_27 = arith.constant 0 : index
    %c0_28 = arith.constant 0 : index
    %51 = vector.load %arg11[%c0_26, %c0_27, %c0_28] : memref<1x1x128xf32, #tpu.memory_space<vmem>>, vector<1x1x128xf32>
    %52 = vector.shape_cast %51 : vector<1x1x128xf32> to vector<1x128xf32>
    %cst_29 = arith.constant dense<0.000000e+00> : vector<256xf32>
    %53 = vector.multi_reduction <add>, %48, %cst_29 [1] : vector<256x128xf32> to vector<256xf32>
    %54 = vector.shape_cast %53 : vector<256xf32> to vector<256x1xf32>
    %cst_30 = arith.constant 1.280000e+02 : f32
    %55 = vector.broadcast %cst_30 : f32 to vector<256x1xf32>
    %56 = arith.divf %54, %55 : vector<256x1xf32>
    %57 = vector.broadcast %56 : vector<256x1xf32> to vector<256x128xf32>
    %58 = arith.subf %48, %57 : vector<256x128xf32>
    %59 = arith.mulf %58, %58 : vector<256x128xf32>
    %cst_31 = arith.constant dense<0.000000e+00> : vector<256xf32>
    %60 = vector.multi_reduction <add>, %59, %cst_31 [1] : vector<256x128xf32> to vector<256xf32>
    %61 = vector.shape_cast %60 : vector<256xf32> to vector<256x1xf32>
    %cst_32 = arith.constant 1.280000e+02 : f32
    %62 = vector.broadcast %cst_32 : f32 to vector<256x1xf32>
    %63 = arith.divf %61, %62 : vector<256x1xf32>
    %64 = vector.broadcast %56 : vector<256x1xf32> to vector<256x128xf32>
    %65 = arith.subf %48, %64 : vector<256x128xf32>
    %cst_33 = arith.constant 9.99999996E-13 : f32
    %66 = vector.broadcast %cst_33 : f32 to vector<256x1xf32>
    %67 = arith.addf %63, %66 : vector<256x1xf32>
    %68 = math.rsqrt %67 : vector<256x1xf32>
    %69 = vector.broadcast %68 : vector<256x1xf32> to vector<256x128xf32>
    %70 = arith.mulf %65, %69 : vector<256x128xf32>
    %71 = vector.broadcast %50 : vector<1x128xf32> to vector<256x128xf32>
    %72 = arith.mulf %70, %71 : vector<256x128xf32>
    %73 = vector.broadcast %52 : vector<1x128xf32> to vector<256x128xf32>
    %74 = arith.addf %72, %73 : vector<256x128xf32>
    %75 = arith.truncf %74 : vector<256x128xf32> to vector<256x128xbf16>
    %c0_34 = arith.constant 0 : index
    %c0_35 = arith.constant 0 : index
    %c0_36 = arith.constant 0 : index
    %76 = vector.load %arg12[%c0_34, %c0_35, %c0_36] : memref<1x128x256xbf16, #tpu.memory_space<vmem>>, vector<1x128x256xbf16>
    %77 = vector.shape_cast %76 : vector<1x128x256xbf16> to vector<128x256xbf16>
    %cst_37 = arith.constant dense<0.000000e+00> : vector<256x256xf32>
    %78 = tpu.matmul %75, %77, %cst_37 {dimension_numbers = #tpu.dot_dimension_numbers<[1], [0], [0], [1], [0, 0, 1, 1], [], []>} : vector<256x128xbf16>, vector<128x256xbf16>, vector<256x256xf32> -> vector<256x256xf32>
    %c0_38 = arith.constant 0 : index
    %c0_39 = arith.constant 0 : index
    %c0_40 = arith.constant 0 : index
    %79 = vector.load %arg13[%c0_38, %c0_39, %c0_40] : memref<1x1x256xf32, #tpu.memory_space<vmem>>, vector<1x1x256xf32>
    %80 = vector.shape_cast %79 : vector<1x1x256xf32> to vector<1x256xf32>
    %81 = vector.broadcast %80 : vector<1x256xf32> to vector<256x256xf32>
    %82 = arith.addf %78, %81 : vector<256x256xf32>
    %83 = arith.mulf %82, %82 : vector<256x256xf32>
    %84 = arith.mulf %82, %83 : vector<256x256xf32>
    %cst_41 = arith.constant 4.471500e-02 : f32
    %85 = vector.broadcast %cst_41 : f32 to vector<256x256xf32>
    %86 = arith.mulf %85, %84 : vector<256x256xf32>
    %87 = arith.addf %82, %86 : vector<256x256xf32>
    %cst_42 = arith.constant 0.797884583 : f32
    %88 = vector.broadcast %cst_42 : f32 to vector<256x256xf32>
    %89 = arith.mulf %88, %87 : vector<256x256xf32>
    %90 = math.tanh %89 : vector<256x256xf32>
    %cst_43 = arith.constant 1.000000e+00 : f32
    %91 = vector.broadcast %cst_43 : f32 to vector<256x256xf32>
    %92 = arith.addf %91, %90 : vector<256x256xf32>
    %cst_44 = arith.constant 5.000000e-01 : f32
    %93 = vector.broadcast %cst_44 : f32 to vector<256x256xf32>
    %94 = arith.mulf %93, %92 : vector<256x256xf32>
    %95 = arith.mulf %82, %94 : vector<256x256xf32>
    %96 = arith.truncf %95 : vector<256x256xf32> to vector<256x256xbf16>
    %c0_45 = arith.constant 0 : index
    %c0_46 = arith.constant 0 : index
    %c0_47 = arith.constant 0 : index
    %97 = vector.load %arg14[%c0_45, %c0_46, %c0_47] : memref<1x256x128xbf16, #tpu.memory_space<vmem>>, vector<1x256x128xbf16>
    %98 = vector.shape_cast %97 : vector<1x256x128xbf16> to vector<256x128xbf16>
    %cst_48 = arith.constant dense<0.000000e+00> : vector<256x128xf32>
    %99 = tpu.matmul %96, %98, %cst_48 {dimension_numbers = #tpu.dot_dimension_numbers<[1], [0], [0], [1], [0, 0, 1, 1], [], []>} : vector<256x256xbf16>, vector<256x128xbf16>, vector<256x128xf32> -> vector<256x128xf32>
    %c0_49 = arith.constant 0 : index
    %c0_50 = arith.constant 0 : index
    %c0_51 = arith.constant 0 : index
    %100 = vector.load %arg15[%c0_49, %c0_50, %c0_51] : memref<1x1x128xf32, #tpu.memory_space<vmem>>, vector<1x1x128xf32>
    %101 = vector.shape_cast %100 : vector<1x1x128xf32> to vector<1x128xf32>
    %102 = vector.broadcast %101 : vector<1x128xf32> to vector<256x128xf32>
    %103 = arith.addf %99, %102 : vector<256x128xf32>
    %104 = arith.addf %74, %103 : vector<256x128xf32>
    %c0_52 = arith.constant 0 : index
    %c0_53 = arith.constant 0 : index
    %c0_54 = arith.constant 0 : index
    %105 = vector.load %arg16[%c0_52, %c0_53, %c0_54] : memref<1x1x128xf32, #tpu.memory_space<vmem>>, vector<1x1x128xf32>
    %106 = vector.shape_cast %105 : vector<1x1x128xf32> to vector<1x128xf32>
    %c0_55 = arith.constant 0 : index
    %c0_56 = arith.constant 0 : index
    %c0_57 = arith.constant 0 : index
    %107 = vector.load %arg17[%c0_55, %c0_56, %c0_57] : memref<1x1x128xf32, #tpu.memory_space<vmem>>, vector<1x1x128xf32>
    %108 = vector.shape_cast %107 : vector<1x1x128xf32> to vector<1x128xf32>
    %cst_58 = arith.constant dense<0.000000e+00> : vector<256xf32>
    %109 = vector.multi_reduction <add>, %104, %cst_58 [1] : vector<256x128xf32> to vector<256xf32>
    %110 = vector.shape_cast %109 : vector<256xf32> to vector<256x1xf32>
    %cst_59 = arith.constant 1.280000e+02 : f32
    %111 = vector.broadcast %cst_59 : f32 to vector<256x1xf32>
    %112 = arith.divf %110, %111 : vector<256x1xf32>
    %113 = vector.broadcast %112 : vector<256x1xf32> to vector<256x128xf32>
    %114 = arith.subf %104, %113 : vector<256x128xf32>
    %115 = arith.mulf %114, %114 : vector<256x128xf32>
    %cst_60 = arith.constant dense<0.000000e+00> : vector<256xf32>
    %116 = vector.multi_reduction <add>, %115, %cst_60 [1] : vector<256x128xf32> to vector<256xf32>
    %117 = vector.shape_cast %116 : vector<256xf32> to vector<256x1xf32>
    %cst_61 = arith.constant 1.280000e+02 : f32
    %118 = vector.broadcast %cst_61 : f32 to vector<256x1xf32>
    %119 = arith.divf %117, %118 : vector<256x1xf32>
    %120 = vector.broadcast %112 : vector<256x1xf32> to vector<256x128xf32>
    %121 = arith.subf %104, %120 : vector<256x128xf32>
    %cst_62 = arith.constant 9.99999996E-13 : f32
    %122 = vector.broadcast %cst_62 : f32 to vector<256x1xf32>
    %123 = arith.addf %119, %122 : vector<256x1xf32>
    %124 = math.rsqrt %123 : vector<256x1xf32>
    %125 = vector.broadcast %124 : vector<256x1xf32> to vector<256x128xf32>
    %126 = arith.mulf %121, %125 : vector<256x128xf32>
    %127 = vector.broadcast %106 : vector<1x128xf32> to vector<256x128xf32>
    %128 = arith.mulf %126, %127 : vector<256x128xf32>
    %129 = vector.broadcast %108 : vector<1x128xf32> to vector<256x128xf32>
    %130 = arith.addf %128, %129 : vector<256x128xf32>
    %c0_63 = arith.constant 0 : index
    %c0_64 = arith.constant 0 : index
    %131 = vector.load %arg21[%c0_63, %c0_64] : memref<256x128xf32, #tpu.memory_space<vmem>>, vector<256x128xf32>
    tpu.vector_store %arg21[%c0_63, %c0_64], %130 {strides = array<i32>} : memref<256x128xf32, #tpu.memory_space<vmem>>, vector<256x128xf32>,
    %c1_i32 = arith.constant 1 : i32
    %132 = arith.cmpi eq, %arg1, %c1_i32 : i32
    %133 = arith.extui %132 : i1 to i32
    %c0_i32_65 = arith.constant 0 : i32
    %134 = arith.cmpi ne, %133, %c0_i32_65 : i32
    scf.if %134 {
      %135 = vector.shape_cast %130 : vector<256x128xf32> to vector<2x128x128xf32>
      %cst_66 = arith.constant dense<0.000000e+00> : vector<2x128xf32>
      %136 = vector.multi_reduction <add>, %135, %cst_66 [1] : vector<2x128x128xf32> to vector<2x128xf32>
      %cst_67 = arith.constant 1.280000e+02 : f32
      %137 = vector.broadcast %cst_67 : f32 to vector<2x128xf32>
      %138 = arith.divf %136, %137 : vector<2x128xf32>
      %c0_68 = arith.constant 0 : index
      %c0_69 = arith.constant 0 : index
      %139 = vector.load %arg18[%c0_68, %c0_69] : memref<128x128xf32, #tpu.memory_space<vmem>>, vector<128x128xf32>
      %cst_70 = arith.constant dense<0.000000e+00> : vector<2x128xf32>
      %140 = tpu.matmul %138, %139, %cst_70 {dimension_numbers = #tpu.dot_dimension_numbers<[1], [0], [0], [1], [0, 0, 1, 1], [], []>} : vector<2x128xf32>, vector<128x128xf32>, vector<2x128xf32> -> vector<2x128xf32>
      %c0_71 = arith.constant 0 : index
      %c0_72 = arith.constant 0 : index
      %141 = vector.load %arg19[%c0_71, %c0_72] : memref<1x128xf32, #tpu.memory_space<vmem>>, vector<1x128xf32>
      %142 = vector.broadcast %141 : vector<1x128xf32> to vector<2x128xf32>
      %143 = arith.addf %140, %142 : vector<2x128xf32>
      %144 = tpu.iota {dimensions = array<i32: 1>} : vector<2x128xi32>
      %c6_i32 = arith.constant 6 : i32
      %145 = vector.broadcast %c6_i32 : i32 to vector<2x128xi32>
      %146 = arith.cmpi slt, %144, %145 : vector<2x128xi32>
      %cst_73 = arith.constant -1.000000e+30 : f32
      %147 = vector.broadcast %cst_73 : f32 to vector<2x128xf32>
      %148 = arith.select %146, %143, %147 : vector<2x128xi1>, vector<2x128xf32>
      %cst_74 = arith.constant dense<0xFF800000> : vector<2xf32>
      %149 = vector.multi_reduction <maximumf>, %148, %cst_74 [1] : vector<2x128xf32> to vector<2xf32>
      %150 = vector.shape_cast %149 : vector<2xf32> to vector<2x1xf32>
      %151 = vector.broadcast %150 : vector<2x1xf32> to vector<2x128xf32>
      %152 = arith.subf %148, %151 : vector<2x128xf32>
      %153 = math.exp %152 : vector<2x128xf32>
      %cst_75 = arith.constant dense<0.000000e+00> : vector<2xf32>
      %154 = vector.multi_reduction <add>, %153, %cst_75 [1] : vector<2x128xf32> to vector<2xf32>
      %155 = vector.shape_cast %154 : vector<2xf32> to vector<2x1xf32>
      %156 = math.log %155 : vector<2x1xf32>
      %157 = vector.broadcast %156 : vector<2x1xf32> to vector<2x128xf32>
      %158 = arith.subf %152, %157 : vector<2x128xf32>
      %c0_76 = arith.constant 0 : index
      %c0_77 = arith.constant 0 : index
      %159 = vector.load %arg20[%c0_76, %c0_77] : memref<2x128xf32, #tpu.memory_space<vmem>>, vector<2x128xf32>
      tpu.vector_store %arg20[%c0_76, %c0_77], %158 {strides = array<i32>} : memref<2x128xf32, #tpu.memory_space<vmem>>, vector<2x128xf32>,
    } else {
    }
    return
  }
  func.func @transform_1(%arg0: i32, %arg1: i32) -> (i32, i32, i32) {
    %c0_i32 = arith.constant 0 : i32
    %c0_i32_0 = arith.constant 0 : i32
    %c0_i32_1 = arith.constant 0 : i32
    return %arg0, %c0_i32, %c0_i32_0 : i32, i32, i32
  }
  func.func @transform_2(%arg0: i32, %arg1: i32) -> (i32, i32) {
    %c0_i32 = arith.constant 0 : i32
    %c0_i32_0 = arith.constant 0 : i32
    %c0_i32_1 = arith.constant 0 : i32
    return %c0_i32, %c0_i32_0 : i32, i32
  }
  func.func @transform_3(%arg0: i32, %arg1: i32) -> (i32, i32) {
    %c0_i32 = arith.constant 0 : i32
    %c0_i32_0 = arith.constant 0 : i32
    %c0_i32_1 = arith.constant 0 : i32
    return %c0_i32, %c0_i32_0 : i32, i32
  }
  func.func @transform_4(%arg0: i32, %arg1: i32) -> (i32, i32, i32) {
    %c0_i32 = arith.constant 0 : i32
    %c0_i32_0 = arith.constant 0 : i32
    %c0_i32_1 = arith.constant 0 : i32
    return %arg1, %c0_i32, %c0_i32_0 : i32, i32, i32
  }
  func.func @transform_5(%arg0: i32, %arg1: i32) -> (i32, i32, i32) {
    %c0_i32 = arith.constant 0 : i32
    %c0_i32_0 = arith.constant 0 : i32
    %c0_i32_1 = arith.constant 0 : i32
    return %arg1, %c0_i32, %c0_i32_0 : i32, i32, i32
  }
  func.func @transform_6(%arg0: i32, %arg1: i32) -> (i32, i32, i32) {
    %c0_i32 = arith.constant 0 : i32
    %c0_i32_0 = arith.constant 0 : i32
    %c0_i32_1 = arith.constant 0 : i32
    return %arg1, %c0_i32, %c0_i32_0 : i32, i32, i32
  }
  func.func @transform_7(%arg0: i32, %arg1: i32) -> (i32, i32, i32) {
    %c0_i32 = arith.constant 0 : i32
    %c0_i32_0 = arith.constant 0 : i32
    %c0_i32_1 = arith.constant 0 : i32
    return %arg1, %c0_i32, %c0_i32_0 : i32, i32, i32
  }
  func.func @transform_8(%arg0: i32, %arg1: i32) -> (i32, i32, i32) {
    %c0_i32 = arith.constant 0 : i32
    %c0_i32_0 = arith.constant 0 : i32
    %c0_i32_1 = arith.constant 0 : i32
    return %arg1, %c0_i32, %c0_i32_0 : i32, i32, i32
  }
  func.func @transform_9(%arg0: i32, %arg1: i32) -> (i32, i32, i32) {
    %c0_i32 = arith.constant 0 : i32
    %c0_i32_0 = arith.constant 0 : i32
    %c0_i32_1 = arith.constant 0 : i32
    return %arg1, %c0_i32, %c0_i32_0 : i32, i32, i32
  }
  func.func @transform_10(%arg0: i32, %arg1: i32) -> (i32, i32, i32) {
    %c0_i32 = arith.constant 0 : i32
    %c0_i32_0 = arith.constant 0 : i32
    %c0_i32_1 = arith.constant 0 : i32
    return %arg1, %c0_i32, %c0_i32_0 : i32, i32, i32
  }
  func.func @transform_11(%arg0: i32, %arg1: i32) -> (i32, i32, i32) {
    %c0_i32 = arith.constant 0 : i32
    %c0_i32_0 = arith.constant 0 : i32
    %c0_i32_1 = arith.constant 0 : i32
    return %arg1, %c0_i32, %c0_i32_0 : i32, i32, i32
  }
  func.func @transform_12(%arg0: i32, %arg1: i32) -> (i32, i32, i32) {
    %c0_i32 = arith.constant 0 : i32
    %c0_i32_0 = arith.constant 0 : i32
    %c0_i32_1 = arith.constant 0 : i32
    return %arg1, %c0_i32, %c0_i32_0 : i32, i32, i32
  }
  func.func @transform_13(%arg0: i32, %arg1: i32) -> (i32, i32, i32) {
    %c0_i32 = arith.constant 0 : i32
    %c0_i32_0 = arith.constant 0 : i32
    %c0_i32_1 = arith.constant 0 : i32
    return %arg1, %c0_i32, %c0_i32_0 : i32, i32, i32
  }
  func.func @transform_14(%arg0: i32, %arg1: i32) -> (i32, i32, i32) {
    %c0_i32 = arith.constant 0 : i32
    %c0_i32_0 = arith.constant 0 : i32
    %c0_i32_1 = arith.constant 0 : i32
    return %arg1, %c0_i32, %c0_i32_0 : i32, i32, i32
  }
  func.func @transform_15(%arg0: i32, %arg1: i32) -> (i32, i32, i32) {
    %c0_i32 = arith.constant 0 : i32
    %c0_i32_0 = arith.constant 0 : i32
    %c0_i32_1 = arith.constant 0 : i32
    return %arg1, %c0_i32, %c0_i32_0 : i32, i32, i32
  }
  func.func @transform_16(%arg0: i32, %arg1: i32) -> (i32, i32) {
    %c0_i32 = arith.constant 0 : i32
    %c0_i32_0 = arith.constant 0 : i32
    %c0_i32_1 = arith.constant 0 : i32
    return %c0_i32, %c0_i32_0 : i32, i32
  }
  func.func @transform_17(%arg0: i32, %arg1: i32) -> (i32, i32) {
    %c0_i32 = arith.constant 0 : i32
    %c0_i32_0 = arith.constant 0 : i32
    %c0_i32_1 = arith.constant 0 : i32
    return %c0_i32, %c0_i32_0 : i32, i32
  }
  func.func @transform_18(%arg0: i32, %arg1: i32) -> (i32, i32) {
    %c0_i32 = arith.constant 0 : i32
    %c0_i32_0 = arith.constant 0 : i32
    return %arg0, %c0_i32 : i32, i32
  }
}

</mosaic_0001>

<bundles_post_ra>
// kernel: bert_emotion_forward.1
= control target key start
LH: loop header
LB: loop body
LE: loop exit
PB: predicated region body
PF: predicated region fallthrough
CT: control target
= control target key end

     0   :  { %s9953_s0 = inlined_call_operand.vmem [shape: f32[256,128], index: 0, kind: input, shape index: {}]   ;;  %s9954_s1 = inlined_call_operand.vmem [shape: f32[2,1,128], index: 1, kind: input, shape index: {}]   ;;  %s9955_s2 = inlined_call_operand.vmem [shape: f32[1,128], index: 2, kind: input, shape index: {}]   ;;  %s9956_s3 = inlined_call_operand.vmem [shape: f32[1,128], index: 3, kind: input, shape index: {}]   ;;  %s9957_s4 = inlined_call_operand.vmem [shape: bf16[2,128,384], index: 4, kind: input, shape index: {}]   ;;  %s9958_s5 = inlined_call_operand.vmem [shape: f32[2,1,384], index: 5, kind: input, shape index: {}]   ;;  %s9959_s6 = inlined_call_operand.vmem [shape: bf16[2,128,128], index: 6, kind: input, shape index: {}]   ;;  %s9960_s7 = inlined_call_operand.vmem [shape: f32[2,1,128], index: 7, kind: input, shape index: {}]   ;;  %s9961_s8 = inlined_call_operand.vmem [shape: f32[2,1,128], index: 8, kind: input, shape index: {}]   ;;  %s9962_s9 = inlined_call_operand.vmem [shape: f32[2,1,128], index: 9, kind: input, shape index: {}]   ;;  %s9963_s10 = inlined_call_operand.vmem [shape: bf16[2,128,256], index: 10, kind: input, shape index: {}]   ;;  %s9964_s11 = inlined_call_operand.vmem [shape: f32[2,1,256], index: 11, kind: input, shape index: {}]   ;;  %s9965_s12 = inlined_call_operand.vmem [shape: bf16[2,256,128], index: 12, kind: input, shape index: {}]   ;;  %s9966_s13 = inlined_call_operand.vmem [shape: f32[2,1,128], index: 13, kind: input, shape index: {}]   ;;  %s9967_s14 = inlined_call_operand.vmem [shape: f32[2,1,128], index: 14, kind: input, shape index: {}]   ;;  %s9968_s15 = inlined_call_operand.vmem [shape: f32[2,1,128], index: 15, kind: input, shape index: {}]   ;;  %s9969_s16 = inlined_call_operand.vmem [shape: f32[128,128], index: 16, kind: input, shape index: {}]   ;;  %s9970_s17 = inlined_call_operand.vmem [shape: f32[1,128], index: 17, kind: input, shape index: {}]   ;;  %s9971_s18 = inlined_call_operand.hbm [shape: f32[2,128], index: 18, kind: output, shape index: {}]  }
   0x1   :  { %10022 = sst [smem:[#allocation36_spill]] %s9953_s0 }
   0x2   :  { %10023 = sst [smem:[#allocation37_spill]] %s9954_s1 }
   0x3   :  { %10024 = sst [smem:[#allocation38_spill]] %s9955_s2 }
   0x4   :  { %10025 = sst [smem:[#allocation39_spill]] %s9956_s3 }
   0x5   :  { %10026 = sst [smem:[#allocation40_spill]] %s9957_s4 }
   0x6   :  { %10027 = sst [smem:[#allocation41_spill]] %s9958_s5 }
   0x7   :  { %10028 = sst [smem:[#allocation42_spill]] %s9959_s6 }
   0x8   :  { %10029 = sst [smem:[#allocation43_spill]] %s9963_s10 }
   0x9   :  { %10030 = sst [smem:[#allocation44_spill]] %s9969_s16 }
   0xa   :  { %10031 = sst [smem:[#allocation45_spill]] %s9970_s17 }
   0xb   :  { %10032 = sst [smem:[#allocation46_spill]] %s9971_s18 }
   0xc   :  { %23 = vsyncpa [#allocation5], 0  ;;  %s6915_s27 = smov 0   ;;  %s6917_s28 = smov 0  }
   0xd   :  { %s6919_s29 = smov 0  }
   0xe LB: > { %10033 = sst [smem:[#allocation9_spill]] %s6810_s28  ;;  %s38_s0 = sadd.s32 1, %s6810_s28  ;;  %s6814_s29 = sphi %s6919_s29, %s29_s29   ;;  %s6810_s28 = sphi %s6917_s28, %s10152_s28   ;;  %s6806_s27 = sphi %s6915_s27, %s10151_s27  }
   0xf   : > { %10034 = sst [smem:[#allocation10_spill]] %s6814_s29  ;;  %p39_p0 = scmp.ge.s32.totalorder %s38_s0, 2 }
  0x10   : > { %p5552_p1 = scmp.ge.s32.totalorder %s6814_s29, 1  ;;  %p607_p2 = scmp.lt.s32.totalorder %s6814_s29, 3 }
  0x11   : > { %s10154_s0 = smov (%p39_p0, %s38_s0), 0 }
  0x12   : > { %10035 = sst [smem:[#allocation11_spill]] %s10154_s0  ;;  %p608_p3 = pnand %p5552_p1, %p607_p2 }
  0x14   : > { %611 = sbr.rel (%p608_p3) target bundleno = 3549 (0xddd), region = 88 }
  0x19   : > { %p704_p4 = scmp.lt.s32.totalorder %s6806_s27, 1  ;;  %s10036_s6 = sld [smem:[#allocation42_spill]] }
  0x1a   : > { %s10037_s4 = sld [smem:[#allocation40_spill]]  ;;  %p5561_p5 = scmp.ne.s32.totalorder %s6806_s27, 0 }
  0x1b   : > { %s6938_s19 = scalar_select %p704_p4, %s6806_s27, 1 }
  0x1c   : > { %s10038_s5 = sld [smem:[#allocation41_spill]] }
  0x1d   : > { %s6162_s1 = smul.u32 192, %s6938_s19  ;;  %s5643_s20 = sshll.u32 %s6938_s19, 6 }
  0x1e   : > { %s6163_s21 = smul.u32 3, %s6938_s19  ;;  %s5644_s24 = sshll.u32 %s6938_s19, 7 }
  0x1f   : > { %s6946_s23 = scalar_lea.vmem %s10036_s6, %s5643_s20  ;;  %s10039_s10 = sld [smem:[#allocation43_spill]] }
  0x20   : > { %s6951_s26 = scalar_lea.vmem %s10037_s4, %s6162_s1  ;;  %s5558_s30 = sshll.u32 %s6938_s19, 1 }
  0x21   : > { %s6980_s18 = scalar_lea.vmem %s9964_s11, %s5558_s30  ;;  %s6985_s3 = scalar_lea.vmem %s9965_s12, %s5644_s24 }
  0x22   : > { %s6960_s17 = scalar_lea.vmem %s10038_s5, %s6163_s21  ;;  %s743_s2 = scalar_lea.vmem %s9966_s13, %s6938_s19 }
  0x23   : > { %s746_s1 = scalar_lea.vmem %s9967_s14, %s6938_s19  ;;  %754 = sbr.rel (%p5561_p5) target bundleno = 433 (0x1b1), region = 92 }
  0x24   : > { %s10040_s0 = sld [smem:[#allocation36_spill]] (!%p5561_p5) }
  0x25   : > { %s6974_s4 = scalar_lea.vmem %s10039_s10, %s5644_s24  ;;  %s749_s10 = scalar_lea.vmem %s9968_s15, %s6938_s19 }
  0x2a   : > { %v790_v0 = vld [vmem:[%s10040_s0] sm:$0xff]  ;;  %v792_v1 = vld [vmem:[%s10040_s0 + $0x8] sm:$0xff]  ;;  %v794_v2 = vld [vmem:[%s10040_s0 + $0x10] sm:$0xff] }
  0x2b   : > { %791 = vst [vmem:[#allocation2 + $0xb0] sm:$0xff] %v790_v0  ;;  %793 = vst [vmem:[#allocation2] sm:$0xff] %v792_v1  ;;  %v796_v3 = vld [vmem:[%s10040_s0 + $0x18] sm:$0xff]  ;;  %v798_v4 = vld [vmem:[%s10040_s0 + $0x20] sm:$0xff] }
  0x2c   : > { %795 = vst [vmem:[#allocation2 + $0xd8] sm:$0xff] %v794_v2  ;;  %v800_v5 = vld [vmem:[%s10040_s0 + $0x28] sm:$0xff]  ;;  %797 = vst [vmem:[#allocation2 + $0x18] sm:$0xff] %v796_v3  ;;  %v802_v6 = vld [vmem:[%s10040_s0 + $0x30] sm:$0xff] }
  0x2d   : > { %799 = vst [vmem:[#allocation2 + $0x50] sm:$0xff] %v798_v4  ;;  %801 = vst [vmem:[#allocation2 + $0x68] sm:$0xff] %v800_v5  ;;  %v804_v7 = vld [vmem:[%s10040_s0 + $0x38] sm:$0xff]  ;;  %v806_v8 = vld [vmem:[%s10040_s0 + $0x40] sm:$0xff] }
  0x2e   : > { %803 = vst [vmem:[#allocation2 + $0x30] sm:$0xff] %v802_v6  ;;  %805 = vst [vmem:[#allocation2 + $0x48] sm:$0xff] %v804_v7  ;;  %v808_v9 = vld [vmem:[%s10040_s0 + $0x48] sm:$0xff]  ;;  %v810_v10 = vld [vmem:[%s10040_s0 + $0x50] sm:$0xff] }
  0x2f   : > { %807 = vst [vmem:[#allocation2 + $0x80] sm:$0xff] %v806_v8  ;;  %v812_v11 = vld [vmem:[%s10040_s0 + $0x58] sm:$0xff]  ;;  %809 = vst [vmem:[#allocation2 + $0x88] sm:$0xff] %v808_v9  ;;  %v814_v12 = vld [vmem:[%s10040_s0 + $0x60] sm:$0xff] }
  0x30   : > { %811 = vst [vmem:[#allocation2 + $0xe8] sm:$0xff] %v810_v10  ;;  %813 = vst [vmem:[#allocation2 + $0xb8] sm:$0xff] %v812_v11  ;;  %v816_v13 = vld [vmem:[%s10040_s0 + $0x68] sm:$0xff]  ;;  %v818_v14 = vld [vmem:[%s10040_s0 + $0x70] sm:$0xff] }
  0x31   : > { %815 = vst [vmem:[#allocation2 + $0x60] sm:$0xff] %v814_v12  ;;  %817 = vst [vmem:[#allocation2 + $0xf0] sm:$0xff] %v816_v13  ;;  %v820_v15 = vld [vmem:[%s10040_s0 + $0x78] sm:$0xff]  ;;  %v822_v16 = vld [vmem:[%s10040_s0 + $0x80] sm:$0xff] }
  0x32   : > { %819 = vst [vmem:[#allocation2 + $0x8] sm:$0xff] %v818_v14  ;;  %v824_v17 = vld [vmem:[%s10040_s0 + $0x88] sm:$0xff]  ;;  %821 = vst [vmem:[#allocation2 + $0x78] sm:$0xff] %v820_v15  ;;  %v826_v18 = vld [vmem:[%s10040_s0 + $0x90] sm:$0xff] }
  0x33   : > { %823 = vst [vmem:[#allocation2 + $0x38] sm:$0xff] %v822_v16  ;;  %825 = vst [vmem:[#allocation2 + $0x58] sm:$0xff] %v824_v17  ;;  %v828_v19 = vld [vmem:[%s10040_s0 + $0x98] sm:$0xff]  ;;  %v830_v20 = vld [vmem:[%s10040_s0 + $0xa0] sm:$0xff] }
  0x34   : > { %827 = vst [vmem:[#allocation2 + $0x40] sm:$0xff] %v826_v18  ;;  %829 = vst [vmem:[#allocation2 + $0xc8] sm:$0xff] %v828_v19  ;;  %v832_v21 = vld [vmem:[%s10040_s0 + $0xa8] sm:$0xff]  ;;  %v834_v22 = vld [vmem:[%s10040_s0 + $0xb0] sm:$0xff] }
  0x35   : > { %831 = vst [vmem:[#allocation2 + $0xe0] sm:$0xff] %v830_v20  ;;  %v836_v23 = vld [vmem:[%s10040_s0 + $0xb8] sm:$0xff]  ;;  %833 = vst [vmem:[#allocation2 + $0x90] sm:$0xff] %v832_v21  ;;  %v838_v24 = vld [vmem:[%s10040_s0 + $0xc0] sm:$0xff] }
  0x36   : > { %835 = vst [vmem:[#allocation2 + $0x70] sm:$0xff] %v834_v22  ;;  %837 = vst [vmem:[#allocation2 + $0xc0] sm:$0xff] %v836_v23  ;;  %v840_v25 = vld [vmem:[%s10040_s0 + $0xc8] sm:$0xff]  ;;  %v842_v26 = vld [vmem:[%s10040_s0 + $0xd0] sm:$0xff] }
  0x37   : > { %839 = vst [vmem:[#allocation2 + $0xa8] sm:$0xff] %v838_v24  ;;  %841 = vst [vmem:[#allocation2 + $0xd0] sm:$0xff] %v840_v25  ;;  %v844_v27 = vld [vmem:[%s10040_s0 + $0xd8] sm:$0xff]  ;;  %v846_v28 = vld [vmem:[%s10040_s0 + $0xe0] sm:$0xff] }
  0x38   : > { %843 = vst [vmem:[#allocation2 + $0x10] sm:$0xff] %v842_v26  ;;  %v848_v29 = vld [vmem:[%s10040_s0 + $0xe8] sm:$0xff]  ;;  %845 = vst [vmem:[#allocation2 + $0x28] sm:$0xff] %v844_v27  ;;  %v850_v30 = vld [vmem:[%s10040_s0 + $0xf0] sm:$0xff] }
  0x39   : > { %847 = vst [vmem:[#allocation2 + $0xa0] sm:$0xff] %v846_v28  ;;  %849 = vst [vmem:[#allocation2 + $0xf8] sm:$0xff] %v848_v29  ;;  %v852_v31 = vld [vmem:[%s10040_s0 + $0xf8] sm:$0xff] }
  0x3a   : > { %851 = vst [vmem:[#allocation2 + $0x20] sm:$0xff] %v850_v30  ;;  %853 = vst [vmem:[#allocation2 + $0x98] sm:$0xff] %v852_v31 }
  0x3b   : > { %861 = vsyncadd [#allocation3], 4096 }
  0x3c   : > { %6798 = dma.done.wait [#allocation3], 4096 }
  0x3d   : > { %6799 = vsyncadd [#allocation3], 4294963200  ;;  %v7096_v32 = vld [vmem:[#allocation2 + $0xb0] sm:$0xff]  ;;  %v7098_v33 = vld [vmem:[#allocation2 + $0xd8] sm:$0xff]  ;;  %s10041_s28 = sld [smem:[#allocation38_spill]] }
  0x3e   : > { %899 = vadd.xlane.f32.xlu0 %v7096_v32  ;;  %903 = vadd.xlane.f32.xlu1 %v7098_v33  ;;  %v7102_v34 = vld [vmem:[#allocation2] sm:$0xff]  ;;  %v7104_v35 = vld [vmem:[#allocation2 + $0x18] sm:$0xff]  ;;  %v7108_v36 = vld [vmem:[#allocation2 + $0x50] sm:$0xff]  ;;  %s10042_s29 = sld [smem:[#allocation39_spill]] }
  0x3f   : > { %v7110_v37 = vld [vmem:[#allocation2 + $0x68] sm:$0xff]  ;;  %v7114_v38 = vld [vmem:[#allocation2 + $0x30] sm:$0xff]  ;;  %v7120_v40 = vld [vmem:[#allocation2 + $0x80] sm:$0xff] }
  0x40   : > { %v7116_v39 = vld [vmem:[#allocation2 + $0x48] sm:$0xff]  ;;  %v7128_v43 = vld [vmem:[#allocation2 + $0xb8] sm:$0xff]  ;;  %v7132_v44 = vld [vmem:[#allocation2 + $0x60] sm:$0xff] }
  0x41   : > { %v7122_v41 = vld [vmem:[#allocation2 + $0x88] sm:$0xff]  ;;  %v7134_v45 = vld [vmem:[#allocation2 + $0xf0] sm:$0xff]  ;;  %v7140_v47 = vld [vmem:[#allocation2 + $0x78] sm:$0xff] }
  0x42   : > { %901 = vadd.xlane.f32.xlu0 %v7102_v34  ;;  %905 = vadd.xlane.f32.xlu1 %v7104_v35  ;;  %v7126_v42 = vld [vmem:[#allocation2 + $0xe8] sm:$0xff]  ;;  %v7144_v48 = vld [vmem:[#allocation2 + $0x38] sm:$0xff]  ;;  %v7150_v50 = vld [vmem:[#allocation2 + $0x40] sm:$0xff] }
  0x43   : > { %v7138_v46 = vld [vmem:[#allocation2 + $0x8] sm:$0xff]  ;;  %v7146_v49 = vld [vmem:[#allocation2 + $0x58] sm:$0xff]  ;;  %v7156_v52 = vld [vmem:[#allocation2 + $0xe0] sm:$0xff] }
  0x44   : > { %v7152_v51 = vld [vmem:[#allocation2 + $0xc8] sm:$0xff]  ;;  %v7158_v53 = vld [vmem:[#allocation2 + $0x90] sm:$0xff]  ;;  %v7164_v55 = vld [vmem:[#allocation2 + $0xc0] sm:$0xff] }
  0x45   : > { %v7162_v54 = vld [vmem:[#allocation2 + $0x70] sm:$0xff]  ;;  %v7168_v56 = vld [vmem:[#allocation2 + $0xa8] sm:$0xff]  ;;  %v7180_v60 = vld [vmem:[#allocation2 + $0xa0] sm:$0xff] }
  0x46   : > { %907 = vadd.xlane.f32.xlu0 %v7108_v36  ;;  %909 = vadd.xlane.f32.xlu1 %v7110_v37  ;;  %v7170_v57 = vld [vmem:[#allocation2 + $0xd0] sm:$0xff]  ;;  %v7176_v59 = vld [vmem:[#allocation2 + $0x28] sm:$0xff]  ;;  %v7182_v61 = vld [vmem:[#allocation2 + $0xf8] sm:$0xff] }
  0x47   : > { %v7174_v58 = vld [vmem:[#allocation2 + $0x10] sm:$0xff]  ;;  %v7186_v62 = vld [vmem:[#allocation2 + $0x20] sm:$0xff]  ;;  %v7188_v63 = vld [vmem:[#allocation2 + $0x98] sm:$0xff] }
  0x4a   : > { %911 = vadd.xlane.f32.xlu0 %v7114_v38  ;;  %913 = vadd.xlane.f32.xlu1 %v7116_v39 }
  0x4e   : > { %915 = vadd.xlane.f32.xlu0 %v7120_v40  ;;  %917 = vadd.xlane.f32.xlu1 %v7122_v41 }
  0x52   : > { %919 = vadd.xlane.f32.xlu0 %v7126_v42  ;;  %921 = vadd.xlane.f32.xlu1 %v7128_v43 }
  0x56   : > { %923 = vadd.xlane.f32.xlu0 %v7132_v44  ;;  %925 = vadd.xlane.f32.xlu1 %v7134_v45 }
  0x5a   : > { %927 = vadd.xlane.f32.xlu0 %v7138_v46  ;;  %929 = vadd.xlane.f32.xlu1 %v7140_v47 }
  0x5e   : > { %931 = vadd.xlane.f32.xlu0 %v7144_v48  ;;  %933 = vadd.xlane.f32.xlu1 %v7146_v49 }
  0x62   : > { %935 = vadd.xlane.f32.xlu0 %v7150_v50  ;;  %937 = vadd.xlane.f32.xlu1 %v7152_v51 }
  0x66   : > { %939 = vadd.xlane.f32.xlu0 %v7156_v52  ;;  %941 = vadd.xlane.f32.xlu1 %v7158_v53 }
  0x6a   : > { %943 = vadd.xlane.f32.xlu0 %v7162_v54  ;;  %945 = vadd.xlane.f32.xlu1 %v7164_v55 }
  0x6e   : > { %947 = vadd.xlane.f32.xlu0 %v7168_v56  ;;  %949 = vadd.xlane.f32.xlu1 %v7170_v57 }
  0x72   : > { %951 = vadd.xlane.f32.xlu0 %v7174_v58  ;;  %953 = vadd.xlane.f32.xlu1 %v7176_v59 }
  0x76   : > { %955 = vadd.xlane.f32.xlu0 %v7180_v60  ;;  %957 = vadd.xlane.f32.xlu1 %v7182_v61 }
  0x7a   : > { %959 = vadd.xlane.f32.xlu0 %v7186_v62  ;;  %961 = vadd.xlane.f32.xlu1 %v7188_v63 }
  0xc7   : > { %v900_v0 = vpop.xlane.xlu0 %899  ;;  %v904_v1 = vpop.xlane.xlu1 %903 }
  0xc8   : > { %v964_v2 = vmul.f32 0.0078125, %v900_v0  ;;  %v966_v3 = vmul.f32 0.0078125, %v904_v1 }
  0xca   : > { %v7193_v4 = vsub.f32 %v7096_v32, %v964_v2  ;;  %v7196_v5 = vsub.f32 %v7098_v33, %v966_v3 }
  0xcb   : > { %v902_v6 = vpop.xlane.xlu0 %901  ;;  %v906_v7 = vpop.xlane.xlu1 %905 }
  0xcc   : > { %v965_v8 = vmul.f32 0.0078125, %v902_v6  ;;  %v1028_v9 = vmul.f32 %v7193_v4, %v7193_v4  ;;  %v967_v10 = vmul.f32 0.0078125, %v906_v7  ;;  %v1030_v13 = vmul.f32 %v7196_v5, %v7196_v5 }
  0xce   : > { %v7201_v11 = vsub.f32 %v7102_v34, %v965_v8  ;;  %1060 = vadd.xlane.f32.xlu0 %v1028_v9  ;;  %v7204_v12 = vsub.f32 %v7104_v35, %v967_v10 }
  0xcf   : > { %v908_v14 = vpop.xlane.xlu0 %907  ;;  %v910_v15 = vpop.xlane.xlu1 %909 }
  0xd0   : > { %v968_v16 = vmul.f32 0.0078125, %v908_v14  ;;  %v1029_v17 = vmul.f32 %v7201_v11, %v7201_v11  ;;  %v969_v18 = vmul.f32 0.0078125, %v910_v15  ;;  %v1031_v21 = vmul.f32 %v7204_v12, %v7204_v12 }
  0xd2   : > { %v7211_v19 = vsub.f32 %v7108_v36, %v968_v16  ;;  %1064 = vadd.xlane.f32.xlu0 %v1030_v13  ;;  %1062 = vadd.xlane.f32.xlu1 %v1029_v17  ;;  %v7214_v20 = vsub.f32 %v7110_v37, %v969_v18 }
  0xd3   : > { %v912_v22 = vpop.xlane.xlu0 %911  ;;  %v914_v23 = vpop.xlane.xlu1 %913 }
  0xd4   : > { %v970_v24 = vmul.f32 0.0078125, %v912_v22  ;;  %v1032_v25 = vmul.f32 %v7211_v19, %v7211_v19  ;;  %v971_v26 = vmul.f32 0.0078125, %v914_v23  ;;  %v1033_v29 = vmul.f32 %v7214_v20, %v7214_v20 }
  0xd6   : > { %v7221_v27 = vsub.f32 %v7114_v38, %v970_v24  ;;  %1066 = vadd.xlane.f32.xlu1 %v1031_v21  ;;  %1068 = vadd.xlane.f32.xlu0 %v1032_v25  ;;  %v7224_v28 = vsub.f32 %v7116_v39, %v971_v26 }
  0xd7   : > { %v916_v30 = vpop.xlane.xlu0 %915  ;;  %v918_v31 = vpop.xlane.xlu1 %917 }
  0xd8   : > { %v972_v32 = vmul.f32 0.0078125, %v916_v30  ;;  %v1034_v33 = vmul.f32 %v7221_v27, %v7221_v27  ;;  %v973_v34 = vmul.f32 0.0078125, %v918_v31  ;;  %v1035_v37 = vmul.f32 %v7224_v28, %v7224_v28 }
  0xda   : > { %v7231_v35 = vsub.f32 %v7120_v40, %v972_v32  ;;  %1070 = vadd.xlane.f32.xlu1 %v1033_v29  ;;  %1072 = vadd.xlane.f32.xlu0 %v1034_v33  ;;  %v7234_v36 = vsub.f32 %v7122_v41, %v973_v34 }
  0xdb   : > { %v920_v38 = vpop.xlane.xlu0 %919  ;;  %v922_v39 = vpop.xlane.xlu1 %921 }
  0xdc   : > { %v974_v0 = vmul.f32 0.0078125, %v920_v38  ;;  %v1036_v1 = vmul.f32 %v7231_v35, %v7231_v35  ;;  %v975_v2 = vmul.f32 0.0078125, %v922_v39  ;;  %v1037_v41 = vmul.f32 %v7234_v36, %v7234_v36 }
  0xde   : > { %v7241_v3 = vsub.f32 %v7126_v42, %v974_v0  ;;  %1074 = vadd.xlane.f32.xlu1 %v1035_v37  ;;  %1076 = vadd.xlane.f32.xlu0 %v1036_v1  ;;  %v7244_v40 = vsub.f32 %v7128_v43, %v975_v2 }
  0xdf   : > { %v924_v6 = vpop.xlane.xlu0 %923  ;;  %v926_v7 = vpop.xlane.xlu1 %925 }
  0xe0   : > { %v976_v8 = vmul.f32 0.0078125, %v924_v6  ;;  %v1038_v9 = vmul.f32 %v7241_v3, %v7241_v3  ;;  %v977_v10 = vmul.f32 0.0078125, %v926_v7  ;;  %v1039_v43 = vmul.f32 %v7244_v40, %v7244_v40 }
  0xe2   : > { %v7251_v13 = vsub.f32 %v7132_v44, %v976_v8  ;;  %1078 = vadd.xlane.f32.xlu1 %v1037_v41  ;;  %1080 = vadd.xlane.f32.xlu0 %v1038_v9  ;;  %v7254_v42 = vsub.f32 %v7134_v45, %v977_v10 }
  0xe3   : > { %v928_v14 = vpop.xlane.xlu0 %927  ;;  %v930_v15 = vpop.xlane.xlu1 %929 }
  0xe4   : > { %v978_v16 = vmul.f32 0.0078125, %v928_v14  ;;  %v1040_v17 = vmul.f32 %v7251_v13, %v7251_v13  ;;  %v979_v18 = vmul.f32 0.0078125, %v930_v15  ;;  %v1041_v45 = vmul.f32 %v7254_v42, %v7254_v42 }
  0xe6   : > { %v7261_v21 = vsub.f32 %v7138_v46, %v978_v16  ;;  %1082 = vadd.xlane.f32.xlu1 %v1039_v43  ;;  %1084 = vadd.xlane.f32.xlu0 %v1040_v17  ;;  %v7264_v44 = vsub.f32 %v7140_v47, %v979_v18 }
  0xe7   : > { %v932_v22 = vpop.xlane.xlu0 %931  ;;  %v934_v23 = vpop.xlane.xlu1 %933 }
  0xe8   : > { %v980_v24 = vmul.f32 0.0078125, %v932_v22  ;;  %v1042_v25 = vmul.f32 %v7261_v21, %v7261_v21  ;;  %v981_v26 = vmul.f32 0.0078125, %v934_v23  ;;  %v1043_v47 = vmul.f32 %v7264_v44, %v7264_v44 }
  0xea   : > { %v7271_v29 = vsub.f32 %v7144_v48, %v980_v24  ;;  %1086 = vadd.xlane.f32.xlu1 %v1041_v45  ;;  %1088 = vadd.xlane.f32.xlu0 %v1042_v25  ;;  %v7274_v46 = vsub.f32 %v7146_v49, %v981_v26 }
  0xeb   : > { %v936_v30 = vpop.xlane.xlu0 %935  ;;  %v938_v31 = vpop.xlane.xlu1 %937 }
  0xec   : > { %v982_v32 = vmul.f32 0.0078125, %v936_v30  ;;  %v1044_v33 = vmul.f32 %v7271_v29, %v7271_v29  ;;  %v983_v34 = vmul.f32 0.0078125, %v938_v31  ;;  %v1045_v49 = vmul.f32 %v7274_v46, %v7274_v46 }
  0xee   : > { %v7281_v37 = vsub.f32 %v7150_v50, %v982_v32  ;;  %1090 = vadd.xlane.f32.xlu1 %v1043_v47  ;;  %1092 = vadd.xlane.f32.xlu0 %v1044_v33  ;;  %v7284_v48 = vsub.f32 %v7152_v51, %v983_v34 }
  0xef   : > { %v940_v38 = vpop.xlane.xlu0 %939  ;;  %v942_v39 = vpop.xlane.xlu1 %941 }
  0xf0   : > { %v984_v0 = vmul.f32 0.0078125, %v940_v38  ;;  %v1046_v1 = vmul.f32 %v7281_v37, %v7281_v37  ;;  %v985_v2 = vmul.f32 0.0078125, %v942_v39  ;;  %v1047_v51 = vmul.f32 %v7284_v48, %v7284_v48 }
  0xf2   : > { %v7291_v41 = vsub.f32 %v7156_v52, %v984_v0  ;;  %1094 = vadd.xlane.f32.xlu1 %v1045_v49  ;;  %1096 = vadd.xlane.f32.xlu0 %v1046_v1  ;;  %v7294_v50 = vsub.f32 %v7158_v53, %v985_v2 }
  0xf3   : > { %v944_v6 = vpop.xlane.xlu0 %943  ;;  %v946_v7 = vpop.xlane.xlu1 %945 }
  0xf4   : > { %v986_v8 = vmul.f32 0.0078125, %v944_v6  ;;  %v1048_v9 = vmul.f32 %v7291_v41, %v7291_v41  ;;  %v987_v10 = vmul.f32 0.0078125, %v946_v7  ;;  %v1049_v53 = vmul.f32 %v7294_v50, %v7294_v50 }
  0xf6   : > { %v7301_v43 = vsub.f32 %v7162_v54, %v986_v8  ;;  %1098 = vadd.xlane.f32.xlu1 %v1047_v51  ;;  %1100 = vadd.xlane.f32.xlu0 %v1048_v9  ;;  %v7304_v52 = vsub.f32 %v7164_v55, %v987_v10 }
  0xf7   : > { %v948_v14 = vpop.xlane.xlu0 %947  ;;  %v950_v15 = vpop.xlane.xlu1 %949 }
  0xf8   : > { %v988_v16 = vmul.f32 0.0078125, %v948_v14  ;;  %v1050_v17 = vmul.f32 %v7301_v43, %v7301_v43  ;;  %v989_v18 = vmul.f32 0.0078125, %v950_v15  ;;  %v1051_v55 = vmul.f32 %v7304_v52, %v7304_v52 }
  0xfa   : > { %v7311_v45 = vsub.f32 %v7168_v56, %v988_v16  ;;  %1102 = vadd.xlane.f32.xlu1 %v1049_v53  ;;  %1104 = vadd.xlane.f32.xlu0 %v1050_v17  ;;  %v7314_v54 = vsub.f32 %v7170_v57, %v989_v18 }
  0xfb   : > { %v952_v22 = vpop.xlane.xlu0 %951  ;;  %v954_v23 = vpop.xlane.xlu1 %953 }
  0xfc   : > { %v990_v24 = vmul.f32 0.0078125, %v952_v22  ;;  %v1052_v25 = vmul.f32 %v7311_v45, %v7311_v45  ;;  %v991_v26 = vmul.f32 0.0078125, %v954_v23  ;;  %v1053_v57 = vmul.f32 %v7314_v54, %v7314_v54 }
  0xfe   : > { %v7321_v47 = vsub.f32 %v7174_v58, %v990_v24  ;;  %1106 = vadd.xlane.f32.xlu1 %v1051_v55  ;;  %1108 = vadd.xlane.f32.xlu0 %v1052_v25  ;;  %v7324_v56 = vsub.f32 %v7176_v59, %v991_v26 }
  0xff   : > { %v956_v30 = vpop.xlane.xlu0 %955  ;;  %v958_v31 = vpop.xlane.xlu1 %957 }
 0x100   : > { %v992_v32 = vmul.f32 0.0078125, %v956_v30  ;;  %v1054_v33 = vmul.f32 %v7321_v47, %v7321_v47  ;;  %v993_v34 = vmul.f32 0.0078125, %v958_v31  ;;  %v1055_v59 = vmul.f32 %v7324_v56, %v7324_v56 }
 0x102   : > { %v7331_v49 = vsub.f32 %v7180_v60, %v992_v32  ;;  %1110 = vadd.xlane.f32.xlu1 %v1053_v57  ;;  %1112 = vadd.xlane.f32.xlu0 %v1054_v33  ;;  %v7334_v58 = vsub.f32 %v7182_v61, %v993_v34 }
 0x103   : > { %v960_v38 = vpop.xlane.xlu0 %959  ;;  %v962_v39 = vpop.xlane.xlu1 %961 }
 0x104   : > { %v994_v0 = vmul.f32 0.0078125, %v960_v38  ;;  %v1056_v1 = vmul.f32 %v7331_v49, %v7331_v49  ;;  %v995_v2 = vmul.f32 0.0078125, %v962_v39  ;;  %v1057_v61 = vmul.f32 %v7334_v58, %v7334_v58 }
 0x106   : > { %v7341_v51 = vsub.f32 %v7186_v62, %v994_v0  ;;  %1114 = vadd.xlane.f32.xlu1 %v1055_v59  ;;  %1116 = vadd.xlane.f32.xlu0 %v1056_v1  ;;  %v7344_v60 = vsub.f32 %v7188_v63, %v995_v2  ;;  %v7355_v0 = vld [vmem:[%s10041_s28] ss:$0 sm:$0xff] }
 0x108   : > { %v1058_v6 = vmul.f32 %v7341_v51, %v7341_v51  ;;  %v1059_v7 = vmul.f32 %v7344_v60, %v7344_v60 }
 0x10a   : > { %1118 = vadd.xlane.f32.xlu1 %v1057_v61  ;;  %1120 = vadd.xlane.f32.xlu0 %v1058_v6  ;;  %v7361_v6 = vld [vmem:[%s10042_s29] ss:$0 sm:$0xff] }
 0x10e   : > { %1122 = vadd.xlane.f32.xlu1 %v1059_v7 }
 0x157   : > { %v1061_v8 = vpop.xlane.xlu0 %1060 }
 0x158   : > { %v1124_v62 = vmul.f32 0.0078125, %v1061_v8 }
 0x15a   : > { %v1156_v9 = vadd.f32 1e-12, %v1124_v62 }
 0x15b   : > { %v1063_v10 = vpop.xlane.xlu1 %1062  ;;  %v1065_v53 = vpop.xlane.xlu0 %1064 }
 0x15c   : > { %6198 = vrsqrt.f32 %v1156_v9  ;;  %v1125_v63 = vmul.f32 0.0078125, %v1063_v10  ;;  %v1126_v14 = vmul.f32 0.0078125, %v1065_v53 }
 0x15e   : > { %v1157_v15 = vadd.f32 1e-12, %v1125_v63  ;;  %v1158_v16 = vadd.f32 1e-12, %v1126_v14 }
 0x15f   : > { %v1067_v17 = vpop.xlane.xlu1 %1066  ;;  %v1069_v18 = vpop.xlane.xlu0 %1068 }
 0x160   : > { %6200 = vrsqrt.f32 %v1157_v15  ;;  %v1127_v55 = vmul.f32 0.0078125, %v1067_v17  ;;  %v1128_v22 = vmul.f32 0.0078125, %v1069_v18 }
 0x161   : > { %6202 = vrsqrt.f32 %v1158_v16 }
 0x162   : > { %v1159_v23 = vadd.f32 1e-12, %v1127_v55  ;;  %v1160_v24 = vadd.f32 1e-12, %v1128_v22 }
 0x163   : > { %v1071_v25 = vpop.xlane.xlu1 %1070  ;;  %v1073_v26 = vpop.xlane.xlu0 %1072 }
 0x164   : > { %6204 = vrsqrt.f32 %v1159_v23  ;;  %v1129_v57 = vmul.f32 0.0078125, %v1071_v25  ;;  %v1130_v30 = vmul.f32 0.0078125, %v1073_v26 }
 0x165   : > { %6206 = vrsqrt.f32 %v1160_v24 }
 0x166   : > { %v1161_v31 = vadd.f32 1e-12, %v1129_v57  ;;  %v1162_v32 = vadd.f32 1e-12, %v1130_v30 }
 0x167   : > { %v1075_v33 = vpop.xlane.xlu1 %1074  ;;  %v1077_v34 = vpop.xlane.xlu0 %1076 }
 0x168   : > { %6208 = vrsqrt.f32 %v1161_v31  ;;  %v1131_v59 = vmul.f32 0.0078125, %v1075_v33  ;;  %v1132_v38 = vmul.f32 0.0078125, %v1077_v34 }
 0x169   : > { %v6199_v39 = vpop.eup %6198  ;;  %6210 = vrsqrt.f32 %v1162_v32 }
 0x16a   : > { %v1220_v1 = vmul.f32 %v6199_v39, %v7193_v4  ;;  %v1163_v2 = vadd.f32 1e-12, %v1131_v59  ;;  %v1164_v61 = vadd.f32 1e-12, %v1132_v38 }
 0x16b   : > { %v1079_v7 = vpop.xlane.xlu1 %1078  ;;  %v1081_v8 = vpop.xlane.xlu0 %1080 }
 0x16c   : > { %v1258_v62 = vmul.f32 %v7355_v0, %v1220_v1  ;;  %6212 = vrsqrt.f32 %v1163_v2  ;;  %v1133_v9 = vmul.f32 0.0078125, %v1079_v7  ;;  %v1134_v10 = vmul.f32 0.0078125, %v1081_v8 }
 0x16d   : > { %v6201_v53 = vpop.eup %6200  ;;  %6214 = vrsqrt.f32 %v1164_v61 }
 0x16e   : > { %v6203_v63 = vpop.eup %6202  ;;  %v1296_v14 = vadd.f32 %v7361_v6, %v1258_v62  ;;  %v1221_v4 = vmul.f32 %v6201_v53, %v7201_v11  ;;  %v1165_v15 = vadd.f32 1e-12, %v1133_v9  ;;  %v1166_v16 = vadd.f32 1e-12, %v1134_v10 }
 0x16f   : > { %v1222_v17 = vmul.f32 %v6203_v63, %v7196_v5  ;;  %v1083_v18 = vpop.xlane.xlu1 %1082  ;;  %v1085_v55 = vpop.xlane.xlu0 %1084 }
 0x170   : > { %1328 = vst [vmem:[#allocation2 + $0xb0] sm:$0xff] %v1296_v14  ;;  %v1259_v22 = vmul.f32 %v7355_v0, %v1221_v4  ;;  %6216 = vrsqrt.f32 %v1165_v15  ;;  %v1135_v23 = vmul.f32 0.0078125, %v1083_v18  ;;  %v1136_v24 = vmul.f32 0.0078125, %v1085_v55 }
 0x171   : > { %v6205_v25 = vpop.eup %6204  ;;  %v1260_v26 = vmul.f32 %v7355_v0, %v1222_v17  ;;  %6218 = vrsqrt.f32 %v1166_v16 }
 0x172   : > { %v6207_v57 = vpop.eup %6206  ;;  %v1297_v30 = vadd.f32 %v7361_v6, %v1259_v22  ;;  %v1223_v11 = vmul.f32 %v6205_v25, %v7204_v12  ;;  %v1167_v31 = vadd.f32 1e-12, %v1135_v23  ;;  %v1168_v32 = vadd.f32 1e-12, %v1136_v24 }
 0x173   : > { %v1298_v5 = vadd.f32 %v7361_v6, %v1260_v26  ;;  %v1224_v33 = vmul.f32 %v6207_v57, %v7211_v19  ;;  %v1087_v34 = vpop.xlane.xlu1 %1086  ;;  %v1089_v59 = vpop.xlane.xlu0 %1088 }
 0x174   : > { %1329 = vst [vmem:[#allocation2] sm:$0xff] %v1297_v30  ;;  %v1261_v38 = vmul.f32 %v7355_v0, %v1223_v11  ;;  %6220 = vrsqrt.f32 %v1167_v31  ;;  %v1137_v39 = vmul.f32 0.0078125, %v1087_v34  ;;  %v1138_v1 = vmul.f32 0.0078125, %v1089_v59 }
 0x175   : > { %v6209_v2 = vpop.eup %6208  ;;  %1330 = vst [vmem:[#allocation2 + $0xd8] sm:$0xff] %v1298_v5  ;;  %v1262_v61 = vmul.f32 %v7355_v0, %v1224_v33  ;;  %6222 = vrsqrt.f32 %v1168_v32 }
 0x176   : > { %v6211_v12 = vpop.eup %6210  ;;  %v1299_v7 = vadd.f32 %v7361_v6, %v1261_v38  ;;  %v1225_v8 = vmul.f32 %v6209_v2, %v7214_v20  ;;  %v1169_v62 = vadd.f32 1e-12, %v1137_v39  ;;  %v1170_v19 = vadd.f32 1e-12, %v1138_v1 }
 0x177   : > { %v1300_v9 = vadd.f32 %v7361_v6, %v1262_v61  ;;  %v1226_v10 = vmul.f32 %v6211_v12, %v7221_v27  ;;  %v1091_v53 = vpop.xlane.xlu1 %1090  ;;  %v1093_v63 = vpop.xlane.xlu0 %1092 }
 0x178   : > { %1331 = vst [vmem:[#allocation2 + $0x18] sm:$0xff] %v1299_v7  ;;  %v1263_v14 = vmul.f32 %v7355_v0, %v1225_v8  ;;  %6224 = vrsqrt.f32 %v1169_v62  ;;  %v1139_v4 = vmul.f32 0.0078125, %v1091_v53  ;;  %v1140_v15 = vmul.f32 0.0078125, %v1093_v63 }
 0x179   : > { %v6213_v16 = vpop.eup %6212  ;;  %1332 = vst [vmem:[#allocation2 + $0x50] sm:$0xff] %v1300_v9  ;;  %v1264_v17 = vmul.f32 %v7355_v0, %v1226_v10  ;;  %6226 = vrsqrt.f32 %v1170_v19 }
 0x17a   : > { %v6215_v20 = vpop.eup %6214  ;;  %v1301_v18 = vadd.f32 %v7361_v6, %v1263_v14  ;;  %v1227_v55 = vmul.f32 %v6213_v16, %v7224_v28  ;;  %v1171_v22 = vadd.f32 1e-12, %v1139_v4  ;;  %v1172_v27 = vadd.f32 1e-12, %v1140_v15 }
 0x17b   : > { %v1302_v23 = vadd.f32 %v7361_v6, %v1264_v17  ;;  %v1228_v24 = vmul.f32 %v6215_v20, %v7231_v35  ;;  %v1095_v25 = vpop.xlane.xlu1 %1094  ;;  %v1097_v26 = vpop.xlane.xlu0 %1096 }
 0x17c   : > { %1333 = vst [vmem:[#allocation2 + $0x68] sm:$0xff] %v1301_v18  ;;  %v1265_v57 = vmul.f32 %v7355_v0, %v1227_v55  ;;  %6228 = vrsqrt.f32 %v1171_v22  ;;  %v1141_v30 = vmul.f32 0.0078125, %v1095_v25  ;;  %v1142_v11 = vmul.f32 0.0078125, %v1097_v26 }
 0x17d   : > { %v6217_v31 = vpop.eup %6216  ;;  %1334 = vst [vmem:[#allocation2 + $0x30] sm:$0xff] %v1302_v23  ;;  %v1266_v32 = vmul.f32 %v7355_v0, %v1228_v24  ;;  %6230 = vrsqrt.f32 %v1172_v27 }
 0x17e   : > { %v6219_v28 = vpop.eup %6218  ;;  %v1303_v5 = vadd.f32 %v7361_v6, %v1265_v57  ;;  %v1229_v33 = vmul.f32 %v6217_v31, %v7234_v36  ;;  %v1173_v34 = vadd.f32 1e-12, %v1141_v30  ;;  %v1174_v35 = vadd.f32 1e-12, %v1142_v11 }
 0x17f   : > { %v1304_v59 = vadd.f32 %v7361_v6, %v1266_v32  ;;  %v1230_v38 = vmul.f32 %v6219_v28, %v7241_v3  ;;  %v1099_v39 = vpop.xlane.xlu1 %1098  ;;  %v1101_v1 = vpop.xlane.xlu0 %1100 }
 0x180   : > { %1335 = vst [vmem:[#allocation2 + $0x48] sm:$0xff] %v1303_v5  ;;  %v1267_v2 = vmul.f32 %v7355_v0, %v1229_v33  ;;  %6232 = vrsqrt.f32 %v1173_v34  ;;  %v1143_v61 = vmul.f32 0.0078125, %v1099_v39  ;;  %v1144_v12 = vmul.f32 0.0078125, %v1101_v1 }
 0x181   : > { %v6221_v7 = vpop.eup %6220  ;;  %1336 = vst [vmem:[#allocation2 + $0x80] sm:$0xff] %v1304_v59  ;;  %v1268_v8 = vmul.f32 %v7355_v0, %v1230_v38  ;;  %6234 = vrsqrt.f32 %v1174_v35 }
 0x182   : > { %v6223_v36 = vpop.eup %6222  ;;  %v1305_v62 = vadd.f32 %v7361_v6, %v1267_v2  ;;  %v1231_v19 = vmul.f32 %v6221_v7, %v7244_v40  ;;  %v1175_v9 = vadd.f32 1e-12, %v1143_v61  ;;  %v1176_v3 = vadd.f32 1e-12, %v1144_v12 }
 0x183   : > { %v1306_v10 = vadd.f32 %v7361_v6, %v1268_v8  ;;  %v1232_v53 = vmul.f32 %v6223_v36, %v7251_v13  ;;  %v1103_v63 = vpop.xlane.xlu1 %1102  ;;  %v1105_v14 = vpop.xlane.xlu0 %1104 }
 0x184   : > { %1337 = vst [vmem:[#allocation2 + $0x88] sm:$0xff] %v1305_v62  ;;  %v1269_v4 = vmul.f32 %v7355_v0, %v1231_v19  ;;  %6236 = vrsqrt.f32 %v1175_v9  ;;  %v1145_v15 = vmul.f32 0.0078125, %v1103_v63  ;;  %v1146_v16 = vmul.f32 0.0078125, %v1105_v14 }
 0x185   : > { %v6225_v17 = vpop.eup %6224  ;;  %1338 = vst [vmem:[#allocation2 + $0xe8] sm:$0xff] %v1306_v10  ;;  %v1270_v20 = vmul.f32 %v7355_v0, %v1232_v53  ;;  %6238 = vrsqrt.f32 %v1176_v3 }
 0x186   : > { %v6227_v40 = vpop.eup %6226  ;;  %v1307_v18 = vadd.f32 %v7361_v6, %v1269_v4  ;;  %v1233_v55 = vmul.f32 %v6225_v17, %v7254_v42  ;;  %v1177_v22 = vadd.f32 1e-12, %v1145_v15  ;;  %v1178_v13 = vadd.f32 1e-12, %v1146_v16 }
 0x187   : > { %v1308_v27 = vadd.f32 %v7361_v6, %v1270_v20  ;;  %v1234_v23 = vmul.f32 %v6227_v40, %v7261_v21  ;;  %v1107_v24 = vpop.xlane.xlu1 %1106  ;;  %v1109_v25 = vpop.xlane.xlu0 %1108 }
 0x188   : > { %1339 = vst [vmem:[#allocation2 + $0xb8] sm:$0xff] %v1307_v18  ;;  %v1271_v26 = vmul.f32 %v7355_v0, %v1233_v55  ;;  %6240 = vrsqrt.f32 %v1177_v22  ;;  %v1147_v57 = vmul.f32 0.0078125, %v1107_v24  ;;  %v1148_v30 = vmul.f32 0.0078125, %v1109_v25 }
 0x189   : > { %v6229_v11 = vpop.eup %6228  ;;  %1340 = vst [vmem:[#allocation2 + $0x60] sm:$0xff] %v1308_v27  ;;  %v1272_v31 = vmul.f32 %v7355_v0, %v1234_v23  ;;  %6242 = vrsqrt.f32 %v1178_v13 }
 0x18a   : > { %v6231_v42 = vpop.eup %6230  ;;  %v1309_v32 = vadd.f32 %v7361_v6, %v1271_v26  ;;  %v1235_v28 = vmul.f32 %v6229_v11, %v7264_v44  ;;  %v1179_v5 = vadd.f32 1e-12, %v1147_v57  ;;  %v1180_v21 = vadd.f32 1e-12, %v1148_v30 }
 0x18b   : > { %v1310_v33 = vadd.f32 %v7361_v6, %v1272_v31  ;;  %v1236_v34 = vmul.f32 %v6231_v42, %v7271_v29  ;;  %v1111_v35 = vpop.xlane.xlu1 %1110  ;;  %v1113_v59 = vpop.xlane.xlu0 %1112 }
 0x18c   : > { %1341 = vst [vmem:[#allocation2 + $0xf0] sm:$0xff] %v1309_v32  ;;  %v1273_v38 = vmul.f32 %v7355_v0, %v1235_v28  ;;  %6244 = vrsqrt.f32 %v1179_v5  ;;  %v1149_v39 = vmul.f32 0.0078125, %v1111_v35  ;;  %v1150_v1 = vmul.f32 0.0078125, %v1113_v59 }
 0x18d   : > { %v6233_v2 = vpop.eup %6232  ;;  %1342 = vst [vmem:[#allocation2 + $0x8] sm:$0xff] %v1310_v33  ;;  %v1274_v61 = vmul.f32 %v7355_v0, %v1236_v34  ;;  %6246 = vrsqrt.f32 %v1180_v21 }
 0x18e   : > { %v6235_v44 = vpop.eup %6234  ;;  %v1311_v12 = vadd.f32 %v7361_v6, %v1273_v38  ;;  %v1237_v7 = vmul.f32 %v6233_v2, %v7274_v46  ;;  %v1181_v8 = vadd.f32 1e-12, %v1149_v39  ;;  %v1182_v29 = vadd.f32 1e-12, %v1150_v1 }
 0x18f   : > { %v1312_v36 = vadd.f32 %v7361_v6, %v1274_v61  ;;  %v1238_v62 = vmul.f32 %v6235_v44, %v7281_v37  ;;  %v1115_v19 = vpop.xlane.xlu1 %1114  ;;  %v1117_v9 = vpop.xlane.xlu0 %1116 }
 0x190   : > { %1343 = vst [vmem:[#allocation2 + $0x78] sm:$0xff] %v1311_v12  ;;  %v1275_v3 = vmul.f32 %v7355_v0, %v1237_v7  ;;  %6248 = vrsqrt.f32 %v1181_v8  ;;  %v1151_v10 = vmul.f32 0.0078125, %v1115_v19  ;;  %v1152_v53 = vmul.f32 0.0078125, %v1117_v9 }
 0x191   : > { %v6237_v63 = vpop.eup %6236  ;;  %1344 = vst [vmem:[#allocation2 + $0x38] sm:$0xff] %v1312_v36  ;;  %v1276_v14 = vmul.f32 %v7355_v0, %v1238_v62  ;;  %6250 = vrsqrt.f32 %v1182_v29 }
 0x192   : > { %v6239_v46 = vpop.eup %6238  ;;  %v1313_v4 = vadd.f32 %v7361_v6, %v1275_v3  ;;  %v1239_v15 = vmul.f32 %v6237_v63, %v7284_v48  ;;  %v1183_v16 = vadd.f32 1e-12, %v1151_v10  ;;  %v1184_v37 = vadd.f32 1e-12, %v1152_v53 }
 0x193   : > { %v1314_v17 = vadd.f32 %v7361_v6, %v1276_v14  ;;  %v1240_v20 = vmul.f32 %v6239_v46, %v7291_v41  ;;  %v1119_v40 = vpop.xlane.xlu1 %1118  ;;  %v1121_v18 = vpop.xlane.xlu0 %1120 }
 0x194   : > { %1345 = vst [vmem:[#allocation2 + $0x58] sm:$0xff] %v1313_v4  ;;  %v1277_v55 = vmul.f32 %v7355_v0, %v1239_v15  ;;  %6252 = vrsqrt.f32 %v1183_v16  ;;  %v1153_v22 = vmul.f32 0.0078125, %v1119_v40  ;;  %v1154_v13 = vmul.f32 0.0078125, %v1121_v18 }
 0x195   : > { %v6241_v27 = vpop.eup %6240  ;;  %1346 = vst [vmem:[#allocation2 + $0x40] sm:$0xff] %v1314_v17  ;;  %v1278_v23 = vmul.f32 %v7355_v0, %v1240_v20  ;;  %6254 = vrsqrt.f32 %v1184_v37 }
 0x196   : > { %v6243_v48 = vpop.eup %6242  ;;  %v1315_v24 = vadd.f32 %v7361_v6, %v1277_v55  ;;  %v1241_v25 = vmul.f32 %v6241_v27, %v7294_v50  ;;  %v1185_v26 = vadd.f32 1e-12, %v1153_v22  ;;  %v1186_v41 = vadd.f32 1e-12, %v1154_v13 }
 0x197   : > { %v1316_v57 = vadd.f32 %v7361_v6, %v1278_v23  ;;  %v1242_v30 = vmul.f32 %v6243_v48, %v7301_v43  ;;  %v1123_v11 = vpop.xlane.xlu1 %1122 }
 0x198   : > { %1347 = vst [vmem:[#allocation2 + $0xc8] sm:$0xff] %v1315_v24  ;;  %v1279_v31 = vmul.f32 %v7355_v0, %v1241_v25  ;;  %6256 = vrsqrt.f32 %v1185_v26  ;;  %v1155_v42 = vmul.f32 0.0078125, %v1123_v11 }
 0x199   : > { %v6245_v32 = vpop.eup %6244  ;;  %1348 = vst [vmem:[#allocation2 + $0xe0] sm:$0xff] %v1316_v57  ;;  %v1280_v28 = vmul.f32 %v7355_v0, %v1242_v30  ;;  %6258 = vrsqrt.f32 %v1186_v41 }
 0x19a   : > { %v6247_v5 = vpop.eup %6246  ;;  %v1317_v50 = vadd.f32 %v7361_v6, %v1279_v31  ;;  %v1243_v21 = vmul.f32 %v6245_v32, %v7304_v52  ;;  %v1187_v33 = vadd.f32 1e-12, %v1155_v42 }
 0x19b   : > { %v1318_v34 = vadd.f32 %v7361_v6, %v1280_v28  ;;  %v1244_v43 = vmul.f32 %v6247_v5, %v7311_v45 }
 0x19c   : > { %1349 = vst [vmem:[#allocation2 + $0x90] sm:$0xff] %v1317_v50  ;;  %v1281_v35 = vmul.f32 %v7355_v0, %v1243_v21  ;;  %6260 = vrsqrt.f32 %v1187_v33 }
 0x19d   : > { %v6249_v59 = vpop.eup %6248  ;;  %1350 = vst [vmem:[#allocation2 + $0x70] sm:$0xff] %v1318_v34  ;;  %v1282_v38 = vmul.f32 %v7355_v0, %v1244_v43 }
 0x19e   : > { %v6251_v39 = vpop.eup %6250  ;;  %v1319_v1 = vadd.f32 %v7361_v6, %v1281_v35  ;;  %v1245_v2 = vmul.f32 %v6249_v59, %v7314_v54 }
 0x19f   : > { %v1320_v52 = vadd.f32 %v7361_v6, %v1282_v38  ;;  %v1246_v61 = vmul.f32 %v6251_v39, %v7321_v47 }
 0x1a0   : > { %1351 = vst [vmem:[#allocation2 + $0xc0] sm:$0xff] %v1319_v1  ;;  %v1283_v45 = vmul.f32 %v7355_v0, %v1245_v2 }
 0x1a1   : > { %v6253_v44 = vpop.eup %6252  ;;  %1352 = vst [vmem:[#allocation2 + $0xa8] sm:$0xff] %v1320_v52  ;;  %v1284_v12 = vmul.f32 %v7355_v0, %v1246_v61 }
 0x1a2   : > { %v6255_v7 = vpop.eup %6254  ;;  %v1321_v8 = vadd.f32 %v7361_v6, %v1283_v45  ;;  %v1247_v29 = vmul.f32 %v6253_v44, %v7324_v56 }
 0x1a3   : > { %v1322_v36 = vadd.f32 %v7361_v6, %v1284_v12  ;;  %v1248_v54 = vmul.f32 %v6255_v7, %v7331_v49 }
 0x1a4   : > { %1353 = vst [vmem:[#allocation2 + $0xd0] sm:$0xff] %v1321_v8  ;;  %v1285_v62 = vmul.f32 %v7355_v0, %v1247_v29 }
 0x1a5   : > { %v6257_v47 = vpop.eup %6256  ;;  %1354 = vst [vmem:[#allocation2 + $0x10] sm:$0xff] %v1322_v36  ;;  %v1286_v19 = vmul.f32 %v7355_v0, %v1248_v54 }
 0x1a6   : > { %v6259_v9 = vpop.eup %6258  ;;  %v1323_v3 = vadd.f32 %v7361_v6, %v1285_v62  ;;  %v1249_v10 = vmul.f32 %v6257_v47, %v7334_v58 }
 0x1a7   : > { %v1324_v53 = vadd.f32 %v7361_v6, %v1286_v19  ;;  %v1250_v56 = vmul.f32 %v6259_v9, %v7341_v51 }
 0x1a8   : > { %1355 = vst [vmem:[#allocation2 + $0x28] sm:$0xff] %v1323_v3  ;;  %v1287_v63 = vmul.f32 %v7355_v0, %v1249_v10 }
 0x1a9   : > { %v6261_v49 = vpop.eup %6260  ;;  %1356 = vst [vmem:[#allocation2 + $0xa0] sm:$0xff] %v1324_v53  ;;  %v1288_v14 = vmul.f32 %v7355_v0, %v1250_v56 }
 0x1aa   : > { %v1325_v46 = vadd.f32 %v7361_v6, %v1287_v63  ;;  %v1251_v4 = vmul.f32 %v6261_v49, %v7344_v60 }
 0x1ab   : > { %v1326_v15 = vadd.f32 %v7361_v6, %v1288_v14 }
 0x1ac   : > { %1357 = vst [vmem:[#allocation2 + $0xf8] sm:$0xff] %v1325_v46  ;;  %v1289_v58 = vmul.f32 %v7355_v0, %v1251_v4 }
 0x1ad   : > { %1358 = vst [vmem:[#allocation2 + $0x20] sm:$0xff] %v1326_v15 }
 0x1ae   : > { %v1327_v16 = vadd.f32 %v7361_v6, %v1289_v58 }
 0x1b0   : > { %1359 = vst [vmem:[#allocation2 + $0x98] sm:$0xff] %v1327_v16 }
 0x1b1 PF: > { %v6262_v51 = vld [vmem:[%s6951_s26 + $0xac] ss:$12 sps:$4 sm:$0xff]   ;;  %v6264_v37 = vld [vmem:[%s6951_s26 + $0xa8] ss:$12 sps:$4 sm:$0xff]   ;;  %v9980_v17 = vmov 0   ;;  %v1361_v41 = vld [vmem:[#allocation2] sm:$0xff]  ;;  %s10091_s22 = scalar_lea.vmem %s9960_s7, %s6938_s19  ;;  %s10092_s25 = scalar_lea.vmem %s9961_s8, %s6938_s19 }
 0x1b2   : > { %1617 = vmatprep.mubr.bf16.mxu0 %v9980_v17  ;;  %1737 = vmatprep.mubr.bf16.mxu1 %v9980_v17  ;;  %v6265_v60 = vld [vmem:[%s6951_s26 + $0x94] ss:$12 sps:$4 sm:$0xff]   ;;  %v6267_v0 = vld [vmem:[%s6951_s26 + $0x90] ss:$12 sps:$4 sm:$0xff]   ;;  %v6270_v20 = vld [vmem:[%s6951_s26 + $0x78] ss:$12 sps:$4 sm:$0xff]   ;;  %s10093_s24 = scalar_lea.vmem %s9962_s9, %s6938_s19 }
 0x1b3   : > { %1585 = vmatprep.subr.bf16.mxu0 %v6262_v51  ;;  %6146 = vmatprep.subr.bf16.mxu1 %v6262_v51  ;;  %v6268_v6 = vld [vmem:[%s6951_s26 + $0x7c] ss:$12 sps:$4 sm:$0xff]   ;;  %v6271_v40 = vld [vmem:[%s6951_s26 + $0x64] ss:$12 sps:$4 sm:$0xff]   ;;  %v6273_v18 = vld [vmem:[%s6951_s26 + $0x60] ss:$12 sps:$4 sm:$0xff]  }
 0x1b4   : > { %1586 = vmatpush1.bf16.msra.mxu0 %v6264_v37  ;;  %6154 = vmatpush1.bf16.msra.mxu1 %v6264_v37  ;;  %v6274_v55 = vld [vmem:[%s6951_s26 + $0x4c] ss:$12 sps:$4 sm:$0xff]   ;;  %v6276_v22 = vld [vmem:[%s6951_s26 + $0x48] ss:$12 sps:$4 sm:$0xff]   ;;  %v6279_v27 = vld [vmem:[%s6951_s26 + $0x30] ss:$12 sps:$4 sm:$0xff]  }
 0x1b5   : > { %1587 = vmatprep.subr.bf16.mxu0 %v6265_v60  ;;  %6147 = vmatprep.subr.bf16.mxu1 %v6265_v60  ;;  %v6277_v13 = vld [vmem:[%s6951_s26 + $0x34] ss:$12 sps:$4 sm:$0xff]   ;;  %v6280_v23 = vld [vmem:[%s6951_s26 + $0x1c] ss:$12 sps:$4 sm:$0xff]   ;;  %v6282_v48 = vld [vmem:[%s6951_s26 + $0x18] ss:$12 sps:$4 sm:$0xff]  }
 0x1b6   : > { %v6283_v24 = vld [vmem:[%s6951_s26 + $0x4] ss:$12 sps:$4 sm:$0xff]   ;;  %v6285_v25 = vld [vmem:[%s6951_s26] ss:$12 sps:$4 sm:$0xff]   ;;  %v1362_v28 = vld [vmem:[#allocation2 + $0xd8] sm:$0xff]  ;;  %s10084_s21 = sld [smem:[#allocation37_spill]] }
 0x1b7   : > { %v1360_v26 = vld [vmem:[#allocation2 + $0xb0] sm:$0xff]  ;;  %v1384_v57 = vld [vmem:[#allocation2 + $0xa8] sm:$0xff]  ;;  %v6287_v32 = vld [vmem:[%s6951_s26 + $0x98] ss:$12 sps:$4 sm:$0xff]   ;;  %p5636_p6 = scmp.ne.s32.totalorder %s6806_s27, 1 }
 0x1b8   : > { %1588 = vmatpush1.bf16.msra.mxu0 %v6267_v0  ;;  %6155 = vmatpush1.bf16.msra.mxu1 %v6267_v0  ;;  %v1385_v30 = vld [vmem:[#allocation2 + $0xd0] sm:$0xff]  ;;  %v1392_v31 = vpack.c.bf16 %v1361_v41, %v1360_v26  ;;  %v1363_v5 = vld [vmem:[#allocation2 + $0x18] sm:$0xff]  ;;  %v1387_v21 = vld [vmem:[#allocation2 + $0x28] sm:$0xff] }
 0x1b9   : > { %1589 = vmatprep.subr.bf16.mxu0 %v6268_v6  ;;  %6148 = vmatprep.subr.bf16.mxu1 %v6268_v6  ;;  %v6286_v11 = vld [vmem:[%s6951_s26 + $0xb0] ss:$12 sps:$4 sm:$0xff]   ;;  %v7477_v42 = vpack.c.bf16 %v1385_v30, %v1384_v57  ;;  %v6288_v33 = vld [vmem:[%s6951_s26 + $0x80] ss:$12 sps:$4 sm:$0xff]   ;;  %v1393_v34 = vpack.c.bf16 %v1363_v5, %v1362_v28  ;;  %v6289_v35 = vld [vmem:[%s6951_s26 + $0x68] ss:$12 sps:$4 sm:$0xff]  }
 0x1ba   : > { %v1386_v50 = vld [vmem:[#allocation2 + $0x10] sm:$0xff]  ;;  %v1365_v38 = vld [vmem:[#allocation2 + $0x68] sm:$0xff]  ;;  %v1388_v39 = vld [vmem:[#allocation2 + $0xa0] sm:$0xff] }
 0x1bb   : > { %v7484_v43 = vpack.c.bf16 %v1387_v21, %v1386_v50  ;;  %v1364_v59 = vld [vmem:[#allocation2 + $0x50] sm:$0xff]  ;;  %v1389_v1 = vld [vmem:[#allocation2 + $0xf8] sm:$0xff]  ;;  %v1367_v12 = vld [vmem:[#allocation2 + $0x48] sm:$0xff] }
 0x1bc   : > { %1590 = vmatpush1.bf16.msra.mxu0 %v6270_v20  ;;  %6156 = vmatpush1.bf16.msra.mxu1 %v6270_v20  ;;  %v6290_v2 = vld [vmem:[%s6951_s26 + $0x50] ss:$12 sps:$4 sm:$0xff]   ;;  %v1394_v52 = vpack.c.bf16 %v1365_v38, %v1364_v59  ;;  %v7491_v61 = vpack.c.bf16 %v1389_v1, %v1388_v39  ;;  %v6291_v45 = vld [vmem:[%s6951_s26 + $0x38] ss:$12 sps:$4 sm:$0xff]   ;;  %v6292_v29 = vld [vmem:[%s6951_s26 + $0x20] ss:$12 sps:$4 sm:$0xff]  }
 0x1bd   : > { %1591 = vmatprep.subr.bf16.mxu0 %v6271_v40  ;;  %6149 = vmatprep.subr.bf16.mxu1 %v6271_v40  ;;  %v1366_v44 = vld [vmem:[#allocation2 + $0x30] sm:$0xff]  ;;  %v1390_v7 = vld [vmem:[#allocation2 + $0x20] sm:$0xff]  ;;  %v1391_v8 = vld [vmem:[#allocation2 + $0x98] sm:$0xff] }
 0x1be   : > { %v1395_v36 = vpack.c.bf16 %v1367_v12, %v1366_v44  ;;  %v7498_v54 = vpack.c.bf16 %v1391_v8, %v1390_v7  ;;  %v6293_v62 = vld [vmem:[%s6951_s26 + $0x8] ss:$12 sps:$4 sm:$0xff]   ;;  %v1368_v47 = vld [vmem:[#allocation2 + $0x80] sm:$0xff]  ;;  %v1371_v10 = vld [vmem:[#allocation2 + $0xb8] sm:$0xff] }
 0x1bf   : > { %v1369_v19 = vld [vmem:[#allocation2 + $0x88] sm:$0xff]  ;;  %v1372_v56 = vld [vmem:[#allocation2 + $0x60] sm:$0xff]  ;;  %v1373_v63 = vld [vmem:[#allocation2 + $0xf0] sm:$0xff] }
 0x1c0   : > { %1592 = vmatpush1.bf16.msra.mxu0 %v6273_v18  ;;  %6157 = vmatpush1.bf16.msra.mxu1 %v6273_v18  ;;  %v1396_v9 = vpack.c.bf16 %v1369_v19, %v1368_v47  ;;  %v1370_v3 = vld [vmem:[#allocation2 + $0xe8] sm:$0xff]  ;;  %v1398_v49 = vpack.c.bf16 %v1373_v63, %v1372_v56  ;;  %v1375_v46 = vld [vmem:[#allocation2 + $0x78] sm:$0xff]  ;;  %v1378_v51 = vld [vmem:[#allocation2 + $0x40] sm:$0xff] }
 0x1c1   : > { %1593 = vmatprep.subr.bf16.mxu0 %v6274_v55  ;;  %6150 = vmatprep.subr.bf16.mxu1 %v6274_v55  ;;  %v1397_v53 = vpack.c.bf16 %v1371_v10, %v1370_v3  ;;  %v1374_v14 = vld [vmem:[#allocation2 + $0x8] sm:$0xff]  ;;  %v1376_v15 = vld [vmem:[#allocation2 + $0x38] sm:$0xff]  ;;  %v1380_v60 = vld [vmem:[#allocation2 + $0xe0] sm:$0xff] }
 0x1c2   : > { %v1399_v4 = vpack.c.bf16 %v1375_v46, %v1374_v14  ;;  %v1377_v58 = vld [vmem:[#allocation2 + $0x58] sm:$0xff]  ;;  %v1379_v37 = vld [vmem:[#allocation2 + $0xc8] sm:$0xff]  ;;  %v1381_v0 = vld [vmem:[#allocation2 + $0x90] sm:$0xff] }
 0x1c3   : > { %v1400_v16 = vpack.c.bf16 %v1377_v58, %v1376_v15  ;;  %v1401_v6 = vpack.c.bf16 %v1379_v37, %v1378_v51  ;;  %v1402_v20 = vpack.c.bf16 %v1381_v0, %v1380_v60  ;;  %v1382_v40 = vld [vmem:[#allocation2 + $0x70] sm:$0xff]  ;;  %v1383_v18 = vld [vmem:[#allocation2 + $0xc0] sm:$0xff] }
 0x1c4   : > { %1594 = vmatpush1.bf16.msra.mxu0 %v6276_v22  ;;  %6158 = vmatpush1.bf16.msra.mxu1 %v6276_v22  ;;  %v1403_v55 = vpack.c.bf16 %v1383_v18, %v1382_v40  ;;  %v9977_v22 = vlaneseq }
 0x1c5   : > { %1595 = vmatprep.subr.bf16.mxu0 %v6277_v13  ;;  %6151 = vmatprep.subr.bf16.mxu1 %v6277_v13 }
 0x1c6   : > { %v7515_v13 = vshrl.u32 %v9977_v22, 7 }
 0x1c8   : > { %1596 = vmatpush1.bf16.msra.mxu0 %v6279_v27  ;;  %6159 = vmatpush1.bf16.msra.mxu1 %v6279_v27  ;;  %10043 = vst [vmem:[#allocation12_spill] sm:$0xff] %v7515_v13  ;;  %v9979_v27 = vsub.s32 0, %v7515_v13  ;;  %v9978_v10 = vsub.s32 1, %v7515_v13 }
 0x1c9   : > { %1597 = vmatprep.subr.bf16.mxu0 %v6280_v23  ;;  %6152 = vmatprep.subr.bf16.mxu1 %v6280_v23  ;;  %v7519_v23 = vld [vmem:[%s6960_s17] sm:$0x7] }
 0x1cc   : > { %1598 = vmatpush1.bf16.msra.mxu0 %v6282_v48  ;;  %6160 = vmatpush1.bf16.msra.mxu1 %v6282_v48 }
 0x1cd   : > { %1599 = vmatprep.subr.bf16.mxu0 %v6283_v24  ;;  %6153 = vmatprep.subr.bf16.mxu1 %v6283_v24 }
 0x1d0   : > { %1600 = vmatpush1.bf16.msra.mxu0 %v6285_v25  ;;  %6161 = vmatpush1.bf16.msra.mxu1 %v6285_v25  ;;  %v7524_v25 = vrot.slane %v7519_v23, %v9979_v27 }
 0x1d1   : > { %5887 = vmatprep.subr.bf16.mxu1 %v6286_v11 }
 0x1d3   : > { %1618 = vmatmul.mubr.bf16.vlgmr.msra.gmra.mxu0 %v1392_v31  ;;  %1738 = vmatmul.mubr.bf16.vlgmr.msra.gmra.mxu1 %v7477_v42 }
 0x1d4   : > { %1627 = vmatprep.mubr.bf16.mxu0 %v9980_v17  ;;  %1747 = vmatprep.mubr.bf16.mxu1 %v9980_v17 }
 0x1d5   : > { %5888 = vmatpush3.bf16.msra.mxu1 %v6286_v11 }
 0x1d6   : > { %5889 = vmatprep.subr.bf16.mxu1 %v6287_v32 }
 0x1d9   : > { %5890 = vmatpush3.bf16.msra.mxu1 %v6287_v32 }
 0x1da   : > { %5891 = vmatprep.subr.bf16.mxu1 %v6288_v33 }
 0x1db   : > { %1628 = vmatmul.mubr.bf16.gmra.mxu0 %v1393_v34  ;;  %1748 = vmatmul.mubr.bf16.gmra.mxu1 %v7484_v43 }
 0x1dc   : > { %1637 = vmatprep.mubr.bf16.mxu0 %v9980_v17  ;;  %1757 = vmatprep.mubr.bf16.mxu1 %v9980_v17 }
 0x1dd   : > { %5892 = vmatpush3.bf16.msra.mxu1 %v6288_v33 }
 0x1de   : > { %5893 = vmatprep.subr.bf16.mxu1 %v6289_v35 }
 0x1e1   : > { %5894 = vmatpush3.bf16.msra.mxu1 %v6289_v35 }
 0x1e2   : > { %5895 = vmatprep.subr.bf16.mxu1 %v6290_v2 }
 0x1e3   : > { %1638 = vmatmul.mubr.bf16.gmra.mxu0 %v1394_v52  ;;  %1758 = vmatmul.mubr.bf16.gmra.mxu1 %v7491_v61 }
 0x1e4   : > { %1647 = vmatprep.mubr.bf16.mxu0 %v9980_v17  ;;  %1767 = vmatprep.mubr.bf16.mxu1 %v9980_v17 }
 0x1e5   : > { %5896 = vmatpush3.bf16.msra.mxu1 %v6290_v2 }
 0x1e6   : > { %5897 = vmatprep.subr.bf16.mxu1 %v6291_v45 }
 0x1e9   : > { %5898 = vmatpush3.bf16.msra.mxu1 %v6291_v45 }
 0x1ea   : > { %5899 = vmatprep.subr.bf16.mxu1 %v6292_v29 }
 0x1eb   : > { %1648 = vmatmul.mubr.bf16.gmra.mxu0 %v1395_v36  ;;  %1768 = vmatmul.mubr.bf16.gmra.mxu1 %v7498_v54 }
 0x1ec   : > { %1657 = vmatprep.mubr.bf16.mxu0 %v9980_v17  ;;  %5903 = vmatprep.mubr.bf16.mxu1 %v1392_v31 }
 0x1ed   : > { %5900 = vmatpush3.bf16.msra.mxu1 %v6292_v29 }
 0x1ee   : > { %5901 = vmatprep.subr.bf16.mxu1 %v6293_v62 }
 0x1f1   : > { %5902 = vmatpush3.bf16.msra.mxu1 %v6293_v62 }
 0x1f3   : > { %1658 = vmatmul.mubr.bf16.gmra.mxu0 %v1396_v9 }
 0x1f4   : > { %1667 = vmatprep.mubr.bf16.mxu0 %v9980_v17  ;;  %5904 = vmatmul.mubr.bf16.vlgmr.msra.gmra.mxu1 %v1393_v34 }
 0x1f5   : > { %5907 = vmatprep.mubr.bf16.mxu1 %v1394_v52 }
 0x1fb   : > { %1668 = vmatmul.mubr.bf16.gmra.mxu0 %v1397_v53 }
 0x1fc   : > { %1677 = vmatprep.mubr.bf16.mxu0 %v9980_v17  ;;  %5908 = vmatmul.mubr.bf16.gmra.mxu1 %v1395_v36 }
 0x1fd   : > { %5911 = vmatprep.mubr.bf16.mxu1 %v1396_v9 }
 0x203   : > { %1678 = vmatmul.mubr.bf16.gmra.mxu0 %v1398_v49 }
 0x204   : > { %1687 = vmatprep.mubr.bf16.mxu0 %v9980_v17  ;;  %5912 = vmatmul.mubr.bf16.gmra.mxu1 %v1397_v53 }
 0x205   : > { %5915 = vmatprep.mubr.bf16.mxu1 %v1398_v49 }
 0x20b   : > { %1688 = vmatmul.mubr.bf16.gmra.mxu0 %v1399_v4 }
 0x20c   : > { %1697 = vmatprep.mubr.bf16.mxu0 %v9980_v17  ;;  %5916 = vmatmul.mubr.bf16.gmra.mxu1 %v1399_v4  ;;  %v7588_v4 = vrot.slane %v7519_v23, %v9978_v10 }
 0x20d   : > { %5919 = vmatprep.mubr.bf16.mxu1 %v1400_v16 }
 0x213   : > { %1698 = vmatmul.mubr.bf16.gmra.mxu0 %v1400_v16 }
 0x214   : > { %1707 = vmatprep.mubr.bf16.mxu0 %v9980_v17  ;;  %5920 = vmatmul.mubr.bf16.gmra.mxu1 %v1401_v6 }
 0x215   : > { %5923 = vmatprep.mubr.bf16.mxu1 %v1402_v20 }
 0x21b   : > { %1708 = vmatmul.mubr.bf16.gmra.mxu0 %v1401_v6 }
 0x21c   : > { %1717 = vmatprep.mubr.bf16.mxu0 %v9980_v17  ;;  %5924 = vmatmul.mubr.bf16.gmra.mxu1 %v1403_v55 }
 0x21d   : > { %5927 = vmatprep.mubr.bf16.mxu1 %v7477_v42 }
 0x223   : > { %1718 = vmatmul.mubr.bf16.gmra.mxu0 %v1402_v20 }
 0x224   : > { %1727 = vmatprep.mubr.bf16.mxu0 %v9980_v17  ;;  %5928 = vmatmul.mubr.bf16.gmra.mxu1 %v7484_v43 }
 0x225   : > { %5931 = vmatprep.mubr.bf16.mxu1 %v7491_v61 }
 0x22b   : > { %1728 = vmatmul.mubr.bf16.gmra.mxu0 %v1403_v55 }
 0x22c   : > { %5932 = vmatmul.mubr.bf16.gmra.mxu1 %v7498_v54 }
 0x293   : > { %v1619_v48 = vpop.f32.mrf.mxu0  ;;  %v1739_v24 = vpop.f32.mrf.mxu1 }
 0x294   : > { %v7531_v57 = vadd.f32 %v1739_v24, %v7524_v25  ;;  %v1620_v31 = vadd.f32 %v1619_v48, %v7524_v25 }
 0x295   : > { %v7526_v26 = vpop.f32.mrf.mxu0  ;;  %v7528_v41 = vpop.f32.mrf.mxu1 }
 0x297   : > { %v1623_v30 = vpop.f32.mrf.mxu0  ;;  %v1743_v11 = vpop.f32.mrf.mxu1 }
 0x298   : > { %v1624_v42 = vadd.f32 %v1623_v30, %v7524_v25  ;;  %v7536_v32 = vadd.f32 %v1743_v11, %v7524_v25 }
 0x299   : > { %v7538_v28 = vpop.f32.mrf.mxu0  ;;  %v7540_v5 = vpop.f32.mrf.mxu1 }
 0x29a   : > { %v1939_v50 = vpack.c.bf16 %v1624_v42, %v1620_v31 }
 0x29b   : > { %v1629_v33 = vpop.f32.mrf.mxu0  ;;  %v1749_v34 = vpop.f32.mrf.mxu1 }
 0x29c   : > { %5951 = vmatprep.mubr.bf16.mxu1 %v1939_v50  ;;  %v7547_v59 = vadd.f32 %v1749_v34, %v7524_v25  ;;  %v7550_v1 = vadd.f32 %v1629_v33, %v7524_v25 }
 0x29d   : > { %v7544_v43 = vpop.f32.mrf.mxu0  ;;  %v1751_v35 = vpop.f32.mrf.mxu1 }
 0x29e   : > { %10044 = vst [vmem:[#allocation13_spill] sm:$0xff] %v7547_v59 }
 0x29f   : > { %v1633_v38 = vpop.f32.mrf.mxu0  ;;  %v1753_v39 = vpop.f32.mrf.mxu1 }
 0x2a0   : > { %v7553_v2 = vadd.f32 %v1633_v38, %v7524_v25  ;;  %v7556_v52 = vadd.f32 %v1753_v39, %v7524_v25 }
 0x2a1   : > { %v7558_v61 = vpop.f32.mrf.mxu0  ;;  %v1755_v45 = vpop.f32.mrf.mxu1 }
 0x2a2   : > { %10045 = vst [vmem:[#allocation14_spill] sm:$0xff] %v7556_v52 }
 0x2a3   : > { %v1639_v7 = vpop.f32.mrf.mxu0  ;;  %v1759_v8 = vpop.f32.mrf.mxu1 }
 0x2a4   : > { %v7567_v54 = vadd.f32 %v1759_v8, %v7524_v25  ;;  %v7570_v19 = vadd.f32 %v1639_v7, %v7524_v25 }
 0x2a5   : > { %v7564_v29 = vpop.f32.mrf.mxu0  ;;  %v1761_v36 = vpop.f32.mrf.mxu1 }
 0x2a6   : > { %10046 = vst [vmem:[#allocation15_spill] sm:$0xff] %v7567_v54  ;;  %v1762_v37 = vadd.f32 %v1761_v36, %v7588_v4  ;;  %v1752_v36 = vadd.f32 %v1751_v35, %v7588_v4 }
 0x2a7   : > { %v1643_v62 = vpop.f32.mrf.mxu0  ;;  %v1763_v47 = vpop.f32.mrf.mxu1 }
 0x2a8   : > { %v7573_v9 = vadd.f32 %v1643_v62, %v7524_v25  ;;  %v7576_v3 = vadd.f32 %v1763_v47, %v7524_v25  ;;  %v1756_v62 = vadd.f32 %v1755_v45, %v7588_v4  ;;  %v1742_v45 = vadd.f32 %v7528_v41, %v7588_v4 }
 0x2a9   : > { %v7579_v53 = vpop.f32.mrf.mxu0  ;;  %v1765_v56 = vpop.f32.mrf.mxu1 }
 0x2aa   : > { %10047 = vst [vmem:[#allocation16_spill] sm:$0xff] %v7576_v3  ;;  %v1766_v60 = vadd.f32 %v1765_v56, %v7588_v4 }
 0x2ab   : > { %v1649_v14 = vpop.f32.mrf.mxu0  ;;  %v1769_v46 = vpop.f32.mrf.mxu1 }
 0x2ac   : > { %v7593_v16 = vadd.f32 %v1769_v46, %v7524_v25  ;;  %v7598_v6 = vadd.f32 %v1649_v14, %v7524_v25  ;;  %v1969_v42 = vpack.c.bf16 %v1766_v60, %v1762_v37 }
 0x2ad   : > { %v7590_v15 = vpop.f32.mrf.mxu0  ;;  %v1771_v58 = vpop.f32.mrf.mxu1 }
 0x2ae   : > { %10048 = vst [vmem:[#allocation17_spill] sm:$0xff] %v7593_v16  ;;  %v1772_v40 = vadd.f32 %v1771_v58, %v7588_v4 }
 0x2af   : > { %v1653_v51 = vpop.f32.mrf.mxu0  ;;  %v1773_v0 = vpop.f32.mrf.mxu1 }
 0x2b0   : > { %v7601_v20 = vadd.f32 %v1653_v51, %v7524_v25  ;;  %v7605_v18 = vadd.f32 %v1773_v0, %v7524_v25  ;;  %v1968_v51 = vpack.c.bf16 %v1756_v62, %v1752_v36 }
 0x2b1   : > { %v7607_v55 = vpop.f32.mrf.mxu0  ;;  %v1775_v48 = vpop.f32.mrf.mxu1 }
 0x2b2   : > { %10049 = vst [vmem:[#allocation18_spill] sm:$0xff] %v7605_v18  ;;  %v1776_v11 = vadd.f32 %v1775_v48, %v7588_v4 }
 0x2b3   : > { %v1659_v31 = vpop.f32.mrf.mxu0 }
 0x2b4   : > { %v1970_v50 = vpack.c.bf16 %v1776_v11, %v1772_v40  ;;  %v7614_v33 = vpop.f32.mrf.mxu1  ;;  %v7621_v7 = vadd.f32 %v1659_v31, %v7524_v25  ;;  %v1746_v40 = vadd.f32 %v7540_v5, %v7588_v4 }
 0x2b5   : > { %v7616_v34 = vpop.f32.mrf.mxu0 }
 0x2b6   : > { %5967 = vmatprep.subr.bf16.mxu0 %v1970_v50  ;;  %v7618_v38 = vpop.f32.mrf.mxu1  ;;  %v1967_v41 = vpack.c.bf16 %v1746_v40, %v1742_v45 }
 0x2b7   : > { %10050 = vst [vmem:[#allocation19_spill] sm:$0xff] %v7618_v38  ;;  %v1663_v39 = vpop.f32.mrf.mxu0  ;;  %5968 = vmatpush3.bf16.xpose.msra.mxu0 %v1970_v50 }
 0x2b8   : > { %v7624_v8 = vadd.f32 %v1663_v39, %v7524_v25  ;;  %5969 = vmatprep.subr.bf16.mxu0 %v1969_v42  ;;  %v7628_v47 = vpop.f32.mrf.mxu1 }
 0x2b9   : > { %v7630_v56 = vpop.f32.mrf.mxu0 }
 0x2ba   : > { %v7634_v46 = vpop.f32.mrf.mxu1 }
 0x2bb   : > { %10051 = vst [vmem:[#allocation20_spill] sm:$0xff] %v7634_v46  ;;  %v1669_v58 = vpop.f32.mrf.mxu0 }
 0x2bc   : > { %v7636_v37 = vpop.f32.mrf.mxu1  ;;  %v7647_v48 = vadd.f32 %v1669_v58, %v7524_v25 }
 0x2bd   : > { %v7638_v60 = vpop.f32.mrf.mxu0 }
 0x2be   : > { %v7640_v0 = vpop.f32.mrf.mxu1 }
 0x2bf   : > { %v1673_v35 = vpop.f32.mrf.mxu0  ;;  %5970 = vmatpush3.bf16.xpose.msra.mxu0 %v1969_v42 }
 0x2c0   : > { %v7650_v11 = vadd.f32 %v1673_v35, %v7524_v25  ;;  %5971 = vmatprep.subr.bf16.mxu0 %v1968_v51  ;;  %v7652_v31 = vpop.f32.mrf.mxu1 }
 0x2c1   : > { %v1675_v50 = vpop.f32.mrf.mxu0 }
 0x2c2   : > { %v7656_v42 = vpop.f32.mrf.mxu1 }
 0x2c3   : > { %v1679_v36 = vpop.f32.mrf.mxu0 }
 0x2c4   : > { %v7658_v62 = vpop.f32.mrf.mxu1  ;;  %v7663_v35 = vadd.f32 %v1679_v36, %v7524_v25 }
 0x2c5   : > { %v1681_v5 = vpop.f32.mrf.mxu0 }
 0x2c6   : > { %v7660_v22 = vpop.f32.mrf.mxu1  ;;  %10052 = vst [vmem:[#allocation21_spill] sm:$0xff] %v7663_v35 }
 0x2c7   : > { %v1683_v58 = vpop.f32.mrf.mxu0  ;;  %5972 = vmatpush3.bf16.xpose.msra.mxu0 %v1968_v51 }
 0x2c8   : > { %v7666_v10 = vadd.f32 %v1683_v58, %v7524_v25  ;;  %5973 = vmatprep.subr.bf16.mxu0 %v1967_v41  ;;  %v7668_v27 = vpop.f32.mrf.mxu1  ;;  %v1452_v58 = vsub.s32 2, %v7515_v13 }
 0x2c9   : > { %v1685_v17 = vpop.f32.mrf.mxu0 }
 0x2ca   : > { %10053 = vst [vmem:[#allocation22_spill] sm:$0xff] %v7666_v10  ;;  %v7672_v40 = vpop.f32.mrf.mxu1  ;;  %v1686_v24 = vadd.f32 %v1685_v17, %v7588_v4 }
 0x2cb   : > { %v1689_v30 = vpop.f32.mrf.mxu0 }
 0x2cc   : > { %v7674_v49 = vpop.f32.mrf.mxu1  ;;  %v7680_v39 = vadd.f32 %v1689_v30, %v7524_v25  ;;  %v7695_v30 = vrot.slane %v7519_v23, %v1452_v58 }
 0x2cd   : > { %v1691_v12 = vpop.f32.mrf.mxu0 }
 0x2ce   : > { %v7676_v51 = vpop.f32.mrf.mxu1  ;;  %10054 = vst [vmem:[#allocation23_spill] sm:$0xff] %v7680_v39  ;;  %v1692_v63 = vadd.f32 %v1691_v12, %v7588_v4 }
 0x2cf   : > { %v1693_v36 = vpop.f32.mrf.mxu0  ;;  %5974 = vmatpush3.bf16.xpose.msra.mxu0 %v1967_v41 }
 0x2d0   : > { %v7683_v21 = vadd.f32 %v1693_v36, %v7524_v25  ;;  %v7685_v14 = vpop.f32.mrf.mxu1  ;;  %v1682_v36 = vadd.f32 %v1681_v5, %v7588_v4 }
 0x2d1   : > { %v1695_v45 = vpop.f32.mrf.mxu0 }
 0x2d2   : > { %10055 = vst [vmem:[#allocation24_spill] sm:$0xff] %v7683_v21  ;;  %v1696_v41 = vadd.f32 %v1695_v45, %v7588_v4  ;;  %v7692_v16 = vpop.f32.mrf.mxu1  ;;  %v1961_v12 = vpack.c.bf16 %v1686_v24, %v1682_v36 }
 0x2d3   : > { %v1699_v13 = vpop.f32.mrf.mxu0 }
 0x2d4   : > { %v1962_v18 = vpack.c.bf16 %v1696_v41, %v1692_v63  ;;  %v5921_v46 = vpop.f32.mrf.mxu1  ;;  %v1700_v54 = vadd.f32 %v1699_v13, %v7524_v25  ;;  %v1676_v41 = vadd.f32 %v1675_v50, %v7588_v4 }
 0x2d5   : > { %v7698_v38 = vpop.f32.mrf.mxu0  ;;  %v1885_v17 = vadd.f32 %v5921_v46, %v7695_v30 }
 0x2d6   : > { %5935 = vmatprep.subr.bf16.mxu1 %v1962_v18  ;;  %v1876_v44 = vpop.f32.mrf.mxu1 }
 0x2d7   : > { %v1703_v45 = vpop.f32.mrf.mxu0  ;;  %5936 = vmatpush3.bf16.xpose.msra.mxu1 %v1962_v18  ;;  %v1877_v39 = vadd.f32 %v1876_v44, %v7695_v30  ;;  %v1672_v44 = vadd.f32 %v7638_v60, %v7588_v4 }
 0x2d8   : > { %v1704_v23 = vadd.f32 %v1703_v45, %v7524_v25  ;;  %5937 = vmatprep.subr.bf16.mxu1 %v1961_v12  ;;  %v5922_v58 = vpop.f32.mrf.mxu1 }
 0x2d9   : > { %v7704_v5 = vpop.f32.mrf.mxu0  ;;  %v1888_v63 = vadd.f32 %v5922_v58, %v7695_v30  ;;  %v1960_v50 = vpack.c.bf16 %v1676_v41, %v1672_v44 }
 0x2da   : > { %v1947_v46 = vpack.c.bf16 %v1704_v23, %v1700_v54  ;;  %v1879_v24 = vpop.f32.mrf.mxu1 }
 0x2db   : > { %v7708_v36 = vpop.f32.mrf.mxu0  ;;  %v7710_v13 = vpack.c.bf16 %v1888_v63, %v1885_v17  ;;  %v1880_v18 = vadd.f32 %v1879_v24, %v7695_v30 }
 0x2dc   : > { %5983 = vmatprep.mubr.bf16.mxu0 %v1947_v46  ;;  %v5925_v45 = vpop.f32.mrf.mxu1  ;;  %v1666_v46 = vadd.f32 %v7630_v56, %v7588_v4 }
 0x2dd   : > { %10056 = vst [vmem:[#allocation25_spill] sm:$0xff] %v7710_v13  ;;  %v7715_v21 = vpop.f32.mrf.mxu0  ;;  %v7717_v3 = vpack.c.bf16 %v1880_v18, %v1877_v39  ;;  %v1901_v58 = vadd.f32 %v5925_v45, %v7695_v30 }
 0x2de   : > { %v1892_v54 = vpop.f32.mrf.mxu1 }
 0x2df   : > { %10057 = vst [vmem:[#allocation26_spill] sm:$0xff] %v7717_v3  ;;  %v7720_v23 = vpop.f32.mrf.mxu0  ;;  %5938 = vmatpush3.bf16.xpose.msra.mxu1 %v1961_v12  ;;  %v1893_v17 = vadd.f32 %v1892_v54, %v7695_v30  ;;  %v1662_v12 = vadd.f32 %v7616_v34, %v7588_v4  ;;  %v1656_v34 = vadd.f32 %v7607_v55, %v7588_v4 }
 0x2e0   : > { %5939 = vmatprep.subr.bf16.mxu1 %v1960_v50  ;;  %v5926_v63 = vpop.f32.mrf.mxu1 }
 0x2e1   : > { %v1715_v24 = vpop.f32.mrf.mxu0  ;;  %v1904_v60 = vadd.f32 %v5926_v63, %v7695_v30  ;;  %v1959_v63 = vpack.c.bf16 %v1666_v46, %v1662_v12 }
 0x2e2   : > { %v1895_v13 = vpop.f32.mrf.mxu1 }
 0x2e3   : > { %v7726_v39 = vpop.f32.mrf.mxu0  ;;  %v7728_v18 = vpack.c.bf16 %v1904_v60, %v1901_v58  ;;  %v1896_v41 = vadd.f32 %v1895_v13, %v7695_v30 }
 0x2e4   : > { %v5929_v44 = vpop.f32.mrf.mxu1 }
 0x2e5   : > { %10058 = vst [vmem:[#allocation27_spill] sm:$0xff] %v7728_v18  ;;  %v1721_v45 = vpop.f32.mrf.mxu0  ;;  %v7733_v54 = vpack.c.bf16 %v1896_v41, %v1893_v17  ;;  %v1917_v3 = vadd.f32 %v5929_v44, %v7695_v30 }
 0x2e6   : > { %v1908_v35 = vpop.f32.mrf.mxu1  ;;  %v1722_v52 = vadd.f32 %v1721_v45, %v7588_v4 }
 0x2e7   : > { %10059 = vst [vmem:[#allocation28_spill] sm:$0xff] %v7733_v54  ;;  %v7736_v10 = vpop.f32.mrf.mxu0  ;;  %5940 = vmatpush3.bf16.xpose.msra.mxu1 %v1960_v50  ;;  %v1909_v56 = vadd.f32 %v1908_v35, %v7695_v30  ;;  %v1652_v50 = vadd.f32 %v7590_v15, %v7588_v4 }
 0x2e8   : > { %5941 = vmatprep.subr.bf16.mxu1 %v1959_v63  ;;  %v5930_v58 = vpop.f32.mrf.mxu1 }
 0x2e9   : > { %v1725_v60 = vpop.f32.mrf.mxu0  ;;  %v1920_v13 = vadd.f32 %v5930_v58, %v7695_v30  ;;  %v1958_v54 = vpack.c.bf16 %v1656_v34, %v1652_v50  ;;  %v1642_v50 = vadd.f32 %v7564_v29, %v7588_v4 }
 0x2ea   : > { %v1911_v18 = vpop.f32.mrf.mxu1 }
 0x2eb   : > { %v7742_v17 = vpop.f32.mrf.mxu0  ;;  %v7744_v41 = vpack.c.bf16 %v1920_v13, %v1917_v3  ;;  %v1912_v46 = vadd.f32 %v1911_v18, %v7695_v30  ;;  %v1726_v3 = vadd.f32 %v1725_v60, %v7588_v4 }
 0x2ec   : > { %v7749_v12 = vpop.f32.mrf.mxu1 }
 0x2ed   : > { %v1731_v35 = vpop.f32.mrf.mxu0  ;;  %v7751_v44 = vpack.c.bf16 %v1912_v46, %v1909_v56  ;;  %v1646_v56 = vadd.f32 %v7579_v53, %v7588_v4  ;;  %v1965_v45 = vpack.c.bf16 %v1726_v3, %v1722_v52  ;;  %v1716_v53 = vadd.f32 %v1715_v24, %v7588_v4 }
 0x2ee   : > { %v1924_v58 = vpop.f32.mrf.mxu1  ;;  %v1732_v18 = vadd.f32 %v1731_v35, %v7588_v4  ;;  %v1632_v52 = vadd.f32 %v7544_v43, %v7588_v4  ;;  %v1626_v24 = vadd.f32 %v7538_v28, %v7588_v4  ;;  %v1714_v28 = vadd.f32 %v7720_v23, %v7524_v25 }
 0x2ef   : > { %10060 = vst [vmem:[#allocation29_spill] sm:$0xff] %v7751_v44  ;;  %v1733_v59 = vpop.f32.mrf.mxu0  ;;  %5942 = vmatpush3.bf16.xpose.msra.mxu1 %v1959_v63  ;;  %v1925_v55 = vadd.f32 %v1924_v58, %v7695_v30  ;;  %v1957_v35 = vpack.c.bf16 %v1646_v56, %v1642_v50  ;;  %v1712_v44 = vadd.f32 %v7715_v21, %v7588_v4 }
 0x2f0   : > { %5943 = vmatprep.subr.bf16.mxu1 %v1958_v54  ;;  %v7757_v13 = vpop.f32.mrf.mxu1  ;;  %v1706_v21 = vadd.f32 %v7704_v5, %v7588_v4  ;;  %v1872_v5 = vadd.f32 %v7685_v14, %v7695_v30  ;;  %v1864_v14 = vadd.f32 %v7692_v16, %v7695_v30  ;;  %v1853_v23 = vadd.f32 %v7658_v62, %v7695_v30 }
 0x2f1   : > { %v1735_v15 = vpop.f32.mrf.mxu0  ;;  %v1964_v29 = vpack.c.bf16 %v1716_v53, %v1712_v44  ;;  %v10062_v16 = vpack.c.bf16 %v7573_v9, %v7570_v19  ;;  %v10063_v19 = vpack.c.bf16 %v7601_v20, %v7598_v6  ;;  %v10065_v9 = vpack.c.bf16 %v7536_v32, %v7531_v57  ;;  %v10067_v32 = vld [vmem:[#allocation14_spill] sm:$0xff] }
 0x2f2   : > { %v1736_v34 = vadd.f32 %v1735_v15, %v7588_v4  ;;  %v1927_v46 = vpop.f32.mrf.mxu1  ;;  %v1636_v15 = vadd.f32 %v7558_v61, %v7588_v4  ;;  %v1622_v61 = vadd.f32 %v7526_v26, %v7588_v4  ;;  %v1720_v26 = vadd.f32 %v7726_v39, %v7524_v25 }
 0x2f3   : > { %v1928_v63 = vadd.f32 %v1927_v46, %v7695_v30  ;;  %v1856_v39 = vadd.f32 %v7668_v27, %v7695_v30  ;;  %v1734_v46 = vadd.f32 %v1733_v59, %v7524_v25  ;;  %v1845_v27 = vadd.f32 %v7660_v22, %v7695_v30 }
 0x2f4   : > { %v1966_v58 = vpack.c.bf16 %v1736_v34, %v1732_v18  ;;  %v1955_v43 = vpack.c.bf16 %v1626_v24, %v1622_v61  ;;  %v1710_v18 = vadd.f32 %v7708_v36, %v7524_v25  ;;  %v1837_v59 = vadd.f32 %v7636_v37, %v7695_v30  ;;  %v10081_v24 = vld [vmem:[#allocation18_spill] sm:$0xff]  ;;  %v10082_v61 = vld [vmem:[#allocation17_spill] sm:$0xff] }
 0x2f5   : > { %v7765_v60 = vpack.c.bf16 %v1928_v63, %v1925_v55  ;;  %v1956_v55 = vpack.c.bf16 %v1636_v15, %v1632_v52  ;;  %v2552_v62 = vpack.c.bf16 %v1856_v39, %v1853_v23  ;;  %v10064_v22 = vpack.c.bf16 %v7624_v8, %v7621_v7  ;;  %v10068_v8 = vld [vmem:[#allocation13_spill] sm:$0xff]  ;;  %v10070_v63 = vld [vmem:[#allocation22_spill] sm:$0xff] }
 0x2f6   : > { %5975 = vmatprep.subr.bf16.mxu0 %v1966_v58  ;;  %v1948_v56 = vpack.c.bf16 %v1714_v28, %v1710_v18  ;;  %v1829_v37 = vadd.f32 %v7640_v0, %v7695_v30  ;;  %v1821_v6 = vadd.f32 %v7614_v33, %v7695_v30  ;;  %v1824_v20 = vadd.f32 %v7628_v47, %v7695_v30  ;;  %v10076_v47 = vld [vmem:[#allocation19_spill] sm:$0xff] }
 0x2f7   : > { %5944 = vmatpush3.bf16.xpose.msra.mxu1 %v1958_v54  ;;  %5976 = vmatpush3.bf16.xpose.msra.mxu0 %v1966_v58  ;;  %v1702_v54 = vadd.f32 %v7698_v38, %v7588_v4  ;;  %v1869_v38 = vadd.f32 %v7674_v49, %v7695_v30  ;;  %v1724_v4 = vadd.f32 %v7736_v10, %v7524_v25  ;;  %v10074_v58 = vld [vmem:[#allocation15_spill] sm:$0xff] }
 0x2f8   : > { %5945 = vmatprep.subr.bf16.mxu1 %v1957_v35  ;;  %5977 = vmatprep.subr.bf16.mxu0 %v1965_v45  ;;  %v1861_v49 = vadd.f32 %v7676_v51, %v7695_v30  ;;  %v1730_v10 = vadd.f32 %v7742_v17, %v7524_v25  ;;  %v10061_v51 = vpack.c.bf16 %v7553_v2, %v7550_v1 }
 0x2f9   : > { %v1963_v3 = vpack.c.bf16 %v1706_v21, %v1702_v54  ;;  %v2554_v44 = vpack.c.bf16 %v1872_v5, %v1869_v38  ;;  %v1949_v36 = vpack.c.bf16 %v1724_v4, %v1720_v26  ;;  %v1848_v17 = vadd.f32 %v7672_v40, %v7695_v30  ;;  %v10079_v54 = vld [vmem:[#allocation23_spill] sm:$0xff] }
 0x2fa   : > { %v2553_v34 = vpack.c.bf16 %v1864_v14, %v1861_v49  ;;  %v1950_v25 = vpack.c.bf16 %v1734_v46, %v1730_v10  ;;  %v1840_v1 = vadd.f32 %v7652_v31, %v7695_v30  ;;  %v1832_v40 = vadd.f32 %v7656_v42, %v7695_v30  ;;  %v10071_v42 = vld [vmem:[#allocation21_spill] sm:$0xff] }
 0x2fb   : > { %v2551_v2 = vpack.c.bf16 %v1848_v17, %v1845_v27  ;;  %v10066_v57 = vpack.c.bf16 %v7650_v11, %v7647_v48  ;;  %v10069_v0 = vpack.c.bf16 %v10067_v32, %v10068_v8  ;;  %v10072_v50 = vpack.c.bf16 %v10070_v63, %v10071_v42  ;;  %v10077_v48 = vld [vmem:[#allocation20_spill] sm:$0xff] }
 0x2fc   : > { %v2550_v31 = vpack.c.bf16 %v1840_v1, %v1837_v59  ;;  %v2549_v7 = vpack.c.bf16 %v1832_v40, %v1829_v37  ;;  %v2548_v53 = vpack.c.bf16 %v1824_v20, %v1821_v6  ;;  %v1816_v11 = vadd.f32 %v10077_v48, %v7695_v30 }
 0x2fd   : > { %v1933_v52 = vadd.f32 %v7749_v12, %v7695_v30 }
 0x2ff   : > { %5946 = vmatpush3.bf16.xpose.msra.mxu1 %v1957_v35  ;;  %5978 = vmatpush3.bf16.xpose.msra.mxu0 %v1965_v45  ;;  %v10073_v45 = vld [vmem:[#allocation16_spill] sm:$0xff]  ;;  %v1813_v35 = vadd.f32 %v10076_v47, %v7695_v30 }
 0x300   : > { %5947 = vmatprep.subr.bf16.mxu1 %v1956_v55  ;;  %5979 = vmatprep.subr.bf16.mxu0 %v1964_v29  ;;  %v10075_v33 = vpack.c.bf16 %v10073_v45, %v10074_v58 }
 0x301   : > { %v2547_v15 = vpack.c.bf16 %v1816_v11, %v1813_v35  ;;  %v7925_v11 = vld [vmem:[%s10084_s21 + $0x1] ss:$0 sm:$0xff] }
 0x307   : > { %5948 = vmatpush3.bf16.xpose.msra.mxu1 %v1956_v55  ;;  %5980 = vmatpush3.bf16.xpose.msra.mxu0 %v1964_v29  ;;  %v1936_v29 = vadd.f32 %v7757_v13, %v7695_v30  ;;  %v10078_v55 = vld [vmem:[#allocation24_spill] sm:$0xff]  ;;  %v7868_v30 = vld [vmem:[%s10084_s21] ss:$0 sm:$0xff] }
 0x308   : > { %5949 = vmatprep.subr.bf16.mxu1 %v1955_v43  ;;  %5981 = vmatprep.subr.bf16.mxu0 %v1963_v3  ;;  %v10080_v21 = vpack.c.bf16 %v10078_v55, %v10079_v54 }
 0x30f   : > { %5950 = vmatpush3.bf16.xpose.msra.mxu1 %v1955_v43  ;;  %5982 = vmatpush3.bf16.xpose.msra.mxu0 %v1963_v3  ;;  %v10083_v3 = vpack.c.bf16 %v10081_v24, %v10082_v61  ;;  %v7862_v43 = vpack.c.bf16 %v1936_v29, %v1933_v52 }
 0x310   : > { %5999 = vmatprep.subr.bf16.mxu1 %v2554_v44 }
 0x316   : > { %5952 = vmatmul.mubr.bf16.vlgmr.msra.gmra.mxu1 %v10061_v51  ;;  %5984 = vmatmul.mubr.bf16.vlgmr.msra.gmra.mxu0 %v1948_v56 }
 0x317   : > { %5955 = vmatprep.mubr.bf16.mxu1 %v10062_v16  ;;  %5987 = vmatprep.mubr.bf16.mxu0 %v1949_v36 }
 0x318   : > { %6000 = vmatpush3.bf16.msra.mxu1 %v2554_v44 }
 0x319   : > { %6001 = vmatprep.subr.bf16.mxu1 %v2553_v34 }
 0x31c   : > { %6002 = vmatpush3.bf16.msra.mxu1 %v2553_v34 }
 0x31d   : > { %6003 = vmatprep.subr.bf16.mxu1 %v2552_v62 }
 0x31e   : > { %5956 = vmatmul.mubr.bf16.gmra.mxu1 %v10063_v19  ;;  %5988 = vmatmul.mubr.bf16.gmra.mxu0 %v1950_v25 }
 0x31f   : > { %5959 = vmatprep.mubr.bf16.mxu1 %v10064_v22  ;;  %5991 = vmatprep.mubr.bf16.mxu0 %v10065_v9 }
 0x320   : > { %6004 = vmatpush3.bf16.msra.mxu1 %v2552_v62 }
 0x321   : > { %6005 = vmatprep.subr.bf16.mxu1 %v2551_v2 }
 0x324   : > { %6006 = vmatpush3.bf16.msra.mxu1 %v2551_v2 }
 0x325   : > { %6007 = vmatprep.subr.bf16.mxu1 %v2550_v31 }
 0x326   : > { %5960 = vmatmul.mubr.bf16.gmra.mxu1 %v10066_v57  ;;  %5992 = vmatmul.mubr.bf16.gmra.mxu0 %v10069_v0 }
 0x327   : > { %5963 = vmatprep.mubr.bf16.mxu1 %v10072_v50  ;;  %5995 = vmatprep.mubr.bf16.mxu0 %v10075_v33 }
 0x328   : > { %6008 = vmatpush3.bf16.msra.mxu1 %v2550_v31 }
 0x329   : > { %6009 = vmatprep.subr.bf16.mxu1 %v2549_v7 }
 0x32c   : > { %6010 = vmatpush3.bf16.msra.mxu1 %v2549_v7 }
 0x32d   : > { %6011 = vmatprep.subr.bf16.mxu1 %v2548_v53 }
 0x32e   : > { %5964 = vmatmul.mubr.bf16.gmra.mxu1 %v10080_v21  ;;  %5996 = vmatmul.mubr.bf16.gmra.mxu0 %v10083_v3 }
 0x330   : > { %6012 = vmatpush3.bf16.msra.mxu1 %v2548_v53 }
 0x331   : > { %6013 = vmatprep.subr.bf16.mxu1 %v2547_v15 }
 0x334   : > { %6014 = vmatpush3.bf16.msra.mxu1 %v2547_v15 }
 0x335   : > { %6031 = vmatprep.subr.bf16.mxu1 %v7862_v43 }
 0x3d6   : > { %v5953_v38 = vpop.f32.mrf.mxu1  ;;  %v5985_v51 = vpop.f32.mrf.mxu0 }
 0x3d7   : > { %v2167_v12 = vmul.f32 0.088388346, %v5953_v38  ;;  %v2183_v54 = vmul.f32 0.088388346, %v5985_v51 }
 0x3d8   : > { %v2005_v13 = vpop.f32.mrf.mxu1  ;;  %v2102_v1 = vpop.f32.mrf.mxu0 }
 0x3d9   : > { %v2165_v5 = vmul.f32 0.088388346, %v2005_v13  ;;  %v7871_v44 = vadd.f32 %v7868_v30, %v2167_v12  ;;  %v2181_v53 = vmul.f32 0.088388346, %v2102_v1  ;;  %v7944_v13 = vadd.f32 %v7925_v11, %v2183_v54 }
 0x3da   : > { %v5954_v18 = vpop.f32.mrf.mxu1  ;;  %v5986_v40 = vpop.f32.mrf.mxu0 }
 0x3db   : > { %v2168_v28 = vmul.f32 0.088388346, %v5954_v18  ;;  %2247 = vmax.xlane.f32.xlu1 %v7871_v44  ;;  %v7875_v26 = vadd.f32 %v7868_v30, %v2165_v5  ;;  %v7936_v24 = vadd.f32 %v7925_v11, %v2181_v53  ;;  %v2184_v38 = vmul.f32 0.088388346, %v5986_v40 }
 0x3dc   : > { %v2008_v4 = vpop.f32.mrf.mxu1  ;;  %v2105_v0 = vpop.f32.mrf.mxu0 }
 0x3dd   : > { %v2166_v49 = vmul.f32 0.088388346, %v2008_v4  ;;  %2243 = vmax.xlane.f32.xlu0 %v7875_v26  ;;  %v7879_v14 = vadd.f32 %v7868_v30, %v2168_v28  ;;  %v2182_v21 = vmul.f32 0.088388346, %v2105_v0 }
 0x3de   : > { %v5957_v56 = vpop.f32.mrf.mxu1  ;;  %v5989_v47 = vpop.f32.mrf.mxu0 }
 0x3df   : > { %2249 = vmax.xlane.f32.xlu1 %v7879_v14  ;;  %v7883_v36 = vadd.f32 %v7868_v30, %v2166_v49  ;;  %v2171_v10 = vmul.f32 0.088388346, %v5957_v56  ;;  %v7947_v5 = vadd.f32 %v7925_v11, %v2182_v21  ;;  %v2187_v28 = vmul.f32 0.088388346, %v5989_v47 }
 0x3e0   : > { %v2021_v23 = vpop.f32.mrf.mxu1  ;;  %v2118_v55 = vpop.f32.mrf.mxu0  ;;  %v7955_v49 = vadd.f32 %v7925_v11, %v2184_v38 }
 0x3e1   : > { %v2169_v39 = vmul.f32 0.088388346, %v2021_v23  ;;  %2245 = vmax.xlane.f32.xlu0 %v7883_v36  ;;  %v7891_v25 = vadd.f32 %v7868_v30, %v2171_v10  ;;  %v2185_v12 = vmul.f32 0.088388346, %v2118_v55  ;;  %v7960_v23 = vadd.f32 %v7925_v11, %v2187_v28 }
 0x3e2   : > { %v5958_v34 = vpop.f32.mrf.mxu1  ;;  %v5990_v3 = vpop.f32.mrf.mxu0 }
 0x3e3   : > { %v7887_v46 = vadd.f32 %v7868_v30, %v2169_v39  ;;  %v2172_v17 = vmul.f32 0.088388346, %v5958_v34  ;;  %v2188_v56 = vmul.f32 0.088388346, %v5990_v3 }
 0x3e4   : > { %v2024_v16 = vpop.f32.mrf.mxu1  ;;  %v2121_v18 = vpop.f32.mrf.mxu0 }
 0x3e5   : > { %v2170_v27 = vmul.f32 0.088388346, %v2024_v16  ;;  %2251 = vmax.xlane.f32.xlu0 %v7887_v46  ;;  %v7899_v37 = vadd.f32 %v7868_v30, %v2172_v17  ;;  %v2186_v4 = vmul.f32 0.088388346, %v2121_v18  ;;  %v7968_v34 = vadd.f32 %v7925_v11, %v2188_v56 }
 0x3e6   : > { %v5961_v62 = vpop.f32.mrf.mxu1 }
 0x3e7   : > { %v7894_v59 = vadd.f32 %v7868_v30, %v2170_v27  ;;  %v2175_v9 = vmul.f32 0.088388346, %v5961_v62  ;;  %v7963_v39 = vadd.f32 %v7925_v11, %v2186_v4 }
 0x3e8   : > { %v2037_v2 = vpop.f32.mrf.mxu1 }
 0x3e9   : > { %v2173_v19 = vmul.f32 0.088388346, %v2037_v2  ;;  %2255 = vmax.xlane.f32.xlu0 %v7891_v25  ;;  %2253 = vmax.xlane.f32.xlu1 %v7894_v59  ;;  %v7907_v32 = vadd.f32 %v7868_v30, %v2175_v9 }
 0x3ea   : > { %v5962_v22 = vpop.f32.mrf.mxu1 }
 0x3eb   : > { %v7902_v31 = vadd.f32 %v7868_v30, %v2173_v19  ;;  %v2176_v57 = vmul.f32 0.088388346, %v5962_v22 }
 0x3ec   : > { %v2040_v6 = vpop.f32.mrf.mxu1 }
 0x3ed   : > { %v2174_v20 = vmul.f32 0.088388346, %v2040_v6  ;;  %2257 = vmax.xlane.f32.xlu1 %v7899_v37  ;;  %2259 = vmax.xlane.f32.xlu0 %v7902_v31  ;;  %v7915_v58 = vadd.f32 %v7868_v30, %v2176_v57 }
 0x3ee   : > { %v5965_v7 = vpop.f32.mrf.mxu1 }
 0x3ef   : > { %v7910_v8 = vadd.f32 %v7868_v30, %v2174_v20  ;;  %v2179_v45 = vmul.f32 0.088388346, %v5965_v7  ;;  %v5993_v20 = vpop.f32.mrf.mxu0 }
 0x3f0   : > { %v2053_v63 = vpop.f32.mrf.mxu1 }
 0x3f1   : > { %v2177_v42 = vmul.f32 0.088388346, %v2053_v63  ;;  %2263 = vmax.xlane.f32.xlu0 %v7907_v32  ;;  %2261 = vmax.xlane.f32.xlu1 %v7910_v8  ;;  %v7928_v52 = vadd.f32 %v7868_v30, %v2179_v45  ;;  %v2134_v57 = vpop.f32.mrf.mxu0 }
 0x3f2   : > { %v5966_v50 = vpop.f32.mrf.mxu1 }
 0x3f3   : > { %v7918_v33 = vadd.f32 %v7868_v30, %v2177_v42  ;;  %v2180_v15 = vmul.f32 0.088388346, %v5966_v50  ;;  %v5994_v45 = vpop.f32.mrf.mxu0 }
 0x3f4   : > { %v2056_v35 = vpop.f32.mrf.mxu1 }
 0x3f5   : > { %v2178_v48 = vmul.f32 0.088388346, %v2056_v35  ;;  %2265 = vmax.xlane.f32.xlu1 %v7915_v58  ;;  %2267 = vmax.xlane.f32.xlu0 %v7918_v33  ;;  %v7939_v61 = vadd.f32 %v7868_v30, %v2180_v15  ;;  %v2189_v15 = vmul.f32 0.088388346, %v2134_v57  ;;  %v2137_v54 = vpop.f32.mrf.mxu0 }
 0x3f6   : > { %v2190_v38 = vmul.f32 0.088388346, %v2137_v54 }
 0x3f7   : > { %v7931_v29 = vadd.f32 %v7868_v30, %v2178_v48  ;;  %v7952_v30 = vadd.f32 %v7925_v11, %v2185_v12  ;;  %v7989_v18 = vadd.f32 %v7925_v11, %v2189_v15 }
 0x3f9   : > { %2271 = vmax.xlane.f32.xlu0 %v7928_v52  ;;  %2269 = vmax.xlane.f32.xlu1 %v7931_v29 }
 0x3fd   : > { %2275 = vmax.xlane.f32.xlu0 %v7936_v24  ;;  %2273 = vmax.xlane.f32.xlu1 %v7939_v61 }
 0x401   : > { %2279 = vmax.xlane.f32.xlu0 %v7944_v13  ;;  %2277 = vmax.xlane.f32.xlu1 %v7947_v5 }
 0x405   : > { %2283 = vmax.xlane.f32.xlu0 %v7952_v30  ;;  %2281 = vmax.xlane.f32.xlu1 %v7955_v49 }
 0x409   : > { %2287 = vmax.xlane.f32.xlu0 %v7960_v23  ;;  %2285 = vmax.xlane.f32.xlu1 %v7963_v39 }
 0x40d   : > { %2289 = vmax.xlane.f32.xlu1 %v7968_v34 }
 0x464   : > { %v2248_v10 = vpop.xlane.xlu1 %2247 }
 0x465   : > { %v2309_v51 = vsub.f32 %v7871_v44, %v2248_v10  ;;  %v2192_v10 = vmul.f32 0.088388346, %v5994_v45 }
 0x466   : > { %v2244_v16 = vpop.xlane.xlu0 %2243 }
 0x467   : > { %v2307_v27 = vsub.f32 %v7875_v26, %v2244_v16  ;;  %v2343_v1 = vmul.f32 1.442695, %v2309_v51 }
 0x468   : > { %v2250_v62 = vpop.xlane.xlu1 %2249 }
 0x469   : > { %v2339_v17 = vmul.f32 1.442695, %v2307_v27  ;;  %v2310_v19 = vsub.f32 %v7879_v14, %v2250_v62  ;;  %v8000_v27 = vadd.f32 %v7925_v11, %v2190_v38 }
 0x46a   : > { %v2246_v2 = vpop.xlane.xlu0 %2245 }
 0x46b   : > { %6342 = vpow2.f32 %v2339_v17  ;;  %v2308_v22 = vsub.f32 %v7883_v36, %v2246_v2  ;;  %v2345_v6 = vmul.f32 1.442695, %v2310_v19  ;;  %v8007_v19 = vadd.f32 %v7925_v11, %v2192_v10 }
 0x46c   : > { %6344 = vpow2.f32 %v2343_v1 }
 0x46d   : > { %v2341_v9 = vmul.f32 1.442695, %v2308_v22 }
 0x46e   : > { %v2252_v40 = vpop.xlane.xlu0 %2251 }
 0x46f   : > { %6346 = vpow2.f32 %v2341_v9  ;;  %v2311_v26 = vsub.f32 %v7887_v46, %v2252_v40 }
 0x470   : > { %6348 = vpow2.f32 %v2345_v6 }
 0x471   : > { %v2347_v50 = vmul.f32 1.442695, %v2311_v26 }
 0x472   : > { %v2256_v7 = vpop.xlane.xlu0 %2255  ;;  %v2254_v44 = vpop.xlane.xlu1 %2253 }
 0x473   : > { %v2313_v0 = vsub.f32 %v7891_v25, %v2256_v7  ;;  %v2312_v14 = vsub.f32 %v7894_v59, %v2254_v44  ;;  %6350 = vpow2.f32 %v2347_v50  ;;  %v2191_v59 = vmul.f32 0.088388346, %v5993_v20 }
 0x475   : > { %v2351_v47 = vmul.f32 1.442695, %v2313_v0  ;;  %v2349_v46 = vmul.f32 1.442695, %v2312_v14  ;;  %v7996_v56 = vadd.f32 %v7925_v11, %v2191_v59 }
 0x476   : > { %v2258_v63 = vpop.xlane.xlu1 %2257  ;;  %v2260_v42 = vpop.xlane.xlu0 %2259 }
 0x477   : > { %v2314_v25 = vsub.f32 %v7899_v37, %v2258_v63  ;;  %6352 = vpow2.f32 %v2351_v47  ;;  %v5997_v37 = vpop.f32.mrf.mxu0  ;;  %v2315_v51 = vsub.f32 %v7902_v31, %v2260_v42 }
 0x478   : > { %v7978_v36 = vpop.eup %6342  ;;  %6354 = vpow2.f32 %v2349_v46  ;;  %v2195_v0 = vmul.f32 0.088388346, %v5997_v37 }
 0x479   : > { %2403 = vadd.xlane.f32.xlu0 %v7978_v36  ;;  %v7981_v48 = vpop.eup %6344  ;;  %v2353_v12 = vmul.f32 1.442695, %v2314_v25  ;;  %v2150_v62 = vpop.f32.mrf.mxu0  ;;  %v2355_v1 = vmul.f32 1.442695, %v2315_v51 }
 0x47a   : > { %v2264_v35 = vpop.xlane.xlu0 %2263  ;;  %v2262_v53 = vpop.xlane.xlu1 %2261  ;;  %v2193_v6 = vmul.f32 0.088388346, %v2150_v62 }
 0x47b   : > { %6356 = vpow2.f32 %v2353_v12  ;;  %v2317_v17 = vsub.f32 %v7907_v32, %v2264_v35  ;;  %v2316_v2 = vsub.f32 %v7910_v8, %v2262_v53  ;;  %v5998_v31 = vpop.f32.mrf.mxu0  ;;  %v8031_v53 = vadd.f32 %v7925_v11, %v2195_v0 }
 0x47c   : > { %v7984_v55 = vpop.eup %6346  ;;  %6358 = vpow2.f32 %v2355_v1 }
 0x47d   : > { %2407 = vadd.xlane.f32.xlu0 %v7981_v48  ;;  %2405 = vadd.xlane.f32.xlu1 %v7984_v55  ;;  %v7991_v28 = vpop.eup %6348  ;;  %v2359_v20 = vmul.f32 1.442695, %v2317_v17  ;;  %v2357_v8 = vmul.f32 1.442695, %v2316_v2  ;;  %v2153_v57 = vpop.f32.mrf.mxu0 }
 0x47e   : > { %v2266_v21 = vpop.xlane.xlu1 %2265  ;;  %v2268_v3 = vpop.xlane.xlu0 %2267  ;;  %v2194_v14 = vmul.f32 0.088388346, %v2153_v57 }
 0x47f   : > { %v2318_v7 = vsub.f32 %v7915_v58, %v2266_v21  ;;  %v2319_v44 = vsub.f32 %v7918_v33, %v2268_v3  ;;  %6360 = vpow2.f32 %v2359_v20  ;;  %v8023_v58 = vadd.f32 %v7925_v11, %v2193_v6 }
 0x480   : > { %v8009_v22 = vpop.eup %6350  ;;  %6362 = vpow2.f32 %v2357_v8 }
 0x481   : > { %2291 = vmax.xlane.f32.xlu0 %v7989_v18  ;;  %2409 = vadd.xlane.f32.xlu1 %v7991_v28  ;;  %v2361_v63 = vmul.f32 1.442695, %v2318_v7  ;;  %v2363_v45 = vmul.f32 1.442695, %v2319_v44 }
 0x482   : > { %v2270_v4 = vpop.xlane.xlu1 %2269  ;;  %v2272_v16 = vpop.xlane.xlu0 %2271 }
 0x483   : > { %v2321_v42 = vsub.f32 %v7928_v52, %v2272_v16  ;;  %v2320_v33 = vsub.f32 %v7931_v29, %v2270_v4  ;;  %v2196_v52 = vmul.f32 0.088388346, %v5998_v31  ;;  %6364 = vpow2.f32 %v2361_v63 }
 0x484   : > { %v8014_v32 = vpop.eup %6352  ;;  %6366 = vpow2.f32 %v2363_v45  ;;  %v8036_v29 = vadd.f32 %v7925_v11, %v2194_v14 }
 0x485   : > { %2295 = vmax.xlane.f32.xlu0 %v7996_v56  ;;  %2293 = vmax.xlane.f32.xlu1 %v8000_v27  ;;  %v8017_v26 = vpop.eup %6354  ;;  %v2367_v15 = vmul.f32 1.442695, %v2321_v42  ;;  %v2365_v25 = vmul.f32 1.442695, %v2320_v33  ;;  %v8043_v37 = vadd.f32 %v7925_v11, %v2196_v52 }
 0x486   : > { %v2274_v9 = vpop.xlane.xlu1 %2273  ;;  %v2276_v40 = vpop.xlane.xlu0 %2275 }
 0x487   : > { %v2323_v46 = vsub.f32 %v7936_v24, %v2276_v40  ;;  %v2322_v54 = vsub.f32 %v7939_v61, %v2274_v9  ;;  %6368 = vpow2.f32 %v2367_v15 }
 0x488   : > { %v8026_v35 = vpop.eup %6356  ;;  %6370 = vpow2.f32 %v2365_v25 }
 0x489   : > { %2411 = vadd.xlane.f32.xlu0 %v8009_v22  ;;  %2297 = vmax.xlane.f32.xlu1 %v8007_v19  ;;  %v2371_v3 = vmul.f32 1.442695, %v2323_v46  ;;  %v2369_v12 = vmul.f32 1.442695, %v2322_v54  ;;  %v8045_v61 = vpop.eup %6358 }
 0x48a   : > { %v2278_v50 = vpop.xlane.xlu1 %2277  ;;  %v2280_v47 = vpop.xlane.xlu0 %2279 }
 0x48b   : > { %v2325_v38 = vsub.f32 %v7944_v13, %v2280_v47  ;;  %v2324_v24 = vsub.f32 %v7947_v5, %v2278_v50  ;;  %6372 = vpow2.f32 %v2371_v3 }
 0x48c   : > { %v8050_v16 = vpop.eup %6360  ;;  %6374 = vpow2.f32 %v2369_v12 }
 0x48d   : > { %2415 = vadd.xlane.f32.xlu0 %v8014_v32  ;;  %2413 = vadd.xlane.f32.xlu1 %v8017_v26  ;;  %v2375_v4 = vmul.f32 1.442695, %v2325_v38  ;;  %v2373_v13 = vmul.f32 1.442695, %v2324_v24  ;;  %v8053_v11 = vpop.eup %6362 }
 0x48e   : > { %v2282_v59 = vpop.xlane.xlu1 %2281  ;;  %v2284_v21 = vpop.xlane.xlu0 %2283 }
 0x48f   : > { %v2327_v10 = vsub.f32 %v7952_v30, %v2284_v21  ;;  %v2326_v5 = vsub.f32 %v7955_v49, %v2282_v59  ;;  %6376 = vpow2.f32 %v2375_v4 }
 0x490   : > { %v8058_v2 = vpop.eup %6364  ;;  %6378 = vpow2.f32 %v2373_v13 }
 0x491   : > { %2299 = vmax.xlane.f32.xlu0 %v8023_v58  ;;  %2417 = vadd.xlane.f32.xlu1 %v8026_v35  ;;  %v2379_v17 = vmul.f32 1.442695, %v2327_v10  ;;  %v2377_v30 = vmul.f32 1.442695, %v2326_v5  ;;  %v8061_v9 = vpop.eup %6366 }
 0x492   : > { %v2286_v51 = vpop.xlane.xlu1 %2285  ;;  %v2288_v62 = vpop.xlane.xlu0 %2287 }
 0x493   : > { %v2329_v1 = vsub.f32 %v7960_v23, %v2288_v62  ;;  %v2328_v31 = vsub.f32 %v7963_v39, %v2286_v51  ;;  %6380 = vpow2.f32 %v2379_v17 }
 0x494   : > { %v8065_v6 = vpop.eup %6368  ;;  %6382 = vpow2.f32 %v2377_v30 }
 0x495   : > { %2303 = vmax.xlane.f32.xlu0 %v8031_v53  ;;  %2301 = vmax.xlane.f32.xlu1 %v8036_v29  ;;  %v2383_v40 = vmul.f32 1.442695, %v2329_v1  ;;  %v2381_v20 = vmul.f32 1.442695, %v2328_v31  ;;  %v8068_v7 = vpop.eup %6370 }
 0x496   : > { %v2290_v49 = vpop.xlane.xlu1 %2289 }
 0x497   : > { %v2330_v23 = vsub.f32 %v7968_v34, %v2290_v49  ;;  %6384 = vpow2.f32 %v2383_v40 }
 0x498   : > { %v8072_v39 = vpop.eup %6372  ;;  %6386 = vpow2.f32 %v2381_v20 }
 0x499   : > { %2419 = vadd.xlane.f32.xlu0 %v8045_v61  ;;  %2305 = vmax.xlane.f32.xlu1 %v8043_v37  ;;  %v2385_v8 = vmul.f32 1.442695, %v2330_v23  ;;  %v8074_v44 = vpop.eup %6374 }
 0x49b   : > { %6388 = vpow2.f32 %v2385_v8 }
 0x49c   : > { %v8078_v57 = vpop.eup %6376 }
 0x49d   : > { %2423 = vadd.xlane.f32.xlu0 %v8050_v16  ;;  %2421 = vadd.xlane.f32.xlu1 %v8053_v11  ;;  %v8080_v34 = vpop.eup %6378 }
 0x4a0   : > { %v8084_v0 = vpop.eup %6380 }
 0x4a1   : > { %2427 = vadd.xlane.f32.xlu0 %v8061_v9  ;;  %2425 = vadd.xlane.f32.xlu1 %v8058_v2  ;;  %v8086_v63 = vpop.eup %6382 }
 0x4a4   : > { %v8090_v42 = vpop.eup %6384 }
 0x4a5   : > { %2431 = vadd.xlane.f32.xlu0 %v8065_v6  ;;  %2429 = vadd.xlane.f32.xlu1 %v8068_v7  ;;  %v8092_v50 = vpop.eup %6386 }
 0x4a8   : > { %v8096_v14 = vpop.eup %6388 }
 0x4a9   : > { %2435 = vadd.xlane.f32.xlu0 %v8072_v39  ;;  %2433 = vadd.xlane.f32.xlu1 %v8074_v44 }
 0x4ad   : > { %2439 = vadd.xlane.f32.xlu0 %v8078_v57  ;;  %2437 = vadd.xlane.f32.xlu1 %v8080_v34 }
 0x4b1   : > { %2443 = vadd.xlane.f32.xlu0 %v8084_v0  ;;  %2441 = vadd.xlane.f32.xlu1 %v8086_v63 }
 0x4b5   : > { %2447 = vadd.xlane.f32.xlu0 %v8090_v42  ;;  %2445 = vadd.xlane.f32.xlu1 %v8092_v50 }
 0x4b9   : > { %2449 = vadd.xlane.f32.xlu1 %v8096_v14 }
 0x502   : > { %v2404_v45 = vpop.xlane.xlu0 %2403 }
 0x503   : > { %6390 = vrcp.f32 %v2404_v45 }
 0x506   : > { %v2408_v33 = vpop.xlane.xlu0 %2407  ;;  %v2406_v47 = vpop.xlane.xlu1 %2405 }
 0x507   : > { %6392 = vrcp.f32 %v2406_v47 }
 0x508   : > { %6394 = vrcp.f32 %v2408_v33 }
 0x50a   : > { %v2292_v52 = vpop.xlane.xlu0 %2291  ;;  %v2410_v15 = vpop.xlane.xlu1 %2409 }
 0x50b   : > { %v2331_v46 = vsub.f32 %v7989_v18, %v2292_v52  ;;  %6396 = vrcp.f32 %v2410_v15 }
 0x50d   : > { %v2387_v25 = vmul.f32 1.442695, %v2331_v46 }
 0x50e   : > { %v2296_v54 = vpop.xlane.xlu0 %2295  ;;  %v2294_v59 = vpop.xlane.xlu1 %2293 }
 0x50f   : > { %6398 = vpow2.f32 %v2387_v25  ;;  %v2333_v21 = vsub.f32 %v7996_v56, %v2296_v54  ;;  %v2332_v3 = vsub.f32 %v8000_v27, %v2294_v59 }
 0x510   : > { %v6391_v10 = vpop.eup %6390 }
 0x511   : > { %v2391_v38 = vmul.f32 1.442695, %v2333_v21  ;;  %v2389_v12 = vmul.f32 1.442695, %v2332_v3  ;;  %v2499_v1 = vmul.f32 %v6391_v10, %v7978_v36  ;;  %v10085_v3 = vld [vmem:[#allocation29_spill] sm:$0xff] }
 0x512   : > { %v2412_v24 = vpop.xlane.xlu0 %2411  ;;  %v2298_v4 = vpop.xlane.xlu1 %2297 }
 0x513   : > { %6400 = vpow2.f32 %v2391_v38  ;;  %v2334_v51 = vsub.f32 %v8007_v19, %v2298_v4 }
 0x514   : > { %6402 = vpow2.f32 %v2389_v12  ;;  %v6393_v13 = vpop.eup %6392 }
 0x515   : > { %v2393_v18 = vmul.f32 1.442695, %v2334_v51  ;;  %v6395_v5 = vpop.eup %6394  ;;  %6404 = vrcp.f32 %v2412_v24  ;;  %v2500_v56 = vmul.f32 %v6393_v13, %v7984_v55  ;;  %v10086_v13 = vld [vmem:[#allocation27_spill] sm:$0xff] }
 0x516   : > { %v2416_v62 = vpop.xlane.xlu0 %2415  ;;  %v2414_v17 = vpop.xlane.xlu1 %2413  ;;  %v2501_v31 = vmul.f32 %v6395_v5, %v7981_v48 }
 0x517   : > { %6406 = vpow2.f32 %v2393_v18  ;;  %v2531_v30 = vpack.c.bf16 %v2500_v56, %v2499_v1 }
 0x518   : > { %v6397_v27 = vpop.eup %6396  ;;  %6408 = vrcp.f32 %v2416_v62 }
 0x519   : > { %6410 = vrcp.f32 %v2414_v17  ;;  %v2502_v19 = vmul.f32 %v6397_v27, %v7991_v28  ;;  %6015 = vmatprep.mubr.bf16.mxu1 %v2531_v30  ;;  %v10088_v27 = vld [vmem:[#allocation25_spill] sm:$0xff] }
 0x51a   : > { %v2300_v49 = vpop.xlane.xlu0 %2299  ;;  %v2418_v40 = vpop.xlane.xlu1 %2417 }
 0x51b   : > { %v2335_v20 = vsub.f32 %v8023_v58, %v2300_v49  ;;  %6412 = vrcp.f32 %v2418_v40  ;;  %v2532_v23 = vpack.c.bf16 %v2502_v19, %v2501_v31 }
 0x51c   : > { %v8108_v8 = vpop.eup %6398 }
 0x51d   : > { %v2395_v36 = vmul.f32 1.442695, %v2335_v20  ;;  %2451 = vadd.xlane.f32.xlu0 %v8108_v8  ;;  %6016 = vmatmul.mubr.bf16.vlgmr.msra.gmra.mxu1 %v2532_v23  ;;  %v10089_v20 = vld [vmem:[#allocation26_spill] sm:$0xff] }
 0x51e   : > { %6032 = vmatpush3.bf16.msra.mxu1 %v7862_v43  ;;  %v2304_v55 = vpop.xlane.xlu0 %2303  ;;  %v2302_v45 = vpop.xlane.xlu1 %2301 }
 0x51f   : > { %6414 = vpow2.f32 %v2395_v36  ;;  %v2337_v48 = vsub.f32 %v8031_v53, %v2304_v55  ;;  %6033 = vmatprep.subr.bf16.mxu1 %v7765_v60  ;;  %v2336_v28 = vsub.f32 %v8036_v29, %v2302_v45 }
 0x520   : > { %v8115_v58 = vpop.eup %6400 }
 0x521   : > { %v8117_v33 = vpop.eup %6402  ;;  %v2399_v47 = vmul.f32 1.442695, %v2337_v48  ;;  %v2397_v52 = vmul.f32 1.442695, %v2336_v28  ;;  %2455 = vadd.xlane.f32.xlu0 %v8115_v58 }
 0x522   : > { %6034 = vmatpush3.bf16.msra.mxu1 %v7765_v60  ;;  %2453 = vadd.xlane.f32.xlu1 %v8117_v33  ;;  %v2420_v43 = vpop.xlane.xlu0 %2419  ;;  %v2306_v15 = vpop.xlane.xlu1 %2305 }
 0x523   : > { %v6405_v46 = vpop.eup %6404  ;;  %6416 = vpow2.f32 %v2399_v47  ;;  %6035 = vmatprep.subr.bf16.mxu1 %v7744_v41  ;;  %v2338_v53 = vsub.f32 %v8043_v37, %v2306_v15 }
 0x524   : > { %v8124_v29 = vpop.eup %6406  ;;  %6418 = vpow2.f32 %v2397_v52  ;;  %v2503_v38 = vmul.f32 %v6405_v46, %v8009_v22 }
 0x525   : > { %v6409_v25 = vpop.eup %6408  ;;  %v2401_v54 = vmul.f32 1.442695, %v2338_v53  ;;  %6420 = vrcp.f32 %v2420_v43 }
 0x526   : > { %v6411_v59 = vpop.eup %6410  ;;  %6036 = vmatpush3.bf16.msra.mxu1 %v7744_v41  ;;  %2457 = vadd.xlane.f32.xlu1 %v8124_v29  ;;  %v2424_v60 = vpop.xlane.xlu0 %2423  ;;  %v2505_v4 = vmul.f32 %v6409_v25, %v8014_v32 }
 0x527   : > { %v2422_v21 = vpop.xlane.xlu1 %2421  ;;  %6422 = vpow2.f32 %v2401_v54  ;;  %6037 = vmatprep.subr.bf16.mxu1 %v10085_v3  ;;  %v2504_v37 = vmul.f32 %v6411_v59, %v8017_v26  ;;  %v10087_v26 = vld [vmem:[#allocation28_spill] sm:$0xff] }
 0x528   : > { %v6413_v12 = vpop.eup %6412  ;;  %6424 = vrcp.f32 %v2422_v21 }
 0x529   : > { %v2533_v24 = vpack.c.bf16 %v2504_v37, %v2503_v38  ;;  %v2506_v10 = vmul.f32 %v6413_v12, %v8026_v35  ;;  %6426 = vrcp.f32 %v2424_v60  ;;  %v6295_v38 = vld [vmem:[%s6946_s23 + $0x30] sm:$0xff]  }
 0x52a   : > { %6038 = vmatpush3.bf16.msra.mxu1 %v10085_v3  ;;  %v2428_v41 = vpop.xlane.xlu0 %2427  ;;  %v6294_v3 = vld [vmem:[%s6946_s23 + $0x38] sm:$0xff]  }
 0x52b   : > { %v2426_v51 = vpop.xlane.xlu1 %2425  ;;  %6019 = vmatprep.mubr.bf16.mxu1 %v2533_v24  ;;  %6039 = vmatprep.subr.bf16.mxu1 %v10086_v13  ;;  %v2534_v18 = vpack.c.bf16 %v2506_v10, %v2505_v4 }
 0x52c   : > { %v8135_v5 = vpop.eup %6414  ;;  %6428 = vrcp.f32 %v2426_v51  ;;  %6063 = vmatprep.subr.bf16.mxu0 %v6294_v3 }
 0x52d   : > { %2459 = vadd.xlane.f32.xlu0 %v8135_v5  ;;  %6020 = vmatmul.mubr.bf16.gmra.mxu1 %v2534_v18  ;;  %6430 = vrcp.f32 %v2428_v41 }
 0x52e   : > { %6040 = vmatpush3.bf16.msra.mxu1 %v10086_v13  ;;  %v2432_v22 = vpop.xlane.xlu0 %2431  ;;  %6064 = vmatpush3.bf16.msra.mxu0 %v6294_v3 }
 0x52f   : > { %v2430_v32 = vpop.xlane.xlu1 %2429  ;;  %6041 = vmatprep.subr.bf16.mxu1 %v10087_v26  ;;  %6065 = vmatprep.subr.bf16.mxu0 %v6295_v38 }
 0x530   : > { %v8140_v35 = vpop.eup %6416  ;;  %6432 = vrcp.f32 %v2430_v32  ;;  %v6296_v32 = vld [vmem:[%s6946_s23 + $0x28] sm:$0xff]  }
 0x531   : > { %v8142_v62 = vpop.eup %6418  ;;  %2463 = vadd.xlane.f32.xlu0 %v8140_v35  ;;  %6434 = vrcp.f32 %v2432_v22 }
 0x532   : > { %6042 = vmatpush3.bf16.msra.mxu1 %v10087_v26  ;;  %2461 = vadd.xlane.f32.xlu1 %v8142_v62  ;;  %v2436_v17 = vpop.xlane.xlu0 %2435  ;;  %v6421_v56 = vpop.eup %6420 }
 0x533   : > { %v2434_v1 = vpop.xlane.xlu1 %2433  ;;  %6043 = vmatprep.subr.bf16.mxu1 %v10088_v27  ;;  %v2507_v23 = vmul.f32 %v6421_v56, %v8045_v61  ;;  %6066 = vmatpush3.bf16.msra.mxu0 %v6295_v38  ;;  %v6298_v56 = vld [vmem:[%s6946_s23 + $0x18] sm:$0xff]  }
 0x534   : > { %v8148_v30 = vpop.eup %6422  ;;  %6436 = vrcp.f32 %v2434_v1  ;;  %6067 = vmatprep.subr.bf16.mxu0 %v6296_v32  ;;  %v6297_v1 = vld [vmem:[%s6946_s23 + $0x20] sm:$0xff]  }
 0x535   : > { %v6425_v31 = vpop.eup %6424  ;;  %6438 = vrcp.f32 %v2436_v17 }
 0x536   : > { %6044 = vmatpush3.bf16.msra.mxu1 %v10088_v27  ;;  %2465 = vadd.xlane.f32.xlu1 %v8148_v30  ;;  %v2440_v19 = vpop.xlane.xlu0 %2439  ;;  %v6427_v40 = vpop.eup %6426  ;;  %v2508_v36 = vmul.f32 %v6425_v31, %v8053_v11 }
 0x537   : > { %v2438_v49 = vpop.xlane.xlu1 %2437  ;;  %6045 = vmatprep.subr.bf16.mxu1 %v10089_v20  ;;  %v2509_v47 = vmul.f32 %v6427_v40, %v8050_v16  ;;  %6068 = vmatpush3.bf16.msra.mxu0 %v6296_v32 }
 0x538   : > { %6440 = vrcp.f32 %v2438_v49  ;;  %v2535_v45 = vpack.c.bf16 %v2508_v36, %v2507_v23  ;;  %6069 = vmatprep.subr.bf16.mxu0 %v6297_v1 }
 0x539   : > { %v6429_v55 = vpop.eup %6428  ;;  %6442 = vrcp.f32 %v2440_v19 }
 0x53a   : > { %6046 = vmatpush3.bf16.msra.mxu1 %v10089_v20  ;;  %v2444_v48 = vpop.xlane.xlu0 %2443  ;;  %v2510_v52 = vmul.f32 %v6429_v55, %v8058_v2  ;;  %v6431_v43 = vpop.eup %6430  ;;  %6023 = vmatprep.mubr.bf16.mxu1 %v2535_v45 }
 0x53b   : > { %v2442_v28 = vpop.xlane.xlu1 %2441  ;;  %v2511_v53 = vmul.f32 %v6431_v43, %v8061_v9  ;;  %6070 = vmatpush3.bf16.msra.mxu0 %v6297_v1 }
 0x53c   : > { %6444 = vrcp.f32 %v2442_v28  ;;  %v2536_v15 = vpack.c.bf16 %v2510_v52, %v2509_v47  ;;  %6071 = vmatprep.subr.bf16.mxu0 %v6298_v56 }
 0x53d   : > { %v6433_v46 = vpop.eup %6432  ;;  %6446 = vrcp.f32 %v2444_v48 }
 0x53e   : > { %6024 = vmatmul.mubr.bf16.gmra.mxu1 %v2536_v15  ;;  %v2448_v61 = vpop.xlane.xlu0 %2447  ;;  %v2512_v25 = vmul.f32 %v6433_v46, %v8068_v7  ;;  %v6435_v54 = vpop.eup %6434 }
 0x53f   : > { %v2446_v11 = vpop.xlane.xlu1 %2445  ;;  %v2513_v60 = vmul.f32 %v6435_v54, %v8065_v6  ;;  %6072 = vmatpush3.bf16.msra.mxu0 %v6298_v56 }
 0x540   : > { %6448 = vrcp.f32 %v2446_v11  ;;  %v2537_v16 = vpack.c.bf16 %v2512_v25, %v2511_v53 }
 0x541   : > { %v6437_v59 = vpop.eup %6436  ;;  %6450 = vrcp.f32 %v2448_v61 }
 0x542   : > { %6027 = vmatprep.mubr.bf16.mxu1 %v2537_v16  ;;  %v2514_v21 = vmul.f32 %v6437_v59, %v8074_v44  ;;  %v6439_v37 = vpop.eup %6438 }
 0x543   : > { %v2450_v2 = vpop.xlane.xlu1 %2449  ;;  %v2515_v7 = vmul.f32 %v6439_v37, %v8072_v39 }
 0x544   : > { %6452 = vrcp.f32 %v2450_v2  ;;  %v2538_v12 = vpack.c.bf16 %v2514_v21, %v2513_v60 }
 0x545   : > { %v6441_v9 = vpop.eup %6440 }
 0x546   : > { %6028 = vmatmul.mubr.bf16.gmra.mxu1 %v2538_v12  ;;  %v2516_v24 = vmul.f32 %v6441_v9, %v8080_v34  ;;  %v6443_v4 = vpop.eup %6442 }
 0x547   : > { %v2517_v44 = vmul.f32 %v6443_v4, %v8078_v57 }
 0x548   : > { %v2539_v10 = vpack.c.bf16 %v2516_v24, %v2515_v7 }
 0x549   : > { %v6445_v6 = vpop.eup %6444 }
 0x54a   : > { %6047 = vmatprep.mubr.bf16.mxu1 %v2539_v10  ;;  %v2518_v41 = vmul.f32 %v6445_v6, %v8086_v63  ;;  %v6447_v51 = vpop.eup %6446 }
 0x54b   : > { %v2519_v39 = vmul.f32 %v6447_v51, %v8084_v0  ;;  %v6299_v0 = vld [vmem:[%s6946_s23 + $0x10] sm:$0xff]  }
 0x54c   : > { %v2540_v13 = vpack.c.bf16 %v2518_v41, %v2517_v44  ;;  %6073 = vmatprep.subr.bf16.mxu0 %v6299_v0 }
 0x54d   : > { %v6449_v18 = vpop.eup %6448  ;;  %6074 = vmatpush3.bf16.msra.mxu0 %v6299_v0 }
 0x54e   : > { %v6451_v22 = vpop.eup %6450  ;;  %6048 = vmatmul.mubr.bf16.vlgmr.msra.gmra.mxu1 %v2540_v13  ;;  %v2520_v34 = vmul.f32 %v6449_v18, %v8092_v50  ;;  %v6300_v50 = vld [vmem:[%s6946_s23 + $0x8] sm:$0xff]  }
 0x54f   : > { %v2521_v57 = vmul.f32 %v6451_v22, %v8090_v42  ;;  %6075 = vmatprep.subr.bf16.mxu0 %v6300_v50  ;;  %v6301_v42 = vld [vmem:[%s6946_s23] sm:$0xff]  }
 0x550   : > { %v2541_v17 = vpack.c.bf16 %v2520_v34, %v2519_v39 }
 0x551   : > { %v6453_v26 = vpop.eup %6452  ;;  %6076 = vmatpush3.bf16.msra.mxu0 %v6300_v50 }
 0x552   : > { %v2522_v63 = vmul.f32 %v6453_v26, %v8096_v14  ;;  %6051 = vmatprep.mubr.bf16.mxu1 %v2541_v17  ;;  %6077 = vmatprep.subr.bf16.mxu0 %v6301_v42 }
 0x554   : > { %v2542_v27 = vpack.c.bf16 %v2522_v63, %v2521_v57 }
 0x555   : > { %6078 = vmatpush3.bf16.msra.mxu0 %v6301_v42 }
 0x556   : > { %6052 = vmatmul.mubr.bf16.gmra.mxu1 %v2542_v27 }
 0x5a6   : > { %v2452_v14 = vpop.xlane.xlu0 %2451 }
 0x5a7   : > { %6454 = vrcp.f32 %v2452_v14 }
 0x5aa   : > { %v2456_v31 = vpop.xlane.xlu0 %2455 }
 0x5ab   : > { %v2454_v19 = vpop.xlane.xlu1 %2453 }
 0x5ac   : > { %6456 = vrcp.f32 %v2454_v19 }
 0x5ad   : > { %6458 = vrcp.f32 %v2456_v31 }
 0x5af   : > { %v2458_v49 = vpop.xlane.xlu1 %2457 }
 0x5b0   : > { %6460 = vrcp.f32 %v2458_v49 }
 0x5b4   : > { %v6455_v20 = vpop.eup %6454 }
 0x5b5   : > { %v2523_v36 = vmul.f32 %v6455_v20, %v8108_v8 }
 0x5b6   : > { %v2460_v40 = vpop.xlane.xlu0 %2459 }
 0x5b7   : > { %6462 = vrcp.f32 %v2460_v40 }
 0x5b9   : > { %v6457_v23 = vpop.eup %6456 }
 0x5ba   : > { %v2524_v55 = vmul.f32 %v6457_v23, %v8117_v33  ;;  %v6459_v45 = vpop.eup %6458  ;;  %v2464_v48 = vpop.xlane.xlu0 %2463 }
 0x5bb   : > { %v2462_v28 = vpop.xlane.xlu1 %2461  ;;  %v2525_v43 = vmul.f32 %v6459_v45, %v8115_v58 }
 0x5bc   : > { %6464 = vrcp.f32 %v2462_v28  ;;  %v2543_v47 = vpack.c.bf16 %v2524_v55, %v2523_v36 }
 0x5bd   : > { %v6461_v52 = vpop.eup %6460  ;;  %6466 = vrcp.f32 %v2464_v48 }
 0x5be   : > { %6055 = vmatprep.mubr.bf16.mxu1 %v2543_v47  ;;  %v2526_v15 = vmul.f32 %v6461_v52, %v8124_v29  ;;  %v10090_v29 = vmov 0  }
 0x5bf   : > { %v2466_v46 = vpop.xlane.xlu1 %2465 }
 0x5c0   : > { %6468 = vrcp.f32 %v2466_v46  ;;  %v2544_v61 = vpack.c.bf16 %v2526_v15, %v2525_v43  ;;  %v8192_v43 = vld [vmem:[%s10091_s22] ss:$0 sm:$0xff] }
 0x5c2   : > { %6056 = vmatmul.mubr.bf16.gmra.mxu1 %v2544_v61 }
 0x5c4   : > { %v6463_v11 = vpop.eup %6462 }
 0x5c5   : > { %v2527_v33 = vmul.f32 %v6463_v11, %v8135_v5 }
 0x5c9   : > { %v6465_v8 = vpop.eup %6464 }
 0x5ca   : > { %v2528_v53 = vmul.f32 %v6465_v8, %v8142_v62  ;;  %v6467_v25 = vpop.eup %6466  ;;  %v6726_v8 = vld [vmem:[#allocation2 + $0xb0] sm:$0xff] }
 0x5cb   : > { %v2529_v59 = vmul.f32 %v6467_v25, %v8140_v35 }
 0x5cc   : > { %v2545_v54 = vpack.c.bf16 %v2528_v53, %v2527_v33 }
 0x5cd   : > { %v6469_v16 = vpop.eup %6468 }
 0x5ce   : > { %6059 = vmatprep.mubr.bf16.mxu1 %v2545_v54  ;;  %v2530_v58 = vmul.f32 %v6469_v16, %v8148_v30  ;;  %v6727_v16 = vld [vmem:[#allocation2 + $0xd8] sm:$0xff] }
 0x5d0   : > { %v2546_v2 = vpack.c.bf16 %v2530_v58, %v2529_v59  ;;  %v6728_v58 = vld [vmem:[#allocation2] sm:$0xff] }
 0x5d2   : > { %6060 = vmatmul.mubr.bf16.gmra.mxu1 %v2546_v2 }
 0x5d3   : > { %3624 = vmatprep.mubr.bf16.mxu1 %v10090_v29 }
 0x5dd   : > { %v6017_v60 = vpop.f32.mrf.mxu1 }
 0x5df   : > { %v2597_v21 = vpop.f32.mrf.mxu1 }
 0x5e1   : > { %v6018_v3 = vpop.f32.mrf.mxu1 }
 0x5e2   : > { %v2758_v5 = vpack.c.bf16 %v6018_v3, %v6017_v60  ;;  %v6729_v60 = vld [vmem:[#allocation2 + $0x18] sm:$0xff] }
 0x5e3   : > { %v2600_v38 = vpop.f32.mrf.mxu1 }
 0x5e4   : > { %v2757_v37 = vpack.c.bf16 %v2600_v38, %v2597_v21 }
 0x5e6   : > { %6079 = vmatprep.mubr.bf16.mxu0 %v2757_v37 }
 0x5e7   : > { %6080 = vmatmul.mubr.bf16.vlgmr.msra.gmra.mxu0 %v2758_v5 }
 0x5ed   : > { %v6021_v62 = vpop.f32.mrf.mxu1 }
 0x5ef   : > { %v2613_v12 = vpop.f32.mrf.mxu1 }
 0x5f1   : > { %v6022_v9 = vpop.f32.mrf.mxu1 }
 0x5f2   : > { %v2760_v35 = vpack.c.bf16 %v6022_v9, %v6021_v62 }
 0x5f3   : > { %v2616_v7 = vpop.f32.mrf.mxu1 }
 0x5f4   : > { %v2759_v24 = vpack.c.bf16 %v2616_v7, %v2613_v12  ;;  %v6730_v12 = vld [vmem:[#allocation2 + $0x50] sm:$0xff] }
 0x5f6   : > { %6083 = vmatprep.mubr.bf16.mxu0 %v2759_v24 }
 0x5f7   : > { %6084 = vmatmul.mubr.bf16.gmra.mxu0 %v2760_v35 }
 0x5fe   : > { %v6025_v30 = vpop.f32.mrf.mxu1 }
 0x600   : > { %v2629_v4 = vpop.f32.mrf.mxu1 }
 0x602   : > { %v6026_v10 = vpop.f32.mrf.mxu1 }
 0x603   : > { %v2762_v41 = vpack.c.bf16 %v6026_v10, %v6025_v30  ;;  %v6731_v30 = vld [vmem:[#allocation2 + $0x30] sm:$0xff]  ;;  %v6732_v10 = vld [vmem:[#allocation2 + $0x68] sm:$0xff] }
 0x604   : > { %v2632_v6 = vpop.f32.mrf.mxu1 }
 0x605   : > { %v2761_v44 = vpack.c.bf16 %v2632_v6, %v2629_v4 }
 0x606   : > { %v6029_v51 = vpop.f32.mrf.mxu1 }
 0x607   : > { %6087 = vmatprep.mubr.bf16.mxu0 %v2761_v44  ;;  %v6733_v44 = vld [vmem:[#allocation2 + $0x48] sm:$0xff] }
 0x608   : > { %v2645_v13 = vpop.f32.mrf.mxu1  ;;  %6088 = vmatmul.mubr.bf16.gmra.mxu0 %v2762_v41 }
 0x60a   : > { %v6030_v18 = vpop.f32.mrf.mxu1 }
 0x60b   : > { %v2764_v34 = vpack.c.bf16 %v6030_v18, %v6029_v51 }
 0x60c   : > { %v2648_v22 = vpop.f32.mrf.mxu1 }
 0x60d   : > { %v2763_v39 = vpack.c.bf16 %v2648_v22, %v2645_v13 }
 0x60e   : > { %v6049_v32 = vpop.f32.mrf.mxu1 }
 0x60f   : > { %6091 = vmatprep.mubr.bf16.mxu0 %v2763_v39 }
 0x610   : > { %v2694_v26 = vpop.f32.mrf.mxu1  ;;  %6092 = vmatmul.mubr.bf16.gmra.mxu0 %v2764_v34  ;;  %v6734_v34 = vld [vmem:[#allocation2 + $0x80] sm:$0xff] }
 0x612   : > { %v6050_v17 = vpop.f32.mrf.mxu1 }
 0x613   : > { %v2766_v1 = vpack.c.bf16 %v6050_v17, %v6049_v32 }
 0x614   : > { %v2697_v57 = vpop.f32.mrf.mxu1 }
 0x615   : > { %v2765_v63 = vpack.c.bf16 %v2697_v57, %v2694_v26 }
 0x616   : > { %v6053_v56 = vpop.f32.mrf.mxu1 }
 0x617   : > { %6095 = vmatprep.mubr.bf16.mxu0 %v2765_v63 }
 0x618   : > { %v2710_v27 = vpop.f32.mrf.mxu1  ;;  %6096 = vmatmul.mubr.bf16.gmra.mxu0 %v2766_v1  ;;  %v6735_v1 = vld [vmem:[#allocation2 + $0x88] sm:$0xff] }
 0x61a   : > { %v6054_v0 = vpop.f32.mrf.mxu1 }
 0x61b   : > { %v2768_v14 = vpack.c.bf16 %v6054_v0, %v6053_v56 }
 0x61c   : > { %v2713_v50 = vpop.f32.mrf.mxu1 }
 0x61d   : > { %v2767_v42 = vpack.c.bf16 %v2713_v50, %v2710_v27  ;;  %v6736_v27 = vld [vmem:[#allocation2 + $0xe8] sm:$0xff] }
 0x61f   : > { %6099 = vmatprep.mubr.bf16.mxu0 %v2767_v42 }
 0x620   : > { %6100 = vmatmul.mubr.bf16.gmra.mxu0 %v2768_v14 }
 0x682   : > { %v6057_v31 = vpop.f32.mrf.mxu1 }
 0x684   : > { %v2726_v19 = vpop.f32.mrf.mxu1 }
 0x686   : > { %v6058_v49 = vpop.f32.mrf.mxu1 }
 0x687   : > { %v2770_v23 = vpack.c.bf16 %v6058_v49, %v6057_v31 }
 0x688   : > { %v2729_v40 = vpop.f32.mrf.mxu1 }
 0x689   : > { %v2769_v20 = vpack.c.bf16 %v2729_v40, %v2726_v19  ;;  %v6737_v19 = vld [vmem:[#allocation2 + $0xb8] sm:$0xff]  ;;  %v6738_v40 = vld [vmem:[#allocation2 + $0x60] sm:$0xff] }
 0x68b   : > { %6103 = vmatprep.mubr.bf16.mxu0 %v2769_v20 }
 0x68c   : > { %6104 = vmatmul.mubr.bf16.gmra.mxu0 %v2770_v23 }
 0x692   : > { %v6061_v36 = vpop.f32.mrf.mxu1 }
 0x694   : > { %v2742_v55 = vpop.f32.mrf.mxu1 }
 0x696   : > { %v6062_v45 = vpop.f32.mrf.mxu1 }
 0x697   : > { %v2772_v47 = vpack.c.bf16 %v6062_v45, %v6061_v36 }
 0x698   : > { %v2745_v48 = vpop.f32.mrf.mxu1 }
 0x699   : > { %v2771_v28 = vpack.c.bf16 %v2745_v48, %v2742_v55  ;;  %v6739_v48 = vld [vmem:[#allocation2 + $0xf0] sm:$0xff] }
 0x69b   : > { %6107 = vmatprep.mubr.bf16.mxu0 %v2771_v28 }
 0x69c   : > { %6108 = vmatmul.mubr.bf16.gmra.mxu0 %v2772_v47  ;;  %v6740_v47 = vld [vmem:[#allocation2 + $0x8] sm:$0xff] }
 0x6a7   : > { %v6081_v52 = vpop.f32.mrf.mxu0 }
 0x6a8   : > { %v2887_v11 = vadd.f32 %v6081_v52, %v8192_v43 }
 0x6a9   : > { %v2878_v15 = vpop.f32.mrf.mxu0 }
 0x6aa   : > { %v2879_v46 = vadd.f32 %v8192_v43, %v2878_v15  ;;  %v8201_v59 = vadd.f32 %v6727_v16, %v2887_v11 }
 0x6ab   : > { %v6082_v61 = vpop.f32.mrf.mxu0 }
 0x6ac   : > { %v8196_v33 = vadd.f32 %v6726_v8, %v2879_v46  ;;  %v2890_v54 = vadd.f32 %v6082_v61, %v8192_v43  ;;  %v6741_v8 = vld [vmem:[#allocation2 + $0x78] sm:$0xff] }
 0x6ad   : > { %v2881_v53 = vpop.f32.mrf.mxu0 }
 0x6ae   : > { %v2882_v25 = vadd.f32 %v8192_v43, %v2881_v53  ;;  %3039 = vadd.xlane.f32.xlu0 %v8196_v33  ;;  %v8207_v21 = vadd.f32 %v6729_v60, %v2890_v54 }
 0x6b0   : > { %v8203_v2 = vadd.f32 %v6728_v58, %v2882_v25  ;;  %v6742_v25 = vld [vmem:[#allocation2 + $0x38] sm:$0xff] }
 0x6b2   : > { %3043 = vadd.xlane.f32.xlu0 %v8201_v59  ;;  %3041 = vadd.xlane.f32.xlu1 %v8203_v2 }
 0x6b6   : > { %3045 = vadd.xlane.f32.xlu1 %v8207_v21 }
 0x6b7   : > { %v6085_v3 = vpop.f32.mrf.mxu0 }
 0x6b8   : > { %v2903_v62 = vadd.f32 %v6085_v3, %v8192_v43  ;;  %v6743_v3 = vld [vmem:[#allocation2 + $0x58] sm:$0xff] }
 0x6b9   : > { %v2894_v38 = vpop.f32.mrf.mxu0 }
 0x6ba   : > { %v2895_v37 = vadd.f32 %v8192_v43, %v2894_v38  ;;  %v8217_v4 = vadd.f32 %v6731_v30, %v2903_v62  ;;  %v6745_v62 = vld [vmem:[#allocation2 + $0xc8] sm:$0xff] }
 0x6bb   : > { %v6086_v5 = vpop.f32.mrf.mxu0 }
 0x6bc   : > { %v8212_v9 = vadd.f32 %v6730_v12, %v2895_v37  ;;  %v2906_v35 = vadd.f32 %v6086_v5, %v8192_v43  ;;  %v6744_v37 = vld [vmem:[#allocation2 + $0x40] sm:$0xff] }
 0x6bd   : > { %v2897_v7 = vpop.f32.mrf.mxu0 }
 0x6be   : > { %v2898_v24 = vadd.f32 %v8192_v43, %v2897_v7  ;;  %3047 = vadd.xlane.f32.xlu0 %v8212_v9  ;;  %v8223_v41 = vadd.f32 %v6733_v44, %v2906_v35  ;;  %v6302_v7 = vld [vmem:[%s6974_s4 + $0x70] ss:$8 sps:$4 sm:$0xff]  }
 0x6c0   : > { %v8219_v6 = vadd.f32 %v6732_v10, %v2898_v24  ;;  %v6304_v24 = vld [vmem:[%s6974_s4 + $0x74] ss:$8 sps:$4 sm:$0xff]  }
 0x6c1   : > { %3592 = vmatprep.subr.bf16.mxu1 %v6304_v24 }
 0x6c2   : > { %3051 = vadd.xlane.f32.xlu0 %v8217_v4  ;;  %3049 = vadd.xlane.f32.xlu1 %v8219_v6 }
 0x6c3   : > { %3593 = vmatpush1.bf16.msra.mxu1 %v6302_v7  ;;  %v6310_v7 = vld [vmem:[%s6974_s4 + $0x54] ss:$8 sps:$4 sm:$0xff]  }
 0x6c6   : > { %3053 = vadd.xlane.f32.xlu1 %v8223_v41 }
 0x6c8   : > { %v6089_v51 = vpop.f32.mrf.mxu0 }
 0x6c9   : > { %v2919_v39 = vadd.f32 %v6089_v51, %v8192_v43 }
 0x6ca   : > { %v2910_v13 = vpop.f32.mrf.mxu0 }
 0x6cb   : > { %v2911_v18 = vadd.f32 %v8192_v43, %v2910_v13  ;;  %v8235_v0 = vadd.f32 %v6736_v27, %v2919_v39  ;;  %v6746_v27 = vld [vmem:[#allocation2 + $0xe0] sm:$0xff] }
 0x6cc   : > { %v6090_v22 = vpop.f32.mrf.mxu0 }
 0x6cd   : > { %v8228_v32 = vadd.f32 %v6734_v34, %v2911_v18  ;;  %v2922_v63 = vadd.f32 %v6090_v22, %v8192_v43 }
 0x6ce   : > { %v2913_v26 = vpop.f32.mrf.mxu0 }
 0x6cf   : > { %v2914_v17 = vadd.f32 %v8192_v43, %v2913_v26  ;;  %3055 = vadd.xlane.f32.xlu0 %v8228_v32  ;;  %v8241_v49 = vadd.f32 %v6737_v19, %v2922_v63 }
 0x6d0   : > { %v6093_v57 = vpop.f32.mrf.mxu0 }
 0x6d1   : > { %v8233_v56 = vadd.f32 %v6735_v1, %v2914_v17  ;;  %v2935_v31 = vadd.f32 %v6093_v57, %v8192_v43 }
 0x6d2   : > { %v2926_v50 = vpop.f32.mrf.mxu0 }
 0x6d3   : > { %v2927_v42 = vadd.f32 %v8192_v43, %v2926_v50  ;;  %3057 = vadd.xlane.f32.xlu1 %v8233_v56  ;;  %3059 = vadd.xlane.f32.xlu0 %v8235_v0  ;;  %v8251_v52 = vadd.f32 %v6740_v47, %v2935_v31 }
 0x6d4   : > { %v6094_v14 = vpop.f32.mrf.mxu0 }
 0x6d5   : > { %v8243_v20 = vadd.f32 %v6738_v40, %v2927_v42  ;;  %v2938_v45 = vadd.f32 %v6094_v14, %v8192_v43  ;;  %v6747_v40 = vld [vmem:[#allocation2 + $0x90] sm:$0xff] }
 0x6d6   : > { %v2929_v23 = vpop.f32.mrf.mxu0 }
 0x6d7   : > { %v2930_v36 = vadd.f32 %v8192_v43, %v2929_v23  ;;  %3061 = vadd.xlane.f32.xlu1 %v8241_v49  ;;  %3063 = vadd.xlane.f32.xlu0 %v8243_v20  ;;  %v8257_v53 = vadd.f32 %v6741_v8, %v2938_v45  ;;  %v6305_v8 = vld [vmem:[%s6974_s4 + $0x60] ss:$8 sps:$4 sm:$0xff]  }
 0x6d8   : > { %v6097_v55 = vpop.f32.mrf.mxu0 }
 0x6d9   : > { %v8249_v28 = vadd.f32 %v6739_v48, %v2930_v36  ;;  %v2951_v11 = vadd.f32 %v6097_v55, %v8192_v43  ;;  %v6748_v48 = vld [vmem:[#allocation2 + $0x70] sm:$0xff] }
 0x6da   : > { %v2942_v15 = vpop.f32.mrf.mxu0 }
 0x6db   : > { %v2943_v46 = vadd.f32 %v8192_v43, %v2942_v15  ;;  %3065 = vadd.xlane.f32.xlu1 %v8249_v28  ;;  %3067 = vadd.xlane.f32.xlu0 %v8251_v52  ;;  %v8267_v5 = vadd.f32 %v6744_v37, %v2951_v11 }
 0x6dc   : > { %v6098_v61 = vpop.f32.mrf.mxu0 }
 0x6dd   : > { %v8259_v54 = vadd.f32 %v6742_v25, %v2943_v46  ;;  %v2954_v60 = vadd.f32 %v6098_v61, %v8192_v43 }
 0x6de   : > { %v2945_v16 = vpop.f32.mrf.mxu0 }
 0x6df   : > { %v2946_v58 = vadd.f32 %v8192_v43, %v2945_v16  ;;  %3069 = vadd.xlane.f32.xlu1 %v8257_v53  ;;  %3071 = vadd.xlane.f32.xlu0 %v8259_v54  ;;  %v8271_v12 = vadd.f32 %v6745_v62, %v2954_v60  ;;  %v6749_v60 = vld [vmem:[#allocation2 + $0xc0] sm:$0xff] }
 0x6e0   : > { %v6101_v35 = vpop.f32.mrf.mxu0 }
 0x6e1   : > { %v8265_v38 = vadd.f32 %v6743_v3, %v2946_v58  ;;  %v2967_v19 = vadd.f32 %v6101_v35, %v8192_v43 }
 0x6e2   : > { %v2958_v30 = vpop.f32.mrf.mxu0 }
 0x6e3   : > { %3073 = vadd.xlane.f32.xlu1 %v8265_v38  ;;  %3075 = vadd.xlane.f32.xlu0 %v8267_v5  ;;  %v2959_v18 = vadd.f32 %v8192_v43, %v2958_v30  ;;  %v8304_v47 = vadd.f32 %v6748_v48, %v2967_v19  ;;  %v6308_v30 = vld [vmem:[%s6974_s4 + $0x50] ss:$8 sps:$4 sm:$0xff]  }
 0x6e4   : > { %v6102_v51 = vpop.f32.mrf.mxu0 }
 0x6e5   : > { %v8285_v50 = vadd.f32 %v6746_v27, %v2959_v18  ;;  %v2970_v55 = vadd.f32 %v6102_v51, %v8192_v43  ;;  %v6750_v18 = vld [vmem:[#allocation2 + $0xa8] sm:$0xff]  ;;  %v6751_v27 = vld [vmem:[#allocation2 + $0xd0] sm:$0xff] }
 0x6e6   : > { %v2961_v57 = vpop.f32.mrf.mxu0 }
 0x6e7   : > { %3077 = vadd.xlane.f32.xlu1 %v8271_v12  ;;  %v8316_v3 = vadd.f32 %v6749_v60, %v2970_v55 }
 0x737   : > { %v3040_v10 = vpop.xlane.xlu0 %3039 }
 0x738   : > { %v3104_v44 = vmul.f32 0.0078125, %v3040_v10 }
 0x73a   : > { %v8277_v13 = vsub.f32 %v8196_v33, %v3104_v44  ;;  %v2962_v33 = vadd.f32 %v8192_v43, %v2961_v57 }
 0x73b   : > { %v3044_v22 = vpop.xlane.xlu0 %3043  ;;  %v3042_v39 = vpop.xlane.xlu1 %3041 }
 0x73c   : > { %v3106_v34 = vmul.f32 0.0078125, %v3044_v22  ;;  %v3105_v26 = vmul.f32 0.0078125, %v3042_v39  ;;  %v3168_v17 = vmul.f32 %v8277_v13, %v8277_v13  ;;  %v8297_v23 = vadd.f32 %v6747_v40, %v2962_v33 }
 0x73e   : > { %3200 = vadd.xlane.f32.xlu0 %v3168_v17  ;;  %v8283_v63 = vsub.f32 %v8203_v2, %v3105_v26  ;;  %v8291_v31 = vsub.f32 %v8201_v59, %v3106_v34  ;;  %v6313_v34 = vld [vmem:[%s6974_s4 + $0x44] ss:$8 sps:$4 sm:$0xff]   ;;  %v6311_v17 = vld [vmem:[%s6974_s4 + $0x40] ss:$8 sps:$4 sm:$0xff]  }
 0x73f   : > { %v3046_v1 = vpop.xlane.xlu1 %3045 }
 0x740   : > { %v3107_v42 = vmul.f32 0.0078125, %v3046_v1  ;;  %v3169_v14 = vmul.f32 %v8283_v63, %v8283_v63  ;;  %v3170_v2 = vmul.f32 %v8291_v31, %v8291_v31 }
 0x742   : > { %3079 = vadd.xlane.f32.xlu0 %v8285_v50  ;;  %3202 = vadd.xlane.f32.xlu1 %v3169_v14  ;;  %v8300_v36 = vsub.f32 %v8207_v21, %v3107_v42  ;;  %v6307_v21 = vld [vmem:[%s6974_s4 + $0x64] ss:$8 sps:$4 sm:$0xff]   ;;  %v6316_v42 = vld [vmem:[%s6974_s4 + $0x34] ss:$8 sps:$4 sm:$0xff]   ;;  %v6314_v14 = vld [vmem:[%s6974_s4 + $0x30] ss:$8 sps:$4 sm:$0xff]  }
 0x743   : > { %3594 = vmatprep.subr.bf16.mxu1 %v6307_v21 }
 0x744   : > { %v3171_v15 = vmul.f32 %v8300_v36, %v8300_v36  ;;  %3595 = vmatpush1.bf16.msra.mxu1 %v6305_v8 }
 0x745   : > { %3596 = vmatprep.subr.bf16.mxu1 %v6310_v7  ;;  %v6320_v7 = vld [vmem:[%s6974_s4 + $0x10] ss:$8 sps:$4 sm:$0xff]  }
 0x746   : > { %3204 = vadd.xlane.f32.xlu0 %v3170_v2  ;;  %3081 = vadd.xlane.f32.xlu1 %v8297_v23  ;;  %v6752_v2 = vld [vmem:[#allocation2 + $0x10] sm:$0xff] }
 0x747   : > { %v3048_v59 = vpop.xlane.xlu0 %3047 }
 0x748   : > { %v3108_v45 = vmul.f32 0.0078125, %v3048_v59  ;;  %3597 = vmatpush1.bf16.msra.mxu1 %v6308_v30 }
 0x749   : > { %3598 = vmatprep.subr.bf16.mxu1 %v6313_v34 }
 0x74a   : > { %3083 = vadd.xlane.f32.xlu0 %v8304_v47  ;;  %3206 = vadd.xlane.f32.xlu1 %v3171_v15  ;;  %v8310_v46 = vsub.f32 %v8212_v9, %v3108_v45  ;;  %v6317_v15 = vld [vmem:[%s6974_s4 + $0x20] ss:$8 sps:$4 sm:$0xff]  }
 0x74b   : > { %v3052_v61 = vpop.xlane.xlu0 %3051  ;;  %v3050_v11 = vpop.xlane.xlu1 %3049 }
 0x74c   : > { %v6105_v25 = vpop.f32.mrf.mxu0  ;;  %v3109_v16 = vmul.f32 0.0078125, %v3050_v11  ;;  %v3172_v58 = vmul.f32 %v8310_v46, %v8310_v46  ;;  %v3110_v37 = vmul.f32 0.0078125, %v3052_v61  ;;  %3599 = vmatpush1.bf16.msra.mxu1 %v6311_v17  ;;  %v6753_v11 = vld [vmem:[#allocation2 + $0x28] sm:$0xff] }
 0x74d   : > { %v2983_v57 = vadd.f32 %v6105_v25, %v8192_v43  ;;  %3600 = vmatprep.subr.bf16.mxu1 %v6316_v42  ;;  %v6325_v17 = vld [vmem:[%s6974_s4 + $0x4] ss:$8 sps:$4 sm:$0xff]   ;;  %v6755_v42 = vld [vmem:[#allocation2 + $0xf8] sm:$0xff] }
 0x74e   : > { %v2974_v62 = vpop.f32.mrf.mxu0  ;;  %3208 = vadd.xlane.f32.xlu0 %v3172_v58  ;;  %3085 = vadd.xlane.f32.xlu1 %v8316_v3  ;;  %v8320_v9 = vsub.f32 %v8219_v6, %v3109_v16  ;;  %v8330_v39 = vsub.f32 %v8217_v4, %v3110_v37  ;;  %v6322_v37 = vld [vmem:[%s6974_s4 + $0x14] ss:$8 sps:$4 sm:$0xff]  }
 0x74f   : > { %v2975_v24 = vadd.f32 %v8192_v43, %v2974_v62  ;;  %v3054_v35 = vpop.xlane.xlu1 %3053  ;;  %v8347_v40 = vadd.f32 %v6752_v2, %v2983_v57  ;;  %v6323_v57 = vld [vmem:[%s6974_s4] ss:$8 sps:$4 sm:$0xff]  }
 0x750   : > { %v6106_v10 = vpop.f32.mrf.mxu0  ;;  %v3173_v44 = vmul.f32 %v8320_v9, %v8320_v9  ;;  %v3111_v51 = vmul.f32 0.0078125, %v3054_v35  ;;  %v3174_v1 = vmul.f32 %v8330_v39, %v8330_v39  ;;  %3601 = vmatpush1.bf16.msra.mxu1 %v6314_v14 }
 0x751   : > { %v8327_v22 = vadd.f32 %v6750_v18, %v2975_v24  ;;  %v2986_v59 = vadd.f32 %v6106_v10, %v8192_v43 }
 0x752   : > { %v2977_v6 = vpop.f32.mrf.mxu0  ;;  %3210 = vadd.xlane.f32.xlu1 %v3173_v44  ;;  %v8342_v33 = vsub.f32 %v8223_v41, %v3111_v51  ;;  %v6319_v41 = vld [vmem:[%s6974_s4 + $0x24] ss:$8 sps:$4 sm:$0xff]  }
 0x753   : > { %v2978_v26 = vadd.f32 %v8192_v43, %v2977_v6  ;;  %3087 = vadd.xlane.f32.xlu0 %v8327_v22  ;;  %3602 = vmatprep.subr.bf16.mxu1 %v6319_v41  ;;  %v8358_v8 = vadd.f32 %v6753_v11, %v2986_v59  ;;  %v6754_v44 = vld [vmem:[#allocation2 + $0xa0] sm:$0xff] }
 0x754   : > { %v3175_v45 = vmul.f32 %v8342_v33, %v8342_v33  ;;  %3603 = vmatpush1.bf16.msra.mxu1 %v6317_v15 }
 0x755   : > { %v8339_v4 = vadd.f32 %v6751_v27, %v2978_v26  ;;  %3604 = vmatprep.subr.bf16.mxu1 %v6322_v37 }
 0x757   : > { %3212 = vadd.xlane.f32.xlu0 %v3174_v1  ;;  %3089 = vadd.xlane.f32.xlu1 %v8339_v4 }
 0x758   : > { %v3056_v19 = vpop.xlane.xlu0 %3055  ;;  %3605 = vmatpush1.bf16.msra.mxu1 %v6320_v7 }
 0x759   : > { %v3112_v55 = vmul.f32 0.0078125, %v3056_v19  ;;  %3606 = vmatprep.subr.bf16.mxu1 %v6325_v17 }
 0x75b   : > { %v8354_v48 = vsub.f32 %v8228_v32, %v3112_v55  ;;  %3091 = vadd.xlane.f32.xlu0 %v8347_v40  ;;  %3214 = vadd.xlane.f32.xlu1 %v3175_v45  ;;  %v6756_v45 = vld [vmem:[#allocation2 + $0x20] sm:$0xff] }
 0x75c   : > { %v3060_v21 = vpop.xlane.xlu0 %3059  ;;  %v6109_v61 = vpop.f32.mrf.mxu0  ;;  %3607 = vmatpush1.bf16.msra.mxu1 %v6323_v57 }
 0x75d   : > { %v3114_v25 = vmul.f32 0.0078125, %v3060_v21  ;;  %v3058_v16 = vpop.xlane.xlu1 %3057  ;;  %v3176_v58 = vmul.f32 %v8354_v48, %v8354_v48 }
 0x75e   : > { %v3113_v60 = vmul.f32 0.0078125, %v3058_v16  ;;  %v2990_v32 = vpop.f32.mrf.mxu0 }
 0x75f   : > { %v2991_v62 = vadd.f32 %v8192_v43, %v2990_v32  ;;  %3216 = vadd.xlane.f32.xlu0 %v3176_v58  ;;  %3093 = vadd.xlane.f32.xlu1 %v8358_v8  ;;  %v8370_v10 = vsub.f32 %v8235_v0, %v3114_v25  ;;  %v2999_v0 = vadd.f32 %v6109_v61, %v8192_v43  ;;  %v6757_v32 = vld [vmem:[#allocation2 + $0x98] sm:$0xff] }
 0x760   : > { %v8367_v24 = vsub.f32 %v8233_v56, %v3113_v60  ;;  %v3064_v35 = vpop.xlane.xlu0 %3063  ;;  %v6110_v30 = vpop.f32.mrf.mxu0 }
 0x761   : > { %v8372_v51 = vadd.f32 %v6754_v44, %v2991_v62  ;;  %v3062_v18 = vpop.xlane.xlu1 %3061  ;;  %v3116_v27 = vmul.f32 0.0078125, %v3064_v35  ;;  %v3178_v2 = vmul.f32 %v8370_v10, %v8370_v10  ;;  %v8389_v41 = vadd.f32 %v6756_v45, %v2999_v0 }
 0x762   : > { %v3115_v6 = vmul.f32 0.0078125, %v3062_v18  ;;  %v2993_v34 = vpop.f32.mrf.mxu0  ;;  %v3177_v26 = vmul.f32 %v8367_v24, %v8367_v24  ;;  %v3002_v11 = vadd.f32 %v6110_v30, %v8192_v43 }
 0x763   : > { %v2994_v56 = vadd.f32 %v8192_v43, %v2993_v34  ;;  %3095 = vadd.xlane.f32.xlu0 %v8372_v51  ;;  %v8392_v15 = vsub.f32 %v8243_v20, %v3116_v27 }
 0x764   : > { %3218 = vadd.xlane.f32.xlu1 %v3177_v26  ;;  %v3068_v1 = vpop.xlane.xlu0 %3067  ;;  %v8386_v59 = vsub.f32 %v8241_v49, %v3115_v6  ;;  %v8403_v37 = vadd.f32 %v6757_v32, %v3002_v11 }
 0x765   : > { %v8381_v14 = vadd.f32 %v6755_v42, %v2994_v56  ;;  %v3066_v19 = vpop.xlane.xlu1 %3065  ;;  %v3118_v21 = vmul.f32 0.0078125, %v3068_v1  ;;  %v3180_v20 = vmul.f32 %v8392_v15, %v8392_v15 }
 0x766   : > { %v3117_v25 = vmul.f32 0.0078125, %v3066_v19  ;;  %v3179_v16 = vmul.f32 %v8386_v59, %v8386_v59 }
 0x767   : > { %3220 = vadd.xlane.f32.xlu0 %v3178_v2  ;;  %v8399_v49 = vsub.f32 %v8251_v52, %v3118_v21 }
 0x768   : > { %3097 = vadd.xlane.f32.xlu1 %v8381_v14  ;;  %v3072_v55 = vpop.xlane.xlu0 %3071  ;;  %v8406_v43 = vsub.f32 %v8249_v28, %v3117_v25 }
 0x769   : > { %v3070_v61 = vpop.xlane.xlu1 %3069  ;;  %v3120_v58 = vmul.f32 0.0078125, %v3072_v55  ;;  %v3182_v30 = vmul.f32 %v8399_v49, %v8399_v49 }
 0x76a   : > { %v3119_v62 = vmul.f32 0.0078125, %v3070_v61  ;;  %v3181_v28 = vmul.f32 %v8406_v43, %v8406_v43 }
 0x76b   : > { %3099 = vadd.xlane.f32.xlu0 %v8389_v41  ;;  %v8410_v35 = vsub.f32 %v8259_v54, %v3120_v58 }
 0x76c   : > { %3222 = vadd.xlane.f32.xlu1 %v3179_v16  ;;  %v3076_v7 = vpop.xlane.xlu0 %3075  ;;  %v8415_v44 = vsub.f32 %v8257_v53, %v3119_v62 }
 0x76d   : > { %v3074_v60 = vpop.xlane.xlu1 %3073  ;;  %v3122_v52 = vmul.f32 0.0078125, %v3076_v7  ;;  %v3184_v54 = vmul.f32 %v8410_v35, %v8410_v35 }
 0x76e   : > { %v3121_v18 = vmul.f32 0.0078125, %v3074_v60  ;;  %v3183_v53 = vmul.f32 %v8415_v44, %v8415_v44 }
 0x76f   : > { %3224 = vadd.xlane.f32.xlu0 %v3180_v20  ;;  %v8420_v34 = vsub.f32 %v8267_v5, %v3122_v52 }
 0x770   : > { %3101 = vadd.xlane.f32.xlu1 %v8403_v37  ;;  %v8425_v26 = vsub.f32 %v8265_v38, %v3121_v18 }
 0x771   : > { %v3078_v6 = vpop.xlane.xlu1 %3077  ;;  %v3186_v56 = vmul.f32 %v8420_v34, %v8420_v34 }
 0x772   : > { %v3123_v17 = vmul.f32 0.0078125, %v3078_v6  ;;  %v3185_v5 = vmul.f32 %v8425_v26, %v8425_v26 }
 0x773   : > { %3228 = vadd.xlane.f32.xlu0 %v3182_v30 }
 0x774   : > { %3226 = vadd.xlane.f32.xlu1 %v3181_v28  ;;  %v8432_v57 = vsub.f32 %v8271_v12, %v3123_v17 }
 0x776   : > { %v3187_v38 = vmul.f32 %v8432_v57, %v8432_v57 }
 0x777   : > { %3232 = vadd.xlane.f32.xlu0 %v3184_v54 }
 0x778   : > { %3230 = vadd.xlane.f32.xlu1 %v3183_v53 }
 0x77b   : > { %3236 = vadd.xlane.f32.xlu0 %v3186_v56 }
 0x77c   : > { %3234 = vadd.xlane.f32.xlu1 %v3185_v5 }
 0x780   : > { %3238 = vadd.xlane.f32.xlu1 %v3187_v38  ;;  %v8462_v38 = vld [vmem:[%s10092_s25] ss:$0 sm:$0xff] }
 0x7c7   : > { %v3201_v1 = vpop.xlane.xlu0 %3200 }
 0x7c8   : > { %v3264_v0 = vmul.f32 0.0078125, %v3201_v1 }
 0x7ca   : > { %v3296_v27 = vadd.f32 1e-12, %v3264_v0 }
 0x7cb   : > { %v3080_v42 = vpop.xlane.xlu0 %3079  ;;  %v3203_v19 = vpop.xlane.xlu1 %3202 }
 0x7cc   : > { %6470 = vrsqrt.f32 %v3296_v27  ;;  %v3124_v2 = vmul.f32 0.0078125, %v3080_v42  ;;  %v3265_v55 = vmul.f32 0.0078125, %v3203_v19 }
 0x7ce   : > { %v8439_v12 = vsub.f32 %v8285_v50, %v3124_v2  ;;  %v3297_v45 = vadd.f32 1e-12, %v3265_v55 }
 0x7cf   : > { %v3205_v21 = vpop.xlane.xlu0 %3204  ;;  %v3082_v61 = vpop.xlane.xlu1 %3081 }
 0x7d0   : > { %6472 = vrsqrt.f32 %v3297_v45  ;;  %v3266_v11 = vmul.f32 0.0078125, %v3205_v21  ;;  %v3125_v25 = vmul.f32 0.0078125, %v3082_v61  ;;  %v3188_v16 = vmul.f32 %v8439_v12, %v8439_v12  ;;  %v8476_v45 = vld [vmem:[%s10093_s24] ss:$0 sm:$0xff] }
 0x7d2   : > { %v3298_v58 = vadd.f32 1e-12, %v3266_v11  ;;  %v8444_v60 = vsub.f32 %v8297_v23, %v3125_v25  ;;  %3240 = vadd.xlane.f32.xlu0 %v3188_v16 }
 0x7d3   : > { %v3084_v20 = vpop.xlane.xlu0 %3083  ;;  %v3207_v32 = vpop.xlane.xlu1 %3206 }
 0x7d4   : > { %6474 = vrsqrt.f32 %v3298_v58  ;;  %v3126_v62 = vmul.f32 0.0078125, %v3084_v20  ;;  %v3267_v50 = vmul.f32 0.0078125, %v3207_v32  ;;  %v3189_v7 = vmul.f32 %v8444_v60, %v8444_v60 }
 0x7d6   : > { %v8449_v52 = vsub.f32 %v8304_v47, %v3126_v62  ;;  %v3299_v30 = vadd.f32 1e-12, %v3267_v50  ;;  %3242 = vadd.xlane.f32.xlu1 %v3189_v7 }
 0x7d7   : > { %v3209_v18 = vpop.xlane.xlu0 %3208  ;;  %v3086_v28 = vpop.xlane.xlu1 %3085 }
 0x7d8   : > { %6476 = vrsqrt.f32 %v3299_v30  ;;  %v3268_v23 = vmul.f32 0.0078125, %v3209_v18  ;;  %v3127_v6 = vmul.f32 0.0078125, %v3086_v28  ;;  %v3190_v54 = vmul.f32 %v8449_v52, %v8449_v52 }
 0x7d9   : > { %v6471_v17 = vpop.eup %6470 }
 0x7da   : > { %v3360_v53 = vmul.f32 %v6471_v17, %v8277_v13  ;;  %v3300_v56 = vadd.f32 1e-12, %v3268_v23  ;;  %v8455_v5 = vsub.f32 %v8316_v3, %v3127_v6  ;;  %3244 = vadd.xlane.f32.xlu0 %v3190_v54 }
 0x7db   : > { %v3211_v47 = vpop.xlane.xlu1 %3210 }
 0x7dc   : > { %6478 = vrsqrt.f32 %v3300_v56  ;;  %v3088_v1 = vpop.xlane.xlu0 %3087  ;;  %v3269_v0 = vmul.f32 0.0078125, %v3211_v47  ;;  %v3191_v27 = vmul.f32 %v8455_v5, %v8455_v5  ;;  %v3398_v2 = vmul.f32 %v8462_v38, %v3360_v53 }
 0x7dd   : > { %v6473_v13 = vpop.eup %6472  ;;  %v3128_v42 = vmul.f32 0.0078125, %v3088_v1 }
 0x7de   : > { %v3361_v19 = vmul.f32 %v6473_v13, %v8283_v63  ;;  %v3301_v3 = vadd.f32 1e-12, %v3269_v0  ;;  %3246 = vadd.xlane.f32.xlu1 %v3191_v27 }
 0x7df   : > { %v8469_v55 = vsub.f32 %v8327_v22, %v3128_v42  ;;  %v8482_v22 = vadd.f32 %v8476_v45, %v3398_v2 }
 0x7e0   : > { %6480 = vrsqrt.f32 %v3301_v3  ;;  %v3213_v21 = vpop.xlane.xlu0 %3212  ;;  %v3090_v61 = vpop.xlane.xlu1 %3089  ;;  %v3399_v11 = vmul.f32 %v8462_v38, %v3361_v19 }
 0x7e1   : > { %v6475_v25 = vpop.eup %6474  ;;  %v3270_v63 = vmul.f32 0.0078125, %v3213_v21  ;;  %v3129_v16 = vmul.f32 0.0078125, %v3090_v61  ;;  %v3192_v58 = vmul.f32 %v8469_v55, %v8469_v55 }
 0x7e2   : > { %v8485_v20 = vadd.f32 %v8476_v45, %v3399_v11  ;;  %v3362_v32 = vmul.f32 %v6475_v25, %v8291_v31 }
 0x7e3   : > { %v3302_v62 = vadd.f32 1e-12, %v3270_v63  ;;  %v8489_v50 = vsub.f32 %v8339_v4, %v3129_v16  ;;  %3248 = vadd.xlane.f32.xlu0 %v3192_v58 }
 0x7e4   : > { %v3092_v7 = vpop.xlane.xlu0 %3091  ;;  %v3215_v30 = vpop.xlane.xlu1 %3214  ;;  %v3468_v18 = vpack.c.bf16 %v8485_v20, %v8482_v22  ;;  %v3400_v17 = vmul.f32 %v8462_v38, %v3362_v32 }
 0x7e5   : > { %v6477_v28 = vpop.eup %6476  ;;  %6482 = vrsqrt.f32 %v3302_v62  ;;  %v3130_v23 = vmul.f32 0.0078125, %v3092_v7  ;;  %v3271_v6 = vmul.f32 0.0078125, %v3215_v30  ;;  %v3193_v54 = vmul.f32 %v8489_v50, %v8489_v50 }
 0x7e6   : > { %3625 = vmatmul.mubr.bf16.vlgmr.msra.gmra.mxu1 %v3468_v18  ;;  %v3363_v31 = vmul.f32 %v6477_v28, %v8300_v36  ;;  %v8505_v42 = vadd.f32 %v8476_v45, %v3400_v17 }
 0x7e7   : > { %v8498_v4 = vsub.f32 %v8347_v40, %v3130_v23  ;;  %v3303_v53 = vadd.f32 1e-12, %v3271_v6  ;;  %3250 = vadd.xlane.f32.xlu1 %v3193_v54  ;;  %3634 = vmatprep.mubr.bf16.mxu1 %v10090_v29 }
 0x7e8   : > { %v3217_v56 = vpop.xlane.xlu0 %3216  ;;  %v3094_v47 = vpop.xlane.xlu1 %3093  ;;  %v3401_v1 = vmul.f32 %v8462_v38, %v3363_v31 }
 0x7e9   : > { %v6479_v0 = vpop.eup %6478  ;;  %6484 = vrsqrt.f32 %v3303_v53  ;;  %v3272_v27 = vmul.f32 0.0078125, %v3217_v56  ;;  %v3131_v13 = vmul.f32 0.0078125, %v3094_v47  ;;  %v3194_v36 = vmul.f32 %v8498_v4, %v8498_v4 }
 0x7ea   : > { %v8508_v40 = vadd.f32 %v8476_v45, %v3401_v1  ;;  %v3364_v19 = vmul.f32 %v6479_v0, %v8310_v46 }
 0x7eb   : > { %v3304_v3 = vadd.f32 1e-12, %v3272_v27  ;;  %v8512_v2 = vsub.f32 %v8358_v8, %v3131_v13  ;;  %3252 = vadd.xlane.f32.xlu0 %v3194_v36 }
 0x7ec   : > { %v3096_v21 = vpop.xlane.xlu0 %3095  ;;  %v3469_v61 = vpack.c.bf16 %v8508_v40, %v8505_v42  ;;  %v3402_v32 = vmul.f32 %v8462_v38, %v3364_v19 }
 0x7ed   : > { %v6481_v11 = vpop.eup %6480  ;;  %6486 = vrsqrt.f32 %v3304_v3  ;;  %v3132_v25 = vmul.f32 0.0078125, %v3096_v21  ;;  %v3219_v63 = vpop.xlane.xlu1 %3218  ;;  %v3195_v16 = vmul.f32 %v8512_v2, %v8512_v2 }
 0x7ee   : > { %v3273_v58 = vmul.f32 0.0078125, %v3219_v63  ;;  %3635 = vmatmul.mubr.bf16.gmra.mxu1 %v3469_v61  ;;  %v3365_v46 = vmul.f32 %v6481_v11, %v8320_v9  ;;  %v8528_v54 = vadd.f32 %v8476_v45, %v3402_v32 }
 0x7ef   : > { %v8521_v8 = vsub.f32 %v8372_v51, %v3132_v25  ;;  %3254 = vadd.xlane.f32.xlu1 %v3195_v16  ;;  %3644 = vmatprep.mubr.bf16.mxu1 %v10090_v29 }
 0x7f0   : > { %v3305_v62 = vadd.f32 1e-12, %v3273_v58  ;;  %v3221_v7 = vpop.xlane.xlu0 %3220  ;;  %v3403_v30 = vmul.f32 %v8462_v38, %v3365_v46 }
 0x7f1   : > { %v3274_v18 = vmul.f32 0.0078125, %v3221_v7  ;;  %v3098_v28 = vpop.xlane.xlu1 %3097  ;;  %v3196_v23 = vmul.f32 %v8521_v8, %v8521_v8 }
 0x7f2   : > { %v6483_v6 = vpop.eup %6482  ;;  %6488 = vrsqrt.f32 %v3305_v62  ;;  %v3133_v9 = vmul.f32 0.0078125, %v3098_v28  ;;  %v8531_v51 = vadd.f32 %v8476_v45, %v3403_v30 }
 0x7f3   : > { %v3306_v31 = vadd.f32 1e-12, %v3274_v18  ;;  %3256 = vadd.xlane.f32.xlu0 %v3196_v23  ;;  %v3366_v17 = vmul.f32 %v6483_v6, %v8330_v39 }
 0x7f4   : > { %v8535_v53 = vsub.f32 %v8381_v14, %v3133_v9  ;;  %v3100_v56 = vpop.xlane.xlu0 %3099  ;;  %v3470_v47 = vpack.c.bf16 %v8531_v51, %v8528_v54 }
 0x7f5   : > { %6490 = vrsqrt.f32 %v3306_v31  ;;  %v3134_v1 = vmul.f32 0.0078125, %v3100_v56  ;;  %v3223_v0 = vpop.xlane.xlu1 %3222  ;;  %v3404_v14 = vmul.f32 %v8462_v38, %v3366_v17 }
 0x7f6   : > { %v6485_v27 = vpop.eup %6484  ;;  %v3275_v13 = vmul.f32 0.0078125, %v3223_v0  ;;  %3645 = vmatmul.mubr.bf16.gmra.mxu1 %v3470_v47  ;;  %v3197_v36 = vmul.f32 %v8535_v53, %v8535_v53 }
 0x7f7   : > { %v8542_v19 = vsub.f32 %v8389_v41, %v3134_v1  ;;  %3654 = vmatprep.mubr.bf16.mxu1 %v10090_v29  ;;  %v3367_v39 = vmul.f32 %v6485_v27, %v8342_v33  ;;  %v8551_v46 = vadd.f32 %v8476_v45, %v3404_v14 }
 0x7f8   : > { %v3307_v3 = vadd.f32 1e-12, %v3275_v13  ;;  %3258 = vadd.xlane.f32.xlu1 %v3197_v36  ;;  %v3225_v21 = vpop.xlane.xlu0 %3224 }
 0x7f9   : > { %v3276_v61 = vmul.f32 0.0078125, %v3225_v21  ;;  %v3102_v11 = vpop.xlane.xlu1 %3101  ;;  %v3198_v25 = vmul.f32 %v8542_v19, %v8542_v19  ;;  %v3405_v63 = vmul.f32 %v8462_v38, %v3367_v39 }
 0x7fa   : > { %v6487_v16 = vpop.eup %6486  ;;  %6492 = vrsqrt.f32 %v3307_v3  ;;  %v3135_v41 = vmul.f32 0.0078125, %v3102_v11 }
 0x7fb   : > { %v3308_v58 = vadd.f32 1e-12, %v3276_v61  ;;  %3260 = vadd.xlane.f32.xlu0 %v3198_v25  ;;  %v8554_v33 = vadd.f32 %v8476_v45, %v3405_v63  ;;  %v3368_v32 = vmul.f32 %v6487_v16, %v8354_v48 }
 0x7fc   : > { %v8558_v62 = vsub.f32 %v8403_v37, %v3135_v41  ;;  %v3229_v7 = vpop.xlane.xlu0 %3228 }
 0x7fd   : > { %6494 = vrsqrt.f32 %v3308_v58  ;;  %v3278_v30 = vmul.f32 0.0078125, %v3229_v7  ;;  %v3227_v18 = vpop.xlane.xlu1 %3226  ;;  %v3471_v28 = vpack.c.bf16 %v8554_v33, %v8551_v46  ;;  %v3406_v17 = vmul.f32 %v8462_v38, %v3368_v32 }
 0x7fe   : > { %v3277_v23 = vmul.f32 0.0078125, %v3227_v18  ;;  %v3199_v6 = vmul.f32 %v8558_v62, %v8558_v62 }
 0x7ff   : > { %v6489_v9 = vpop.eup %6488  ;;  %v3310_v31 = vadd.f32 1e-12, %v3278_v30  ;;  %3655 = vmatmul.mubr.bf16.gmra.mxu1 %v3471_v28  ;;  %v8569_v13 = vadd.f32 %v8476_v45, %v3406_v17 }
 0x800   : > { %v3309_v48 = vadd.f32 1e-12, %v3277_v23  ;;  %3262 = vadd.xlane.f32.xlu1 %v3199_v6  ;;  %3664 = vmatprep.mubr.bf16.mxu1 %v10090_v29  ;;  %v3369_v37 = vmul.f32 %v6489_v9, %v8367_v24  ;;  %v3233_v56 = vpop.xlane.xlu0 %3232 }
 0x801   : > { %v3231_v47 = vpop.xlane.xlu1 %3230  ;;  %v3280_v36 = vmul.f32 0.0078125, %v3233_v56 }
 0x802   : > { %v6491_v1 = vpop.eup %6490  ;;  %6496 = vrsqrt.f32 %v3309_v48  ;;  %v3279_v0 = vmul.f32 0.0078125, %v3231_v47  ;;  %v3407_v27 = vmul.f32 %v8462_v38, %v3369_v37 }
 0x803   : > { %6498 = vrsqrt.f32 %v3310_v31  ;;  %v3370_v3 = vmul.f32 %v6491_v1, %v8370_v10  ;;  %v3312_v25 = vadd.f32 1e-12, %v3280_v36 }
 0x804   : > { %v3311_v39 = vadd.f32 1e-12, %v3279_v0  ;;  %v8572_v14 = vadd.f32 %v8476_v45, %v3407_v27  ;;  %v3237_v63 = vpop.xlane.xlu0 %3236 }
 0x805   : > { %v3235_v21 = vpop.xlane.xlu1 %3234  ;;  %v3408_v58 = vmul.f32 %v8462_v38, %v3370_v3  ;;  %v3282_v18 = vmul.f32 0.0078125, %v3237_v63 }
 0x806   : > { %10094 = vst [vmem:[#allocation14_spill] sm:$0xff] %v8572_v14  ;;  %6500 = vrsqrt.f32 %v3311_v39  ;;  %v3281_v24 = vmul.f32 0.0078125, %v3235_v21  ;;  %v3472_v61 = vpack.c.bf16 %v8572_v14, %v8569_v13 }
 0x807   : > { %v6493_v11 = vpop.eup %6492  ;;  %v8582_v28 = vadd.f32 %v8476_v45, %v3408_v58  ;;  %v3314_v17 = vadd.f32 1e-12, %v3282_v18 }
 0x808   : > { %v3313_v16 = vadd.f32 1e-12, %v3281_v24  ;;  %3665 = vmatmul.mubr.bf16.gmra.mxu1 %v3472_v61  ;;  %v3371_v41 = vmul.f32 %v6493_v11, %v8386_v59 }
 0x809   : > { %v3239_v32 = vpop.xlane.xlu1 %3238  ;;  %3674 = vmatprep.mubr.bf16.mxu1 %v10090_v29  ;;  %10095 = vst [vmem:[#allocation13_spill] sm:$0xff] %v8582_v28 }
 0x80a   : > { %v6495_v7 = vpop.eup %6494  ;;  %6502 = vrsqrt.f32 %v3313_v16  ;;  %v3283_v10 = vmul.f32 0.0078125, %v3239_v32  ;;  %v3409_v30 = vmul.f32 %v8462_v38, %v3371_v41 }
 0x80b   : > { %6504 = vrsqrt.f32 %v3312_v25  ;;  %v3372_v59 = vmul.f32 %v6495_v7, %v8392_v15 }
 0x80c   : > { %v8585_v23 = vadd.f32 %v8476_v45, %v3409_v30  ;;  %v3315_v6 = vadd.f32 1e-12, %v3283_v10 }
 0x80d   : > { %v3410_v56 = vmul.f32 %v8462_v38, %v3372_v59 }
 0x80e   : > { %10096 = vst [vmem:[#allocation22_spill] sm:$0xff] %v8585_v23  ;;  %v3473_v9 = vpack.c.bf16 %v8585_v23, %v8582_v28  ;;  %6506 = vrsqrt.f32 %v3315_v6  ;;  %v6326_v6 = vld [vmem:[%s6985_s3 + $0x78] sm:$0xff]  }
 0x80f   : > { %v6497_v31 = vpop.eup %6496  ;;  %6508 = vrsqrt.f32 %v3314_v17  ;;  %v8595_v15 = vadd.f32 %v8476_v45, %v3410_v56  ;;  %5758 = vmatprep.subr.bf16.mxu0 %v6326_v6  ;;  %v6329_v17 = vld [vmem:[%s6985_s3 + $0x30] sm:$0xff]   ;;  %v6332_v56 = vld [vmem:[%s6985_s3 + $0x60] sm:$0xff]  }
 0x810   : > { %v6499_v48 = vpop.eup %6498  ;;  %3675 = vmatmul.mubr.bf16.gmra.mxu1 %v3473_v9  ;;  %v3373_v37 = vmul.f32 %v6497_v31, %v8406_v43  ;;  %v6327_v9 = vld [vmem:[%s6985_s3 + $0x38] sm:$0xff]   ;;  %v6328_v31 = vld [vmem:[%s6985_s3 + $0x70] sm:$0xff]  }
 0x811   : > { %3684 = vmatprep.mubr.bf16.mxu1 %v10090_v29  ;;  %10097 = vst [vmem:[#allocation21_spill] sm:$0xff] %v8595_v15  ;;  %v3374_v27 = vmul.f32 %v6499_v48, %v8399_v49  ;;  %5759 = vmatpush3.bf16.msra.mxu0 %v6327_v9  ;;  %v6330_v48 = vld [vmem:[%s6985_s3 + $0x68] sm:$0xff]  }
 0x812   : > { %v3411_v47 = vmul.f32 %v8462_v38, %v3373_v37  ;;  %5760 = vmatprep.subr.bf16.mxu0 %v6328_v31  ;;  %v6331_v37 = vld [vmem:[%s6985_s3 + $0x28] sm:$0xff]  }
 0x813   : > { %v6501_v1 = vpop.eup %6500  ;;  %v3412_v21 = vmul.f32 %v8462_v38, %v3374_v27  ;;  %v6335_v27 = vld [vmem:[%s6985_s3 + $0x18] sm:$0xff]  }
 0x814   : > { %v8598_v0 = vadd.f32 %v8476_v45, %v3411_v47  ;;  %v3375_v36 = vmul.f32 %v6501_v1, %v8415_v44  ;;  %v6333_v47 = vld [vmem:[%s6985_s3 + $0x20] sm:$0xff]   ;;  %v6334_v1 = vld [vmem:[%s6985_s3 + $0x58] sm:$0xff]  }
 0x815   : > { %v8612_v49 = vadd.f32 %v8476_v45, %v3412_v21  ;;  %5761 = vmatpush3.bf16.msra.mxu0 %v6329_v17  ;;  %v6340_v21 = vld [vmem:[%s6985_s3 + $0x40] sm:$0xff]  }
 0x816   : > { %10098 = vst [vmem:[#allocation16_spill] sm:$0xff] %v8598_v0  ;;  %v3474_v43 = vpack.c.bf16 %v8598_v0, %v8595_v15  ;;  %v3413_v39 = vmul.f32 %v8462_v38, %v3375_v36  ;;  %5762 = vmatprep.subr.bf16.mxu0 %v6330_v48  ;;  %v6336_v36 = vld [vmem:[%s6985_s3 + $0x50] sm:$0xff]  }
 0x817   : > { %v6503_v3 = vpop.eup %6502  ;;  %10100 = vst [vmem:[#allocation19_spill] sm:$0xff] %v8612_v49 }
 0x818   : > { %3685 = vmatmul.mubr.bf16.gmra.mxu1 %v3474_v43  ;;  %v6505_v24 = vpop.eup %6504  ;;  %v8608_v61 = vadd.f32 %v8476_v45, %v3413_v39  ;;  %v3377_v11 = vmul.f32 %v6503_v3, %v8425_v26  ;;  %v6337_v43 = vld [vmem:[%s6985_s3 + $0x10] sm:$0xff]   ;;  %v6338_v39 = vld [vmem:[%s6985_s3 + $0x48] sm:$0xff]  }
 0x819   : > { %3694 = vmatprep.mubr.bf16.mxu1 %v10090_v29  ;;  %v3376_v44 = vmul.f32 %v6505_v24, %v8410_v35  ;;  %5763 = vmatpush3.bf16.msra.mxu0 %v6331_v37  ;;  %v6339_v3 = vld [vmem:[%s6985_s3 + $0x8] sm:$0xff]   ;;  %v6341_v24 = vld [vmem:[%s6985_s3] sm:$0xff]  }
 0x81a   : > { %10099 = vst [vmem:[#allocation15_spill] sm:$0xff] %v8608_v61  ;;  %v3475_v25 = vpack.c.bf16 %v8608_v61, %v8612_v49  ;;  %v3415_v63 = vmul.f32 %v8462_v38, %v3377_v11  ;;  %5764 = vmatprep.subr.bf16.mxu0 %v6332_v56 }
 0x81b   : > { %v6507_v16 = vpop.eup %6506  ;;  %v3414_v58 = vmul.f32 %v8462_v38, %v3376_v44 }
 0x81c   : > { %v6509_v41 = vpop.eup %6508  ;;  %v8621_v26 = vadd.f32 %v8476_v45, %v3415_v63  ;;  %v3379_v32 = vmul.f32 %v6507_v16, %v8432_v57 }
 0x81d   : > { %v8625_v35 = vadd.f32 %v8476_v45, %v3414_v58  ;;  %v3378_v7 = vmul.f32 %v6509_v41, %v8420_v34  ;;  %5765 = vmatpush3.bf16.msra.mxu0 %v6333_v47 }
 0x81e   : > { %10101 = vst [vmem:[#allocation20_spill] sm:$0xff] %v8621_v26  ;;  %v3417_v30 = vmul.f32 %v8462_v38, %v3379_v32  ;;  %5766 = vmatprep.subr.bf16.mxu0 %v6334_v1 }
 0x81f   : > { %10102 = vst [vmem:[#allocation24_spill] sm:$0xff] %v8625_v35  ;;  %v3476_v10 = vpack.c.bf16 %v8621_v26, %v8625_v35  ;;  %v3416_v18 = vmul.f32 %v8462_v38, %v3378_v7 }
 0x820   : > { %3695 = vmatmul.mubr.bf16.gmra.mxu1 %v3475_v25  ;;  %v8634_v57 = vadd.f32 %v8476_v45, %v3417_v30 }
 0x821   : > { %3704 = vmatprep.mubr.bf16.mxu1 %v10090_v29  ;;  %v8637_v59 = vadd.f32 %v8476_v45, %v3416_v18  ;;  %5767 = vmatpush3.bf16.msra.mxu0 %v6335_v27 }
 0x822   : > { %10103 = vst [vmem:[#allocation23_spill] sm:$0xff] %v8634_v57  ;;  %5768 = vmatprep.subr.bf16.mxu0 %v6336_v36 }
 0x823   : > { %10104 = vst [vmem:[#allocation18_spill] sm:$0xff] %v8637_v59  ;;  %v3477_v34 = vpack.c.bf16 %v8634_v57, %v8637_v59 }
 0x825   : > { %5769 = vmatpush3.bf16.msra.mxu0 %v6337_v43 }
 0x826   : > { %5770 = vmatprep.subr.bf16.mxu0 %v6338_v39 }
 0x828   : > { %3705 = vmatmul.mubr.bf16.gmra.mxu1 %v3476_v10 }
 0x829   : > { %3714 = vmatprep.mubr.bf16.mxu1 %v10090_v29  ;;  %5771 = vmatpush3.bf16.msra.mxu0 %v6339_v3 }
 0x82a   : > { %5772 = vmatprep.subr.bf16.mxu0 %v6340_v21 }
 0x82d   : > { %5773 = vmatpush3.bf16.msra.mxu0 %v6341_v24 }
 0x830   : > { %3715 = vmatmul.mubr.bf16.gmra.mxu1 %v3477_v34 }
 0x831   : > { %3724 = vmatprep.mubr.bf16.mxu1 %v10090_v29 }
 0x85b   : > { %v3241_v11 = vpop.xlane.xlu0 %3240 }
 0x85c   : > { %v3284_v44 = vmul.f32 0.0078125, %v3241_v11 }
 0x85e   : > { %v3316_v25 = vadd.f32 1e-12, %v3284_v44 }
 0x85f   : > { %v3243_v63 = vpop.xlane.xlu1 %3242 }
 0x860   : > { %6510 = vrsqrt.f32 %v3316_v25  ;;  %v3285_v16 = vmul.f32 0.0078125, %v3243_v63 }
 0x862   : > { %v3317_v41 = vadd.f32 1e-12, %v3285_v16 }
 0x863   : > { %v3245_v58 = vpop.xlane.xlu0 %3244 }
 0x864   : > { %6512 = vrsqrt.f32 %v3317_v41  ;;  %v3286_v32 = vmul.f32 0.0078125, %v3245_v58 }
 0x866   : > { %v3318_v7 = vadd.f32 1e-12, %v3286_v32 }
 0x867   : > { %v3247_v10 = vpop.xlane.xlu1 %3246 }
 0x868   : > { %6514 = vrsqrt.f32 %v3318_v7  ;;  %v3287_v30 = vmul.f32 0.0078125, %v3247_v10 }
 0x86a   : > { %v3319_v18 = vadd.f32 1e-12, %v3287_v30 }
 0x86c   : > { %6516 = vrsqrt.f32 %v3319_v18  ;;  %v3249_v34 = vpop.xlane.xlu0 %3248 }
 0x86d   : > { %v6511_v6 = vpop.eup %6510  ;;  %v3288_v9 = vmul.f32 0.0078125, %v3249_v34 }
 0x86e   : > { %v3380_v31 = vmul.f32 %v6511_v6, %v8439_v12 }
 0x86f   : > { %v3320_v17 = vadd.f32 1e-12, %v3288_v9 }
 0x870   : > { %v3251_v48 = vpop.xlane.xlu1 %3250  ;;  %v3418_v1 = vmul.f32 %v8462_v38, %v3380_v31 }
 0x871   : > { %v6513_v37 = vpop.eup %6512  ;;  %6518 = vrsqrt.f32 %v3320_v17  ;;  %v3289_v56 = vmul.f32 0.0078125, %v3251_v48 }
 0x872   : > { %v3381_v47 = vmul.f32 %v6513_v37, %v8444_v60  ;;  %v8663_v21 = vadd.f32 %v8476_v45, %v3418_v1 }
 0x873   : > { %v3321_v27 = vadd.f32 1e-12, %v3289_v56 }
 0x874   : > { %v3253_v36 = vpop.xlane.xlu0 %3252  ;;  %v3419_v43 = vmul.f32 %v8462_v38, %v3381_v47  ;;  %10105 = vst [vmem:[#allocation17_spill] sm:$0xff] %v8663_v21 }
 0x875   : > { %v6515_v39 = vpop.eup %6514  ;;  %6520 = vrsqrt.f32 %v3321_v27  ;;  %v3290_v3 = vmul.f32 0.0078125, %v3253_v36 }
 0x876   : > { %v8666_v12 = vadd.f32 %v8476_v45, %v3419_v43  ;;  %v3382_v24 = vmul.f32 %v6515_v39, %v8449_v52 }
 0x877   : > { %v3322_v11 = vadd.f32 1e-12, %v3290_v3 }
 0x878   : > { %10106 = vst [vmem:[#allocation29_spill] sm:$0xff] %v8666_v12  ;;  %v3255_v44 = vpop.xlane.xlu1 %3254  ;;  %v3478_v60 = vpack.c.bf16 %v8666_v12, %v8663_v21  ;;  %v3420_v41 = vmul.f32 %v8462_v38, %v3382_v24 }
 0x879   : > { %v6517_v25 = vpop.eup %6516  ;;  %6522 = vrsqrt.f32 %v3322_v11  ;;  %v3291_v63 = vmul.f32 0.0078125, %v3255_v44 }
 0x87a   : > { %3725 = vmatmul.mubr.bf16.gmra.mxu1 %v3478_v60  ;;  %v3383_v16 = vmul.f32 %v6517_v25, %v8455_v5  ;;  %v8676_v30 = vadd.f32 %v8476_v45, %v3420_v41 }
 0x87b   : > { %v3323_v58 = vadd.f32 1e-12, %v3291_v63  ;;  %3734 = vmatprep.mubr.bf16.mxu1 %v10090_v29 }
 0x87c   : > { %v3257_v32 = vpop.xlane.xlu0 %3256  ;;  %v3421_v7 = vmul.f32 %v8462_v38, %v3383_v16  ;;  %10107 = vst [vmem:[#allocation27_spill] sm:$0xff] %v8676_v30 }
 0x87d   : > { %6524 = vrsqrt.f32 %v3323_v58  ;;  %v3292_v52 = vmul.f32 0.0078125, %v3257_v32 }
 0x87e   : > { %v6519_v10 = vpop.eup %6518  ;;  %v8679_v18 = vadd.f32 %v8476_v45, %v3421_v7 }
 0x87f   : > { %v3324_v34 = vadd.f32 1e-12, %v3292_v52  ;;  %v3384_v5 = vmul.f32 %v6519_v10, %v8469_v55 }
 0x880   : > { %10108 = vst [vmem:[#allocation28_spill] sm:$0xff] %v8679_v18  ;;  %v3479_v6 = vpack.c.bf16 %v8679_v18, %v8676_v30 }
 0x881   : > { %6526 = vrsqrt.f32 %v3324_v34  ;;  %v3259_v9 = vpop.xlane.xlu1 %3258  ;;  %v3422_v37 = vmul.f32 %v8462_v38, %v3384_v5 }
 0x882   : > { %v6521_v31 = vpop.eup %6520  ;;  %v3293_v17 = vmul.f32 0.0078125, %v3259_v9  ;;  %3735 = vmatmul.mubr.bf16.gmra.mxu1 %v3479_v6 }
 0x883   : > { %3744 = vmatprep.mubr.bf16.mxu1 %v10090_v29  ;;  %v3385_v48 = vmul.f32 %v6521_v31, %v8489_v50  ;;  %v8689_v43 = vadd.f32 %v8476_v45, %v3422_v37 }
 0x884   : > { %v3325_v56 = vadd.f32 1e-12, %v3293_v17  ;;  %v3261_v47 = vpop.xlane.xlu0 %3260 }
 0x885   : > { %v3294_v1 = vmul.f32 0.0078125, %v3261_v47  ;;  %v3423_v27 = vmul.f32 %v8462_v38, %v3385_v48  ;;  %10109 = vst [vmem:[#allocation25_spill] sm:$0xff] %v8689_v43 }
 0x886   : > { %v6523_v55 = vpop.eup %6522  ;;  %6528 = vrsqrt.f32 %v3325_v56 }
 0x887   : > { %v3326_v36 = vadd.f32 1e-12, %v3294_v1  ;;  %v8692_v39 = vadd.f32 %v8476_v45, %v3423_v27  ;;  %v3386_v3 = vmul.f32 %v6523_v55, %v8498_v4  ;;  %v10117_v27 = vld [vmem:[#allocation12_spill] sm:$0xff] }
 0x888   : > { %v10118_v55 = vsub.s32 0, %v10117_v27 }
 0x889   : > { %10110 = vst [vmem:[#allocation26_spill] sm:$0xff] %v8692_v39  ;;  %6530 = vrsqrt.f32 %v3326_v36  ;;  %v3263_v50 = vpop.xlane.xlu1 %3262  ;;  %v3480_v24 = vpack.c.bf16 %v8692_v39, %v8689_v43  ;;  %v3424_v25 = vmul.f32 %v8462_v38, %v3386_v3 }
 0x88a   : > { %v6525_v11 = vpop.eup %6524  ;;  %v3295_v44 = vmul.f32 0.0078125, %v3263_v50 }
 0x88b   : > { %3745 = vmatmul.mubr.bf16.gmra.mxu1 %v3480_v24  ;;  %v3387_v60 = vmul.f32 %v6525_v11, %v8512_v2  ;;  %v8702_v4 = vadd.f32 %v8476_v45, %v3424_v25 }
 0x88c   : > { %v3327_v63 = vadd.f32 1e-12, %v3295_v44  ;;  %3754 = vmatprep.mubr.bf16.mxu1 %v10090_v29 }
 0x88d   : > { %v3425_v16 = vmul.f32 %v8462_v38, %v3387_v60  ;;  %10111 = vst [vmem:[#allocation30_spill] sm:$0xff] %v8702_v4 }
 0x88e   : > { %v6527_v41 = vpop.eup %6526  ;;  %6532 = vrsqrt.f32 %v3327_v63 }
 0x88f   : > { %v8705_v58 = vadd.f32 %v8476_v45, %v3425_v16  ;;  %v3388_v32 = vmul.f32 %v6527_v41, %v8521_v8 }
 0x891   : > { %10112 = vst [vmem:[#allocation31_spill] sm:$0xff] %v8705_v58  ;;  %v3481_v2 = vpack.c.bf16 %v8705_v58, %v8702_v4  ;;  %v3426_v10 = vmul.f32 %v8462_v38, %v3388_v32 }
 0x893   : > { %v6529_v7 = vpop.eup %6528  ;;  %3755 = vmatmul.mubr.bf16.gmra.mxu1 %v3481_v2  ;;  %v8715_v6 = vadd.f32 %v8476_v45, %v3426_v10 }
 0x894   : > { %3764 = vmatprep.mubr.bf16.mxu1 %v10090_v29  ;;  %v3389_v52 = vmul.f32 %v6529_v7, %v8535_v53 }
 0x895   : > { %10113 = vst [vmem:[#allocation32_spill] sm:$0xff] %v8715_v6 }
 0x896   : > { %v6531_v34 = vpop.eup %6530  ;;  %v3427_v5 = vmul.f32 %v8462_v38, %v3389_v52 }
 0x897   : > { %v3390_v9 = vmul.f32 %v6531_v34, %v8542_v19  ;;  %v3500_v19 = vld [vmem:[%s6980_s18] sm:$0x3]  ;;  %s10145_s18 = sld [smem:[#allocation45_spill]] (!%p5636_p6) }
 0x898   : > { %v8718_v8 = vadd.f32 %v8476_v45, %v3427_v5  ;;  %v8738_v36 = vrot.slane %v3500_v19, %v10118_v55 }
 0x899   : > { %v3428_v48 = vmul.f32 %v8462_v38, %v3390_v9 }
 0x89a   : > { %10114 = vst [vmem:[#allocation33_spill] sm:$0xff] %v8718_v8  ;;  %v3482_v31 = vpack.c.bf16 %v8718_v8, %v8715_v6 }
 0x89b   : > { %v6533_v17 = vpop.eup %6532  ;;  %v8728_v56 = vadd.f32 %v8476_v45, %v3428_v48 }
 0x89c   : > { %3765 = vmatmul.mubr.bf16.gmra.mxu1 %v3482_v31  ;;  %v3391_v53 = vmul.f32 %v6533_v17, %v8558_v62  ;;  %v10119_v62 = vsub.s32 1, %v10117_v27 }
 0x89d   : > { %3774 = vmatprep.mubr.bf16.mxu1 %v10090_v29  ;;  %10115 = vst [vmem:[#allocation34_spill] sm:$0xff] %v8728_v56 }
 0x89e   : > { %v3429_v37 = vmul.f32 %v8462_v38, %v3391_v53  ;;  %v8742_v29 = vrot.slane %v3500_v19, %v10119_v62 }
 0x8a0   : > { %v8731_v47 = vadd.f32 %v8476_v45, %v3429_v37 }
 0x8a2   : > { %10116 = vst [vmem:[#allocation35_spill] sm:$0xff] %v8731_v47  ;;  %v3483_v1 = vpack.c.bf16 %v8731_v47, %v8728_v56 }
 0x8a4   : > { %3775 = vmatmul.mubr.bf16.gmra.mxu1 %v3483_v1 }
 0x8a6   : > { %v3626_v38 = vpop.f32.mrf.mxu1 }
 0x8a7   : > { %v8745_v3 = vadd.f32 %v3626_v38, %v8738_v36 }
 0x8a8   : > { %v3628_v50 = vpop.f32.mrf.mxu1 }
 0x8a9   : > { %v3785_v45 = vmul.f32 %v8745_v3, %v8745_v3  ;;  %v8750_v24 = vadd.f32 %v3628_v50, %v8742_v29 }
 0x8aa   : > { %v3630_v11 = vpop.f32.mrf.mxu1 }
 0x8ab   : > { %v3849_v44 = vmul.f32 %v3785_v45, %v8745_v3  ;;  %v3786_v60 = vmul.f32 %v8750_v24, %v8750_v24  ;;  %v8756_v25 = vadd.f32 %v3630_v11, %v8738_v36 }
 0x8ac   : > { %v3632_v63 = vpop.f32.mrf.mxu1 }
 0x8ad   : > { %v3913_v16 = vmul.f32 0.044715, %v3849_v44  ;;  %v3850_v41 = vmul.f32 %v3786_v60, %v8750_v24  ;;  %v3787_v32 = vmul.f32 %v8756_v25, %v8756_v25  ;;  %v8762_v2 = vadd.f32 %v3632_v63, %v8742_v29 }
 0x8ae   : > { %v3636_v7 = vpop.f32.mrf.mxu1 }
 0x8af   : > { %v3977_v52 = vadd.f32 %v3913_v16, %v8745_v3  ;;  %v3914_v10 = vmul.f32 0.044715, %v3850_v41  ;;  %v3851_v34 = vmul.f32 %v3787_v32, %v8756_v25  ;;  %v3788_v5 = vmul.f32 %v8762_v2, %v8762_v2 }
 0x8b0   : > { %v8769_v9 = vadd.f32 %v3636_v7, %v8738_v36  ;;  %v3638_v31 = vpop.f32.mrf.mxu1 }
 0x8b1   : > { %v4041_v17 = vmul.f32 0.7978846, %v3977_v52  ;;  %v3978_v53 = vadd.f32 %v3914_v10, %v8750_v24  ;;  %v3915_v48 = vmul.f32 0.044715, %v3851_v34  ;;  %v3852_v37 = vmul.f32 %v3788_v5, %v8762_v2 }
 0x8b2   : > { %v3789_v19 = vmul.f32 %v8769_v9, %v8769_v9  ;;  %v8776_v1 = vadd.f32 %v3638_v31, %v8742_v29  ;;  %v3640_v27 = vpop.f32.mrf.mxu1 }
 0x8b3   : > { %6534 = vtanh.f32 %v4041_v17  ;;  %v4042_v55 = vmul.f32 0.7978846, %v3978_v53  ;;  %v3979_v62 = vadd.f32 %v3915_v48, %v8756_v25  ;;  %v3916_v38 = vmul.f32 0.044715, %v3852_v37 }
 0x8b4   : > { %v3790_v50 = vmul.f32 %v8776_v1, %v8776_v1  ;;  %v8782_v45 = vadd.f32 %v3640_v27, %v8738_v36  ;;  %v3642_v11 = vpop.f32.mrf.mxu1  ;;  %v3853_v16 = vmul.f32 %v3789_v19, %v8769_v9 }
 0x8b5   : > { %v4043_v44 = vmul.f32 0.7978846, %v3979_v62  ;;  %v3980_v60 = vadd.f32 %v3916_v38, %v8762_v2  ;;  %v8786_v63 = vadd.f32 %v3642_v11, %v8742_v29  ;;  %6536 = vtanh.f32 %v4042_v55 }
 0x8b6   : > { %v3854_v41 = vmul.f32 %v3790_v50, %v8776_v1  ;;  %v3791_v32 = vmul.f32 %v8782_v45, %v8782_v45  ;;  %v3646_v7 = vpop.f32.mrf.mxu1  ;;  %v3917_v19 = vmul.f32 0.044715, %v3853_v16 }
 0x8b7   : > { %6538 = vtanh.f32 %v4043_v44  ;;  %v4044_v52 = vmul.f32 0.7978846, %v3980_v60  ;;  %v3792_v10 = vmul.f32 %v8786_v63, %v8786_v63  ;;  %v8795_v34 = vadd.f32 %v3646_v7, %v8738_v36 }
 0x8b8   : > { %v3918_v5 = vmul.f32 0.044715, %v3854_v41  ;;  %v3855_v31 = vmul.f32 %v3791_v32, %v8782_v45  ;;  %v3648_v17 = vpop.f32.mrf.mxu1 }
 0x8b9   : > { %6540 = vtanh.f32 %v4044_v52  ;;  %v3856_v53 = vmul.f32 %v3792_v10, %v8786_v63  ;;  %v3793_v48 = vmul.f32 %v8795_v34, %v8795_v34  ;;  %v8802_v37 = vadd.f32 %v3648_v17, %v8742_v29 }
 0x8ba   : > { %v3982_v27 = vadd.f32 %v3918_v5, %v8776_v1  ;;  %v3650_v55 = vpop.f32.mrf.mxu1  ;;  %v3919_v60 = vmul.f32 0.044715, %v3855_v31  ;;  %v3981_v5 = vadd.f32 %v3917_v19, %v8769_v9 }
 0x8bb   : > { %v3920_v62 = vmul.f32 0.044715, %v3856_v53  ;;  %v3857_v38 = vmul.f32 %v3793_v48, %v8795_v34  ;;  %v3794_v50 = vmul.f32 %v8802_v37, %v8802_v37  ;;  %v8809_v11 = vadd.f32 %v3650_v55, %v8738_v36 }
 0x8bc   : > { %v4046_v44 = vmul.f32 0.7978846, %v3982_v27  ;;  %v3652_v41 = vpop.f32.mrf.mxu1  ;;  %v4045_v8 = vmul.f32 0.7978846, %v3981_v5 }
 0x8bd   : > { %v3984_v32 = vadd.f32 %v3920_v62, %v8786_v63  ;;  %v3921_v7 = vmul.f32 0.044715, %v3857_v38  ;;  %v3858_v16 = vmul.f32 %v3794_v50, %v8802_v37  ;;  %v3795_v52 = vmul.f32 %v8809_v11, %v8809_v11 }
 0x8be   : > { %v8816_v10 = vadd.f32 %v3652_v41, %v8742_v29  ;;  %6542 = vtanh.f32 %v4046_v44  ;;  %v3983_v38 = vadd.f32 %v3919_v60, %v8782_v45 }
 0x8bf   : > { %v4048_v17 = vmul.f32 0.7978846, %v3984_v32  ;;  %v3859_v53 = vmul.f32 %v3795_v52, %v8809_v11  ;;  %v3656_v48 = vpop.f32.mrf.mxu1  ;;  %v3922_v31 = vmul.f32 0.044715, %v3858_v16  ;;  %v3985_v50 = vadd.f32 %v3921_v7, %v8795_v34 }
 0x8c0   : > { %v6535_v27 = vpop.eup %6534  ;;  %v3796_v55 = vmul.f32 %v8816_v10, %v8816_v10  ;;  %v8823_v62 = vadd.f32 %v3656_v48, %v8738_v36 }
 0x8c1   : > { %6544 = vtanh.f32 %v4048_v17  ;;  %v3658_v41 = vpop.f32.mrf.mxu1  ;;  %v3923_v19 = vmul.f32 0.044715, %v3859_v53  ;;  %v4169_v47 = vadd.f32 1.0, %v6535_v27  ;;  %v3986_v60 = vadd.f32 %v3922_v31, %v8802_v37 }
 0x8c2   : > { %v3860_v32 = vmul.f32 %v3796_v55, %v8816_v10  ;;  %v3797_v52 = vmul.f32 %v8823_v62, %v8823_v62  ;;  %v8831_v44 = vadd.f32 %v3658_v41, %v8742_v29  ;;  %v6537_v16 = vpop.eup %6536  ;;  %v4047_v55 = vmul.f32 0.7978846, %v3983_v38 }
 0x8c3   : > { %v3660_v56 = vpop.f32.mrf.mxu1  ;;  %v4049_v4 = vmul.f32 0.7978846, %v3985_v50  ;;  %v3987_v27 = vadd.f32 %v3923_v19, %v8809_v11  ;;  %v4170_v43 = vadd.f32 1.0, %v6537_v16  ;;  %v4233_v5 = vmul.f32 0.5, %v4169_v47 }
 0x8c4   : > { %v6539_v48 = vpop.eup %6538  ;;  %v3861_v17 = vmul.f32 %v3797_v52, %v8823_v62  ;;  %v3798_v7 = vmul.f32 %v8831_v44, %v8831_v44  ;;  %v8838_v6 = vadd.f32 %v3660_v56, %v8738_v36  ;;  %v3924_v39 = vmul.f32 0.044715, %v3860_v32 }
 0x8c5   : > { %v4171_v53 = vadd.f32 1.0, %v6539_v48  ;;  %v3662_v58 = vpop.f32.mrf.mxu1  ;;  %6546 = vtanh.f32 %v4045_v8  ;;  %v4050_v48 = vmul.f32 0.7978846, %v3986_v60  ;;  %v4051_v19 = vmul.f32 0.7978846, %v3987_v27 }
 0x8c6   : > { %v6541_v41 = vpop.eup %6540  ;;  %v3925_v18 = vmul.f32 0.044715, %v3861_v17  ;;  %v3862_v31 = vmul.f32 %v3798_v7, %v8831_v44  ;;  %v8843_v52 = vadd.f32 %v3662_v58, %v8742_v29  ;;  %v3799_v56 = vmul.f32 %v8838_v6, %v8838_v6 }
 0x8c7   : > { %v4172_v30 = vadd.f32 1.0, %v6541_v41  ;;  %v4235_v12 = vmul.f32 0.5, %v4171_v53  ;;  %6548 = vtanh.f32 %v4047_v55  ;;  %v3988_v58 = vadd.f32 %v3924_v39, %v8816_v10 }
 0x8c8   : > { %v3666_v38 = vpop.f32.mrf.mxu1  ;;  %v3800_v50 = vmul.f32 %v8843_v52, %v8843_v52  ;;  %6550 = vtanh.f32 %v4049_v4  ;;  %v4234_v8 = vmul.f32 0.5, %v4170_v43  ;;  %v4297_v16 = vmul.f32 %v4233_v5, %v8745_v3 }
 0x8c9   : > { %v8850_v47 = vadd.f32 %v3666_v38, %v8738_v36  ;;  %v3989_v60 = vadd.f32 %v3925_v18, %v8823_v62  ;;  %v3926_v17 = vmul.f32 0.044715, %v3862_v31  ;;  %6552 = vtanh.f32 %v4050_v48 }
 0x8ca   : > { %v3668_v32 = vpop.f32.mrf.mxu1  ;;  %v3863_v53 = vmul.f32 %v3799_v56, %v8838_v6  ;;  %v3864_v55 = vmul.f32 %v3800_v50, %v8843_v52  ;;  %v4236_v4 = vmul.f32 0.5, %v4172_v30  ;;  %v4299_v39 = vmul.f32 %v4235_v12, %v8756_v25 }
 0x8cb   : > { %v3801_v7 = vmul.f32 %v8850_v47, %v8850_v47  ;;  %v6543_v27 = vpop.eup %6542  ;;  %v8862_v3 = vadd.f32 %v3668_v32, %v8742_v29  ;;  %6554 = vtanh.f32 %v4051_v19  ;;  %v4052_v31 = vmul.f32 0.7978846, %v3988_v58 }
 0x8cc   : > { %v3670_v41 = vpop.f32.mrf.mxu1  ;;  %v4298_v56 = vmul.f32 %v4234_v8, %v8750_v24  ;;  %v4300_v38 = vmul.f32 %v4236_v4, %v8762_v2  ;;  %v4053_v30 = vmul.f32 0.7978846, %v3989_v60  ;;  %v3990_v50 = vadd.f32 %v3926_v17, %v8831_v44 }
 0x8cd   : > { %v3865_v43 = vmul.f32 %v3801_v7, %v8850_v47  ;;  %v8865_v18 = vadd.f32 %v3670_v41, %v8738_v36  ;;  %v3927_v32 = vmul.f32 0.044715, %v3863_v53  ;;  %v3928_v7 = vmul.f32 0.044715, %v3864_v55 }
 0x8ce   : > { %v6545_v5 = vpop.eup %6544  ;;  %v3672_v48 = vpop.f32.mrf.mxu1  ;;  %v4362_v19 = vpack.c.bf16 %v4300_v38, %v4298_v56  ;;  %v4361_v58 = vpack.c.bf16 %v4299_v39, %v4297_v16  ;;  %v3802_v24 = vmul.f32 %v8862_v3, %v8862_v3  ;;  %v4174_v53 = vadd.f32 1.0, %v6543_v27 }
 0x8cf   : > { %v3929_v12 = vmul.f32 0.044715, %v3865_v43  ;;  %v3803_v25 = vmul.f32 %v8865_v18, %v8865_v18  ;;  %v8873_v41 = vadd.f32 %v3672_v48, %v8742_v29  ;;  %v4176_v55 = vadd.f32 1.0, %v6545_v5 }
 0x8d0   : > { %v3676_v21 = vpop.f32.mrf.mxu1  ;;  %4560 = vmatprep.mubr.bf16.mxu0 %v4362_v19  ;;  %6556 = vtanh.f32 %v4052_v31  ;;  %v4054_v43 = vmul.f32 0.7978846, %v3990_v50  ;;  %v3991_v48 = vadd.f32 %v3927_v32, %v8838_v6  ;;  %v3992_v56 = vadd.f32 %v3928_v7, %v8843_v52 }
 0x8d1   : > { %v3993_v57 = vadd.f32 %v3929_v12, %v8850_v47  ;;  %v3867_v2 = vmul.f32 %v3803_v25, %v8865_v18  ;;  %v3804_v8 = vmul.f32 %v8873_v41, %v8873_v41  ;;  %v8882_v60 = vadd.f32 %v3676_v21, %v8738_v36  ;;  %4561 = vmatmul.mubr.bf16.vlgmr.msra.gmra.mxu0 %v4361_v58 }
 0x8d2   : > { %v3678_v17 = vpop.f32.mrf.mxu1  ;;  %v6547_v12 = vpop.eup %6546  ;;  %6558 = vtanh.f32 %v4053_v30  ;;  %v3866_v27 = vmul.f32 %v3802_v24, %v8862_v3  ;;  %v4238_v32 = vmul.f32 0.5, %v4174_v53  ;;  %v4240_v7 = vmul.f32 0.5, %v4176_v55 }
 0x8d3   : > { %v4057_v4 = vmul.f32 0.7978846, %v3993_v57  ;;  %v3931_v16 = vmul.f32 0.044715, %v3867_v2  ;;  %v8885_v39 = vadd.f32 %v3678_v17, %v8742_v29  ;;  %v3805_v21 = vmul.f32 %v8882_v60, %v8882_v60 }
 0x8d4   : > { %v3680_v38 = vpop.f32.mrf.mxu1  ;;  %v3868_v57 = vmul.f32 %v3804_v8, %v8873_v41  ;;  %v6549_v31 = vpop.eup %6548  ;;  %v4055_v8 = vmul.f32 0.7978846, %v3991_v48  ;;  %v4056_v17 = vmul.f32 0.7978846, %v3992_v56  ;;  %v3930_v55 = vmul.f32 0.044715, %v3866_v27 }
 0x8d5   : > { %v8894_v5 = vadd.f32 %v3680_v38, %v8738_v36  ;;  %6560 = vtanh.f32 %v4057_v4  ;;  %v3869_v50 = vmul.f32 %v3805_v21, %v8882_v60  ;;  %v8897_v19 = vpop.eup %6550  ;;  %v3995_v58 = vadd.f32 %v3931_v16, %v8865_v18 }
 0x8d6   : > { %v3682_v25 = vpop.f32.mrf.mxu1  ;;  %v3806_v30 = vmul.f32 %v8885_v39, %v8885_v39  ;;  %6562 = vtanh.f32 %v4054_v43  ;;  %v6553_v53 = vpop.eup %6552  ;;  %v3932_v38 = vmul.f32 0.044715, %v3868_v57  ;;  %v4304_v43 = vmul.f32 %v4240_v7, %v8786_v63 }
 0x8d7   : > { %v3807_v24 = vmul.f32 %v8894_v5, %v8894_v5  ;;  %v8905_v2 = vadd.f32 %v3682_v25, %v8742_v29  ;;  %v3933_v4 = vmul.f32 0.044715, %v3869_v50  ;;  %v4302_v25 = vmul.f32 %v4238_v32, %v8776_v1 }
 0x8d8   : > { %v3686_v21 = vpop.f32.mrf.mxu1  ;;  %v8916_v56 = vpop.eup %6554  ;;  %v4059_v50 = vmul.f32 0.7978846, %v3995_v58  ;;  %v3870_v27 = vmul.f32 %v3806_v30, %v8885_v39  ;;  %6564 = vtanh.f32 %v4055_v8  ;;  %v3994_v1 = vadd.f32 %v3930_v55, %v8862_v3 }
 0x8d9   : > { %v3871_v59 = vmul.f32 %v3807_v24, %v8894_v5  ;;  %v3808_v16 = vmul.f32 %v8905_v2, %v8905_v2  ;;  %v3997_v26 = vadd.f32 %v3933_v4, %v8882_v60  ;;  %v8912_v35 = vadd.f32 %v3686_v21, %v8738_v36 }
 0x8da   : > { %v3688_v48 = vpop.f32.mrf.mxu1  ;;  %v4364_v21 = vpack.c.bf16 %v4304_v43, %v4302_v25  ;;  %6566 = vtanh.f32 %v4056_v17  ;;  %v4173_v30 = vadd.f32 1.0, %v6547_v12  ;;  %v3996_v8 = vadd.f32 %v3932_v38, %v8873_v41 }
 0x8db   : > { %v3872_v57 = vmul.f32 %v3808_v16, %v8905_v2  ;;  %v8921_v24 = vadd.f32 %v3688_v48, %v8742_v29  ;;  %v3809_v4 = vmul.f32 %v8912_v35, %v8912_v35  ;;  %v4061_v63 = vmul.f32 0.7978846, %v3997_v26 }
 0x8dc   : > { %v3690_v61 = vpop.f32.mrf.mxu1  ;;  %v3935_v32 = vmul.f32 0.044715, %v3871_v59  ;;  %4568 = vmatprep.mubr.bf16.mxu0 %v4364_v21  ;;  %v4175_v16 = vadd.f32 1.0, %v6549_v31  ;;  %6568 = vtanh.f32 %v4059_v50  ;;  %v3934_v49 = vmul.f32 0.044715, %v3870_v27 }
 0x8dd   : > { %v3810_v7 = vmul.f32 %v8921_v24, %v8921_v24  ;;  %v3873_v58 = vmul.f32 %v3809_v4, %v8912_v35  ;;  %v3936_v25 = vmul.f32 0.044715, %v3872_v57  ;;  %v6557_v43 = vpop.eup %6556  ;;  %v4237_v26 = vmul.f32 0.5, %v4173_v30 }
 0x8de   : > { %v3692_v48 = vpop.f32.mrf.mxu1  ;;  %v4239_v59 = vmul.f32 0.5, %v4175_v16  ;;  %v8932_v0 = vadd.f32 %v3690_v61, %v8738_v36  ;;  %v4058_v15 = vmul.f32 0.7978846, %v3994_v1  ;;  %6570 = vtanh.f32 %v4061_v63 }
 0x8df   : > { %v3874_v55 = vmul.f32 %v3810_v7, %v8921_v24  ;;  %v3999_v12 = vadd.f32 %v3935_v32, %v8894_v5  ;;  %v8936_v31 = vadd.f32 %v3692_v48, %v8742_v29  ;;  %v8938_v50 = vpop.eup %6558  ;;  %v3937_v38 = vmul.f32 0.044715, %v3873_v58 }
 0x8e0   : > { %v3696_v17 = vpop.f32.mrf.mxu1  ;;  %v4301_v27 = vmul.f32 %v4237_v26, %v8769_v9  ;;  %v4303_v57 = vmul.f32 %v4239_v59, %v8782_v45  ;;  %v3811_v4 = vmul.f32 %v8932_v0, %v8932_v0  ;;  %v4060_v7 = vmul.f32 0.7978846, %v3996_v8 }
 0x8e1   : > { %v3998_v1 = vadd.f32 %v3934_v49, %v8885_v39  ;;  %v4000_v63 = vadd.f32 %v3936_v25, %v8905_v2  ;;  %v3812_v32 = vmul.f32 %v8936_v31, %v8936_v31  ;;  %v3938_v30 = vmul.f32 0.044715, %v3874_v55 }
 0x8e2   : > { %v3698_v61 = vpop.f32.mrf.mxu1  ;;  %v6561_v21 = vpop.eup %6560  ;;  %v4363_v16 = vpack.c.bf16 %v4303_v57, %v4301_v27  ;;  %v3875_v58 = vmul.f32 %v3811_v4, %v8932_v0  ;;  %v8950_v9 = vadd.f32 %v3696_v17, %v8738_v36  ;;  %6572 = vtanh.f32 %v4058_v15 }
 0x8e3   : > { %v8952_v48 = vpop.eup %6562  ;;  %v4063_v26 = vmul.f32 0.7978846, %v3999_v12  ;;  %v4178_v8 = vadd.f32 1.0, %v6553_v53  ;;  %v4185_v59 = vadd.f32 1.0, %v6561_v21  ;;  %v4001_v49 = vadd.f32 %v3937_v38, %v8912_v35 }
 0x8e4   : > { %v3700_v45 = vpop.f32.mrf.mxu1  ;;  %4569 = vmatmul.mubr.bf16.gmra.mxu0 %v4363_v16  ;;  %v3813_v25 = vmul.f32 %v8950_v9, %v8950_v9  ;;  %v4180_v55 = vadd.f32 1.0, %v6557_v43  ;;  %6574 = vtanh.f32 %v4060_v7  ;;  %v4062_v57 = vmul.f32 0.7978846, %v3998_v1 }
 0x8e5   : > { %v4064_v4 = vmul.f32 0.7978846, %v4000_v63  ;;  %v3876_v17 = vmul.f32 %v3812_v32, %v8936_v31  ;;  %v4002_v23 = vadd.f32 %v3938_v30, %v8921_v24  ;;  %v3939_v28 = vmul.f32 0.044715, %v3875_v58  ;;  %v8959_v21 = vpop.eup %6564 }
 0x8e6   : > { %v3702_v27 = vpop.f32.mrf.mxu1  ;;  %v4242_v15 = vmul.f32 0.5, %v4178_v8  ;;  %v4244_v12 = vmul.f32 0.5, %v4180_v55  ;;  %6576 = vtanh.f32 %v4063_v26  ;;  %v3877_v38 = vmul.f32 %v3813_v25, %v8950_v9 }
 0x8e7   : > { %v8963_v16 = vadd.f32 %v3698_v61, %v8742_v29  ;;  %v4177_v43 = vadd.f32 1.0, %v8897_v19  ;;  %v4249_v7 = vmul.f32 0.5, %v4185_v59  ;;  %v4065_v1 = vmul.f32 0.7978846, %v4001_v49  ;;  %v6567_v58 = vpop.eup %6566 }
 0x8e8   : > { %v3706_v53 = vpop.f32.mrf.mxu1  ;;  %v4306_v63 = vmul.f32 %v4242_v15, %v8802_v37  ;;  %v4308_v32 = vmul.f32 %v4244_v12, %v8816_v10  ;;  %6578 = vtanh.f32 %v4062_v57  ;;  %v3940_v8 = vmul.f32 0.044715, %v3876_v17 }
 0x8e9   : > { %v3814_v26 = vmul.f32 %v8963_v16, %v8963_v16  ;;  %v4179_v25 = vadd.f32 1.0, %v8916_v56  ;;  %v6569_v55 = vpop.eup %6568  ;;  %6580 = vtanh.f32 %v4064_v4  ;;  %v4066_v61 = vmul.f32 0.7978846, %v4002_v23 }
 0x8ea   : > { %v3708_v30 = vpop.f32.mrf.mxu1  ;;  %v4003_v19 = vadd.f32 %v3939_v28, %v8932_v0  ;;  %v4366_v59 = vpack.c.bf16 %v4308_v32, %v4306_v63  ;;  %v3941_v49 = vmul.f32 0.044715, %v3877_v38  ;;  %v4241_v15 = vmul.f32 0.5, %v4177_v43 }
 0x8eb   : > { %v3878_v37 = vmul.f32 %v3814_v26, %v8963_v16  ;;  %v4243_v10 = vmul.f32 0.5, %v4179_v25  ;;  %v6571_v57 = vpop.eup %6570  ;;  %v8976_v17 = vmul.f32 %v4249_v7, %v8850_v47  ;;  %6582 = vtanh.f32 %v4065_v1 }
 0x8ec   : > { %v8973_v12 = vpop.f32.mrf.mxu1  ;;  %4576 = vmatprep.mubr.bf16.mxu0 %v4366_v59  ;;  %v8979_v56 = vadd.f32 %v3700_v45, %v8738_v36  ;;  %v8982_v23 = vadd.f32 %v3702_v27, %v8742_v29  ;;  %v4187_v28 = vadd.f32 1.0, %v6569_v55  ;;  %v4004_v4 = vadd.f32 %v3940_v8, %v8936_v31 }
 0x8ed   : > { %v4305_v38 = vmul.f32 %v4241_v15, %v8795_v34  ;;  %v4307_v43 = vmul.f32 %v4243_v10, %v8809_v11  ;;  %v4067_v63 = vmul.f32 0.7978846, %v4003_v19  ;;  %v3942_v32 = vmul.f32 0.044715, %v3878_v37 }
 0x8ee   : > { %v3815_v47 = vmul.f32 %v8979_v56, %v8979_v56  ;;  %v3816_v7 = vmul.f32 %v8982_v23, %v8982_v23  ;;  %v4189_v45 = vadd.f32 1.0, %v6571_v57  ;;  %v4005_v1 = vadd.f32 %v3941_v49, %v8950_v9  ;;  %v3712_v8 = vpop.f32.mrf.mxu1 }
 0x8ef   : > { %v4365_v27 = vpack.c.bf16 %v4307_v43, %v4305_v38  ;;  %v8993_v26 = vadd.f32 %v3706_v53, %v8738_v36  ;;  %v6573_v25 = vpop.eup %6572  ;;  %v4182_v55 = vadd.f32 1.0, %v8952_v48  ;;  %v4184_v19 = vadd.f32 1.0, %v6567_v58 }
 0x8f0   : > { %v3879_v34 = vmul.f32 %v3815_v47, %v8979_v56  ;;  %v3880_v11 = vmul.f32 %v3816_v7, %v8982_v23  ;;  %v4251_v59 = vmul.f32 0.5, %v4187_v28  ;;  %6584 = vtanh.f32 %v4066_v61  ;;  %v3716_v58 = vpop.f32.mrf.mxu1 }
 0x8f1   : > { %4577 = vmatmul.mubr.bf16.gmra.mxu0 %v4365_v27  ;;  %v3817_v37 = vmul.f32 %v8993_v26, %v8993_v26  ;;  %v9001_v49 = vadd.f32 %v3708_v30, %v8742_v29  ;;  %v6575_v53 = vpop.eup %6574  ;;  %v4068_v15 = vmul.f32 0.7978846, %v4004_v4  ;;  %v4006_v10 = vadd.f32 %v3942_v32, %v8963_v16 }
 0x8f2   : > { %v3944_v57 = vmul.f32 0.044715, %v3880_v11  ;;  %v4246_v38 = vmul.f32 0.5, %v4182_v55  ;;  %6586 = vtanh.f32 %v4067_v63  ;;  %v3943_v43 = vmul.f32 0.044715, %v3879_v34 }
 0x8f3   : > { %v4248_v47 = vmul.f32 0.5, %v4184_v19  ;;  %v3818_v48 = vmul.f32 %v9001_v49, %v9001_v49  ;;  %v6577_v61 = vpop.eup %6576  ;;  %v4253_v28 = vmul.f32 0.5, %v4189_v45  ;;  %v4069_v7 = vmul.f32 0.7978846, %v4005_v1 }
 0x8f4   : > { %v4008_v27 = vadd.f32 %v3944_v57, %v8982_v23  ;;  %v3881_v30 = vmul.f32 %v3817_v37, %v8993_v26  ;;  %v4310_v4 = vmul.f32 %v4246_v38, %v8831_v44  ;;  %v4181_v63 = vadd.f32 1.0, %v8938_v50 }
 0x8f5   : > { %v4312_v32 = vmul.f32 %v4248_v47, %v8843_v52  ;;  %v3882_v11 = vmul.f32 %v3818_v48, %v9001_v49  ;;  %v6579_v34 = vpop.eup %6578  ;;  %v9013_v55 = vmul.f32 %v4251_v59, %v8865_v18  ;;  %6588 = vtanh.f32 %v4068_v15  ;;  %v3718_v52 = vpop.f32.mrf.mxu1 }
 0x8f6   : > { %v4070_v19 = vmul.f32 0.7978846, %v4006_v10  ;;  %v4183_v45 = vadd.f32 1.0, %v8959_v21  ;;  %v9016_v1 = vpop.eup %6580  ;;  %v4007_v37 = vadd.f32 %v3943_v43, %v8979_v56  ;;  %v4245_v38 = vmul.f32 0.5, %v4181_v63 }
 0x8f7   : > { %v4368_v57 = vpack.c.bf16 %v4312_v32, %v4310_v4  ;;  %v3946_v44 = vmul.f32 0.044715, %v3882_v11  ;;  %v4191_v47 = vadd.f32 1.0, %v6577_v61  ;;  %v3945_v48 = vmul.f32 0.044715, %v3881_v30 }
 0x8f8   : > { %v4247_v14 = vmul.f32 0.5, %v4183_v45  ;;  %v9021_v50 = vadd.f32 %v8973_v12, %v8738_v36  ;;  %v9023_v18 = vpop.eup %6582  ;;  %v9026_v59 = vmul.f32 %v4253_v28, %v8882_v60  ;;  %6590 = vtanh.f32 %v4069_v7  ;;  %v3720_v7 = vpop.f32.mrf.mxu1 }
 0x8f9   : > { %v4072_v21 = vmul.f32 0.7978846, %v4008_v27  ;;  %4584 = vmatprep.mubr.bf16.mxu0 %v4368_v57  ;;  %v4010_v15 = vadd.f32 %v3946_v44, %v9001_v49  ;;  %v4309_v10 = vmul.f32 %v4245_v38, %v8823_v62  ;;  %v9034_v12 = vadd.f32 %v3712_v8, %v8742_v29 }
 0x8fa   : > { %v4311_v43 = vmul.f32 %v4247_v14, %v8838_v6  ;;  %v3819_v61 = vmul.f32 %v9021_v50, %v9021_v50  ;;  %6592 = vtanh.f32 %v4070_v19  ;;  %v4071_v30 = vmul.f32 0.7978846, %v4007_v37  ;;  %v3722_v44 = vpop.f32.mrf.mxu1 }
 0x8fb   : > { %v9037_v60 = vadd.f32 %v3716_v58, %v8738_v36  ;;  %v4186_v28 = vadd.f32 1.0, %v6573_v25  ;;  %v4009_v27 = vadd.f32 %v3945_v48, %v8993_v26  ;;  %v4074_v4 = vmul.f32 0.7978846, %v4010_v15 }
 0x8fc   : > { %v4367_v32 = vpack.c.bf16 %v4311_v43, %v4309_v10  ;;  %v3883_v62 = vmul.f32 %v3819_v61, %v9021_v50  ;;  %6594 = vtanh.f32 %v4072_v21  ;;  %v3820_v14 = vmul.f32 %v9034_v12, %v9034_v12 }
 0x8fd   : > { %v3821_v6 = vmul.f32 %v9037_v60, %v9037_v60  ;;  %v4188_v8 = vadd.f32 1.0, %v6575_v53  ;;  %v6585_v11 = vpop.eup %6584  ;;  %v4255_v63 = vmul.f32 0.5, %v4191_v47  ;;  %v4250_v25 = vmul.f32 0.5, %v4186_v28 }
 0x8fe   : > { %4585 = vmatmul.mubr.bf16.gmra.mxu0 %v4367_v32  ;;  %v3947_v58 = vmul.f32 0.044715, %v3883_v62  ;;  %v9046_v19 = vadd.f32 %v3718_v52, %v8742_v29  ;;  %6596 = vtanh.f32 %v4071_v30  ;;  %v3884_v45 = vmul.f32 %v3820_v14, %v9034_v12 }
 0x8ff   : > { %v3885_v37 = vmul.f32 %v3821_v6, %v9037_v60  ;;  %v4252_v57 = vmul.f32 0.5, %v4188_v8  ;;  %v6587_v38 = vpop.eup %6586  ;;  %v4073_v48 = vmul.f32 0.7978846, %v4009_v27  ;;  %6598 = vtanh.f32 %v4074_v4 }
 0x900   : > { %v4011_v53 = vadd.f32 %v3947_v58, %v9021_v50  ;;  %v3822_v47 = vmul.f32 %v9046_v19, %v9046_v19  ;;  %v3948_v21 = vmul.f32 0.044715, %v3884_v45  ;;  %v4314_v15 = vmul.f32 %v4250_v25, %v8862_v3 }
 0x901   : > { %v4316_v52 = vmul.f32 %v4252_v57, %v8873_v41  ;;  %v9056_v10 = vadd.f32 %v3720_v7, %v8738_v36  ;;  %v4369_v61 = vpack.c.bf16 %v9013_v55, %v8976_v17  ;;  %v9062_v30 = vadd.f32 %v3722_v44, %v8742_v29 }
 0x902   : > { %v3886_v43 = vmul.f32 %v3822_v47, %v9046_v19  ;;  %v4190_v28 = vadd.f32 1.0, %v6579_v34  ;;  %v6589_v27 = vpop.eup %6588  ;;  %v4012_v4 = vadd.f32 %v3948_v21, %v9034_v12  ;;  %v3949_v32 = vmul.f32 0.044715, %v3885_v37 }
 0x903   : > { %v4370_v62 = vpack.c.bf16 %v4316_v52, %v4314_v15  ;;  %v3823_v3 = vmul.f32 %v9056_v10, %v9056_v10  ;;  %v4075_v41 = vmul.f32 0.7978846, %v4011_v53  ;;  %v3824_v14 = vmul.f32 %v9062_v30, %v9062_v30 }
 0x904   : > { %v3950_v7 = vmul.f32 0.044715, %v3886_v43  ;;  %v4192_v6 = vadd.f32 1.0, %v9016_v1  ;;  %v4319_v17 = vmul.f32 %v4255_v63, %v8894_v5  ;;  %v4076_v55 = vmul.f32 0.7978846, %v4012_v4 }
 0x905   : > { %4592 = vmatprep.mubr.bf16.mxu0 %v4370_v62  ;;  %v3887_v34 = vmul.f32 %v3823_v3, %v9056_v10  ;;  %v4254_v8 = vmul.f32 0.5, %v4190_v28  ;;  %v6591_v58 = vpop.eup %6590  ;;  %6600 = vtanh.f32 %v4073_v48  ;;  %v3888_v45 = vmul.f32 %v3824_v14, %v9062_v30 }
 0x906   : > { %v4014_v25 = vadd.f32 %v3950_v7, %v9046_v19  ;;  %4593 = vmatmul.mubr.bf16.gmra.mxu0 %v4369_v61  ;;  %v4256_v37 = vmul.f32 0.5, %v4192_v6  ;;  %v4193_v57 = vadd.f32 1.0, %v9023_v18  ;;  %v4195_v44 = vadd.f32 1.0, %v6587_v38 }
 0x907   : > { %6602 = vtanh.f32 %v4076_v55  ;;  %v3951_v1 = vmul.f32 0.044715, %v3887_v34  ;;  %v6593_v53 = vpop.eup %6592  ;;  %v4013_v5 = vadd.f32 %v3949_v32, %v9037_v60  ;;  %v3952_v47 = vmul.f32 0.044715, %v3888_v45 }
 0x908   : > { %6604 = vtanh.f32 %v4075_v41  ;;  %v4078_v63 = vmul.f32 0.7978846, %v4014_v25  ;;  %v4318_v48 = vmul.f32 %v4254_v8, %v8885_v39  ;;  %v4320_v15 = vmul.f32 %v4256_v37, %v8905_v2 }
 0x909   : > { %v4015_v21 = vadd.f32 %v3951_v1, %v9056_v10  ;;  %v4194_v52 = vadd.f32 1.0, %v6585_v11  ;;  %v6595_v43 = vpop.eup %6594  ;;  %v4016_v18 = vadd.f32 %v3952_v47, %v9062_v30  ;;  %v4196_v38 = vadd.f32 1.0, %v6589_v27 }
 0x90a   : > { %6606 = vtanh.f32 %v4078_v63  ;;  %v4259_v61 = vmul.f32 0.5, %v4195_v44  ;;  %v4372_v28 = vpack.c.bf16 %v4320_v15, %v4318_v48  ;;  %v4371_v4 = vpack.c.bf16 %v4319_v17, %v9026_v59 }
 0x90b   : > { %v4258_v62 = vmul.f32 0.5, %v4194_v52  ;;  %v6597_v32 = vpop.eup %6596  ;;  %v4079_v3 = vmul.f32 0.7978846, %v4015_v21  ;;  %v4080_v41 = vmul.f32 0.7978846, %v4016_v18  ;;  %v4260_v7 = vmul.f32 0.5, %v4196_v38 }
 0x90c   : > { %v4198_v14 = vadd.f32 1.0, %v6593_v53  ;;  %v6599_v6 = vpop.eup %6598  ;;  %v4257_v39 = vmul.f32 0.5, %v4193_v57  ;;  %v4077_v55 = vmul.f32 0.7978846, %v4013_v5  ;;  %4600 = vmatprep.mubr.bf16.mxu0 %v4372_v28  ;;  %v4200_v2 = vadd.f32 1.0, %v6595_v43 }
 0x90d   : > { %6608 = vtanh.f32 %v4080_v41  ;;  %v4322_v11 = vmul.f32 %v4258_v62, %v8921_v24  ;;  %v4324_v27 = vmul.f32 %v4260_v7, %v8936_v31  ;;  %v4323_v59 = vmul.f32 %v4259_v61, %v8932_v0 }
 0x90e   : > { %4601 = vmatmul.mubr.bf16.gmra.mxu0 %v4371_v4  ;;  %v4262_v34 = vmul.f32 0.5, %v4198_v14  ;;  %v4264_v8 = vmul.f32 0.5, %v4200_v2  ;;  %v4199_v17 = vadd.f32 1.0, %v6597_v32  ;;  %6610 = vtanh.f32 %v4079_v3 }
 0x90f   : > { %v4374_v25 = vpack.c.bf16 %v4324_v27, %v4322_v11  ;;  %v4202_v57 = vadd.f32 1.0, %v6599_v6  ;;  %v4321_v44 = vmul.f32 %v4257_v39, %v8912_v35  ;;  %v4197_v1 = vadd.f32 1.0, %v6591_v58 }
 0x910   : > { %v4326_v45 = vmul.f32 %v4262_v34, %v8963_v16  ;;  %v4328_v37 = vmul.f32 %v4264_v8, %v8982_v23  ;;  %6612 = vtanh.f32 %v4077_v55  ;;  %v4263_v5 = vmul.f32 0.5, %v4199_v17 }
 0x911   : > { %4608 = vmatprep.mubr.bf16.mxu0 %v4374_v25  ;;  %v4373_v63 = vpack.c.bf16 %v4323_v59, %v4321_v44  ;;  %v4266_v21 = vmul.f32 0.5, %v4202_v57  ;;  %v4261_v48 = vmul.f32 0.5, %v4197_v1 }
 0x912   : > { %v6601_v24 = vpop.eup %6600  ;;  %v4376_v53 = vpack.c.bf16 %v4328_v37, %v4326_v45  ;;  %v4327_v23 = vmul.f32 %v4263_v5, %v8979_v56 }
 0x913   : > { %v4330_v35 = vmul.f32 %v4266_v21, %v9001_v49  ;;  %v4325_v18 = vmul.f32 %v4261_v48, %v8950_v9  ;;  %v4201_v38 = vadd.f32 1.0, %v6601_v24 }
 0x914   : > { %v6603_v31 = vpop.eup %6602 }
 0x915   : > { %v6605_v47 = vpop.eup %6604  ;;  %v4204_v0 = vadd.f32 1.0, %v6603_v31  ;;  %v4375_v62 = vpack.c.bf16 %v4327_v23, %v4325_v18  ;;  %v4265_v7 = vmul.f32 0.5, %v4201_v38 }
 0x916   : > { %4609 = vmatmul.mubr.bf16.gmra.mxu0 %v4373_v63  ;;  %v4203_v52 = vadd.f32 1.0, %v6605_v47 }
 0x917   : > { %v6607_v15 = vpop.eup %6606  ;;  %4616 = vmatprep.mubr.bf16.mxu0 %v4376_v53  ;;  %v4268_v16 = vmul.f32 0.5, %v4204_v0  ;;  %v4329_v39 = vmul.f32 %v4265_v7, %v8993_v26 }
 0x918   : > { %v4206_v43 = vadd.f32 1.0, %v6607_v15  ;;  %v4267_v4 = vmul.f32 0.5, %v4203_v52 }
 0x919   : > { %v4332_v58 = vmul.f32 %v4268_v16, %v9034_v12 }
 0x91a   : > { %v6609_v61 = vpop.eup %6608  ;;  %v4270_v41 = vmul.f32 0.5, %v4206_v43  ;;  %v4331_v49 = vmul.f32 %v4267_v4, %v9021_v50 }
 0x91b   : > { %v4378_v28 = vpack.c.bf16 %v4332_v58, %v4330_v35  ;;  %v4208_v32 = vadd.f32 1.0, %v6609_v61  ;;  %v6611_v3 = vpop.eup %6610 }
 0x91c   : > { %v4207_v6 = vadd.f32 1.0, %v6611_v3  ;;  %v4334_v9 = vmul.f32 %v4270_v41, %v9046_v19  ;;  %v4377_v27 = vpack.c.bf16 %v4331_v49, %v4329_v39 }
 0x91d   : > { %v4272_v14 = vmul.f32 0.5, %v4208_v32  ;;  %v6613_v56 = vpop.eup %6612 }
 0x91e   : > { %4617 = vmatmul.mubr.bf16.gmra.mxu0 %v4375_v62  ;;  %v4205_v55 = vadd.f32 1.0, %v6613_v56  ;;  %v4271_v11 = vmul.f32 0.5, %v4207_v6 }
 0x91f   : > { %4624 = vmatprep.mubr.bf16.mxu0 %v4378_v28  ;;  %v4336_v12 = vmul.f32 %v4272_v14, %v9062_v30 }
 0x920   : > { %v4269_v34 = vmul.f32 0.5, %v4205_v55  ;;  %v4335_v8 = vmul.f32 %v4271_v11, %v9056_v10 }
 0x921   : > { %v4380_v2 = vpack.c.bf16 %v4336_v12, %v4334_v9 }
 0x922   : > { %v4333_v59 = vmul.f32 %v4269_v34, %v9037_v60 }
 0x924   : > { %v4379_v17 = vpack.c.bf16 %v4335_v8, %v4333_v59 }
 0x926   : > { %4625 = vmatmul.mubr.bf16.gmra.mxu0 %v4377_v27 }
 0x927   : > { %4632 = vmatprep.mubr.bf16.mxu0 %v4380_v2 }
 0x92e   : > { %4633 = vmatmul.mubr.bf16.gmra.mxu0 %v4379_v17 }
 0x93a   : > { %v3726_v50 = vpop.f32.mrf.mxu1 }
 0x93b   : > { %v9098_v30 = vadd.f32 %v3726_v50, %v8738_v36 }
 0x93c   : > { %v3728_v19 = vpop.f32.mrf.mxu1 }
 0x93d   : > { %v3825_v26 = vmul.f32 %v9098_v30, %v9098_v30  ;;  %v9103_v25 = vadd.f32 %v3728_v19, %v8742_v29 }
 0x93e   : > { %v3730_v45 = vpop.f32.mrf.mxu1 }
 0x93f   : > { %v3889_v37 = vmul.f32 %v3825_v26, %v9098_v30  ;;  %v3826_v10 = vmul.f32 %v9103_v25, %v9103_v25  ;;  %v9109_v60 = vadd.f32 %v3730_v45, %v8738_v36 }
 0x940   : > { %v3732_v57 = vpop.f32.mrf.mxu1 }
 0x941   : > { %v3953_v44 = vmul.f32 0.044715, %v3889_v37  ;;  %v3890_v1 = vmul.f32 %v3826_v10, %v9103_v25  ;;  %v3827_v24 = vmul.f32 %v9109_v60, %v9109_v60  ;;  %v9115_v53 = vadd.f32 %v3732_v57, %v8742_v29 }
 0x942   : > { %v3736_v31 = vpop.f32.mrf.mxu1 }
 0x943   : > { %v4017_v5 = vadd.f32 %v3953_v44, %v9098_v30  ;;  %v3891_v63 = vmul.f32 %v3827_v24, %v9109_v60  ;;  %v3828_v47 = vmul.f32 %v9115_v53, %v9115_v53  ;;  %v3954_v0 = vmul.f32 0.044715, %v3890_v1 }
 0x944   : > { %v9122_v21 = vadd.f32 %v3736_v31, %v8738_v36  ;;  %v3738_v48 = vpop.f32.mrf.mxu1 }
 0x945   : > { %v4081_v15 = vmul.f32 0.7978846, %v4017_v5  ;;  %v3955_v16 = vmul.f32 0.044715, %v3891_v63  ;;  %v3892_v23 = vmul.f32 %v3828_v47, %v9115_v53  ;;  %v9128_v35 = vadd.f32 %v3738_v48, %v8742_v29 }
 0x946   : > { %v3829_v52 = vmul.f32 %v9122_v21, %v9122_v21  ;;  %v3740_v58 = vpop.f32.mrf.mxu1  ;;  %v4018_v18 = vadd.f32 %v3954_v0, %v9103_v25 }
 0x947   : > { %v4019_v43 = vadd.f32 %v3955_v16, %v9109_v60  ;;  %v3830_v61 = vmul.f32 %v9128_v35, %v9128_v35  ;;  %v9136_v28 = vadd.f32 %v3740_v58, %v8738_v36  ;;  %6614 = vtanh.f32 %v4081_v15 }
 0x948   : > { %v3893_v38 = vmul.f32 %v3829_v52, %v9122_v21  ;;  %v3742_v4 = vpop.f32.mrf.mxu1  ;;  %v3956_v62 = vmul.f32 0.044715, %v3892_v23  ;;  %v4082_v6 = vmul.f32 0.7978846, %v4018_v18 }
 0x949   : > { %v9139_v32 = vadd.f32 %v3742_v4, %v8742_v29  ;;  %v4083_v3 = vmul.f32 0.7978846, %v4019_v43  ;;  %v3831_v41 = vmul.f32 %v9136_v28, %v9136_v28  ;;  %v3894_v14 = vmul.f32 %v3830_v61, %v9128_v35 }
 0x94a   : > { %v3957_v7 = vmul.f32 0.044715, %v3893_v38  ;;  %v4020_v39 = vadd.f32 %v3956_v62, %v9115_v53 }
 0x94b   : > { %v3832_v56 = vmul.f32 %v9139_v32, %v9139_v32  ;;  %v3746_v49 = vpop.f32.mrf.mxu1  ;;  %v3895_v12 = vmul.f32 %v3831_v41, %v9136_v28  ;;  %6616 = vtanh.f32 %v4083_v3  ;;  %v3958_v8 = vmul.f32 0.044715, %v3894_v14 }
 0x94c   : > { %v9148_v9 = vadd.f32 %v3746_v49, %v8738_v36  ;;  %v4021_v34 = vadd.f32 %v3957_v7, %v9122_v21  ;;  %6618 = vtanh.f32 %v4082_v6  ;;  %v4084_v26 = vmul.f32 0.7978846, %v4020_v39 }
 0x94d   : > { %v3896_v55 = vmul.f32 %v3832_v56, %v9139_v32  ;;  %v3748_v2 = vpop.f32.mrf.mxu1  ;;  %v3959_v11 = vmul.f32 0.044715, %v3895_v12  ;;  %v4022_v24 = vadd.f32 %v3958_v8, %v9128_v35 }
 0x94e   : > { %v3833_v27 = vmul.f32 %v9148_v9, %v9148_v9  ;;  %v9156_v59 = vadd.f32 %v3748_v2, %v8742_v29  ;;  %v4085_v1 = vmul.f32 0.7978846, %v4021_v34  ;;  %6620 = vtanh.f32 %v4084_v26 }
 0x94f   : > { %v3750_v17 = vpop.f32.mrf.mxu1  ;;  %v4023_v50 = vadd.f32 %v3959_v11, %v9136_v28  ;;  %v3960_v45 = vmul.f32 0.044715, %v3896_v55  ;;  %v4086_v61 = vmul.f32 0.7978846, %v4022_v24 }
 0x950   : > { %v3897_v19 = vmul.f32 %v3833_v27, %v9148_v9  ;;  %v3834_v37 = vmul.f32 %v9156_v59, %v9156_v59  ;;  %v9163_v10 = vadd.f32 %v3750_v17, %v8738_v36  ;;  %6622 = vtanh.f32 %v4085_v1 }
 0x951   : > { %v3752_v57 = vpop.f32.mrf.mxu1  ;;  %v4087_v47 = vmul.f32 0.7978846, %v4023_v50  ;;  %v4024_v15 = vadd.f32 %v3960_v45, %v9139_v32 }
 0x952   : > { %v9166_v44 = vadd.f32 %v3752_v57, %v8742_v29  ;;  %v3898_v31 = vmul.f32 %v3834_v37, %v9156_v59  ;;  %v3835_v5 = vmul.f32 %v9163_v10, %v9163_v10  ;;  %v3961_v0 = vmul.f32 0.044715, %v3897_v19 }
 0x953   : > { %v3756_v63 = vpop.f32.mrf.mxu1  ;;  %6624 = vtanh.f32 %v4087_v47  ;;  %v4088_v56 = vmul.f32 0.7978846, %v4024_v15 }
 0x954   : > { %v3836_v48 = vmul.f32 %v9166_v44, %v9166_v44  ;;  %v3899_v16 = vmul.f32 %v3835_v5, %v9163_v10  ;;  %v6615_v52 = vpop.eup %6614  ;;  %v3962_v58 = vmul.f32 0.044715, %v3898_v31  ;;  %v9178_v18 = vadd.f32 %v3756_v63, %v8738_v36 }
 0x955   : > { %v3758_v23 = vpop.f32.mrf.mxu1  ;;  %v4025_v3 = vadd.f32 %v3961_v0, %v9148_v9  ;;  %v4209_v14 = vadd.f32 1.0, %v6615_v52  ;;  %6626 = vtanh.f32 %v4086_v61 }
 0x956   : > { %v3900_v43 = vmul.f32 %v3836_v48, %v9166_v44  ;;  %v9181_v38 = vadd.f32 %v3758_v23, %v8742_v29  ;;  %v3963_v4 = vmul.f32 0.044715, %v3899_v16  ;;  %v4026_v6 = vadd.f32 %v3962_v58, %v9156_v59 }
 0x957   : > { %v3760_v62 = vpop.f32.mrf.mxu1  ;;  %v3837_v12 = vmul.f32 %v9178_v18, %v9178_v18  ;;  %v4089_v34 = vmul.f32 0.7978846, %v4025_v3  ;;  %6628 = vtanh.f32 %v4088_v56  ;;  %v4273_v57 = vmul.f32 0.5, %v4209_v14 }
 0x958   : > { %v3964_v41 = vmul.f32 0.044715, %v3900_v43  ;;  %v3838_v7 = vmul.f32 %v9181_v38, %v9181_v38  ;;  %v9191_v55 = vadd.f32 %v3760_v62, %v8738_v36  ;;  %v6617_v2 = vpop.eup %6616  ;;  %v4027_v11 = vadd.f32 %v3963_v4, %v9163_v10 }
 0x959   : > { %v3762_v49 = vpop.f32.mrf.mxu1  ;;  %v6619_v19 = vpop.eup %6618  ;;  %v4211_v1 = vadd.f32 1.0, %v6617_v2  ;;  %v4090_v24 = vmul.f32 0.7978846, %v4026_v6  ;;  %v3901_v31 = vmul.f32 %v3837_v12, %v9178_v18  ;;  %6630 = vtanh.f32 %v4089_v34 }
 0x95a   : > { %v3902_v39 = vmul.f32 %v3838_v7, %v9181_v38  ;;  %v9195_v27 = vadd.f32 %v3762_v49, %v8742_v29  ;;  %v4028_v8 = vadd.f32 %v3964_v41, %v9166_v44  ;;  %v3839_v17 = vmul.f32 %v9191_v55, %v9191_v55 }
 0x95b   : > { %v4091_v63 = vmul.f32 0.7978846, %v4027_v11  ;;  %v4210_v52 = vadd.f32 1.0, %v6619_v19  ;;  %v6621_v62 = vpop.eup %6620  ;;  %v9217_v3 = vmul.f32 %v4273_v57, %v9098_v30  ;;  %6632 = vtanh.f32 %v4090_v24 }
 0x95c   : > { %v3766_v50 = vpop.f32.mrf.mxu1  ;;  %v3966_v26 = vmul.f32 0.044715, %v3902_v39  ;;  %v3840_v45 = vmul.f32 %v9195_v27, %v9195_v27  ;;  %v3903_v47 = vmul.f32 %v3839_v17, %v9191_v55  ;;  %v4092_v15 = vmul.f32 0.7978846, %v4028_v8 }
 0x95d   : > { %v9203_v37 = vadd.f32 %v3766_v50, %v8738_v36  ;;  %v3965_v41 = vmul.f32 0.044715, %v3901_v31  ;;  %v4275_v56 = vmul.f32 0.5, %v4211_v1  ;;  %6634 = vtanh.f32 %v4091_v63  ;;  %v6623_v12 = vpop.eup %6622 }
 0x95e   : > { %v3768_v5 = vpop.f32.mrf.mxu1  ;;  %v3904_v0 = vmul.f32 %v3840_v45, %v9195_v27  ;;  %v4030_v58 = vadd.f32 %v3966_v26, %v9181_v38  ;;  %v3967_v43 = vmul.f32 0.044715, %v3903_v47  ;;  %6636 = vtanh.f32 %v4092_v15 }
 0x95f   : > { %v9209_v48 = vadd.f32 %v3768_v5, %v8742_v29  ;;  %v3841_v16 = vmul.f32 %v9203_v37, %v9203_v37  ;;  %v4212_v19 = vadd.f32 1.0, %v6621_v62  ;;  %v4029_v26 = vadd.f32 %v3965_v41, %v9178_v18 }
 0x960   : > { %v3770_v23 = vpop.f32.mrf.mxu1  ;;  %v3968_v61 = vmul.f32 0.044715, %v3904_v0  ;;  %v6625_v34 = vpop.eup %6624  ;;  %v4094_v8 = vmul.f32 0.7978846, %v4030_v58  ;;  %v4031_v17 = vadd.f32 %v3967_v43, %v9191_v55  ;;  %v4213_v31 = vadd.f32 1.0, %v6623_v12 }
 0x961   : > { %v3842_v4 = vmul.f32 %v9209_v48, %v9209_v48  ;;  %v9220_v7 = vadd.f32 %v3770_v23, %v8738_v36  ;;  %v3905_v39 = vmul.f32 %v3841_v16, %v9203_v37  ;;  %v4274_v47 = vmul.f32 0.5, %v4210_v52 }
 0x962   : > { %v3772_v14 = vpop.f32.mrf.mxu1  ;;  %v4032_v49 = vadd.f32 %v3968_v61, %v9195_v27  ;;  %v4339_v0 = vmul.f32 %v4275_v56, %v9109_v60  ;;  %v4215_v15 = vadd.f32 1.0, %v6625_v34  ;;  %v6627_v43 = vpop.eup %6626  ;;  %6638 = vtanh.f32 %v4094_v8 }
 0x963   : > { %v3906_v6 = vmul.f32 %v3842_v4, %v9209_v48  ;;  %v3843_v30 = vmul.f32 %v9220_v7, %v9220_v7  ;;  %v9228_v2 = vadd.f32 %v3772_v14, %v8742_v29  ;;  %v3969_v16 = vmul.f32 0.044715, %v3905_v39 }
 0x964   : > { %v3776_v11 = vpop.f32.mrf.mxu1  ;;  %v4096_v45 = vmul.f32 0.7978846, %v4032_v49  ;;  %v4095_v61 = vmul.f32 0.7978846, %v4031_v17  ;;  %v4276_v62 = vmul.f32 0.5, %v4212_v19  ;;  %v6629_v41 = vpop.eup %6628  ;;  %v4277_v12 = vmul.f32 0.5, %v4213_v31 }
 0x965   : > { %v3970_v50 = vmul.f32 0.044715, %v3906_v6  ;;  %v3907_v57 = vmul.f32 %v3843_v30, %v9220_v7  ;;  %v3844_v1 = vmul.f32 %v9228_v2, %v9228_v2  ;;  %v9237_v63 = vadd.f32 %v3776_v11, %v8738_v36 }
 0x966   : > { %v3778_v24 = vpop.f32.mrf.mxu1  ;;  %v4093_v14 = vmul.f32 0.7978846, %v4029_v26  ;;  %6640 = vtanh.f32 %v4096_v45  ;;  %v4338_v60 = vmul.f32 %v4274_v47, %v9103_v25  ;;  %v4340_v56 = vmul.f32 %v4276_v62, %v9115_v53  ;;  %v6631_v17 = vpop.eup %6630 }
 0x967   : > { %v4034_v5 = vadd.f32 %v3970_v50, %v9209_v48  ;;  %v3908_v23 = vmul.f32 %v3844_v1, %v9228_v2  ;;  %v3971_v4 = vmul.f32 0.044715, %v3907_v57  ;;  %v3845_v52 = vmul.f32 %v9237_v63, %v9237_v63 }
 0x968   : > { %v3780_v58 = vpop.f32.mrf.mxu1  ;;  %v4279_v39 = vmul.f32 0.5, %v4215_v15  ;;  %v4033_v30 = vadd.f32 %v3969_v16, %v9203_v37  ;;  %v9248_v34 = vadd.f32 %v3778_v24, %v8742_v29  ;;  %6642 = vtanh.f32 %v4095_v61  ;;  %v6633_v57 = vpop.eup %6632 }
 0x969   : > { %v4098_v49 = vmul.f32 0.7978846, %v4034_v5  ;;  %v3972_v6 = vmul.f32 0.044715, %v3908_v23  ;;  %v4035_v50 = vadd.f32 %v3971_v4, %v9220_v7  ;;  %v4382_v19 = vpack.c.bf16 %v4340_v56, %v4338_v60 }
 0x96a   : > { %v3782_v8 = vpop.f32.mrf.mxu1  ;;  %v9252_v26 = vadd.f32 %v3780_v58, %v8738_v36  ;;  %v3846_v53 = vmul.f32 %v9248_v34, %v9248_v34  ;;  %v4381_v45 = vpack.c.bf16 %v4339_v0, %v9217_v3  ;;  %v3909_v1 = vmul.f32 %v3845_v52, %v9237_v63  ;;  %v6635_v36 = vpop.eup %6634 }
 0x96b   : > { %v4036_v11 = vadd.f32 %v3972_v6, %v9228_v2  ;;  %6644 = vtanh.f32 %v4098_v49  ;;  %4640 = vmatprep.mubr.bf16.mxu0 %v4382_v19  ;;  %v9261_v31 = vadd.f32 %v3782_v8, %v8742_v29  ;;  %v4341_v5 = vmul.f32 %v4277_v12, %v9122_v21  ;;  %v6637_v3 = vpop.eup %6636 }
 0x96c   : > { %6646 = vtanh.f32 %v4093_v14  ;;  %v3847_v24 = vmul.f32 %v9252_v26, %v9252_v26  ;;  %v3910_v47 = vmul.f32 %v3846_v53, %v9248_v34  ;;  %4641 = vmatmul.mubr.bf16.gmra.mxu0 %v4381_v45  ;;  %v4214_v15 = vadd.f32 1.0, %v6627_v43 }
 0x96d   : > { %v4100_v25 = vmul.f32 0.7978846, %v4036_v11  ;;  %v4099_v0 = vmul.f32 0.7978846, %v4035_v50  ;;  %v3848_v23 = vmul.f32 %v9261_v31, %v9261_v31  ;;  %v4216_v58 = vadd.f32 1.0, %v6629_v41 }
 0x96e   : > { %v3911_v16 = vmul.f32 %v3847_v24, %v9252_v26  ;;  %v4343_v61 = vmul.f32 %v4279_v39, %v9136_v28  ;;  %v4097_v29 = vmul.f32 0.7978846, %v4033_v30  ;;  %v3974_v4 = vmul.f32 0.044715, %v3910_v47 }
 0x96f   : > { %6648 = vtanh.f32 %v4100_v25  ;;  %v4278_v62 = vmul.f32 0.5, %v4214_v15  ;;  %v3973_v14 = vmul.f32 0.044715, %v3909_v1  ;;  %v3912_v49 = vmul.f32 %v3848_v23, %v9261_v31  ;;  %v6639_v28 = vpop.eup %6638 }
 0x970   : > { %v3975_v21 = vmul.f32 0.044715, %v3911_v16  ;;  %v4280_v6 = vmul.f32 0.5, %v4216_v58  ;;  %v4219_v12 = vadd.f32 1.0, %v6635_v36  ;;  %v4038_v43 = vadd.f32 %v3974_v4, %v9248_v34 }
 0x971   : > { %v4218_v52 = vadd.f32 1.0, %v6633_v57  ;;  %v4220_v60 = vadd.f32 1.0, %v6637_v3  ;;  %6650 = vtanh.f32 %v4099_v0  ;;  %v3976_v11 = vmul.f32 0.044715, %v3912_v49 }
 0x972   : > { %v4039_v56 = vadd.f32 %v3975_v21, %v9252_v26  ;;  %v4344_v41 = vmul.f32 %v4280_v6, %v9139_v32  ;;  %v4102_v39 = vmul.f32 0.7978846, %v4038_v43  ;;  %v4342_v30 = vmul.f32 %v4278_v62, %v9128_v35 }
 0x973   : > { %v4282_v8 = vmul.f32 0.5, %v4218_v52  ;;  %v4284_v50 = vmul.f32 0.5, %v4220_v60  ;;  %v6641_v19 = vpop.eup %6640  ;;  %v4217_v25 = vadd.f32 1.0, %v6631_v17  ;;  %6652 = vtanh.f32 %v4097_v29 }
 0x974   : > { %v4037_v53 = vadd.f32 %v3973_v14, %v9237_v63  ;;  %v4040_v45 = vadd.f32 %v3976_v11, %v9261_v31  ;;  %6654 = vtanh.f32 %v4102_v39  ;;  %v4384_v57 = vpack.c.bf16 %v4344_v41, %v4342_v30 }
 0x975   : > { %v4346_v1 = vmul.f32 %v4282_v8, %v9156_v59  ;;  %v4348_v24 = vmul.f32 %v4284_v50, %v9166_v44  ;;  %v4283_v32 = vmul.f32 0.5, %v4219_v12  ;;  %v4103_v36 = vmul.f32 0.7978846, %v4039_v56  ;;  %v6643_v35 = vpop.eup %6642 }
 0x976   : > { %v4104_v47 = vmul.f32 0.7978846, %v4040_v45  ;;  %v4383_v15 = vpack.c.bf16 %v4343_v61, %v4341_v5  ;;  %4648 = vmatprep.mubr.bf16.mxu0 %v4384_v57  ;;  %v4222_v0 = vadd.f32 1.0, %v6639_v28  ;;  %v4224_v17 = vadd.f32 1.0, %v6641_v19 }
 0x977   : > { %v4386_v3 = vpack.c.bf16 %v4348_v24, %v4346_v1  ;;  %v4281_v23 = vmul.f32 0.5, %v4217_v25  ;;  %v4101_v58 = vmul.f32 0.7978846, %v4037_v53  ;;  %v4347_v44 = vmul.f32 %v4283_v32, %v9163_v10 }
 0x978   : > { %v6645_v16 = vpop.eup %6644  ;;  %6656 = vtanh.f32 %v4104_v47  ;;  %4649 = vmatmul.mubr.bf16.gmra.mxu0 %v4383_v15  ;;  %v4286_v4 = vmul.f32 0.5, %v4222_v0  ;;  %v4288_v59 = vmul.f32 0.5, %v4224_v17  ;;  %v4223_v14 = vadd.f32 1.0, %v6643_v35 }
 0x979   : > { %v6647_v29 = vpop.eup %6646  ;;  %4656 = vmatprep.mubr.bf16.mxu0 %v4386_v3  ;;  %6658 = vtanh.f32 %v4103_v36  ;;  %v4226_v21 = vadd.f32 1.0, %v6645_v16  ;;  %v4345_v6 = vmul.f32 %v4281_v23, %v9148_v9 }
 0x97a   : > { %v4350_v5 = vmul.f32 %v4286_v4, %v9181_v38  ;;  %v4352_v61 = vmul.f32 %v4288_v59, %v9195_v27  ;;  %v4221_v12 = vadd.f32 1.0, %v6647_v29  ;;  %6660 = vtanh.f32 %v4101_v58 }
 0x97b   : > { %v4287_v60 = vmul.f32 0.5, %v4223_v14  ;;  %v4385_v56 = vpack.c.bf16 %v4347_v44, %v4345_v6  ;;  %v4290_v41 = vmul.f32 0.5, %v4226_v21 }
 0x97c   : > { %v6649_v62 = vpop.eup %6648  ;;  %v4388_v43 = vpack.c.bf16 %v4352_v61, %v4350_v5  ;;  %v4285_v28 = vmul.f32 0.5, %v4221_v12 }
 0x97d   : > { %v4228_v49 = vadd.f32 1.0, %v6649_v62  ;;  %v4351_v27 = vmul.f32 %v4287_v60, %v9191_v55  ;;  %v4354_v9 = vmul.f32 %v4290_v41, %v9209_v48 }
 0x97e   : > { %v6651_v11 = vpop.eup %6650  ;;  %v4349_v50 = vmul.f32 %v4285_v28, %v9178_v18 }
 0x97f   : > { %v4292_v52 = vmul.f32 0.5, %v4228_v49  ;;  %v4227_v30 = vadd.f32 1.0, %v6651_v11 }
 0x980   : > { %4657 = vmatmul.mubr.bf16.gmra.mxu0 %v4385_v56  ;;  %v6653_v10 = vpop.eup %6652  ;;  %v4387_v57 = vpack.c.bf16 %v4351_v27, %v4349_v50 }
 0x981   : > { %4664 = vmatprep.mubr.bf16.mxu0 %v4388_v43  ;;  %v4356_v38 = vmul.f32 %v4292_v52, %v9228_v2  ;;  %v6655_v39 = vpop.eup %6654  ;;  %v4225_v19 = vadd.f32 1.0, %v6653_v10  ;;  %v4291_v45 = vmul.f32 0.5, %v4227_v30 }
 0x982   : > { %v4230_v8 = vadd.f32 1.0, %v6655_v39 }
 0x983   : > { %v4390_v53 = vpack.c.bf16 %v4356_v38, %v4354_v9  ;;  %v4289_v36 = vmul.f32 0.5, %v4225_v19  ;;  %v4355_v55 = vmul.f32 %v4291_v45, %v9220_v7  ;;  %v9296_v7 = vld [vmem:[%s743_s2] ss:$0 sm:$0xff] }
 0x984   : > { %v4294_v32 = vmul.f32 0.5, %v4230_v8 }
 0x985   : > { %v6657_v25 = vpop.eup %6656  ;;  %v4353_v35 = vmul.f32 %v4289_v36, %v9203_v37 }
 0x986   : > { %v4232_v1 = vadd.f32 1.0, %v6657_v25  ;;  %v6659_v24 = vpop.eup %6658  ;;  %v4358_v18 = vmul.f32 %v4294_v32, %v9248_v34 }
 0x987   : > { %v6661_v47 = vpop.eup %6660  ;;  %v4231_v48 = vadd.f32 1.0, %v6659_v24  ;;  %v4389_v16 = vpack.c.bf16 %v4355_v55, %v4353_v35  ;;  %v10120_v35 = vld [vmem:[#allocation14_spill] sm:$0xff] }
 0x988   : > { %4665 = vmatmul.mubr.bf16.gmra.mxu0 %v4387_v57  ;;  %v4296_v2 = vmul.f32 0.5, %v4232_v1  ;;  %v4229_v3 = vadd.f32 1.0, %v6661_v47 }
 0x989   : > { %4672 = vmatprep.mubr.bf16.mxu0 %v4390_v53  ;;  %v4295_v17 = vmul.f32 0.5, %v4231_v48 }
 0x98a   : > { %v4360_v15 = vmul.f32 %v4296_v2, %v9261_v31  ;;  %v4293_v23 = vmul.f32 0.5, %v4229_v3 }
 0x98b   : > { %v4359_v29 = vmul.f32 %v4295_v17, %v9252_v26 }
 0x98c   : > { %v4392_v0 = vpack.c.bf16 %v4360_v15, %v4358_v18  ;;  %v4357_v37 = vmul.f32 %v4293_v23, %v9237_v63  ;;  %v10121_v23 = vld [vmem:[#allocation13_spill] sm:$0xff] }
 0x98e   : > { %v4391_v62 = vpack.c.bf16 %v4359_v29, %v4357_v37  ;;  %v10122_v37 = vld [vmem:[#allocation22_spill] sm:$0xff] }
 0x990   : > { %4673 = vmatmul.mubr.bf16.gmra.mxu0 %v4389_v16 }
 0x991   : > { %v5774_v58 = vpop.f32.mrf.mxu0  ;;  %4680 = vmatprep.mubr.bf16.mxu0 %v4392_v0 }
 0x993   : > { %v5775_v31 = vpop.f32.mrf.mxu0 }
 0x994   : > { %v5776_v34 = vadd.f32 %v5775_v31, %v5774_v58 }
 0x995   : > { %v5777_v4 = vpop.f32.mrf.mxu0 }
 0x996   : > { %v4563_v59 = vadd.f32 %v5776_v34, %v9296_v7 }
 0x997   : > { %v5778_v44 = vpop.f32.mrf.mxu0 }
 0x998   : > { %v5779_v14 = vadd.f32 %v5778_v44, %v5777_v4  ;;  %v9301_v5 = vadd.f32 %v4563_v59, %v8482_v22  ;;  %4681 = vmatmul.mubr.bf16.gmra.mxu0 %v4391_v62 }
 0x99a   : > { %v4566_v26 = vadd.f32 %v5779_v14, %v9296_v7  ;;  %4723 = vadd.xlane.f32.xlu0 %v9301_v5 }
 0x99c   : > { %v9306_v61 = vadd.f32 %v4566_v26, %v8485_v20  ;;  %v10123_v26 = vld [vmem:[#allocation21_spill] sm:$0xff] }
 0x99e   : > { %4725 = vadd.xlane.f32.xlu1 %v9306_v61 }
 0x9a4   : > { %v5780_v63 = vpop.f32.mrf.mxu0 }
 0x9a6   : > { %v5781_v21 = vpop.f32.mrf.mxu0 }
 0x9a7   : > { %v5782_v49 = vadd.f32 %v5781_v21, %v5780_v63 }
 0x9a8   : > { %v5783_v6 = vpop.f32.mrf.mxu0 }
 0x9a9   : > { %v4571_v12 = vadd.f32 %v5782_v49, %v9296_v7 }
 0x9aa   : > { %v5784_v43 = vpop.f32.mrf.mxu0 }
 0x9ab   : > { %v5785_v52 = vadd.f32 %v5784_v43, %v5783_v6  ;;  %v9311_v22 = vadd.f32 %v4571_v12, %v8505_v42  ;;  %v10124_v43 = vld [vmem:[#allocation16_spill] sm:$0xff] }
 0x9ad   : > { %v4574_v60 = vadd.f32 %v5785_v52, %v9296_v7  ;;  %4727 = vadd.xlane.f32.xlu0 %v9311_v22 }
 0x9af   : > { %v9316_v20 = vadd.f32 %v4574_v60, %v8508_v40 }
 0x9b1   : > { %v5786_v56 = vpop.f32.mrf.mxu0  ;;  %4729 = vadd.xlane.f32.xlu1 %v9316_v20 }
 0x9b3   : > { %v5787_v11 = vpop.f32.mrf.mxu0 }
 0x9b4   : > { %v5788_v41 = vadd.f32 %v5787_v11, %v5786_v56 }
 0x9b5   : > { %v5789_v28 = vpop.f32.mrf.mxu0 }
 0x9b6   : > { %v4579_v10 = vadd.f32 %v5788_v41, %v9296_v7 }
 0x9b7   : > { %v5790_v38 = vpop.f32.mrf.mxu0 }
 0x9b8   : > { %v5791_v39 = vadd.f32 %v5790_v38, %v5789_v28  ;;  %v9321_v42 = vadd.f32 %v4579_v10, %v8528_v54  ;;  %v10125_v28 = vld [vmem:[#allocation19_spill] sm:$0xff] }
 0x9ba   : > { %v4582_v27 = vadd.f32 %v5791_v39, %v9296_v7  ;;  %4731 = vadd.xlane.f32.xlu0 %v9321_v42 }
 0x9bc   : > { %v9326_v40 = vadd.f32 %v4582_v27, %v8531_v51 }
 0x9be   : > { %v5792_v30 = vpop.f32.mrf.mxu0  ;;  %4733 = vadd.xlane.f32.xlu1 %v9326_v40 }
 0x9c0   : > { %v5793_v9 = vpop.f32.mrf.mxu0 }
 0x9c1   : > { %v5794_v8 = vadd.f32 %v5793_v9, %v5792_v30  ;;  %v10126_v9 = vld [vmem:[#allocation15_spill] sm:$0xff] }
 0x9c2   : > { %v5795_v50 = vpop.f32.mrf.mxu0 }
 0x9c3   : > { %v4587_v19 = vadd.f32 %v5794_v8, %v9296_v7 }
 0x9c4   : > { %v5796_v25 = vpop.f32.mrf.mxu0 }
 0x9c5   : > { %v5797_v53 = vadd.f32 %v5796_v25, %v5795_v50  ;;  %v9331_v54 = vadd.f32 %v4587_v19, %v8551_v46 }
 0x9c6   : > { %v5798_v45 = vpop.f32.mrf.mxu0 }
 0x9c7   : > { %v4590_v57 = vadd.f32 %v5797_v53, %v9296_v7  ;;  %4735 = vadd.xlane.f32.xlu0 %v9331_v54 }
 0x9c8   : > { %v5799_v51 = vpop.f32.mrf.mxu0 }
 0x9c9   : > { %v5800_v1 = vadd.f32 %v5799_v51, %v5798_v45  ;;  %v9336_v24 = vadd.f32 %v4590_v57, %v8554_v33  ;;  %v10127_v45 = vld [vmem:[#allocation24_spill] sm:$0xff] }
 0x9ca   : > { %v5801_v32 = vpop.f32.mrf.mxu0 }
 0x9cb   : > { %v4595_v36 = vadd.f32 %v5800_v1, %v9296_v7  ;;  %4737 = vadd.xlane.f32.xlu1 %v9336_v24 }
 0x9cc   : > { %v5802_v2 = vpop.f32.mrf.mxu0 }
 0x9cd   : > { %v5803_v47 = vadd.f32 %v5802_v2, %v5801_v32  ;;  %v9341_v46 = vadd.f32 %v4595_v36, %v8569_v13  ;;  %v10128_v2 = vld [vmem:[#allocation20_spill] sm:$0xff] }
 0x9ce   : > { %v5804_v55 = vpop.f32.mrf.mxu0 }
 0x9cf   : > { %v4598_v48 = vadd.f32 %v5803_v47, %v9296_v7  ;;  %4739 = vadd.xlane.f32.xlu0 %v9341_v46 }
 0x9d0   : > { %v5805_v15 = vpop.f32.mrf.mxu0 }
 0x9d1   : > { %v5806_v18 = vadd.f32 %v5805_v15, %v5804_v55  ;;  %v9346_v33 = vadd.f32 %v4598_v48, %v10120_v35  ;;  %v10129_v35 = vld [vmem:[#allocation18_spill] sm:$0xff] }
 0x9d2   : > { %v5807_v3 = vpop.f32.mrf.mxu0 }
 0x9d3   : > { %v4603_v0 = vadd.f32 %v5806_v18, %v9296_v7  ;;  %4741 = vadd.xlane.f32.xlu1 %v9346_v33 }
 0x9d4   : > { %v5808_v17 = vpop.f32.mrf.mxu0 }
 0x9d5   : > { %v5809_v16 = vadd.f32 %v5808_v17, %v5807_v3  ;;  %v9351_v13 = vadd.f32 %v4603_v0, %v10121_v23  ;;  %v10130_v17 = vld [vmem:[#allocation23_spill] sm:$0xff] }
 0x9d6   : > { %v5810_v58 = vpop.f32.mrf.mxu0 }
 0x9d7   : > { %v4606_v29 = vadd.f32 %v5809_v16, %v9296_v7  ;;  %4743 = vadd.xlane.f32.xlu0 %v9351_v13 }
 0x9d8   : > { %v5811_v31 = vpop.f32.mrf.mxu0 }
 0x9d9   : > { %v5812_v34 = vadd.f32 %v5811_v31, %v5810_v58  ;;  %v9356_v4 = vadd.f32 %v4606_v29, %v10122_v37 }
 0x9da   : > { %v5813_v59 = vpop.f32.mrf.mxu0 }
 0x9db   : > { %v4611_v62 = vadd.f32 %v5812_v34, %v9296_v7  ;;  %4745 = vadd.xlane.f32.xlu1 %v9356_v4 }
 0x9dc   : > { %v5814_v44 = vpop.f32.mrf.mxu0 }
 0x9dd   : > { %v5815_v14 = vadd.f32 %v5814_v44, %v5813_v59  ;;  %v9361_v63 = vadd.f32 %v4611_v62, %v10123_v26  ;;  %v10131_v62 = vld [vmem:[#allocation17_spill] sm:$0xff] }
 0x9de   : > { %v5816_v21 = vpop.f32.mrf.mxu0 }
 0x9df   : > { %v4614_v49 = vadd.f32 %v5815_v14, %v9296_v7  ;;  %4747 = vadd.xlane.f32.xlu0 %v9361_v63 }
 0x9e0   : > { %v5817_v6 = vpop.f32.mrf.mxu0 }
 0x9e1   : > { %v5818_v12 = vadd.f32 %v5817_v6, %v5816_v21  ;;  %v9366_v52 = vadd.f32 %v4614_v49, %v10124_v43  ;;  %v10132_v21 = vld [vmem:[#allocation29_spill] sm:$0xff] }
 0x9e2   : > { %v5819_v60 = vpop.f32.mrf.mxu0 }
 0x9e3   : > { %v4619_v56 = vadd.f32 %v5818_v12, %v9296_v7  ;;  %4749 = vadd.xlane.f32.xlu1 %v9366_v52 }
 0x9e4   : > { %v5820_v11 = vpop.f32.mrf.mxu0 }
 0x9e5   : > { %v5821_v41 = vadd.f32 %v5820_v11, %v5819_v60  ;;  %v9371_v10 = vadd.f32 %v4619_v56, %v10125_v28 }
 0x9e6   : > { %v5822_v38 = vpop.f32.mrf.mxu0 }
 0x9e7   : > { %v4622_v39 = vadd.f32 %v5821_v41, %v9296_v7  ;;  %4751 = vadd.xlane.f32.xlu0 %v9371_v10  ;;  %v10133_v41 = vld [vmem:[#allocation27_spill] sm:$0xff] }
 0x9e8   : > { %v5823_v27 = vpop.f32.mrf.mxu0 }
 0x9e9   : > { %v5824_v30 = vadd.f32 %v5823_v27, %v5822_v38  ;;  %v9376_v8 = vadd.f32 %v4622_v39, %v10126_v9  ;;  %v10134_v9 = vld [vmem:[#allocation28_spill] sm:$0xff] }
 0x9ea   : > { %v5825_v50 = vpop.f32.mrf.mxu0 }
 0x9eb   : > { %v4627_v19 = vadd.f32 %v5824_v30, %v9296_v7  ;;  %4753 = vadd.xlane.f32.xlu1 %v9376_v8 }
 0x9ec   : > { %v5826_v25 = vpop.f32.mrf.mxu0 }
 0x9ed   : > { %v5827_v53 = vadd.f32 %v5826_v25, %v5825_v50  ;;  %v9381_v57 = vadd.f32 %v4627_v19, %v10127_v45 }
 0x9ee   : > { %v5828_v51 = vpop.f32.mrf.mxu0 }
 0x9ef   : > { %v4630_v1 = vadd.f32 %v5827_v53, %v9296_v7  ;;  %4755 = vadd.xlane.f32.xlu0 %v9381_v57 }
 0x9f0   : > { %v5829_v32 = vpop.f32.mrf.mxu0 }
 0x9f1   : > { %v5830_v36 = vadd.f32 %v5829_v32, %v5828_v51  ;;  %v9386_v47 = vadd.f32 %v4630_v1, %v10128_v2  ;;  %v10135_v51 = vld [vmem:[#allocation25_spill] sm:$0xff] }
 0x9f2   : > { %v5831_v55 = vpop.f32.mrf.mxu0 }
 0x9f3   : > { %v4635_v48 = vadd.f32 %v5830_v36, %v9296_v7  ;;  %4757 = vadd.xlane.f32.xlu1 %v9386_v47 }
 0x9f4   : > { %v5832_v15 = vpop.f32.mrf.mxu0 }
 0x9f5   : > { %v5833_v18 = vadd.f32 %v5832_v15, %v5831_v55  ;;  %v9391_v3 = vadd.f32 %v4635_v48, %v10129_v35  ;;  %v10136_v48 = vld [vmem:[#allocation26_spill] sm:$0xff] }
 0x9f7   : > { %v4638_v0 = vadd.f32 %v5833_v18, %v9296_v7  ;;  %4759 = vadd.xlane.f32.xlu0 %v9391_v3 }
 0x9f9   : > { %v9396_v16 = vadd.f32 %v4638_v0, %v10130_v17 }
 0x9fb   : > { %4761 = vadd.xlane.f32.xlu1 %v9396_v16 }
 0xa2c   : > { %v5834_v23 = vpop.f32.mrf.mxu0 }
 0xa2e   : > { %v5835_v58 = vpop.f32.mrf.mxu0 }
 0xa2f   : > { %v5836_v29 = vadd.f32 %v5835_v58, %v5834_v23  ;;  %v10137_v23 = vld [vmem:[#allocation30_spill] sm:$0xff] }
 0xa30   : > { %v5837_v31 = vpop.f32.mrf.mxu0 }
 0xa31   : > { %v4643_v34 = vadd.f32 %v5836_v29, %v9296_v7 }
 0xa32   : > { %v5838_v37 = vpop.f32.mrf.mxu0 }
 0xa33   : > { %v5839_v59 = vadd.f32 %v5838_v37, %v5837_v31  ;;  %v9401_v44 = vadd.f32 %v4643_v34, %v10131_v62 }
 0xa35   : > { %v4646_v14 = vadd.f32 %v5839_v59, %v9296_v7  ;;  %4763 = vadd.xlane.f32.xlu0 %v9401_v44  ;;  %v10138_v59 = vld [vmem:[#allocation31_spill] sm:$0xff] }
 0xa37   : > { %v9406_v49 = vadd.f32 %v4646_v14, %v10132_v21 }
 0xa38   : > { %v5840_v26 = vpop.f32.mrf.mxu0 }
 0xa39   : > { %4765 = vadd.xlane.f32.xlu1 %v9406_v49 }
 0xa3a   : > { %v5841_v6 = vpop.f32.mrf.mxu0 }
 0xa3b   : > { %v5842_v12 = vadd.f32 %v5841_v6, %v5840_v26  ;;  %v4724_v6 = vpop.xlane.xlu0 %4723 }
 0xa3c   : > { %v5843_v43 = vpop.f32.mrf.mxu0 }
 0xa3d   : > { %v4651_v60 = vadd.f32 %v5842_v12, %v9296_v7 }
 0xa3e   : > { %v5844_v56 = vpop.f32.mrf.mxu0 }
 0xa3f   : > { %v5845_v11 = vadd.f32 %v5844_v56, %v5843_v43  ;;  %v9411_v28 = vadd.f32 %v4651_v60, %v10133_v41  ;;  %v10139_v43 = vld [vmem:[#allocation32_spill] sm:$0xff]  ;;  %v4787_v41 = vmul.f32 0.0078125, %v4724_v6 }
 0xa40   : > { %v5846_v38 = vpop.f32.mrf.mxu0 }
 0xa41   : > { %v4654_v39 = vadd.f32 %v5845_v11, %v9296_v7  ;;  %4767 = vadd.xlane.f32.xlu0 %v9411_v28 }
 0xa42   : > { %v5847_v27 = vpop.f32.mrf.mxu0 }
 0xa43   : > { %v5848_v30 = vadd.f32 %v5847_v27, %v5846_v38  ;;  %v9416_v50 = vadd.f32 %v4654_v39, %v10134_v9  ;;  %v4726_v39 = vpop.xlane.xlu1 %4725 }
 0xa44   : > { %v5849_v19 = vpop.f32.mrf.mxu0 }
 0xa45   : > { %v4659_v25 = vadd.f32 %v5848_v30, %v9296_v7  ;;  %4769 = vadd.xlane.f32.xlu1 %v9416_v50  ;;  %v10140_v30 = vld [vmem:[#allocation33_spill] sm:$0xff] }
 0xa46   : > { %v5850_v53 = vpop.f32.mrf.mxu0 }
 0xa47   : > { %v5851_v45 = vadd.f32 %v5850_v53, %v5849_v19  ;;  %v9421_v1 = vadd.f32 %v4659_v25, %v10135_v51  ;;  %v4728_v19 = vpop.xlane.xlu0 %4727  ;;  %v4788_v51 = vmul.f32 0.0078125, %v4726_v39 }
 0xa48   : > { %v5852_v32 = vpop.f32.mrf.mxu0 }
 0xa49   : > { %v4662_v36 = vadd.f32 %v5851_v45, %v9296_v7  ;;  %4771 = vadd.xlane.f32.xlu0 %v9421_v1  ;;  %v9451_v45 = vsub.f32 %v9301_v5, %v4787_v41 }
 0xa4a   : > { %v5853_v2 = vpop.f32.mrf.mxu0 }
 0xa4b   : > { %v5854_v55 = vadd.f32 %v5853_v2, %v5852_v32  ;;  %v9426_v15 = vadd.f32 %v4662_v36, %v10136_v48  ;;  %v4789_v36 = vmul.f32 0.0078125, %v4728_v19  ;;  %v4730_v2 = vpop.xlane.xlu1 %4729  ;;  %v10141_v48 = vld [vmem:[#allocation34_spill] sm:$0xff]  ;;  %v4851_v5 = vmul.f32 %v9451_v45, %v9451_v45 }
 0xa4c   : > { %v5855_v18 = vpop.f32.mrf.mxu0 }
 0xa4d   : > { %v4667_v35 = vadd.f32 %v5854_v55, %v9296_v7  ;;  %4773 = vadd.xlane.f32.xlu1 %v9426_v15 }
 0xa4e   : > { %v5856_v0 = vpop.f32.mrf.mxu0 }
 0xa4f   : > { %v5857_v17 = vadd.f32 %v5856_v0, %v5855_v18  ;;  %v9431_v58 = vadd.f32 %v4667_v35, %v10137_v23  ;;  %v4732_v35 = vpop.xlane.xlu0 %4731  ;;  %v9464_v23 = vsub.f32 %v9311_v22, %v4789_v36 }
 0xa50   : > { %v5858_v29 = vpop.f32.mrf.mxu0 }
 0xa51   : > { %v4670_v31 = vadd.f32 %v5857_v17, %v9296_v7  ;;  %4775 = vadd.xlane.f32.xlu0 %v9431_v58  ;;  %v9459_v17 = vsub.f32 %v9306_v61, %v4788_v51 }
 0xa52   : > { %v5859_v34 = vpop.f32.mrf.mxu0 }
 0xa53   : > { %v5860_v37 = vadd.f32 %v5859_v34, %v5858_v29  ;;  %v9436_v62 = vadd.f32 %v4670_v31, %v10138_v59  ;;  %v4790_v29 = vmul.f32 0.0078125, %v4730_v2  ;;  %v4791_v31 = vmul.f32 0.0078125, %v4732_v35  ;;  %v4734_v34 = vpop.xlane.xlu1 %4733 }
 0xa54   : > { %v5861_v14 = vpop.f32.mrf.mxu0  ;;  %v4852_v61 = vmul.f32 %v9459_v17, %v9459_v17 }
 0xa55   : > { %v4675_v26 = vadd.f32 %v5860_v37, %v9296_v7  ;;  %4777 = vadd.xlane.f32.xlu1 %v9436_v62  ;;  %v10142_v37 = vld [vmem:[#allocation35_spill] sm:$0xff]  ;;  %v9476_v22 = vsub.f32 %v9321_v42, %v4791_v31 }
 0xa56   : > { %v5862_v21 = vpop.f32.mrf.mxu0 }
 0xa57   : > { %v5863_v12 = vadd.f32 %v5862_v21, %v5861_v14  ;;  %v9441_v60 = vadd.f32 %v4675_v26, %v10139_v43  ;;  %v4736_v14 = vpop.xlane.xlu0 %4735  ;;  %v9473_v26 = vsub.f32 %v9316_v20, %v4790_v29  ;;  %v4738_v6 = vpop.xlane.xlu1 %4737  ;;  %v4855_v42 = vmul.f32 %v9476_v22, %v9476_v22 }
 0xa58   : > { %v5864_v56 = vpop.f32.mrf.mxu0  ;;  %v4793_v21 = vmul.f32 0.0078125, %v4736_v14 }
 0xa59   : > { %v4678_v11 = vadd.f32 %v5863_v12, %v9296_v7  ;;  %4779 = vadd.xlane.f32.xlu0 %v9441_v60  ;;  %v4853_v12 = vmul.f32 %v9464_v23, %v9464_v23  ;;  %v4854_v39 = vmul.f32 %v9473_v26, %v9473_v26 }
 0xa5a   : > { %v5865_v38 = vpop.f32.mrf.mxu0  ;;  %v9484_v41 = vsub.f32 %v9331_v54, %v4793_v21 }
 0xa5b   : > { %v5866_v27 = vadd.f32 %v5865_v38, %v5864_v56  ;;  %v9446_v9 = vadd.f32 %v4678_v11, %v10140_v30  ;;  %v4740_v43 = vpop.xlane.xlu0 %4739  ;;  %v4794_v11 = vmul.f32 0.0078125, %v4738_v6 }
 0xa5c   : > { %v5867_v25 = vpop.f32.mrf.mxu0  ;;  %v4795_v20 = vmul.f32 0.0078125, %v4740_v43  ;;  %v4742_v38 = vpop.xlane.xlu1 %4741  ;;  %v4857_v51 = vmul.f32 %v9484_v41, %v9484_v41 }
 0xa5d   : > { %v4683_v53 = vadd.f32 %v5866_v27, %v9296_v7  ;;  %4781 = vadd.xlane.f32.xlu1 %v9446_v9  ;;  %v9491_v30 = vsub.f32 %v9336_v24, %v4794_v11  ;;  %v4796_v19 = vmul.f32 0.0078125, %v4742_v38 }
 0xa5e   : > { %v5868_v32 = vpop.f32.mrf.mxu0  ;;  %v9496_v54 = vsub.f32 %v9341_v46, %v4795_v20 }
 0xa5f   : > { %v5869_v55 = vadd.f32 %v5868_v32, %v5867_v25  ;;  %v9454_v18 = vadd.f32 %v4683_v53, %v10141_v48  ;;  %v4858_v24 = vmul.f32 %v9491_v30, %v9491_v30  ;;  %v9503_v2 = vsub.f32 %v9346_v33, %v4796_v19 }
 0xa60   : > { %v4744_v27 = vpop.xlane.xlu0 %4743  ;;  %v4859_v35 = vmul.f32 %v9496_v54, %v9496_v54 }
 0xa61   : > { %v4686_v0 = vadd.f32 %v5869_v55, %v9296_v7  ;;  %4783 = vadd.xlane.f32.xlu0 %v9454_v18  ;;  %v4792_v7 = vmul.f32 0.0078125, %v4734_v34  ;;  %v4797_v25 = vmul.f32 0.0078125, %v4744_v27  ;;  %v4860_v34 = vmul.f32 %v9503_v2, %v9503_v2 }
 0xa63   : > { %v9467_v59 = vadd.f32 %v4686_v0, %v10142_v37  ;;  %v9481_v56 = vsub.f32 %v9326_v40, %v4792_v7  ;;  %v9506_v55 = vsub.f32 %v9351_v13, %v4797_v25 }
 0xa64   : > { %v4746_v53 = vpop.xlane.xlu1 %4745 }
 0xa65   : > { %4785 = vadd.xlane.f32.xlu1 %v9467_v59  ;;  %4883 = vadd.xlane.f32.xlu0 %v4851_v5  ;;  %v4856_v40 = vmul.f32 %v9481_v56, %v9481_v56  ;;  %v4798_v36 = vmul.f32 0.0078125, %v4746_v53  ;;  %v4861_v13 = vmul.f32 %v9506_v55, %v9506_v55 }
 0xa67   : > { %v9511_v5 = vsub.f32 %v9356_v4, %v4798_v36 }
 0xa68   : > { %v4748_v32 = vpop.xlane.xlu0 %4747 }
 0xa69   : > { %4887 = vadd.xlane.f32.xlu0 %v4853_v12  ;;  %4885 = vadd.xlane.f32.xlu1 %v4852_v61  ;;  %v4799_v46 = vmul.f32 0.0078125, %v4748_v32  ;;  %v4862_v4 = vmul.f32 %v9511_v5, %v9511_v5 }
 0xa6b   : > { %v9514_v31 = vsub.f32 %v9361_v63, %v4799_v46 }
 0xa6c   : > { %v4750_v48 = vpop.xlane.xlu1 %4749 }
 0xa6d   : > { %4891 = vadd.xlane.f32.xlu0 %v4855_v42  ;;  %4889 = vadd.xlane.f32.xlu1 %v4854_v39  ;;  %v4800_v29 = vmul.f32 0.0078125, %v4750_v48  ;;  %v4863_v6 = vmul.f32 %v9514_v31, %v9514_v31 }
 0xa6f   : > { %v9521_v7 = vsub.f32 %v9366_v52, %v4800_v29 }
 0xa70   : > { %v4752_v0 = vpop.xlane.xlu0 %4751 }
 0xa71   : > { %4895 = vadd.xlane.f32.xlu0 %v4857_v51  ;;  %4893 = vadd.xlane.f32.xlu1 %v4856_v40  ;;  %v4801_v33 = vmul.f32 0.0078125, %v4752_v0  ;;  %v4864_v43 = vmul.f32 %v9521_v7, %v9521_v7 }
 0xa73   : > { %v9526_v63 = vsub.f32 %v9371_v10, %v4801_v33 }
 0xa74   : > { %v4754_v37 = vpop.xlane.xlu1 %4753 }
 0xa75   : > { %4899 = vadd.xlane.f32.xlu0 %v4859_v35  ;;  %4897 = vadd.xlane.f32.xlu1 %v4858_v24  ;;  %v4802_v61 = vmul.f32 0.0078125, %v4754_v37  ;;  %v4865_v38 = vmul.f32 %v9526_v63, %v9526_v63 }
 0xa77   : > { %v9533_v52 = vsub.f32 %v9376_v8, %v4802_v61 }
 0xa78   : > { %v4756_v14 = vpop.xlane.xlu0 %4755 }
 0xa79   : > { %4903 = vadd.xlane.f32.xlu0 %v4861_v13  ;;  %4901 = vadd.xlane.f32.xlu1 %v4860_v34  ;;  %v4803_v21 = vmul.f32 0.0078125, %v4756_v14 }
 0xa7b   : > { %v9536_v11 = vsub.f32 %v9381_v57, %v4803_v21  ;;  %v4866_v57 = vmul.f32 %v9533_v52, %v9533_v52 }
 0xa7c   : > { %v4758_v12 = vpop.xlane.xlu1 %4757 }
 0xa7d   : > { %4907 = vadd.xlane.f32.xlu0 %v4863_v6  ;;  %4905 = vadd.xlane.f32.xlu1 %v4862_v4  ;;  %v4804_v20 = vmul.f32 0.0078125, %v4758_v12  ;;  %v4867_v8 = vmul.f32 %v9536_v11, %v9536_v11 }
 0xa7f   : > { %v9541_v39 = vsub.f32 %v9386_v47, %v4804_v20 }
 0xa80   : > { %v4760_v10 = vpop.xlane.xlu0 %4759 }
 0xa81   : > { %v4805_v42 = vmul.f32 0.0078125, %v4760_v10  ;;  %4911 = vadd.xlane.f32.xlu0 %v4865_v38  ;;  %4909 = vadd.xlane.f32.xlu1 %v4864_v43 }
 0xa83   : > { %v9544_v27 = vsub.f32 %v9391_v3, %v4805_v42  ;;  %v4868_v3 = vmul.f32 %v9541_v39, %v9541_v39 }
 0xa84   : > { %v4762_v40 = vpop.xlane.xlu1 %4761 }
 0xa85   : > { %v4806_v19 = vmul.f32 0.0078125, %v4762_v40  ;;  %4915 = vadd.xlane.f32.xlu0 %v4867_v8  ;;  %4913 = vadd.xlane.f32.xlu1 %v4866_v57  ;;  %v4869_v47 = vmul.f32 %v9544_v27, %v9544_v27 }
 0xa87   : > { %v9551_v25 = vsub.f32 %v9396_v16, %v4806_v19 }
 0xa89   : > { %4919 = vadd.xlane.f32.xlu0 %v4869_v47  ;;  %4917 = vadd.xlane.f32.xlu1 %v4868_v3  ;;  %v4870_v53 = vmul.f32 %v9551_v25, %v9551_v25 }
 0xa8d   : > { %4921 = vadd.xlane.f32.xlu1 %v4870_v53 }
 0xabe   : > { %v4764_v51 = vpop.xlane.xlu0 %4763 }
 0xabf   : > { %v4807_v32 = vmul.f32 0.0078125, %v4764_v51 }
 0xac1   : > { %v9560_v36 = vsub.f32 %v9401_v44, %v4807_v32 }
 0xac2   : > { %v4766_v24 = vpop.xlane.xlu1 %4765 }
 0xac3   : > { %v4808_v16 = vmul.f32 0.0078125, %v4766_v24  ;;  %v4871_v46 = vmul.f32 %v9560_v36, %v9560_v36 }
 0xac5   : > { %v9565_v48 = vsub.f32 %v9406_v49, %v4808_v16  ;;  %4923 = vadd.xlane.f32.xlu0 %v4871_v46 }
 0xac7   : > { %v4872_v35 = vmul.f32 %v9565_v48, %v9565_v48 }
 0xac9   : > { %4925 = vadd.xlane.f32.xlu1 %v4872_v35 }
 0xaca   : > { %v4768_v0 = vpop.xlane.xlu0 %4767 }
 0xacb   : > { %v4809_v29 = vmul.f32 0.0078125, %v4768_v0 }
 0xacd   : > { %v9570_v33 = vsub.f32 %v9411_v28, %v4809_v29 }
 0xace   : > { %v4770_v44 = vpop.xlane.xlu1 %4769 }
 0xacf   : > { %v4810_v13 = vmul.f32 0.0078125, %v4770_v44  ;;  %v4873_v34 = vmul.f32 %v9570_v33, %v9570_v33 }
 0xad1   : > { %v9575_v37 = vsub.f32 %v9416_v50, %v4810_v13  ;;  %4927 = vadd.xlane.f32.xlu0 %v4873_v34 }
 0xad2   : > { %v4772_v49 = vpop.xlane.xlu0 %4771 }
 0xad3   : > { %v4811_v14 = vmul.f32 0.0078125, %v4772_v49  ;;  %v4874_v4 = vmul.f32 %v9575_v37, %v9575_v37 }
 0xad5   : > { %v9580_v61 = vsub.f32 %v9421_v1, %v4811_v14  ;;  %4929 = vadd.xlane.f32.xlu1 %v4874_v4 }
 0xad6   : > { %v4774_v28 = vpop.xlane.xlu1 %4773 }
 0xad7   : > { %v4812_v21 = vmul.f32 0.0078125, %v4774_v28  ;;  %v4875_v6 = vmul.f32 %v9580_v61, %v9580_v61 }
 0xad9   : > { %v9585_v12 = vsub.f32 %v9426_v15, %v4812_v21  ;;  %4931 = vadd.xlane.f32.xlu0 %v4875_v6 }
 0xada   : > { %v4776_v50 = vpop.xlane.xlu0 %4775 }
 0xadb   : > { %v4813_v43 = vmul.f32 0.0078125, %v4776_v50  ;;  %v4876_v20 = vmul.f32 %v9585_v12, %v9585_v12 }
 0xadd   : > { %v9590_v10 = vsub.f32 %v9431_v58, %v4813_v43  ;;  %4933 = vadd.xlane.f32.xlu1 %v4876_v20 }
 0xade   : > { %v4778_v1 = vpop.xlane.xlu1 %4777 }
 0xadf   : > { %v4814_v38 = vmul.f32 0.0078125, %v4778_v1  ;;  %v4877_v42 = vmul.f32 %v9590_v10, %v9590_v10 }
 0xae1   : > { %v9595_v40 = vsub.f32 %v9436_v62, %v4814_v38  ;;  %4935 = vadd.xlane.f32.xlu0 %v4877_v42 }
 0xae2   : > { %v4780_v15 = vpop.xlane.xlu0 %4779 }
 0xae3   : > { %v4815_v8 = vmul.f32 0.0078125, %v4780_v15  ;;  %v4878_v57 = vmul.f32 %v9595_v40, %v9595_v40 }
 0xae5   : > { %v9600_v19 = vsub.f32 %v9441_v60, %v4815_v8  ;;  %4937 = vadd.xlane.f32.xlu1 %v4878_v57 }
 0xae6   : > { %v4782_v58 = vpop.xlane.xlu1 %4781 }
 0xae7   : > { %v4816_v47 = vmul.f32 0.0078125, %v4782_v58  ;;  %v4879_v3 = vmul.f32 %v9600_v19, %v9600_v19 }
 0xae9   : > { %v9605_v53 = vsub.f32 %v9446_v9, %v4816_v47  ;;  %4939 = vadd.xlane.f32.xlu0 %v4879_v3 }
 0xaea   : > { %v4784_v62 = vpop.xlane.xlu0 %4783 }
 0xaeb   : > { %v4817_v51 = vmul.f32 0.0078125, %v4784_v62  ;;  %v4880_v32 = vmul.f32 %v9605_v53, %v9605_v53 }
 0xaed   : > { %v9610_v24 = vsub.f32 %v9454_v18, %v4817_v51  ;;  %4941 = vadd.xlane.f32.xlu1 %v4880_v32  ;;  %v9624_v51 = vld [vmem:[%s746_s1] ss:$0 sm:$0xff]  ;;  %s10143_s1 = sld [smem:[#allocation44_spill]] (!%p5636_p6) }
 0xaee   : > { %v4884_v60 = vpop.xlane.xlu0 %4883  ;;  %v4786_v16 = vpop.xlane.xlu1 %4785 }
 0xaef   : > { %v4947_v46 = vmul.f32 0.0078125, %v4884_v60  ;;  %v4818_v35 = vmul.f32 0.0078125, %v4786_v16  ;;  %v4881_v0 = vmul.f32 %v9610_v24, %v9610_v24 }
 0xaf1   : > { %v4979_v29 = vadd.f32 1e-12, %v4947_v46  ;;  %v9615_v9 = vsub.f32 %v9467_v59, %v4818_v35  ;;  %4943 = vadd.xlane.f32.xlu0 %v4881_v0  ;;  %v9632_v46 = vld [vmem:[%s749_s10] ss:$0 sm:$0xff] }
 0xaf2   : > { %v4888_v44 = vpop.xlane.xlu0 %4887  ;;  %v4886_v13 = vpop.xlane.xlu1 %4885 }
 0xaf3   : > { %6662 = vrsqrt.f32 %v4979_v29  ;;  %v4949_v34 = vmul.f32 0.0078125, %v4888_v44  ;;  %v4948_v49 = vmul.f32 0.0078125, %v4886_v13  ;;  %v4882_v18 = vmul.f32 %v9615_v9, %v9615_v9 }
 0xaf5   : > { %v4981_v14 = vadd.f32 1e-12, %v4949_v34  ;;  %v4980_v4 = vadd.f32 1e-12, %v4948_v49  ;;  %4945 = vadd.xlane.f32.xlu1 %v4882_v18 }
 0xaf6   : > { %v4892_v28 = vpop.xlane.xlu0 %4891  ;;  %v4890_v21 = vpop.xlane.xlu1 %4889 }
 0xaf7   : > { %6664 = vrsqrt.f32 %v4981_v14  ;;  %v4951_v6 = vmul.f32 0.0078125, %v4892_v28  ;;  %v4950_v50 = vmul.f32 0.0078125, %v4890_v21 }
 0xaf8   : > { %6666 = vrsqrt.f32 %v4980_v4 }
 0xaf9   : > { %v4983_v59 = vadd.f32 1e-12, %v4951_v6  ;;  %v4982_v43 = vadd.f32 1e-12, %v4950_v50 }
 0xafa   : > { %v4896_v20 = vpop.xlane.xlu0 %4895  ;;  %v4894_v1 = vpop.xlane.xlu1 %4893 }
 0xafb   : > { %6668 = vrsqrt.f32 %v4983_v59  ;;  %v4953_v38 = vmul.f32 0.0078125, %v4896_v20  ;;  %v4952_v42 = vmul.f32 0.0078125, %v4894_v1 }
 0xafc   : > { %6670 = vrsqrt.f32 %v4982_v43 }
 0xafd   : > { %v4985_v15 = vadd.f32 1e-12, %v4953_v38  ;;  %v4984_v8 = vadd.f32 1e-12, %v4952_v42 }
 0xafe   : > { %v4900_v57 = vpop.xlane.xlu0 %4899  ;;  %v4898_v58 = vpop.xlane.xlu1 %4897 }
 0xaff   : > { %6672 = vrsqrt.f32 %v4985_v15  ;;  %v4955_v47 = vmul.f32 0.0078125, %v4900_v57  ;;  %v4954_v3 = vmul.f32 0.0078125, %v4898_v58 }
 0xb00   : > { %v6663_v62 = vpop.eup %6662  ;;  %6674 = vrsqrt.f32 %v4984_v8 }
 0xb01   : > { %v5043_v32 = vmul.f32 %v6663_v62, %v9451_v45  ;;  %v4987_v60 = vadd.f32 1e-12, %v4955_v47  ;;  %v4986_v16 = vadd.f32 1e-12, %v4954_v3 }
 0xb02   : > { %v4904_v35 = vpop.xlane.xlu0 %4903  ;;  %v4902_v0 = vpop.xlane.xlu1 %4901 }
 0xb03   : > { %v5081_v29 = vmul.f32 %v9624_v51, %v5043_v32  ;;  %6676 = vrsqrt.f32 %v4987_v60  ;;  %v4957_v44 = vmul.f32 0.0078125, %v4904_v35  ;;  %v4956_v13 = vmul.f32 0.0078125, %v4902_v0 }
 0xb04   : > { %v6665_v34 = vpop.eup %6664  ;;  %6678 = vrsqrt.f32 %v4986_v16 }
 0xb05   : > { %v6667_v49 = vpop.eup %6666  ;;  %v9636_v45 = vadd.f32 %v9632_v46, %v5081_v29  ;;  %v5045_v18 = vmul.f32 %v6665_v34, %v9464_v23  ;;  %v4989_v14 = vadd.f32 1e-12, %v4957_v44  ;;  %v4988_v4 = vadd.f32 1e-12, %v4956_v13 }
 0xb06   : > { %v5044_v28 = vmul.f32 %v6667_v49, %v9459_v17  ;;  %v4908_v21 = vpop.xlane.xlu0 %4907  ;;  %v4906_v6 = vpop.xlane.xlu1 %4905 }
 0xb07   : > { %5151 = vst [vmem:[#allocation2 + $0xb0] sm:$0xff] %v9636_v45  ;;  %v5083_v50 = vmul.f32 %v9624_v51, %v5045_v18  ;;  %6680 = vrsqrt.f32 %v4989_v14  ;;  %v4959_v59 = vmul.f32 0.0078125, %v4908_v21  ;;  %v4958_v43 = vmul.f32 0.0078125, %v4906_v6 }
 0xb08   : > { %v6669_v20 = vpop.eup %6668  ;;  %v5082_v1 = vmul.f32 %v9624_v51, %v5044_v28  ;;  %6682 = vrsqrt.f32 %v4988_v4 }
 0xb09   : > { %v6671_v38 = vpop.eup %6670  ;;  %v9644_v23 = vadd.f32 %v9632_v46, %v5083_v50  ;;  %v5047_v42 = vmul.f32 %v6669_v20, %v9476_v22  ;;  %v4991_v17 = vadd.f32 1e-12, %v4959_v59  ;;  %v4990_v15 = vadd.f32 1e-12, %v4958_v43 }
 0xb0a   : > { %v9648_v8 = vadd.f32 %v9632_v46, %v5082_v1  ;;  %v5046_v57 = vmul.f32 %v6671_v38, %v9473_v26  ;;  %v4912_v58 = vpop.xlane.xlu0 %4911  ;;  %v4910_v47 = vpop.xlane.xlu1 %4909 }
 0xb0b   : > { %5153 = vst [vmem:[#allocation2 + $0xd8] sm:$0xff] %v9644_v23  ;;  %v5085_v3 = vmul.f32 %v9624_v51, %v5047_v42  ;;  %6684 = vrsqrt.f32 %v4991_v17  ;;  %v4961_v62 = vmul.f32 0.0078125, %v4912_v58  ;;  %v4960_v32 = vmul.f32 0.0078125, %v4910_v47 }
 0xb0c   : > { %v6673_v60 = vpop.eup %6672  ;;  %5152 = vst [vmem:[#allocation2] sm:$0xff] %v9648_v8  ;;  %v5084_v22 = vmul.f32 %v9624_v51, %v5046_v57  ;;  %6686 = vrsqrt.f32 %v4990_v15 }
 0xb0d   : > { %v6675_v16 = vpop.eup %6674  ;;  %v9656_v35 = vadd.f32 %v9632_v46, %v5085_v3  ;;  %v5049_v26 = vmul.f32 %v6673_v60, %v9484_v41  ;;  %v4993_v0 = vadd.f32 1e-12, %v4961_v62  ;;  %v4992_v29 = vadd.f32 1e-12, %v4960_v32 }
 0xb0e   : > { %v9660_v44 = vadd.f32 %v9632_v46, %v5084_v22  ;;  %v5048_v13 = vmul.f32 %v6675_v16, %v9481_v56  ;;  %v4916_v34 = vpop.xlane.xlu0 %4915  ;;  %v4914_v49 = vpop.xlane.xlu1 %4913 }
 0xb0f   : > { %5155 = vst [vmem:[#allocation2 + $0x50] sm:$0xff] %v9656_v35  ;;  %v5087_v18 = vmul.f32 %v9624_v51, %v5049_v26  ;;  %6688 = vrsqrt.f32 %v4993_v0  ;;  %v4963_v14 = vmul.f32 0.0078125, %v4916_v34  ;;  %v4962_v4 = vmul.f32 0.0078125, %v4914_v49 }
 0xb10   : > { %v6677_v28 = vpop.eup %6676  ;;  %5154 = vst [vmem:[#allocation2 + $0x18] sm:$0xff] %v9660_v44  ;;  %v5086_v41 = vmul.f32 %v9624_v51, %v5048_v13  ;;  %6690 = vrsqrt.f32 %v4992_v29 }
 0xb11   : > { %v6679_v21 = vpop.eup %6678  ;;  %v9668_v6 = vadd.f32 %v9632_v46, %v5087_v18  ;;  %v5051_v56 = vmul.f32 %v6677_v28, %v9496_v54  ;;  %v4995_v50 = vadd.f32 1e-12, %v4963_v14  ;;  %v4994_v59 = vadd.f32 1e-12, %v4962_v4 }
 0xb12   : > { %v9672_v43 = vadd.f32 %v9632_v46, %v5086_v41  ;;  %v5050_v20 = vmul.f32 %v6679_v21, %v9491_v30  ;;  %v4920_v1 = vpop.xlane.xlu0 %4919  ;;  %v4918_v38 = vpop.xlane.xlu1 %4917 }
 0xb13   : > { %5157 = vst [vmem:[#allocation2 + $0x30] sm:$0xff] %v9668_v6  ;;  %v5089_v42 = vmul.f32 %v9624_v51, %v5051_v56  ;;  %6692 = vrsqrt.f32 %v4995_v50  ;;  %v4965_v17 = vmul.f32 0.0078125, %v4920_v1  ;;  %v4964_v15 = vmul.f32 0.0078125, %v4918_v38 }
 0xb14   : > { %v6681_v57 = vpop.eup %6680  ;;  %5156 = vst [vmem:[#allocation2 + $0x68] sm:$0xff] %v9672_v43  ;;  %v5088_v54 = vmul.f32 %v9624_v51, %v5050_v20  ;;  %6694 = vrsqrt.f32 %v4994_v59 }
 0xb15   : > { %v6683_v58 = vpop.eup %6682  ;;  %v9680_v47 = vadd.f32 %v9632_v46, %v5089_v42  ;;  %v5053_v30 = vmul.f32 %v6681_v57, %v9506_v55  ;;  %v4997_v3 = vadd.f32 1e-12, %v4965_v17  ;;  %v4996_v62 = vadd.f32 1e-12, %v4964_v15 }
 0xb16   : > { %v9684_v32 = vadd.f32 %v9632_v46, %v5088_v54  ;;  %v5052_v60 = vmul.f32 %v6683_v58, %v9503_v2  ;;  %v4922_v22 = vpop.xlane.xlu1 %4921 }
 0xb17   : > { %5159 = vst [vmem:[#allocation2 + $0x80] sm:$0xff] %v9680_v47  ;;  %v5091_v16 = vmul.f32 %v9624_v51, %v5053_v30  ;;  %6696 = vrsqrt.f32 %v4997_v3  ;;  %v4966_v26 = vmul.f32 0.0078125, %v4922_v22 }
 0xb18   : > { %v6685_v0 = vpop.eup %6684  ;;  %5158 = vst [vmem:[#allocation2 + $0x48] sm:$0xff] %v9684_v32  ;;  %v5090_v29 = vmul.f32 %v9624_v51, %v5052_v60  ;;  %6698 = vrsqrt.f32 %v4996_v62 }
 0xb19   : > { %v6687_v55 = vpop.eup %6686  ;;  %v9692_v13 = vadd.f32 %v9632_v46, %v5091_v16  ;;  %v5055_v34 = vmul.f32 %v6685_v0, %v9514_v31  ;;  %v4998_v2 = vadd.f32 1e-12, %v4966_v26 }
 0xb1a   : > { %v9696_v49 = vadd.f32 %v9632_v46, %v5090_v29  ;;  %v5054_v18 = vmul.f32 %v6687_v55, %v9511_v5 }
 0xb1b   : > { %5161 = vst [vmem:[#allocation2 + $0xe8] sm:$0xff] %v9692_v13  ;;  %v5093_v14 = vmul.f32 %v9624_v51, %v5055_v34  ;;  %6700 = vrsqrt.f32 %v4998_v2 }
 0xb1c   : > { %v6689_v4 = vpop.eup %6688  ;;  %5160 = vst [vmem:[#allocation2 + $0x88] sm:$0xff] %v9696_v49  ;;  %v5092_v28 = vmul.f32 %v9624_v51, %v5054_v18 }
 0xb1d   : > { %v6691_v41 = vpop.eup %6690  ;;  %v9704_v21 = vadd.f32 %v9632_v46, %v5093_v14  ;;  %v5057_v31 = vmul.f32 %v6689_v4, %v9526_v63 }
 0xb1e   : > { %v9708_v56 = vadd.f32 %v9632_v46, %v5092_v28  ;;  %v5056_v5 = vmul.f32 %v6691_v41, %v9521_v7 }
 0xb1f   : > { %5163 = vst [vmem:[#allocation2 + $0x60] sm:$0xff] %v9704_v21  ;;  %v5095_v50 = vmul.f32 %v9624_v51, %v5057_v31 }
 0xb20   : > { %v6693_v59 = vpop.eup %6692  ;;  %5162 = vst [vmem:[#allocation2 + $0xb8] sm:$0xff] %v9708_v56  ;;  %v5094_v20 = vmul.f32 %v9624_v51, %v5056_v5 }
 0xb21   : > { %v6695_v1 = vpop.eup %6694  ;;  %v9716_v38 = vadd.f32 %v9632_v46, %v5095_v50  ;;  %v5059_v63 = vmul.f32 %v6693_v59, %v9536_v11 }
 0xb22   : > { %v9720_v42 = vadd.f32 %v9632_v46, %v5094_v20  ;;  %v5058_v7 = vmul.f32 %v6695_v1, %v9533_v52 }
 0xb23   : > { %5165 = vst [vmem:[#allocation2 + $0x8] sm:$0xff] %v9716_v38  ;;  %v5097_v17 = vmul.f32 %v9624_v51, %v5059_v63 }
 0xb24   : > { %v6697_v15 = vpop.eup %6696  ;;  %5164 = vst [vmem:[#allocation2 + $0xf0] sm:$0xff] %v9720_v42  ;;  %v5096_v57 = vmul.f32 %v9624_v51, %v5058_v7 }
 0xb25   : > { %v6699_v54 = vpop.eup %6698  ;;  %v9728_v58 = vadd.f32 %v9632_v46, %v5097_v17  ;;  %v5061_v11 = vmul.f32 %v6697_v15, %v9544_v27 }
 0xb26   : > { %v9732_v30 = vadd.f32 %v9632_v46, %v5096_v57  ;;  %v5060_v52 = vmul.f32 %v6699_v54, %v9541_v39 }
 0xb27   : > { %5167 = vst [vmem:[#allocation2 + $0x38] sm:$0xff] %v9728_v58  ;;  %v5099_v3 = vmul.f32 %v9624_v51, %v5061_v11 }
 0xb28   : > { %v6701_v62 = vpop.eup %6700  ;;  %5166 = vst [vmem:[#allocation2 + $0x78] sm:$0xff] %v9732_v30  ;;  %v5098_v60 = vmul.f32 %v9624_v51, %v5060_v52 }
 0xb29   : > { %v9740_v22 = vadd.f32 %v9632_v46, %v5099_v3  ;;  %v5062_v16 = vmul.f32 %v6701_v62, %v9551_v25 }
 0xb2a   : > { %v9744_v27 = vadd.f32 %v9632_v46, %v5098_v60 }
 0xb2b   : > { %5169 = vst [vmem:[#allocation2 + $0x40] sm:$0xff] %v9740_v22  ;;  %v5100_v39 = vmul.f32 %v9624_v51, %v5062_v16 }
 0xb2c   : > { %5168 = vst [vmem:[#allocation2 + $0x58] sm:$0xff] %v9744_v27 }
 0xb2d   : > { %v9750_v26 = vadd.f32 %v9632_v46, %v5100_v39 }
 0xb2f   : > { %5170 = vst [vmem:[#allocation2 + $0xc8] sm:$0xff] %v9750_v26 }
 0xb4e   : > { %v4924_v0 = vpop.xlane.xlu0 %4923 }
 0xb4f   : > { %v4967_v29 = vmul.f32 0.0078125, %v4924_v0 }
 0xb51   : > { %v4999_v55 = vadd.f32 1e-12, %v4967_v29 }
 0xb52   : > { %v4926_v34 = vpop.xlane.xlu1 %4925 }
 0xb53   : > { %6702 = vrsqrt.f32 %v4999_v55  ;;  %v4968_v25 = vmul.f32 0.0078125, %v4926_v34 }
 0xb55   : > { %v5000_v2 = vadd.f32 1e-12, %v4968_v25 }
 0xb57   : > { %6704 = vrsqrt.f32 %v5000_v2 }
 0xb5a   : > { %v4928_v18 = vpop.xlane.xlu0 %4927 }
 0xb5b   : > { %v4969_v14 = vmul.f32 0.0078125, %v4928_v18 }
 0xb5d   : > { %v5001_v4 = vadd.f32 1e-12, %v4969_v14 }
 0xb5e   : > { %v4930_v28 = vpop.xlane.xlu1 %4929 }
 0xb5f   : > { %6706 = vrsqrt.f32 %v5001_v4  ;;  %v4970_v41 = vmul.f32 0.0078125, %v4930_v28 }
 0xb60   : > { %v6703_v31 = vpop.eup %6702 }
 0xb61   : > { %v5002_v5 = vadd.f32 1e-12, %v4970_v41  ;;  %v5063_v50 = vmul.f32 %v6703_v31, %v9560_v36 }
 0xb62   : > { %v4932_v59 = vpop.xlane.xlu0 %4931 }
 0xb63   : > { %6708 = vrsqrt.f32 %v5002_v5  ;;  %v4971_v20 = vmul.f32 0.0078125, %v4932_v59  ;;  %v5101_v1 = vmul.f32 %v9624_v51, %v5063_v50 }
 0xb64   : > { %v6705_v63 = vpop.eup %6704 }
 0xb65   : > { %v5003_v7 = vadd.f32 1e-12, %v4971_v20  ;;  %v9756_v17 = vadd.f32 %v9632_v46, %v5101_v1  ;;  %v5064_v15 = vmul.f32 %v6705_v63, %v9565_v48 }
 0xb66   : > { %v4934_v57 = vpop.xlane.xlu1 %4933 }
 0xb67   : > { %6710 = vrsqrt.f32 %v5003_v7  ;;  %v4972_v54 = vmul.f32 0.0078125, %v4934_v57  ;;  %5171 = vst [vmem:[#allocation2 + $0xe0] sm:$0xff] %v9756_v17  ;;  %v5102_v11 = vmul.f32 %v9624_v51, %v5064_v15 }
 0xb69   : > { %v5004_v36 = vadd.f32 1e-12, %v4972_v54  ;;  %v9762_v52 = vadd.f32 %v9632_v46, %v5102_v11 }
 0xb6a   : > { %v4936_v3 = vpop.xlane.xlu0 %4935 }
 0xb6b   : > { %6712 = vrsqrt.f32 %v5004_v36  ;;  %v4973_v62 = vmul.f32 0.0078125, %v4936_v3  ;;  %5172 = vst [vmem:[#allocation2 + $0x90] sm:$0xff] %v9762_v52 }
 0xb6c   : > { %v6707_v60 = vpop.eup %6706 }
 0xb6d   : > { %v5065_v16 = vmul.f32 %v6707_v60, %v9570_v33  ;;  %v5005_v48 = vadd.f32 1e-12, %v4973_v62 }
 0xb6e   : > { %v4938_v39 = vpop.xlane.xlu1 %4937 }
 0xb6f   : > { %v5103_v0 = vmul.f32 %v9624_v51, %v5065_v16  ;;  %6714 = vrsqrt.f32 %v5005_v48  ;;  %v4974_v29 = vmul.f32 0.0078125, %v4938_v39 }
 0xb70   : > { %v6709_v55 = vpop.eup %6708 }
 0xb71   : > { %v9768_v34 = vadd.f32 %v9632_v46, %v5103_v0  ;;  %v5066_v25 = vmul.f32 %v6709_v55, %v9575_v37  ;;  %v5006_v2 = vadd.f32 1e-12, %v4974_v29 }
 0xb72   : > { %v4940_v18 = vpop.xlane.xlu0 %4939 }
 0xb73   : > { %5173 = vst [vmem:[#allocation2 + $0x70] sm:$0xff] %v9768_v34  ;;  %v5104_v14 = vmul.f32 %v9624_v51, %v5066_v25  ;;  %6716 = vrsqrt.f32 %v5006_v2  ;;  %v4975_v33 = vmul.f32 0.0078125, %v4940_v18 }
 0xb74   : > { %v6711_v4 = vpop.eup %6710 }
 0xb75   : > { %v9774_v28 = vadd.f32 %v9632_v46, %v5104_v14  ;;  %v5067_v41 = vmul.f32 %v6711_v4, %v9580_v61  ;;  %v5007_v31 = vadd.f32 1e-12, %v4975_v33 }
 0xb76   : > { %v4942_v5 = vpop.xlane.xlu1 %4941 }
 0xb77   : > { %5174 = vst [vmem:[#allocation2 + $0xc0] sm:$0xff] %v9774_v28  ;;  %v5105_v37 = vmul.f32 %v9624_v51, %v5067_v41  ;;  %6718 = vrsqrt.f32 %v5007_v31  ;;  %v4976_v50 = vmul.f32 0.0078125, %v4942_v5 }
 0xb78   : > { %v6713_v59 = vpop.eup %6712 }
 0xb79   : > { %v9780_v20 = vadd.f32 %v9632_v46, %v5105_v37  ;;  %v5068_v1 = vmul.f32 %v6713_v59, %v9585_v12  ;;  %v5008_v63 = vadd.f32 1e-12, %v4976_v50 }
 0xb7a   : > { %v4944_v7 = vpop.xlane.xlu0 %4943 }
 0xb7b   : > { %5175 = vst [vmem:[#allocation2 + $0xa8] sm:$0xff] %v9780_v20  ;;  %v5106_v61 = vmul.f32 %v9624_v51, %v5068_v1  ;;  %6720 = vrsqrt.f32 %v5008_v63  ;;  %v4977_v15 = vmul.f32 0.0078125, %v4944_v7 }
 0xb7c   : > { %v6715_v57 = vpop.eup %6714 }
 0xb7d   : > { %v9786_v54 = vadd.f32 %v9632_v46, %v5106_v61  ;;  %v5069_v11 = vmul.f32 %v6715_v57, %v9590_v10  ;;  %v5009_v36 = vadd.f32 1e-12, %v4977_v15 }
 0xb7e   : > { %v4946_v3 = vpop.xlane.xlu1 %4945 }
 0xb7f   : > { %5176 = vst [vmem:[#allocation2 + $0xd0] sm:$0xff] %v9786_v54  ;;  %v5107_v12 = vmul.f32 %v9624_v51, %v5069_v11  ;;  %6722 = vrsqrt.f32 %v5009_v36  ;;  %v4978_v62 = vmul.f32 0.0078125, %v4946_v3 }
 0xb80   : > { %v6717_v60 = vpop.eup %6716 }
 0xb81   : > { %v9792_v16 = vadd.f32 %v9632_v46, %v5107_v12  ;;  %v5070_v48 = vmul.f32 %v6717_v60, %v9595_v40  ;;  %v5010_v39 = vadd.f32 1e-12, %v4978_v62 }
 0xb83   : > { %5177 = vst [vmem:[#allocation2 + $0x10] sm:$0xff] %v9792_v16  ;;  %v5108_v0 = vmul.f32 %v9624_v51, %v5070_v48  ;;  %6724 = vrsqrt.f32 %v5010_v39 }
 0xb84   : > { %v6719_v10 = vpop.eup %6718 }
 0xb85   : > { %v9798_v29 = vadd.f32 %v9632_v46, %v5108_v0  ;;  %v5071_v55 = vmul.f32 %v6719_v10, %v9600_v19 }
 0xb87   : > { %5178 = vst [vmem:[#allocation2 + $0x28] sm:$0xff] %v9798_v29  ;;  %v5109_v25 = vmul.f32 %v9624_v51, %v5071_v55 }
 0xb88   : > { %v6721_v2 = vpop.eup %6720 }
 0xb89   : > { %v9804_v18 = vadd.f32 %v9632_v46, %v5109_v25  ;;  %v5072_v40 = vmul.f32 %v6721_v2, %v9605_v53 }
 0xb8b   : > { %5179 = vst [vmem:[#allocation2 + $0xa0] sm:$0xff] %v9804_v18  ;;  %v5110_v14 = vmul.f32 %v9624_v51, %v5072_v40 }
 0xb8c   : > { %v6723_v33 = vpop.eup %6722 }
 0xb8d   : > { %v9810_v4 = vadd.f32 %v9632_v46, %v5110_v14  ;;  %v5073_v19 = vmul.f32 %v6723_v33, %v9610_v24 }
 0xb8f   : > { %5180 = vst [vmem:[#allocation2 + $0xf8] sm:$0xff] %v9810_v4  ;;  %v5111_v41 = vmul.f32 %v9624_v51, %v5073_v19 }
 0xb90   : > { %v6725_v31 = vpop.eup %6724 }
 0xb91   : > { %v9816_v5 = vadd.f32 %v9632_v46, %v5111_v41  ;;  %v5074_v53 = vmul.f32 %v6725_v31, %v9615_v9 }
 0xb93   : > { %5181 = vst [vmem:[#allocation2 + $0x20] sm:$0xff] %v9816_v5  ;;  %v5112_v37 = vmul.f32 %v9624_v51, %v5074_v53  ;;  %5186 = sbr.rel (%p5636_p6) target bundleno = 3524 (0xdc4), region = 130 }
 0xb95   : > { %v9822_v50 = vadd.f32 %v9632_v46, %v5112_v37 }
 0xb97   : > { %5182 = vst [vmem:[#allocation2 + $0x98] sm:$0xff] %v9822_v50 }
 0xb98   : > { %v5246_v24 = vld [vmem:[%s10143_s1 + $0x78] sm:$0xff]  ;;  %v5187_v59 = vadd.f32 %v9648_v8, %v9636_v45  ;;  %v5208_v9 = vadd.f32 %v9744_v27, %v9728_v58  ;;  %v6817_v1 = vmov 0.0   ;;  %v5245_v51 = vld [vmem:[%s10143_s1 + $0x70] sm:$0xff]  ;;  %vm6818_vm0 = vmmov 0   ;;  %v5244_v45 = vld [vmem:[%s10143_s1 + $0x68] sm:$0xff] }
 0xb99   : > { %6111 = vmatprep.subr.mxu0 %v6817_v1  ;;  %6143 = vmatprep.mubr.msk.f32.mxu0 %vm6818_vm0, %v6817_v1  ;;  %v5243_v27 = vld [vmem:[%s10143_s1 + $0x60] sm:$0xff]  ;;  %v5242_v7 = vld [vmem:[%s10143_s1 + $0x58] sm:$0xff]  ;;  %v5241_v61 = vld [vmem:[%s10143_s1 + $0x50] sm:$0xff]  ;;  %vm5256_vm1 = vcmask 1041409   ;;  %v10144_v37 = vlaneseq  ;;  %vm5333_vm3 = vcmask 1041408  }
 0xb9a   : > { %6112 = vmatpush3.msra.mxu0 %v5246_v24  ;;  %v5188_v46 = vadd.f32 %v5187_v59, %v9644_v23  ;;  %v5209_v63 = vadd.f32 %v5208_v9, %v9740_v22  ;;  %v5240_v15 = vld [vmem:[%s10143_s1 + $0x48] sm:$0xff]  ;;  %v5239_v57 = vld [vmem:[%s10143_s1 + $0x40] sm:$0xff]  ;;  %v5238_v11 = vld [vmem:[%s10143_s1 + $0x38] sm:$0xff] }
 0xb9b   : > { %6113 = vmatprep.subr.mxu0 %v6817_v1  ;;  %v5237_v36 = vld [vmem:[%s10143_s1 + $0x30] sm:$0xff]  ;;  %v5236_v3 = vld [vmem:[%s10143_s1 + $0x28] sm:$0xff]  ;;  %v5235_v12 = vld [vmem:[%s10143_s1 + $0x20] sm:$0xff] }
 0xb9c   : > { %6114 = vmatpush3.msra.mxu0 %v5245_v51  ;;  %v5189_v8 = vadd.f32 %v5188_v46, %v9660_v44  ;;  %v5210_v58 = vadd.f32 %v5209_v63, %v9750_v26  ;;  %v5234_v60 = vld [vmem:[%s10143_s1 + $0x18] sm:$0xff]  ;;  %v5233_v48 = vld [vmem:[%s10143_s1 + $0x10] sm:$0xff]  ;;  %v5232_v0 = vld [vmem:[%s10143_s1 + $0x8] sm:$0xff] }
 0xb9d   : > { %6115 = vmatprep.subr.mxu0 %v6817_v1  ;;  %v5637_v24 = vld [vmem:[%s10145_s18] ss:$0 sm:$0xff] }
 0xb9e   : > { %6116 = vmatpush3.msra.mxu0 %v5244_v45  ;;  %v5190_v23 = vadd.f32 %v5189_v8, %v9656_v35  ;;  %v5211_v22 = vadd.f32 %v5210_v58, %v9756_v17 }
 0xb9f   : > { %6117 = vmatprep.subr.mxu0 %v6817_v1 }
 0xba0   : > { %6118 = vmatpush3.msra.mxu0 %v5243_v27  ;;  %v5191_v44 = vadd.f32 %v5190_v23, %v9672_v43  ;;  %v5212_v26 = vadd.f32 %v5211_v22, %v9762_v52 }
 0xba1   : > { %6119 = vmatprep.subr.mxu0 %v6817_v1 }
 0xba2   : > { %6120 = vmatpush3.msra.mxu0 %v5242_v7  ;;  %v5192_v35 = vadd.f32 %v5191_v44, %v9668_v6  ;;  %v5213_v17 = vadd.f32 %v5212_v26, %v9768_v34 }
 0xba3   : > { %6121 = vmatprep.subr.mxu0 %v6817_v1 }
 0xba4   : > { %6122 = vmatpush3.msra.mxu0 %v5241_v61  ;;  %v5193_v43 = vadd.f32 %v5192_v35, %v9684_v32  ;;  %v5214_v52 = vadd.f32 %v5213_v17, %v9774_v28 }
 0xba5   : > { %6123 = vmatprep.subr.mxu0 %v6817_v1 }
 0xba6   : > { %6124 = vmatpush3.msra.mxu0 %v5240_v15  ;;  %v5194_v6 = vadd.f32 %v5193_v43, %v9680_v47  ;;  %v5215_v34 = vadd.f32 %v5214_v52, %v9780_v20 }
 0xba7   : > { %6125 = vmatprep.subr.mxu0 %v6817_v1 }
 0xba8   : > { %6126 = vmatpush3.msra.mxu0 %v5239_v57  ;;  %v5195_v32 = vadd.f32 %v5194_v6, %v9696_v49  ;;  %v5216_v28 = vadd.f32 %v5215_v34, %v9786_v54 }
 0xba9   : > { %6127 = vmatprep.subr.mxu0 %v6817_v1 }
 0xbaa   : > { %6128 = vmatpush3.msra.mxu0 %v5238_v11  ;;  %v5196_v47 = vadd.f32 %v5195_v32, %v9692_v13  ;;  %v5217_v20 = vadd.f32 %v5216_v28, %v9792_v16 }
 0xbab   : > { %6129 = vmatprep.subr.mxu0 %v6817_v1 }
 0xbac   : > { %6130 = vmatpush3.msra.mxu0 %v5237_v36  ;;  %v5197_v49 = vadd.f32 %v5196_v47, %v9708_v56  ;;  %v5218_v54 = vadd.f32 %v5217_v20, %v9798_v29  ;;  %v5231_v29 = vld [vmem:[%s10143_s1] sm:$0xff] }
 0xbad   : > { %6131 = vmatprep.subr.mxu0 %v6817_v1 }
 0xbae   : > { %6132 = vmatpush3.msra.mxu0 %v5236_v3  ;;  %v5198_v13 = vadd.f32 %v5197_v49, %v9704_v21  ;;  %v5219_v62 = vadd.f32 %v5218_v54, %v9804_v18 }
 0xbaf   : > { %6133 = vmatprep.subr.mxu0 %v6817_v1 }
 0xbb0   : > { %6134 = vmatpush3.msra.mxu0 %v5235_v12  ;;  %v5199_v56 = vadd.f32 %v5198_v13, %v9720_v42  ;;  %v5220_v16 = vadd.f32 %v5219_v62, %v9810_v4 }
 0xbb1   : > { %6135 = vmatprep.subr.mxu0 %v6817_v1 }
 0xbb2   : > { %6136 = vmatpush3.msra.mxu0 %v5234_v60  ;;  %v5200_v21 = vadd.f32 %v5199_v56, %v9716_v38  ;;  %v5221_v39 = vadd.f32 %v5220_v16, %v9816_v5 }
 0xbb3   : > { %6137 = vmatprep.subr.mxu0 %v6817_v1 }
 0xbb4   : > { %6138 = vmatpush3.msra.mxu0 %v5233_v48  ;;  %v5201_v42 = vadd.f32 %v5200_v21, %v9732_v30  ;;  %v5222_v10 = vadd.f32 %v5221_v39, %v9822_v50  ;;  %v5330_v50 = vand.u32 127, %v10144_v37 }
 0xbb5   : > { %6139 = vmatprep.subr.mxu0 %v6817_v1 }
 0xbb6   : > { %6140 = vmatpush3.msra.mxu0 %v5232_v0  ;;  %v5202_v38 = vrot.slane %v5201_v42, 4  ;;  %v5223_v55 = vrot.slane %v5222_v10, 4  ;;  %vm5331_vm2 = vcmp.lt.s32.totalorder %v5330_v50, 6 }
 0xbb7   : > { %6141 = vmatprep.subr.mxu0 %v6817_v1 }
 0xbb8   : > { %6142 = vmatpush3.msra.mxu0 %v5231_v29  ;;  %v5203_v25 = vadd.f32 %v5202_v38, %v5201_v42  ;;  %v5224_v2 = vadd.f32 %v5223_v55, %v5222_v10 }
 0xbba   : > { %v5204_v18 = vrot.slane %v5203_v25, 2  ;;  %v5225_v40 = vrot.slane %v5224_v2, 2 }
 0xbbc   : > { %v5205_v14 = vadd.f32 %v5204_v18, %v5203_v25  ;;  %v5226_v30 = vadd.f32 %v5225_v40, %v5224_v2 }
 0xbbe   : > { %v5206_v33 = vrot.slane %v5205_v14, 1  ;;  %v5227_v4 = vrot.slane %v5226_v30, 1 }
 0xbc0   : > { %v5207_v19 = vadd.f32 %v5206_v33, %v5205_v14  ;;  %v5228_v41 = vadd.f32 %v5227_v4, %v5226_v30 }
 0xbc2   : > { %v5229_v31 = vmul.f32 0.0078125, %v5207_v19  ;;  %v5230_v5 = vmul.f32 0.0078125, %v5228_v41 }
 0xbc4   : > { %v5257_v53 = vsel %vm5256_vm1, %v5230_v5, %v5229_v31 }
 0xbc5   : > { %6144 = vmatmul.mubr.f32.vlgmr.msra.gmra.mxu0 %v5257_v53 }
 0xc85   : > { %v5325_v59 = vpop.f32.mrf.mxu0 }
 0xc86   : > { %v5326_v9 = vadd.f32 %v5637_v24, %v5325_v59 }
 0xc87   : > { %v6145_v1 = vpop.f32.mrf.mxu0 }
 0xc88   : > { %v5332_v51 = vsel %vm5331_vm2, %v5326_v9, -1e+30 }
 0xc89   : > { %v5334_v46 = vsel %vm5333_vm3, %v5332_v51, -inf }
 0xc8a   : > { %5335 = vmax.xlane.f32.xlu0 %v5334_v46 }
 0xd13   : > { %v5336_v63 = vpop.xlane.xlu0 %5335 }
 0xd14   : > { %v5337_v45 = vsub.f32 %v5332_v51, %v5336_v63 }
 0xd16   : > { %v5338_v8 = vmul.f32 1.442695, %v5337_v45 }
 0xd18   : > { %6758 = vpow2.f32 %v5338_v8 }
 0xd25   : > { %v6759_v58 = vpop.eup %6758 }
 0xd26   : > { %v5340_v27 = vsel %vm5333_vm3, %v6759_v58, 0.0 }
 0xd27   : > { %5341 = vadd.xlane.f32.xlu0 %v5340_v27 }
 0xdb0   : > { %v5342_v23 = vpop.xlane.xlu0 %5341 }
 0xdb1   : > { %6760 = vlog2.f32 %v5342_v23 }
 0xdbe   : > { %v6761_v22 = vpop.eup %6760 }
 0xdbf   : > { %v5344_v7 = vmul.f32 0.6931472, %v6761_v22 }
 0xdc1   : > { %v5345_v44 = vsub.f32 %v5337_v45, %v5344_v7 }
 0xdc3   : > { %5346 = vst [vmem:[#allocation4] sm:$0x3] %v5345_v44 }
 0xdc4 PF: > { %s10146_s3 = sld [smem:[#allocation10_spill]]  ;;  %s6819_s17 = smov [#allocation4]  }
 0xdc5   : > { %s5356_s26 = sshll.u32 %s6819_s17, 4  ;;  %s5357_s26 = int_to_ptr.vmem [resolvable:$true] %s5356_s26 }
 0xdc6   : > { %s6762_s10 = scalar_lea.vmem %s5357_s26, 32  ;;  %p6769_p11 = scmp.lt.s32.totalorder %s5357_s26, %s5357_s26 }
 0xdc7   : > { %p6763_p8 = scmp.ne.s32.totalorder %s5357_s26, %s6762_s10  ;;  %p6770_p12 = scmp.lt.s32.totalorder %s6762_s10, %s6762_s10 }
 0xdc9   : > { %p6771_p13 = por %p6770_p12, %p6769_p11 }
 0xdca   : > { %s10147_s2 = sadd.s32 4294967295, %s10146_s3  }
 0xdcb   : > { %p9929_p7 = scmp.eq.s32.totalorder %s10147_s2, 1 }
 0xdcd   : > { %p6764_p9 = pnand %p6763_p8, %p9929_p7 }
 0xdcf   : > { %p6765_p10 = pneg %p6764_p9 }
 0xdd1   : > { %p6772_p0 = pnand %p6771_p13, %p6765_p10 }
 0xdd3   : > { %6775 = shalt.err (!%p6772_p0)
}
 0xdd4   : > { %s10149_s5 = sld [smem:[#allocation46_spill]] }
 0xdda   : > { %6165 = dma.vmem_to_hbm [thread:$0]  (%p9929_p7), %s5357_s26, 32, %s10149_s5, [#allocation5]  }
 0xddb   : > { %6801 = dma.done.wait (%p9929_p7), [#allocation5], 32  }
 0xddc   : > { %6803 = vsyncadd (%p9929_p7), [#allocation5], 4294967264 }
 0xddd PF: > { %s10150_s27 = sld [smem:[#allocation10_spill]] }
 0xdde   : > { %s10152_s28 = sld [smem:[#allocation11_spill]] }
 0xde3   : > { %s29_s29 = sadd.s32 1, %s10150_s27   ;;  %s10151_s27 = sld [smem:[#allocation9_spill]] }
 0xde4   : > { %p26_p1 = scmp.ge.s32.totalorder %s29_s29, 4  }
 0xde6   :  { %28 = sbr.rel (!%p26_p1) target bundleno = 14 (0xe), region = 203 }
 0xdeb   :  { %5369 = vsyncpa [#allocation5], 1 }
 0xdec   :  { %5371 = vsyncpa [#allocation5 + $0x1], 1 }
 0xded   :  { %5372 = vsyncmov [#allocation3] }
 0xdf0   :  { %s5373_s23 = vpop.sfrf %5372 }
 0xdf1   :  { %p5642_p2 = scmp.ne.s32.totalorder %s5373_s23, 0 }
 0xdf3   :  { %5377 = shalt.err (%p5642_p2)  }

</bundles_post_ra>
